<compile_context>
chip_gen: v7x
topology: tpu7x:2x2x1
jax: 0.10.0
libtpu: 0.0.40
codegen_flags: <defaults>
</compile_context>

<pallas_src>
import functools

import jax
import jax.numpy as jnp
from jax import lax
from jax.experimental import pallas as pl
from jax.experimental.pallas import tpu as pltpu

EPS = 1e-5
_INV_SQRT2 = 0.7071067811865476
USE_TANH_GELU = False        # True -> jax.nn.gelu tanh approx (EUP path, small numeric deviation)
ACT_DTYPE = jnp.bfloat16     # inter-stage activation storage dtype in HBM


# ----------------------------------------------------------------------------
# in-kernel helpers
# ----------------------------------------------------------------------------
def _gelu(x):
    if USE_TANH_GELU:
        return jax.nn.gelu(x, approximate=True)
    # exact GELU (PyTorch nn.GELU default): 0.5*x*(1+erf(x/sqrt(2)))
    return 0.5 * x * (1.0 + lax.erf(x * _INV_SQRT2))


def _shift_w(x, ox):
    """y[:, w, :] = x[:, w+ox, :] (zero outside).  x: (R, W, C)."""
    if ox == 0:
        return x
    r, w, c = x.shape
    z = jnp.zeros((r, abs(ox), c), x.dtype)
    if ox > 0:
        return jnp.concatenate([x[:, ox:, :], z], axis=1)
    return jnp.concatenate([z, x[:, : w + ox, :]], axis=1)


def _dw_chunk(get_rows, w, b, r0, rc, *, K, H, W, ct):
    """Output rows [r0, r0+rc) of a depthwise KxK 'same' conv (+ bias), f32.

    get_rows(lo, hi) -> f32 rows [lo, hi) of the (H, W, ct) source; lo/hi are
    concrete Python ints, so the halo handling below is fully static.  Only
    ~3 row-slabs (rc x W x ct each) are live at any time.
    """
    p = K // 2
    acc = None
    for dy in range(K):
        lo = r0 + dy - p
        hi = lo + rc
        clo, chi = max(lo, 0), min(hi, H)
        if chi <= clo:                       # whole window outside the plane
            rows = jnp.zeros((rc, W, ct), jnp.float32)
        else:
            rows = get_rows(clo, chi)
            if clo > lo or hi > chi:         # zero-fill H halo (edge chunks only)
                parts = []
                if clo > lo:
                    parts.append(jnp.zeros((clo - lo, W, ct), jnp.float32))
                parts.append(rows)
                if hi > chi:
                    parts.append(jnp.zeros((hi - chi, W, ct), jnp.float32))
                rows = jnp.concatenate(parts, axis=0)
        for dx in range(K):
            tap = w[dy:dy + 1, dx:dx + 1, :]            # (1, 1, ct)
            term = _shift_w(rows, dx - p) * tap
            acc = term if acc is None else acc + term
    return acc + b.reshape(1, 1, ct)


def _stats_update(ssum, ssq, vals, ct):
    flat = vals.reshape(-1, ct)
    return (ssum + jnp.sum(flat, axis=0, keepdims=True),
            ssq + jnp.sum(flat * flat, axis=0, keepdims=True))


# ----------------------------------------------------------------------------
# kernels
# ----------------------------------------------------------------------------
def _dw1_kernel(x_ref, w_ref, b_ref, a_ref, s_ref, *, K, H, W, rc):
    ct = x_ref.shape[-1]
    w = w_ref[...]
    b = b_ref[...]
    ssum = jnp.zeros((1, ct), jnp.float32)
    ssq = jnp.zeros((1, ct), jnp.float32)
    for r0 in range(0, H, rc):
        acc = _dw_chunk(lambda lo, hi: x_ref[lo:hi].astype(jnp.float32),
                        w, b, r0, rc, K=K, H=H, W=W, ct=ct)
        a_ref[r0:r0 + rc] = acc.astype(a_ref.dtype)
        ssum, ssq = _stats_update(ssum, ssq, acc, ct)
    s_ref[...] = jnp.concatenate([ssum, ssq], axis=0)        # one (2, ct) store


def _dw2_kernel(a1_ref, sc_ref, sh_ref, w_ref, b_ref, a2_ref, s_ref, g1_scr,
                *, K, H, W, rc):
    ct = a1_ref.shape[-1]
    sc = sc_ref[...].reshape(1, 1, ct)
    sh = sh_ref[...].reshape(1, 1, ct)
    # Phase 1: g1 = GELU(BN1(a1)) -> unpadded VMEM scratch (chunked so the
    # erf-GELU's polynomial temporaries never exceed the register file, and the
    # conv below never recomputes GELU on halo rows).
    for r0 in range(0, H, rc):
        a1 = a1_ref[r0:r0 + rc].astype(jnp.float32)
        g1_scr[r0:r0 + rc] = _gelu(a1 * sc + sh)
    # Phase 2: depthwise conv straight off the scratch.
    w = w_ref[...]
    b = b_ref[...]
    ssum = jnp.zeros((1, ct), jnp.float32)
    ssq = jnp.zeros((1, ct), jnp.float32)
    for r0 in range(0, H, rc):
        acc = _dw_chunk(lambda lo, hi: g1_scr[lo:hi],
                        w, b, r0, rc, K=K, H=H, W=W, ct=ct)
        a2_ref[r0:r0 + rc] = acc.astype(a2_ref.dtype)
        ssum, ssq = _stats_update(ssum, ssq, acc, ct)
    s_ref[...] = jnp.concatenate([ssum, ssq], axis=0)


def _pw_kernel(a2_ref, xres_ref, sc_ref, sh_ref, w_ref, b_ref, g3_ref, s_ref, *, sub):
    tm, c = a2_ref.shape
    wmat = w_ref[...]                                   # (C, C) bf16, resident
    bvec = b_ref[...]
    sc = sc_ref[...]
    sh = sh_ref[...]
    ssum = jnp.zeros((1, c), jnp.float32)
    ssq = jnp.zeros((1, c), jnp.float32)
    for r0 in range(0, tm, sub):
        g2 = _gelu(a2_ref[r0:r0 + sub].astype(jnp.float32) * sc + sh)
        r = (g2 + xres_ref[r0:r0 + sub]).astype(jnp.bfloat16)   # bf16 MXU operands
        y = jnp.dot(r, wmat, preferred_element_type=jnp.float32) + bvec
        g3 = _gelu(y)                                   # pw: conv -> GELU -> BN
        g3_ref[r0:r0 + sub] = g3.astype(g3_ref.dtype)
        ssum = ssum + jnp.sum(g3, axis=0, keepdims=True)
        ssq = ssq + jnp.sum(g3 * g3, axis=0, keepdims=True)
    s_ref[...] = jnp.concatenate([ssum, ssq], axis=0)


def _bn3_kernel(g3_ref, sc_ref, sh_ref, o_ref, *, sub):
    tm, _ = g3_ref.shape
    sc = sc_ref[...]
    sh = sh_ref[...]
    for r0 in range(0, tm, sub):
        o_ref[r0:r0 + sub] = (g3_ref[r0:r0 + sub].astype(jnp.float32) * sc
                              + sh).astype(o_ref.dtype)


# ----------------------------------------------------------------------------
# stage wrappers
# ----------------------------------------------------------------------------
def _vmem_limit_bytes():
    cap = 128 * 1024 * 1024
    try:  # per-generation scoped VMEM limit (v7x: 64 MiB physical; v5e/v6e: 128 MiB)
        cap = int(getattr(pltpu.get_tpu_info(), "vmem_capacity_bytes", cap))
    except Exception:
        pass
    return int(min(cap * 7 // 8, 100 * 1024 * 1024))


def _compiler_params(semantics):
    return pltpu.CompilerParams(dimension_semantics=semantics,
                                vmem_limit_bytes=_vmem_limit_bytes())


def _channel_tile(c):
    return 128 if c % 128 == 0 else c


def _row_chunk(h):
    for rc in (8, 4, 2):
        if h % rc == 0:
            return rc
    return h


def _row_tile(m):
    for t in (512, 256, 128, 64, 32, 16, 8):
        if m % t == 0:
            return t
    return m


def _sub_rows(tm):
    return 128 if tm % 128 == 0 else tm


def _dw1_stage(x, w, b, K):
    N, H, W, C = x.shape
    ct = _channel_tile(C)
    kern = functools.partial(_dw1_kernel, K=K, H=H, W=W, rc=_row_chunk(H))
    grid_spec = pltpu.PrefetchScalarGridSpec(
        num_scalar_prefetch=0,
        grid=(N, C // ct),
        in_specs=[
            pl.BlockSpec((None, H, W, ct), lambda n, j: (n, 0, 0, j)),
            pl.BlockSpec((K, K, ct), lambda n, j: (0, 0, j)),
            pl.BlockSpec((1, ct), lambda n, j: (0, j)),
        ],
        out_specs=[
            pl.BlockSpec((None, H, W, ct), lambda n, j: (n, 0, 0, j)),
            pl.BlockSpec((None, 2, ct), lambda n, j: (n, 0, j)),
        ],
    )
    return pl.pallas_call(
        kern,
        out_shape=(jax.ShapeDtypeStruct((N, H, W, C), ACT_DTYPE),
                   jax.ShapeDtypeStruct((N, 2, C), jnp.float32)),
        grid_spec=grid_spec,
        compiler_params=_compiler_params(("parallel", "parallel")),
    )(x, w, b)


def _dw2_stage(a1, sc1, sh1, w, b, K):
    N, H, W, C = a1.shape
    ct = _channel_tile(C)
    kern = functools.partial(_dw2_kernel, K=K, H=H, W=W, rc=_row_chunk(H))
    grid_spec = pltpu.PrefetchScalarGridSpec(
        num_scalar_prefetch=0,
        grid=(N, C // ct),
        in_specs=[
            pl.BlockSpec((None, H, W, ct), lambda n, j: (n, 0, 0, j)),
            pl.BlockSpec((1, ct), lambda n, j: (0, j)),
            pl.BlockSpec((1, ct), lambda n, j: (0, j)),
            pl.BlockSpec((K, K, ct), lambda n, j: (0, 0, j)),
            pl.BlockSpec((1, ct), lambda n, j: (0, j)),
        ],
        out_specs=[
            pl.BlockSpec((None, H, W, ct), lambda n, j: (n, 0, 0, j)),
            pl.BlockSpec((None, 2, ct), lambda n, j: (n, 0, j)),
        ],
        scratch_shapes=[pltpu.VMEM((H, W, ct), jnp.float32)],   # g1 (unpadded)
    )
    return pl.pallas_call(
        kern,
        out_shape=(jax.ShapeDtypeStruct((N, H, W, C), ACT_DTYPE),
                   jax.ShapeDtypeStruct((N, 2, C), jnp.float32)),
        grid_spec=grid_spec,
        compiler_params=_compiler_params(("parallel", "parallel")),
    )(a1, sc1, sh1, w, b)


def _pw_stage(a2f, xf, sc2, sh2, w_bf16, b):
    M, C = a2f.shape
    tm = _row_tile(M)
    nt = M // tm
    kern = functools.partial(_pw_kernel, sub=_sub_rows(tm))
    grid_spec = pltpu.PrefetchScalarGridSpec(
        num_scalar_prefetch=0,
        grid=(nt,),
        in_specs=[
            pl.BlockSpec((tm, C), lambda i: (i, 0)),
            pl.BlockSpec((tm, C), lambda i: (i, 0)),
            pl.BlockSpec((1, C), lambda i: (0, 0)),
            pl.BlockSpec((1, C), lambda i: (0, 0)),
            pl.BlockSpec((C, C), lambda i: (0, 0)),     # pw weights stay resident
            pl.BlockSpec((1, C), lambda i: (0, 0)),
        ],
        out_specs=[
            pl.BlockSpec((tm, C), lambda i: (i, 0)),
            pl.BlockSpec((None, 2, C), lambda i: (i, 0, 0)),
        ],
    )
    return pl.pallas_call(
        kern,
        out_shape=(jax.ShapeDtypeStruct((M, C), ACT_DTYPE),
                   jax.ShapeDtypeStruct((nt, 2, C), jnp.float32)),
        grid_spec=grid_spec,
        compiler_params=_compiler_params(("parallel",)),
    )(a2f, xf, sc2, sh2, w_bf16, b)


def _bn3_stage(g3f, sc3, sh3):
    M, C = g3f.shape
    tm = _row_tile(M)
    kern = functools.partial(_bn3_kernel, sub=_sub_rows(tm))
    grid_spec = pltpu.PrefetchScalarGridSpec(
        num_scalar_prefetch=0,
        grid=(M // tm,),
        in_specs=[
            pl.BlockSpec((tm, C), lambda i: (i, 0)),
            pl.BlockSpec((1, C), lambda i: (0, 0)),
            pl.BlockSpec((1, C), lambda i: (0, 0)),
        ],
        out_specs=pl.BlockSpec((tm, C), lambda i: (i, 0)),
    )
    return pl.pallas_call(
        kern,
        out_shape=jax.ShapeDtypeStruct((M, C), jnp.float32),
        grid_spec=grid_spec,
        compiler_params=_compiler_params(("parallel",)),
    )(g3f, sc3, sh3)


# ----------------------------------------------------------------------------
# BN partial reduction (tiny jnp glue between pallas_calls)
# ----------------------------------------------------------------------------
def _bn_scale_shift(stats, gamma, beta, count):
    """Reduce (T, 2, C) partials to per-channel affine (scale, shift), f32."""
    ssum = jnp.sum(stats[:, 0, :], axis=0)
    ssq = jnp.sum(stats[:, 1, :], axis=0)
    mean = ssum / count
    # single-pass E[x^2]-mu^2 variance; fine at these magnitudes/counts.
    var = jnp.maximum(ssq / count - mean * mean, 0.0)
    scale = gamma.reshape(-1) * lax.rsqrt(var + EPS)
    shift = beta.reshape(-1) - mean * scale
    return scale.reshape(1, -1), shift.reshape(1, -1)


# ----------------------------------------------------------------------------
# forward
# ----------------------------------------------------------------------------
def convmixer_block_forward_nhwc(x, p, K):
    """x: (N, H, W, C) float32, NHWC.  Returns NHWC float32."""
    N, H, W, C = x.shape
    assert K % 2 == 1, "padding='same' depthwise conv expects an odd kernel size"
    count = float(N * H * W)

    a1, s1 = _dw1_stage(x, p["dw1_w"], p["dw1_b"], K)
    sc1, sh1 = _bn_scale_shift(s1, p["bn1_g"], p["bn1_b"], count)

    a2, s2 = _dw2_stage(a1, sc1, sh1, p["dw2_w"], p["dw2_b"], K)
    sc2, sh2 = _bn_scale_shift(s2, p["bn2_g"], p["bn2_b"], count)

    M = N * H * W
    g3, s3 = _pw_stage(a2.reshape(M, C), x.reshape(M, C), sc2, sh2,
                       p["pw_w"].astype(jnp.bfloat16), p["pw_b"])
    sc3, sh3 = _bn_scale_shift(s3, p["bn3_g"], p["bn3_b"], count)

    out = _bn3_stage(g3, sc3, sh3)
    return out.reshape(N, H, W, C)


def convmixer_block_forward(x_nchw, p, K):
    # NCHW<->NHWC conversion once at the block boundary; a stack of blocks
    # should stay NHWC and call convmixer_block_forward_nhwc.
    x = jnp.transpose(x_nchw, (0, 2, 3, 1)).astype(jnp.float32)
    y = convmixer_block_forward_nhwc(x, p, K)
    return jnp.transpose(y, (0, 3, 1, 2))


# ----------------------------------------------------------------------------
# params, pure-JAX reference, demo
# ----------------------------------------------------------------------------
def init_params(key, dim, K):
    ks = jax.random.split(key, 12)
    s_dw = 1.0 / (K * K) ** 0.5
    s_pw = 1.0 / dim ** 0.5
    f32 = jnp.float32
    return {
        # depthwise conv 1 (PyTorch weight (dim,1,K,K) stored here as (K,K,dim))
        "dw1_w": jax.random.normal(ks[0], (K, K, dim), f32) * s_dw,
        "dw1_b": jax.random.normal(ks[1], (1, dim), f32) * 0.1,
        "bn1_g": 1.0 + 0.1 * jax.random.normal(ks[2], (1, dim), f32),
        "bn1_b": 0.1 * jax.random.normal(ks[3], (1, dim), f32),
        # depthwise conv 2
        "dw2_w": jax.random.normal(ks[4], (K, K, dim), f32) * s_dw,
        "dw2_b": jax.random.normal(ks[5], (1, dim), f32) * 0.1,
        "bn2_g": 1.0 + 0.1 * jax.random.normal(ks[6], (1, dim), f32),
        "bn2_b": 0.1 * jax.random.normal(ks[7], (1, dim), f32),
        # pointwise 1x1 conv (PyTorch weight (dim,dim,1,1) stored as (C_in, C_out))
        "pw_w": jax.random.normal(ks[8], (dim, dim), f32) * s_pw,
        "pw_b": jax.random.normal(ks[9], (1, dim), f32) * 0.1,
        "bn3_g": 1.0 + 0.1 * jax.random.normal(ks[10], (1, dim), f32),
        "bn3_b": 0.1 * jax.random.normal(ks[11], (1, dim), f32),
    }


def _reference(x_nchw, p, K):
    """Pure-JAX f32 reference mirroring the PyTorch module (training-mode BN)."""
    x = jnp.transpose(x_nchw, (0, 2, 3, 1)).astype(jnp.float32)

    def dwconv(v, w, b):
        pd = K // 2
        _, H, W, _ = v.shape
        vp = jnp.pad(v, ((0, 0), (pd, pd), (pd, pd), (0, 0)))
        out = jnp.zeros_like(v)
        for dy in range(K):
            for dx in range(K):
                out = out + vp[:, dy:dy + H, dx:dx + W, :] * w[dy, dx]
        return out + b.reshape(1, 1, 1, -1)

    def bn(v, g, b):
        mu = jnp.mean(v, axis=(0, 1, 2), keepdims=True)
        var = jnp.mean((v - mu) ** 2, axis=(0, 1, 2), keepdims=True)
        return (v - mu) * lax.rsqrt(var + EPS) * g.reshape(1, 1, 1, -1) + b.reshape(1, 1, 1, -1)

    y = _gelu(bn(dwconv(x, p["dw1_w"], p["dw1_b"]), p["bn1_g"], p["bn1_b"]))
    y = _gelu(bn(dwconv(y, p["dw2_w"], p["dw2_b"]), p["bn2_g"], p["bn2_b"]))
    r = y + x
    z = jnp.einsum("nhwc,cd->nhwd", r, p["pw_w"],
                   precision=lax.Precision.HIGHEST) + p["pw_b"].reshape(1, 1, 1, -1)
    z = bn(_gelu(z), p["bn3_g"], p["bn3_b"])
    return jnp.transpose(z, (0, 3, 1, 2))


if __name__ == "__main__":
    # dim=128 keeps the channel (lane) axis and the 1x1-conv MXU tiles dense.
    N, dim, Hsp, Wsp, K = 2, 128, 16, 16, 3
    key = jax.random.PRNGKey(0)
    kx, kp = jax.random.split(key)
    x = jax.random.normal(kx, (N, dim, Hsp, Wsp), jnp.float32)   # NCHW like PyTorch
    params = init_params(kp, dim, K)

    fwd = jax.jit(convmixer_block_forward, static_argnums=(2,))
    out = jax.block_until_ready(fwd(x, params, K))
    assert out.shape == (N, dim, Hsp, Wsp)
    assert bool(jnp.all(jnp.isfinite(out)))

    ref = jax.block_until_ready(_reference(x, params, K))
    max_err = float(jnp.max(jnp.abs(out - ref)))
    mean_err = float(jnp.mean(jnp.abs(out - ref)))
    # bf16 inter-stage storage + bf16 MXU operands vs an all-f32 reference:
    # expected max-abs ~2-4e-2, mean-abs ~5e-3.
    assert max_err < 1.2e-1, f"max-abs mismatch vs pure-JAX reference: {max_err}"
    assert mean_err < 1.5e-2, f"mean-abs mismatch vs pure-JAX reference: {mean_err}"
    print("KERNEL_OK")
</pallas_src>

<mosaic_0001>
module attributes {stable_mosaic.version = 11 : i64} {
  func.func @_dw1_kernel(%arg0: i32, %arg1: i32, %arg2: memref<1x16x16x128xf32, #tpu.memory_space<vmem>>, %arg3: memref<3x3x128xf32, #tpu.memory_space<vmem>>, %arg4: memref<1x128xf32, #tpu.memory_space<vmem>>, %arg5: memref<1x16x16x128xbf16, #tpu.memory_space<vmem>>, %arg6: memref<1x2x128xf32, #tpu.memory_space<vmem>>) attributes {dimension_semantics = [#tpu.dimension_semantics<parallel>, #tpu.dimension_semantics<parallel>], iteration_bounds = array<i64: 2, 1>, scalar_prefetch = 0 : i64, scratch_operands = 0 : i64, tpu.core_type = #tpu.core_type<tc>, window_params = [{transform_indices = @transform_0, window_bounds = array<i64: 1, 16, 16, 128>}, {transform_indices = @transform_1, window_bounds = array<i64: 3, 3, 128>}, {transform_indices = @transform_2, window_bounds = array<i64: 1, 128>}, {transform_indices = @transform_3, window_bounds = array<i64: 1, 16, 16, 128>}, {transform_indices = @transform_4, window_bounds = array<i64: 1, 2, 128>}]} {
    %c0 = arith.constant 0 : index
    %c0_0 = arith.constant 0 : index
    %c0_1 = arith.constant 0 : index
    %0 = vector.load %arg3[%c0, %c0_0, %c0_1] : memref<3x3x128xf32, #tpu.memory_space<vmem>>, vector<3x3x128xf32>
    %c0_2 = arith.constant 0 : index
    %c0_3 = arith.constant 0 : index
    %1 = vector.load %arg4[%c0_2, %c0_3] : memref<1x128xf32, #tpu.memory_space<vmem>>, vector<1x128xf32>
    %cst = arith.constant 0.000000e+00 : f32
    %2 = vector.broadcast %cst : f32 to vector<1x128xf32>
    %cst_4 = arith.constant 0.000000e+00 : f32
    %3 = vector.broadcast %cst_4 : f32 to vector<1x128xf32>
    %c0_5 = arith.constant 0 : index
    %c0_6 = arith.constant 0 : index
    %c0_7 = arith.constant 0 : index
    %c0_8 = arith.constant 0 : index
    %4 = vector.load %arg2[%c0_5, %c0_6, %c0_7, %c0_8] : memref<1x16x16x128xf32, #tpu.memory_space<vmem>>, vector<1x7x16x128xf32>
    %5 = vector.shape_cast %4 : vector<1x7x16x128xf32> to vector<7x16x128xf32>
    %cst_9 = arith.constant 0.000000e+00 : f32
    %6 = vector.broadcast %cst_9 : f32 to vector<1x16x128xf32>
    %7 = tpu.concatenate %6, %5 in 0 : vector<1x16x128xf32>, vector<7x16x128xf32> -> vector<8x16x128xf32>
    %8 = vector.extract_strided_slice %0 {offsets = [0, 0, 0], sizes = [1, 1, 128], strides = [1, 1, 1]} : vector<3x3x128xf32> to vector<1x1x128xf32>
    %cst_10 = arith.constant 0.000000e+00 : f32
    %9 = vector.broadcast %cst_10 : f32 to vector<8x1x128xf32>
    %10 = vector.extract_strided_slice %7 {offsets = [0, 0, 0], sizes = [8, 15, 128], strides = [1, 1, 1]} : vector<8x16x128xf32> to vector<8x15x128xf32>
    %11 = tpu.concatenate %9, %10 in 1 : vector<8x1x128xf32>, vector<8x15x128xf32> -> vector<8x16x128xf32>
    %12 = vector.broadcast %8 : vector<1x1x128xf32> to vector<8x16x128xf32>
    %13 = arith.mulf %11, %12 : vector<8x16x128xf32>
    %14 = vector.extract_strided_slice %0 {offsets = [0, 1, 0], sizes = [1, 1, 128], strides = [1, 1, 1]} : vector<3x3x128xf32> to vector<1x1x128xf32>
    %15 = vector.broadcast %14 : vector<1x1x128xf32> to vector<8x16x128xf32>
    %16 = arith.mulf %7, %15 : vector<8x16x128xf32>
    %17 = arith.addf %13, %16 : vector<8x16x128xf32>
    %18 = vector.extract_strided_slice %0 {offsets = [0, 2, 0], sizes = [1, 1, 128], strides = [1, 1, 1]} : vector<3x3x128xf32> to vector<1x1x128xf32>
    %cst_11 = arith.constant 0.000000e+00 : f32
    %19 = vector.broadcast %cst_11 : f32 to vector<8x1x128xf32>
    %20 = vector.extract_strided_slice %7 {offsets = [0, 1, 0], sizes = [8, 15, 128], strides = [1, 1, 1]} : vector<8x16x128xf32> to vector<8x15x128xf32>
    %21 = tpu.concatenate %20, %19 in 1 : vector<8x15x128xf32>, vector<8x1x128xf32> -> vector<8x16x128xf32>
    %22 = vector.broadcast %18 : vector<1x1x128xf32> to vector<8x16x128xf32>
    %23 = arith.mulf %21, %22 : vector<8x16x128xf32>
    %24 = arith.addf %17, %23 : vector<8x16x128xf32>
    %c0_12 = arith.constant 0 : index
    %c0_13 = arith.constant 0 : index
    %c0_14 = arith.constant 0 : index
    %c0_15 = arith.constant 0 : index
    %25 = vector.load %arg2[%c0_12, %c0_13, %c0_14, %c0_15] : memref<1x16x16x128xf32, #tpu.memory_space<vmem>>, vector<1x8x16x128xf32>
    %26 = vector.shape_cast %25 : vector<1x8x16x128xf32> to vector<8x16x128xf32>
    %27 = vector.extract_strided_slice %0 {offsets = [1, 0, 0], sizes = [1, 1, 128], strides = [1, 1, 1]} : vector<3x3x128xf32> to vector<1x1x128xf32>
    %cst_16 = arith.constant 0.000000e+00 : f32
    %28 = vector.broadcast %cst_16 : f32 to vector<8x1x128xf32>
    %29 = vector.extract_strided_slice %26 {offsets = [0, 0, 0], sizes = [8, 15, 128], strides = [1, 1, 1]} : vector<8x16x128xf32> to vector<8x15x128xf32>
    %30 = tpu.concatenate %28, %29 in 1 : vector<8x1x128xf32>, vector<8x15x128xf32> -> vector<8x16x128xf32>
    %31 = vector.broadcast %27 : vector<1x1x128xf32> to vector<8x16x128xf32>
    %32 = arith.mulf %30, %31 : vector<8x16x128xf32>
    %33 = arith.addf %24, %32 : vector<8x16x128xf32>
    %34 = vector.extract_strided_slice %0 {offsets = [1, 1, 0], sizes = [1, 1, 128], strides = [1, 1, 1]} : vector<3x3x128xf32> to vector<1x1x128xf32>
    %35 = vector.broadcast %34 : vector<1x1x128xf32> to vector<8x16x128xf32>
    %36 = arith.mulf %26, %35 : vector<8x16x128xf32>
    %37 = arith.addf %33, %36 : vector<8x16x128xf32>
    %38 = vector.extract_strided_slice %0 {offsets = [1, 2, 0], sizes = [1, 1, 128], strides = [1, 1, 1]} : vector<3x3x128xf32> to vector<1x1x128xf32>
    %cst_17 = arith.constant 0.000000e+00 : f32
    %39 = vector.broadcast %cst_17 : f32 to vector<8x1x128xf32>
    %40 = vector.extract_strided_slice %26 {offsets = [0, 1, 0], sizes = [8, 15, 128], strides = [1, 1, 1]} : vector<8x16x128xf32> to vector<8x15x128xf32>
    %41 = tpu.concatenate %40, %39 in 1 : vector<8x15x128xf32>, vector<8x1x128xf32> -> vector<8x16x128xf32>
    %42 = vector.broadcast %38 : vector<1x1x128xf32> to vector<8x16x128xf32>
    %43 = arith.mulf %41, %42 : vector<8x16x128xf32>
    %44 = arith.addf %37, %43 : vector<8x16x128xf32>
    %c0_18 = arith.constant 0 : index
    %c1 = arith.constant 1 : index
    %c0_19 = arith.constant 0 : index
    %c0_20 = arith.constant 0 : index
    %45 = vector.load %arg2[%c0_18, %c1, %c0_19, %c0_20] : memref<1x16x16x128xf32, #tpu.memory_space<vmem>>, vector<1x8x16x128xf32>
    %46 = vector.shape_cast %45 : vector<1x8x16x128xf32> to vector<8x16x128xf32>
    %47 = vector.extract_strided_slice %0 {offsets = [2, 0, 0], sizes = [1, 1, 128], strides = [1, 1, 1]} : vector<3x3x128xf32> to vector<1x1x128xf32>
    %cst_21 = arith.constant 0.000000e+00 : f32
    %48 = vector.broadcast %cst_21 : f32 to vector<8x1x128xf32>
    %49 = vector.extract_strided_slice %46 {offsets = [0, 0, 0], sizes = [8, 15, 128], strides = [1, 1, 1]} : vector<8x16x128xf32> to vector<8x15x128xf32>
    %50 = tpu.concatenate %48, %49 in 1 : vector<8x1x128xf32>, vector<8x15x128xf32> -> vector<8x16x128xf32>
    %51 = vector.broadcast %47 : vector<1x1x128xf32> to vector<8x16x128xf32>
    %52 = arith.mulf %50, %51 : vector<8x16x128xf32>
    %53 = arith.addf %44, %52 : vector<8x16x128xf32>
    %54 = vector.extract_strided_slice %0 {offsets = [2, 1, 0], sizes = [1, 1, 128], strides = [1, 1, 1]} : vector<3x3x128xf32> to vector<1x1x128xf32>
    %55 = vector.broadcast %54 : vector<1x1x128xf32> to vector<8x16x128xf32>
    %56 = arith.mulf %46, %55 : vector<8x16x128xf32>
    %57 = arith.addf %53, %56 : vector<8x16x128xf32>
    %58 = vector.extract_strided_slice %0 {offsets = [2, 2, 0], sizes = [1, 1, 128], strides = [1, 1, 1]} : vector<3x3x128xf32> to vector<1x1x128xf32>
    %cst_22 = arith.constant 0.000000e+00 : f32
    %59 = vector.broadcast %cst_22 : f32 to vector<8x1x128xf32>
    %60 = vector.extract_strided_slice %46 {offsets = [0, 1, 0], sizes = [8, 15, 128], strides = [1, 1, 1]} : vector<8x16x128xf32> to vector<8x15x128xf32>
    %61 = tpu.concatenate %60, %59 in 1 : vector<8x15x128xf32>, vector<8x1x128xf32> -> vector<8x16x128xf32>
    %62 = vector.broadcast %58 : vector<1x1x128xf32> to vector<8x16x128xf32>
    %63 = arith.mulf %61, %62 : vector<8x16x128xf32>
    %64 = arith.addf %57, %63 : vector<8x16x128xf32>
    %65 = vector.shape_cast %1 : vector<1x128xf32> to vector<1x1x128xf32>
    %66 = vector.broadcast %65 : vector<1x1x128xf32> to vector<8x16x128xf32>
    %67 = arith.addf %64, %66 : vector<8x16x128xf32>
    %68 = arith.truncf %67 : vector<8x16x128xf32> to vector<8x16x128xbf16>
    %c0_23 = arith.constant 0 : index
    %c0_24 = arith.constant 0 : index
    %c0_25 = arith.constant 0 : index
    %c0_26 = arith.constant 0 : index
    %69 = vector.load %arg5[%c0_23, %c0_24, %c0_25, %c0_26] : memref<1x16x16x128xbf16, #tpu.memory_space<vmem>>, vector<1x8x16x128xbf16>
    %70 = vector.shape_cast %69 : vector<1x8x16x128xbf16> to vector<8x16x128xbf16>
    %71 = vector.shape_cast %68 : vector<8x16x128xbf16> to vector<1x8x16x128xbf16>
    tpu.vector_store %arg5[%c0_23, %c0_24, %c0_25, %c0_26], %71 {strides = array<i32>} : memref<1x16x16x128xbf16, #tpu.memory_space<vmem>>, vector<1x8x16x128xbf16>,
    %72 = vector.shape_cast %67 : vector<8x16x128xf32> to vector<128x128xf32>
    %cst_27 = arith.constant dense<0.000000e+00> : vector<128xf32>
    %73 = vector.multi_reduction <add>, %72, %cst_27 [0] : vector<128x128xf32> to vector<128xf32>
    %74 = vector.shape_cast %73 : vector<128xf32> to vector<1x128xf32>
    %75 = arith.addf %2, %74 : vector<1x128xf32>
    %76 = arith.mulf %72, %72 : vector<128x128xf32>
    %cst_28 = arith.constant dense<0.000000e+00> : vector<128xf32>
    %77 = vector.multi_reduction <add>, %76, %cst_28 [0] : vector<128x128xf32> to vector<128xf32>
    %78 = vector.shape_cast %77 : vector<128xf32> to vector<1x128xf32>
    %79 = arith.addf %3, %78 : vector<1x128xf32>
    %c0_29 = arith.constant 0 : index
    %c7 = arith.constant 7 : index
    %c0_30 = arith.constant 0 : index
    %c0_31 = arith.constant 0 : index
    %80 = vector.load %arg2[%c0_29, %c7, %c0_30, %c0_31] : memref<1x16x16x128xf32, #tpu.memory_space<vmem>>, vector<1x8x16x128xf32>
    %81 = vector.shape_cast %80 : vector<1x8x16x128xf32> to vector<8x16x128xf32>
    %82 = vector.extract_strided_slice %0 {offsets = [0, 0, 0], sizes = [1, 1, 128], strides = [1, 1, 1]} : vector<3x3x128xf32> to vector<1x1x128xf32>
    %cst_32 = arith.constant 0.000000e+00 : f32
    %83 = vector.broadcast %cst_32 : f32 to vector<8x1x128xf32>
    %84 = vector.extract_strided_slice %81 {offsets = [0, 0, 0], sizes = [8, 15, 128], strides = [1, 1, 1]} : vector<8x16x128xf32> to vector<8x15x128xf32>
    %85 = tpu.concatenate %83, %84 in 1 : vector<8x1x128xf32>, vector<8x15x128xf32> -> vector<8x16x128xf32>
    %86 = vector.broadcast %82 : vector<1x1x128xf32> to vector<8x16x128xf32>
    %87 = arith.mulf %85, %86 : vector<8x16x128xf32>
    %88 = vector.extract_strided_slice %0 {offsets = [0, 1, 0], sizes = [1, 1, 128], strides = [1, 1, 1]} : vector<3x3x128xf32> to vector<1x1x128xf32>
    %89 = vector.broadcast %88 : vector<1x1x128xf32> to vector<8x16x128xf32>
    %90 = arith.mulf %81, %89 : vector<8x16x128xf32>
    %91 = arith.addf %87, %90 : vector<8x16x128xf32>
    %92 = vector.extract_strided_slice %0 {offsets = [0, 2, 0], sizes = [1, 1, 128], strides = [1, 1, 1]} : vector<3x3x128xf32> to vector<1x1x128xf32>
    %cst_33 = arith.constant 0.000000e+00 : f32
    %93 = vector.broadcast %cst_33 : f32 to vector<8x1x128xf32>
    %94 = vector.extract_strided_slice %81 {offsets = [0, 1, 0], sizes = [8, 15, 128], strides = [1, 1, 1]} : vector<8x16x128xf32> to vector<8x15x128xf32>
    %95 = tpu.concatenate %94, %93 in 1 : vector<8x15x128xf32>, vector<8x1x128xf32> -> vector<8x16x128xf32>
    %96 = vector.broadcast %92 : vector<1x1x128xf32> to vector<8x16x128xf32>
    %97 = arith.mulf %95, %96 : vector<8x16x128xf32>
    %98 = arith.addf %91, %97 : vector<8x16x128xf32>
    %c0_34 = arith.constant 0 : index
    %c8 = arith.constant 8 : index
    %c0_35 = arith.constant 0 : index
    %c0_36 = arith.constant 0 : index
    %99 = vector.load %arg2[%c0_34, %c8, %c0_35, %c0_36] : memref<1x16x16x128xf32, #tpu.memory_space<vmem>>, vector<1x8x16x128xf32>
    %100 = vector.shape_cast %99 : vector<1x8x16x128xf32> to vector<8x16x128xf32>
    %101 = vector.extract_strided_slice %0 {offsets = [1, 0, 0], sizes = [1, 1, 128], strides = [1, 1, 1]} : vector<3x3x128xf32> to vector<1x1x128xf32>
    %cst_37 = arith.constant 0.000000e+00 : f32
    %102 = vector.broadcast %cst_37 : f32 to vector<8x1x128xf32>
    %103 = vector.extract_strided_slice %100 {offsets = [0, 0, 0], sizes = [8, 15, 128], strides = [1, 1, 1]} : vector<8x16x128xf32> to vector<8x15x128xf32>
    %104 = tpu.concatenate %102, %103 in 1 : vector<8x1x128xf32>, vector<8x15x128xf32> -> vector<8x16x128xf32>
    %105 = vector.broadcast %101 : vector<1x1x128xf32> to vector<8x16x128xf32>
    %106 = arith.mulf %104, %105 : vector<8x16x128xf32>
    %107 = arith.addf %98, %106 : vector<8x16x128xf32>
    %108 = vector.extract_strided_slice %0 {offsets = [1, 1, 0], sizes = [1, 1, 128], strides = [1, 1, 1]} : vector<3x3x128xf32> to vector<1x1x128xf32>
    %109 = vector.broadcast %108 : vector<1x1x128xf32> to vector<8x16x128xf32>
    %110 = arith.mulf %100, %109 : vector<8x16x128xf32>
    %111 = arith.addf %107, %110 : vector<8x16x128xf32>
    %112 = vector.extract_strided_slice %0 {offsets = [1, 2, 0], sizes = [1, 1, 128], strides = [1, 1, 1]} : vector<3x3x128xf32> to vector<1x1x128xf32>
    %cst_38 = arith.constant 0.000000e+00 : f32
    %113 = vector.broadcast %cst_38 : f32 to vector<8x1x128xf32>
    %114 = vector.extract_strided_slice %100 {offsets = [0, 1, 0], sizes = [8, 15, 128], strides = [1, 1, 1]} : vector<8x16x128xf32> to vector<8x15x128xf32>
    %115 = tpu.concatenate %114, %113 in 1 : vector<8x15x128xf32>, vector<8x1x128xf32> -> vector<8x16x128xf32>
    %116 = vector.broadcast %112 : vector<1x1x128xf32> to vector<8x16x128xf32>
    %117 = arith.mulf %115, %116 : vector<8x16x128xf32>
    %118 = arith.addf %111, %117 : vector<8x16x128xf32>
    %c0_39 = arith.constant 0 : index
    %c9 = arith.constant 9 : index
    %c0_40 = arith.constant 0 : index
    %c0_41 = arith.constant 0 : index
    %119 = vector.load %arg2[%c0_39, %c9, %c0_40, %c0_41] : memref<1x16x16x128xf32, #tpu.memory_space<vmem>>, vector<1x7x16x128xf32>
    %120 = vector.shape_cast %119 : vector<1x7x16x128xf32> to vector<7x16x128xf32>
    %cst_42 = arith.constant 0.000000e+00 : f32
    %121 = vector.broadcast %cst_42 : f32 to vector<1x16x128xf32>
    %122 = tpu.concatenate %120, %121 in 0 : vector<7x16x128xf32>, vector<1x16x128xf32> -> vector<8x16x128xf32>
    %123 = vector.extract_strided_slice %0 {offsets = [2, 0, 0], sizes = [1, 1, 128], strides = [1, 1, 1]} : vector<3x3x128xf32> to vector<1x1x128xf32>
    %cst_43 = arith.constant 0.000000e+00 : f32
    %124 = vector.broadcast %cst_43 : f32 to vector<8x1x128xf32>
    %125 = vector.extract_strided_slice %122 {offsets = [0, 0, 0], sizes = [8, 15, 128], strides = [1, 1, 1]} : vector<8x16x128xf32> to vector<8x15x128xf32>
    %126 = tpu.concatenate %124, %125 in 1 : vector<8x1x128xf32>, vector<8x15x128xf32> -> vector<8x16x128xf32>
    %127 = vector.broadcast %123 : vector<1x1x128xf32> to vector<8x16x128xf32>
    %128 = arith.mulf %126, %127 : vector<8x16x128xf32>
    %129 = arith.addf %118, %128 : vector<8x16x128xf32>
    %130 = vector.extract_strided_slice %0 {offsets = [2, 1, 0], sizes = [1, 1, 128], strides = [1, 1, 1]} : vector<3x3x128xf32> to vector<1x1x128xf32>
    %131 = vector.broadcast %130 : vector<1x1x128xf32> to vector<8x16x128xf32>
    %132 = arith.mulf %122, %131 : vector<8x16x128xf32>
    %133 = arith.addf %129, %132 : vector<8x16x128xf32>
    %134 = vector.extract_strided_slice %0 {offsets = [2, 2, 0], sizes = [1, 1, 128], strides = [1, 1, 1]} : vector<3x3x128xf32> to vector<1x1x128xf32>
    %cst_44 = arith.constant 0.000000e+00 : f32
    %135 = vector.broadcast %cst_44 : f32 to vector<8x1x128xf32>
    %136 = vector.extract_strided_slice %122 {offsets = [0, 1, 0], sizes = [8, 15, 128], strides = [1, 1, 1]} : vector<8x16x128xf32> to vector<8x15x128xf32>
    %137 = tpu.concatenate %136, %135 in 1 : vector<8x15x128xf32>, vector<8x1x128xf32> -> vector<8x16x128xf32>
    %138 = vector.broadcast %134 : vector<1x1x128xf32> to vector<8x16x128xf32>
    %139 = arith.mulf %137, %138 : vector<8x16x128xf32>
    %140 = arith.addf %133, %139 : vector<8x16x128xf32>
    %141 = vector.shape_cast %1 : vector<1x128xf32> to vector<1x1x128xf32>
    %142 = vector.broadcast %141 : vector<1x1x128xf32> to vector<8x16x128xf32>
    %143 = arith.addf %140, %142 : vector<8x16x128xf32>
    %144 = arith.truncf %143 : vector<8x16x128xf32> to vector<8x16x128xbf16>
    %c0_45 = arith.constant 0 : index
    %c8_46 = arith.constant 8 : index
    %c0_47 = arith.constant 0 : index
    %c0_48 = arith.constant 0 : index
    %145 = vector.load %arg5[%c0_45, %c8_46, %c0_47, %c0_48] : memref<1x16x16x128xbf16, #tpu.memory_space<vmem>>, vector<1x8x16x128xbf16>
    %146 = vector.shape_cast %145 : vector<1x8x16x128xbf16> to vector<8x16x128xbf16>
    %147 = vector.shape_cast %144 : vector<8x16x128xbf16> to vector<1x8x16x128xbf16>
    tpu.vector_store %arg5[%c0_45, %c8_46, %c0_47, %c0_48], %147 {strides = array<i32>} : memref<1x16x16x128xbf16, #tpu.memory_space<vmem>>, vector<1x8x16x128xbf16>,
    %148 = vector.shape_cast %143 : vector<8x16x128xf32> to vector<128x128xf32>
    %cst_49 = arith.constant dense<0.000000e+00> : vector<128xf32>
    %149 = vector.multi_reduction <add>, %148, %cst_49 [0] : vector<128x128xf32> to vector<128xf32>
    %150 = vector.shape_cast %149 : vector<128xf32> to vector<1x128xf32>
    %151 = arith.addf %75, %150 : vector<1x128xf32>
    %152 = arith.mulf %148, %148 : vector<128x128xf32>
    %cst_50 = arith.constant dense<0.000000e+00> : vector<128xf32>
    %153 = vector.multi_reduction <add>, %152, %cst_50 [0] : vector<128x128xf32> to vector<128xf32>
    %154 = vector.shape_cast %153 : vector<128xf32> to vector<1x128xf32>
    %155 = arith.addf %79, %154 : vector<1x128xf32>
    %156 = tpu.concatenate %151, %155 in 0 : vector<1x128xf32>, vector<1x128xf32> -> vector<2x128xf32>
    %c0_51 = arith.constant 0 : index
    %c0_52 = arith.constant 0 : index
    %c0_53 = arith.constant 0 : index
    %157 = vector.load %arg6[%c0_51, %c0_52, %c0_53] : memref<1x2x128xf32, #tpu.memory_space<vmem>>, vector<1x2x128xf32>
    %158 = vector.shape_cast %157 : vector<1x2x128xf32> to vector<2x128xf32>
    %159 = vector.shape_cast %156 : vector<2x128xf32> to vector<1x2x128xf32>
    tpu.vector_store %arg6[%c0_51, %c0_52, %c0_53], %159 {strides = array<i32>} : memref<1x2x128xf32, #tpu.memory_space<vmem>>, vector<1x2x128xf32>,
    return
  }
  func.func @transform_0(%arg0: i32, %arg1: i32) -> (i32, i32, i32, i32) {
    %c0_i32 = arith.constant 0 : i32
    %c0_i32_0 = arith.constant 0 : i32
    %c0_i32_1 = arith.constant 0 : i32
    return %arg0, %c0_i32, %c0_i32_0, %arg1 : i32, i32, i32, i32
  }
  func.func @transform_1(%arg0: i32, %arg1: i32) -> (i32, i32, i32) {
    %c0_i32 = arith.constant 0 : i32
    %c0_i32_0 = arith.constant 0 : i32
    %c0_i32_1 = arith.constant 0 : i32
    return %c0_i32, %c0_i32_0, %arg1 : i32, i32, i32
  }
  func.func @transform_2(%arg0: i32, %arg1: i32) -> (i32, i32) {
    %c0_i32 = arith.constant 0 : i32
    %c0_i32_0 = arith.constant 0 : i32
    return %c0_i32, %arg1 : i32, i32
  }
  func.func @transform_3(%arg0: i32, %arg1: i32) -> (i32, i32, i32, i32) {
    %c0_i32 = arith.constant 0 : i32
    %c0_i32_0 = arith.constant 0 : i32
    %c0_i32_1 = arith.constant 0 : i32
    return %arg0, %c0_i32, %c0_i32_0, %arg1 : i32, i32, i32, i32
  }
  func.func @transform_4(%arg0: i32, %arg1: i32) -> (i32, i32, i32) {
    %c0_i32 = arith.constant 0 : i32
    %c0_i32_0 = arith.constant 0 : i32
    return %arg0, %c0_i32, %arg1 : i32, i32, i32
  }
}

module attributes {stable_mosaic.version = 11 : i64} {
  func.func @_dw2_kernel(%arg0: i32, %arg1: i32, %arg2: memref<1x16x16x128xbf16, #tpu.memory_space<vmem>>, %arg3: memref<1x128xf32, #tpu.memory_space<vmem>>, %arg4: memref<1x128xf32, #tpu.memory_space<vmem>>, %arg5: memref<3x3x128xf32, #tpu.memory_space<vmem>>, %arg6: memref<1x128xf32, #tpu.memory_space<vmem>>, %arg7: memref<1x16x16x128xbf16, #tpu.memory_space<vmem>>, %arg8: memref<1x2x128xf32, #tpu.memory_space<vmem>>, %arg9: memref<16x16x128xf32, #tpu.memory_space<vmem>>) attributes {dimension_semantics = [#tpu.dimension_semantics<parallel>, #tpu.dimension_semantics<parallel>], iteration_bounds = array<i64: 2, 1>, scalar_prefetch = 0 : i64, scratch_operands = 1 : i64, tpu.core_type = #tpu.core_type<tc>, window_params = [{transform_indices = @transform_0, window_bounds = array<i64: 1, 16, 16, 128>}, {transform_indices = @transform_1, window_bounds = array<i64: 1, 128>}, {transform_indices = @transform_2, window_bounds = array<i64: 1, 128>}, {transform_indices = @transform_3, window_bounds = array<i64: 3, 3, 128>}, {transform_indices = @transform_4, window_bounds = array<i64: 1, 128>}, {transform_indices = @transform_5, window_bounds = array<i64: 1, 16, 16, 128>}, {transform_indices = @transform_6, window_bounds = array<i64: 1, 2, 128>}]} {
    %c0 = arith.constant 0 : index
    %c0_0 = arith.constant 0 : index
    %0 = vector.load %arg3[%c0, %c0_0] : memref<1x128xf32, #tpu.memory_space<vmem>>, vector<1x128xf32>
    %1 = vector.shape_cast %0 : vector<1x128xf32> to vector<1x1x128xf32>
    %c0_1 = arith.constant 0 : index
    %c0_2 = arith.constant 0 : index
    %2 = vector.load %arg4[%c0_1, %c0_2] : memref<1x128xf32, #tpu.memory_space<vmem>>, vector<1x128xf32>
    %3 = vector.shape_cast %2 : vector<1x128xf32> to vector<1x1x128xf32>
    %c0_3 = arith.constant 0 : index
    %c0_4 = arith.constant 0 : index
    %c0_5 = arith.constant 0 : index
    %c0_6 = arith.constant 0 : index
    %4 = vector.load %arg2[%c0_3, %c0_4, %c0_5, %c0_6] : memref<1x16x16x128xbf16, #tpu.memory_space<vmem>>, vector<1x8x16x128xbf16>
    %5 = vector.shape_cast %4 : vector<1x8x16x128xbf16> to vector<8x16x128xbf16>
    %6 = arith.extf %5 : vector<8x16x128xbf16> to vector<8x16x128xf32>
    %7 = vector.broadcast %1 : vector<1x1x128xf32> to vector<8x16x128xf32>
    %8 = arith.mulf %6, %7 : vector<8x16x128xf32>
    %9 = vector.broadcast %3 : vector<1x1x128xf32> to vector<8x16x128xf32>
    %10 = arith.addf %8, %9 : vector<8x16x128xf32>
    %cst = arith.constant 5.000000e-01 : f32
    %11 = vector.broadcast %cst : f32 to vector<8x16x128xf32>
    %12 = arith.mulf %11, %10 : vector<8x16x128xf32>
    %cst_7 = arith.constant 0.707106769 : f32
    %13 = vector.broadcast %cst_7 : f32 to vector<8x16x128xf32>
    %14 = arith.mulf %10, %13 : vector<8x16x128xf32>
    %15 = math.erf %14 : vector<8x16x128xf32>
    %cst_8 = arith.constant 1.000000e+00 : f32
    %16 = vector.broadcast %cst_8 : f32 to vector<8x16x128xf32>
    %17 = arith.addf %16, %15 : vector<8x16x128xf32>
    %18 = arith.mulf %12, %17 : vector<8x16x128xf32>
    %c0_9 = arith.constant 0 : index
    %c0_10 = arith.constant 0 : index
    %c0_11 = arith.constant 0 : index
    %19 = vector.load %arg9[%c0_9, %c0_10, %c0_11] : memref<16x16x128xf32, #tpu.memory_space<vmem>>, vector<8x16x128xf32>
    tpu.vector_store %arg9[%c0_9, %c0_10, %c0_11], %18 {strides = array<i32>} : memref<16x16x128xf32, #tpu.memory_space<vmem>>, vector<8x16x128xf32>,
    %c0_12 = arith.constant 0 : index
    %c8 = arith.constant 8 : index
    %c0_13 = arith.constant 0 : index
    %c0_14 = arith.constant 0 : index
    %20 = vector.load %arg2[%c0_12, %c8, %c0_13, %c0_14] : memref<1x16x16x128xbf16, #tpu.memory_space<vmem>>, vector<1x8x16x128xbf16>
    %21 = vector.shape_cast %20 : vector<1x8x16x128xbf16> to vector<8x16x128xbf16>
    %22 = arith.extf %21 : vector<8x16x128xbf16> to vector<8x16x128xf32>
    %23 = vector.broadcast %1 : vector<1x1x128xf32> to vector<8x16x128xf32>
    %24 = arith.mulf %22, %23 : vector<8x16x128xf32>
    %25 = vector.broadcast %3 : vector<1x1x128xf32> to vector<8x16x128xf32>
    %26 = arith.addf %24, %25 : vector<8x16x128xf32>
    %cst_15 = arith.constant 5.000000e-01 : f32
    %27 = vector.broadcast %cst_15 : f32 to vector<8x16x128xf32>
    %28 = arith.mulf %27, %26 : vector<8x16x128xf32>
    %cst_16 = arith.constant 0.707106769 : f32
    %29 = vector.broadcast %cst_16 : f32 to vector<8x16x128xf32>
    %30 = arith.mulf %26, %29 : vector<8x16x128xf32>
    %31 = math.erf %30 : vector<8x16x128xf32>
    %cst_17 = arith.constant 1.000000e+00 : f32
    %32 = vector.broadcast %cst_17 : f32 to vector<8x16x128xf32>
    %33 = arith.addf %32, %31 : vector<8x16x128xf32>
    %34 = arith.mulf %28, %33 : vector<8x16x128xf32>
    %c8_18 = arith.constant 8 : index
    %c0_19 = arith.constant 0 : index
    %c0_20 = arith.constant 0 : index
    %35 = vector.load %arg9[%c8_18, %c0_19, %c0_20] : memref<16x16x128xf32, #tpu.memory_space<vmem>>, vector<8x16x128xf32>
    tpu.vector_store %arg9[%c8_18, %c0_19, %c0_20], %34 {strides = array<i32>} : memref<16x16x128xf32, #tpu.memory_space<vmem>>, vector<8x16x128xf32>,
    %c0_21 = arith.constant 0 : index
    %c0_22 = arith.constant 0 : index
    %c0_23 = arith.constant 0 : index
    %36 = vector.load %arg5[%c0_21, %c0_22, %c0_23] : memref<3x3x128xf32, #tpu.memory_space<vmem>>, vector<3x3x128xf32>
    %c0_24 = arith.constant 0 : index
    %c0_25 = arith.constant 0 : index
    %37 = vector.load %arg6[%c0_24, %c0_25] : memref<1x128xf32, #tpu.memory_space<vmem>>, vector<1x128xf32>
    %cst_26 = arith.constant 0.000000e+00 : f32
    %38 = vector.broadcast %cst_26 : f32 to vector<1x128xf32>
    %cst_27 = arith.constant 0.000000e+00 : f32
    %39 = vector.broadcast %cst_27 : f32 to vector<1x128xf32>
    %c0_28 = arith.constant 0 : index
    %c0_29 = arith.constant 0 : index
    %c0_30 = arith.constant 0 : index
    %40 = vector.load %arg9[%c0_28, %c0_29, %c0_30] : memref<16x16x128xf32, #tpu.memory_space<vmem>>, vector<7x16x128xf32>
    %cst_31 = arith.constant 0.000000e+00 : f32
    %41 = vector.broadcast %cst_31 : f32 to vector<1x16x128xf32>
    %42 = tpu.concatenate %41, %40 in 0 : vector<1x16x128xf32>, vector<7x16x128xf32> -> vector<8x16x128xf32>
    %43 = vector.extract_strided_slice %36 {offsets = [0, 0, 0], sizes = [1, 1, 128], strides = [1, 1, 1]} : vector<3x3x128xf32> to vector<1x1x128xf32>
    %cst_32 = arith.constant 0.000000e+00 : f32
    %44 = vector.broadcast %cst_32 : f32 to vector<8x1x128xf32>
    %45 = vector.extract_strided_slice %42 {offsets = [0, 0, 0], sizes = [8, 15, 128], strides = [1, 1, 1]} : vector<8x16x128xf32> to vector<8x15x128xf32>
    %46 = tpu.concatenate %44, %45 in 1 : vector<8x1x128xf32>, vector<8x15x128xf32> -> vector<8x16x128xf32>
    %47 = vector.broadcast %43 : vector<1x1x128xf32> to vector<8x16x128xf32>
    %48 = arith.mulf %46, %47 : vector<8x16x128xf32>
    %49 = vector.extract_strided_slice %36 {offsets = [0, 1, 0], sizes = [1, 1, 128], strides = [1, 1, 1]} : vector<3x3x128xf32> to vector<1x1x128xf32>
    %50 = vector.broadcast %49 : vector<1x1x128xf32> to vector<8x16x128xf32>
    %51 = arith.mulf %42, %50 : vector<8x16x128xf32>
    %52 = arith.addf %48, %51 : vector<8x16x128xf32>
    %53 = vector.extract_strided_slice %36 {offsets = [0, 2, 0], sizes = [1, 1, 128], strides = [1, 1, 1]} : vector<3x3x128xf32> to vector<1x1x128xf32>
    %cst_33 = arith.constant 0.000000e+00 : f32
    %54 = vector.broadcast %cst_33 : f32 to vector<8x1x128xf32>
    %55 = vector.extract_strided_slice %42 {offsets = [0, 1, 0], sizes = [8, 15, 128], strides = [1, 1, 1]} : vector<8x16x128xf32> to vector<8x15x128xf32>
    %56 = tpu.concatenate %55, %54 in 1 : vector<8x15x128xf32>, vector<8x1x128xf32> -> vector<8x16x128xf32>
    %57 = vector.broadcast %53 : vector<1x1x128xf32> to vector<8x16x128xf32>
    %58 = arith.mulf %56, %57 : vector<8x16x128xf32>
    %59 = arith.addf %52, %58 : vector<8x16x128xf32>
    %c0_34 = arith.constant 0 : index
    %c0_35 = arith.constant 0 : index
    %c0_36 = arith.constant 0 : index
    %60 = vector.load %arg9[%c0_34, %c0_35, %c0_36] : memref<16x16x128xf32, #tpu.memory_space<vmem>>, vector<8x16x128xf32>
    %61 = vector.extract_strided_slice %36 {offsets = [1, 0, 0], sizes = [1, 1, 128], strides = [1, 1, 1]} : vector<3x3x128xf32> to vector<1x1x128xf32>
    %cst_37 = arith.constant 0.000000e+00 : f32
    %62 = vector.broadcast %cst_37 : f32 to vector<8x1x128xf32>
    %63 = vector.extract_strided_slice %60 {offsets = [0, 0, 0], sizes = [8, 15, 128], strides = [1, 1, 1]} : vector<8x16x128xf32> to vector<8x15x128xf32>
    %64 = tpu.concatenate %62, %63 in 1 : vector<8x1x128xf32>, vector<8x15x128xf32> -> vector<8x16x128xf32>
    %65 = vector.broadcast %61 : vector<1x1x128xf32> to vector<8x16x128xf32>
    %66 = arith.mulf %64, %65 : vector<8x16x128xf32>
    %67 = arith.addf %59, %66 : vector<8x16x128xf32>
    %68 = vector.extract_strided_slice %36 {offsets = [1, 1, 0], sizes = [1, 1, 128], strides = [1, 1, 1]} : vector<3x3x128xf32> to vector<1x1x128xf32>
    %69 = vector.broadcast %68 : vector<1x1x128xf32> to vector<8x16x128xf32>
    %70 = arith.mulf %60, %69 : vector<8x16x128xf32>
    %71 = arith.addf %67, %70 : vector<8x16x128xf32>
    %72 = vector.extract_strided_slice %36 {offsets = [1, 2, 0], sizes = [1, 1, 128], strides = [1, 1, 1]} : vector<3x3x128xf32> to vector<1x1x128xf32>
    %cst_38 = arith.constant 0.000000e+00 : f32
    %73 = vector.broadcast %cst_38 : f32 to vector<8x1x128xf32>
    %74 = vector.extract_strided_slice %60 {offsets = [0, 1, 0], sizes = [8, 15, 128], strides = [1, 1, 1]} : vector<8x16x128xf32> to vector<8x15x128xf32>
    %75 = tpu.concatenate %74, %73 in 1 : vector<8x15x128xf32>, vector<8x1x128xf32> -> vector<8x16x128xf32>
    %76 = vector.broadcast %72 : vector<1x1x128xf32> to vector<8x16x128xf32>
    %77 = arith.mulf %75, %76 : vector<8x16x128xf32>
    %78 = arith.addf %71, %77 : vector<8x16x128xf32>
    %c1 = arith.constant 1 : index
    %c0_39 = arith.constant 0 : index
    %c0_40 = arith.constant 0 : index
    %79 = vector.load %arg9[%c1, %c0_39, %c0_40] : memref<16x16x128xf32, #tpu.memory_space<vmem>>, vector<8x16x128xf32>
    %80 = vector.extract_strided_slice %36 {offsets = [2, 0, 0], sizes = [1, 1, 128], strides = [1, 1, 1]} : vector<3x3x128xf32> to vector<1x1x128xf32>
    %cst_41 = arith.constant 0.000000e+00 : f32
    %81 = vector.broadcast %cst_41 : f32 to vector<8x1x128xf32>
    %82 = vector.extract_strided_slice %79 {offsets = [0, 0, 0], sizes = [8, 15, 128], strides = [1, 1, 1]} : vector<8x16x128xf32> to vector<8x15x128xf32>
    %83 = tpu.concatenate %81, %82 in 1 : vector<8x1x128xf32>, vector<8x15x128xf32> -> vector<8x16x128xf32>
    %84 = vector.broadcast %80 : vector<1x1x128xf32> to vector<8x16x128xf32>
    %85 = arith.mulf %83, %84 : vector<8x16x128xf32>
    %86 = arith.addf %78, %85 : vector<8x16x128xf32>
    %87 = vector.extract_strided_slice %36 {offsets = [2, 1, 0], sizes = [1, 1, 128], strides = [1, 1, 1]} : vector<3x3x128xf32> to vector<1x1x128xf32>
    %88 = vector.broadcast %87 : vector<1x1x128xf32> to vector<8x16x128xf32>
    %89 = arith.mulf %79, %88 : vector<8x16x128xf32>
    %90 = arith.addf %86, %89 : vector<8x16x128xf32>
    %91 = vector.extract_strided_slice %36 {offsets = [2, 2, 0], sizes = [1, 1, 128], strides = [1, 1, 1]} : vector<3x3x128xf32> to vector<1x1x128xf32>
    %cst_42 = arith.constant 0.000000e+00 : f32
    %92 = vector.broadcast %cst_42 : f32 to vector<8x1x128xf32>
    %93 = vector.extract_strided_slice %79 {offsets = [0, 1, 0], sizes = [8, 15, 128], strides = [1, 1, 1]} : vector<8x16x128xf32> to vector<8x15x128xf32>
    %94 = tpu.concatenate %93, %92 in 1 : vector<8x15x128xf32>, vector<8x1x128xf32> -> vector<8x16x128xf32>
    %95 = vector.broadcast %91 : vector<1x1x128xf32> to vector<8x16x128xf32>
    %96 = arith.mulf %94, %95 : vector<8x16x128xf32>
    %97 = arith.addf %90, %96 : vector<8x16x128xf32>
    %98 = vector.shape_cast %37 : vector<1x128xf32> to vector<1x1x128xf32>
    %99 = vector.broadcast %98 : vector<1x1x128xf32> to vector<8x16x128xf32>
    %100 = arith.addf %97, %99 : vector<8x16x128xf32>
    %101 = arith.truncf %100 : vector<8x16x128xf32> to vector<8x16x128xbf16>
    %c0_43 = arith.constant 0 : index
    %c0_44 = arith.constant 0 : index
    %c0_45 = arith.constant 0 : index
    %c0_46 = arith.constant 0 : index
    %102 = vector.load %arg7[%c0_43, %c0_44, %c0_45, %c0_46] : memref<1x16x16x128xbf16, #tpu.memory_space<vmem>>, vector<1x8x16x128xbf16>
    %103 = vector.shape_cast %102 : vector<1x8x16x128xbf16> to vector<8x16x128xbf16>
    %104 = vector.shape_cast %101 : vector<8x16x128xbf16> to vector<1x8x16x128xbf16>
    tpu.vector_store %arg7[%c0_43, %c0_44, %c0_45, %c0_46], %104 {strides = array<i32>} : memref<1x16x16x128xbf16, #tpu.memory_space<vmem>>, vector<1x8x16x128xbf16>,
    %105 = vector.shape_cast %100 : vector<8x16x128xf32> to vector<128x128xf32>
    %cst_47 = arith.constant dense<0.000000e+00> : vector<128xf32>
    %106 = vector.multi_reduction <add>, %105, %cst_47 [0] : vector<128x128xf32> to vector<128xf32>
    %107 = vector.shape_cast %106 : vector<128xf32> to vector<1x128xf32>
    %108 = arith.addf %38, %107 : vector<1x128xf32>
    %109 = arith.mulf %105, %105 : vector<128x128xf32>
    %cst_48 = arith.constant dense<0.000000e+00> : vector<128xf32>
    %110 = vector.multi_reduction <add>, %109, %cst_48 [0] : vector<128x128xf32> to vector<128xf32>
    %111 = vector.shape_cast %110 : vector<128xf32> to vector<1x128xf32>
    %112 = arith.addf %39, %111 : vector<1x128xf32>
    %c7 = arith.constant 7 : index
    %c0_49 = arith.constant 0 : index
    %c0_50 = arith.constant 0 : index
    %113 = vector.load %arg9[%c7, %c0_49, %c0_50] : memref<16x16x128xf32, #tpu.memory_space<vmem>>, vector<8x16x128xf32>
    %114 = vector.extract_strided_slice %36 {offsets = [0, 0, 0], sizes = [1, 1, 128], strides = [1, 1, 1]} : vector<3x3x128xf32> to vector<1x1x128xf32>
    %cst_51 = arith.constant 0.000000e+00 : f32
    %115 = vector.broadcast %cst_51 : f32 to vector<8x1x128xf32>
    %116 = vector.extract_strided_slice %113 {offsets = [0, 0, 0], sizes = [8, 15, 128], strides = [1, 1, 1]} : vector<8x16x128xf32> to vector<8x15x128xf32>
    %117 = tpu.concatenate %115, %116 in 1 : vector<8x1x128xf32>, vector<8x15x128xf32> -> vector<8x16x128xf32>
    %118 = vector.broadcast %114 : vector<1x1x128xf32> to vector<8x16x128xf32>
    %119 = arith.mulf %117, %118 : vector<8x16x128xf32>
    %120 = vector.extract_strided_slice %36 {offsets = [0, 1, 0], sizes = [1, 1, 128], strides = [1, 1, 1]} : vector<3x3x128xf32> to vector<1x1x128xf32>
    %121 = vector.broadcast %120 : vector<1x1x128xf32> to vector<8x16x128xf32>
    %122 = arith.mulf %113, %121 : vector<8x16x128xf32>
    %123 = arith.addf %119, %122 : vector<8x16x128xf32>
    %124 = vector.extract_strided_slice %36 {offsets = [0, 2, 0], sizes = [1, 1, 128], strides = [1, 1, 1]} : vector<3x3x128xf32> to vector<1x1x128xf32>
    %cst_52 = arith.constant 0.000000e+00 : f32
    %125 = vector.broadcast %cst_52 : f32 to vector<8x1x128xf32>
    %126 = vector.extract_strided_slice %113 {offsets = [0, 1, 0], sizes = [8, 15, 128], strides = [1, 1, 1]} : vector<8x16x128xf32> to vector<8x15x128xf32>
    %127 = tpu.concatenate %126, %125 in 1 : vector<8x15x128xf32>, vector<8x1x128xf32> -> vector<8x16x128xf32>
    %128 = vector.broadcast %124 : vector<1x1x128xf32> to vector<8x16x128xf32>
    %129 = arith.mulf %127, %128 : vector<8x16x128xf32>
    %130 = arith.addf %123, %129 : vector<8x16x128xf32>
    %c8_53 = arith.constant 8 : index
    %c0_54 = arith.constant 0 : index
    %c0_55 = arith.constant 0 : index
    %131 = vector.load %arg9[%c8_53, %c0_54, %c0_55] : memref<16x16x128xf32, #tpu.memory_space<vmem>>, vector<8x16x128xf32>
    %132 = vector.extract_strided_slice %36 {offsets = [1, 0, 0], sizes = [1, 1, 128], strides = [1, 1, 1]} : vector<3x3x128xf32> to vector<1x1x128xf32>
    %cst_56 = arith.constant 0.000000e+00 : f32
    %133 = vector.broadcast %cst_56 : f32 to vector<8x1x128xf32>
    %134 = vector.extract_strided_slice %131 {offsets = [0, 0, 0], sizes = [8, 15, 128], strides = [1, 1, 1]} : vector<8x16x128xf32> to vector<8x15x128xf32>
    %135 = tpu.concatenate %133, %134 in 1 : vector<8x1x128xf32>, vector<8x15x128xf32> -> vector<8x16x128xf32>
    %136 = vector.broadcast %132 : vector<1x1x128xf32> to vector<8x16x128xf32>
    %137 = arith.mulf %135, %136 : vector<8x16x128xf32>
    %138 = arith.addf %130, %137 : vector<8x16x128xf32>
    %139 = vector.extract_strided_slice %36 {offsets = [1, 1, 0], sizes = [1, 1, 128], strides = [1, 1, 1]} : vector<3x3x128xf32> to vector<1x1x128xf32>
    %140 = vector.broadcast %139 : vector<1x1x128xf32> to vector<8x16x128xf32>
    %141 = arith.mulf %131, %140 : vector<8x16x128xf32>
    %142 = arith.addf %138, %141 : vector<8x16x128xf32>
    %143 = vector.extract_strided_slice %36 {offsets = [1, 2, 0], sizes = [1, 1, 128], strides = [1, 1, 1]} : vector<3x3x128xf32> to vector<1x1x128xf32>
    %cst_57 = arith.constant 0.000000e+00 : f32
    %144 = vector.broadcast %cst_57 : f32 to vector<8x1x128xf32>
    %145 = vector.extract_strided_slice %131 {offsets = [0, 1, 0], sizes = [8, 15, 128], strides = [1, 1, 1]} : vector<8x16x128xf32> to vector<8x15x128xf32>
    %146 = tpu.concatenate %145, %144 in 1 : vector<8x15x128xf32>, vector<8x1x128xf32> -> vector<8x16x128xf32>
    %147 = vector.broadcast %143 : vector<1x1x128xf32> to vector<8x16x128xf32>
    %148 = arith.mulf %146, %147 : vector<8x16x128xf32>
    %149 = arith.addf %142, %148 : vector<8x16x128xf32>
    %c9 = arith.constant 9 : index
    %c0_58 = arith.constant 0 : index
    %c0_59 = arith.constant 0 : index
    %150 = vector.load %arg9[%c9, %c0_58, %c0_59] : memref<16x16x128xf32, #tpu.memory_space<vmem>>, vector<7x16x128xf32>
    %cst_60 = arith.constant 0.000000e+00 : f32
    %151 = vector.broadcast %cst_60 : f32 to vector<1x16x128xf32>
    %152 = tpu.concatenate %150, %151 in 0 : vector<7x16x128xf32>, vector<1x16x128xf32> -> vector<8x16x128xf32>
    %153 = vector.extract_strided_slice %36 {offsets = [2, 0, 0], sizes = [1, 1, 128], strides = [1, 1, 1]} : vector<3x3x128xf32> to vector<1x1x128xf32>
    %cst_61 = arith.constant 0.000000e+00 : f32
    %154 = vector.broadcast %cst_61 : f32 to vector<8x1x128xf32>
    %155 = vector.extract_strided_slice %152 {offsets = [0, 0, 0], sizes = [8, 15, 128], strides = [1, 1, 1]} : vector<8x16x128xf32> to vector<8x15x128xf32>
    %156 = tpu.concatenate %154, %155 in 1 : vector<8x1x128xf32>, vector<8x15x128xf32> -> vector<8x16x128xf32>
    %157 = vector.broadcast %153 : vector<1x1x128xf32> to vector<8x16x128xf32>
    %158 = arith.mulf %156, %157 : vector<8x16x128xf32>
    %159 = arith.addf %149, %158 : vector<8x16x128xf32>
    %160 = vector.extract_strided_slice %36 {offsets = [2, 1, 0], sizes = [1, 1, 128], strides = [1, 1, 1]} : vector<3x3x128xf32> to vector<1x1x128xf32>
    %161 = vector.broadcast %160 : vector<1x1x128xf32> to vector<8x16x128xf32>
    %162 = arith.mulf %152, %161 : vector<8x16x128xf32>
    %163 = arith.addf %159, %162 : vector<8x16x128xf32>
    %164 = vector.extract_strided_slice %36 {offsets = [2, 2, 0], sizes = [1, 1, 128], strides = [1, 1, 1]} : vector<3x3x128xf32> to vector<1x1x128xf32>
    %cst_62 = arith.constant 0.000000e+00 : f32
    %165 = vector.broadcast %cst_62 : f32 to vector<8x1x128xf32>
    %166 = vector.extract_strided_slice %152 {offsets = [0, 1, 0], sizes = [8, 15, 128], strides = [1, 1, 1]} : vector<8x16x128xf32> to vector<8x15x128xf32>
    %167 = tpu.concatenate %166, %165 in 1 : vector<8x15x128xf32>, vector<8x1x128xf32> -> vector<8x16x128xf32>
    %168 = vector.broadcast %164 : vector<1x1x128xf32> to vector<8x16x128xf32>
    %169 = arith.mulf %167, %168 : vector<8x16x128xf32>
    %170 = arith.addf %163, %169 : vector<8x16x128xf32>
    %171 = vector.shape_cast %37 : vector<1x128xf32> to vector<1x1x128xf32>
    %172 = vector.broadcast %171 : vector<1x1x128xf32> to vector<8x16x128xf32>
    %173 = arith.addf %170, %172 : vector<8x16x128xf32>
    %174 = arith.truncf %173 : vector<8x16x128xf32> to vector<8x16x128xbf16>
    %c0_63 = arith.constant 0 : index
    %c8_64 = arith.constant 8 : index
    %c0_65 = arith.constant 0 : index
    %c0_66 = arith.constant 0 : index
    %175 = vector.load %arg7[%c0_63, %c8_64, %c0_65, %c0_66] : memref<1x16x16x128xbf16, #tpu.memory_space<vmem>>, vector<1x8x16x128xbf16>
    %176 = vector.shape_cast %175 : vector<1x8x16x128xbf16> to vector<8x16x128xbf16>
    %177 = vector.shape_cast %174 : vector<8x16x128xbf16> to vector<1x8x16x128xbf16>
    tpu.vector_store %arg7[%c0_63, %c8_64, %c0_65, %c0_66], %177 {strides = array<i32>} : memref<1x16x16x128xbf16, #tpu.memory_space<vmem>>, vector<1x8x16x128xbf16>,
    %178 = vector.shape_cast %173 : vector<8x16x128xf32> to vector<128x128xf32>
    %cst_67 = arith.constant dense<0.000000e+00> : vector<128xf32>
    %179 = vector.multi_reduction <add>, %178, %cst_67 [0] : vector<128x128xf32> to vector<128xf32>
    %180 = vector.shape_cast %179 : vector<128xf32> to vector<1x128xf32>
    %181 = arith.addf %108, %180 : vector<1x128xf32>
    %182 = arith.mulf %178, %178 : vector<128x128xf32>
    %cst_68 = arith.constant dense<0.000000e+00> : vector<128xf32>
    %183 = vector.multi_reduction <add>, %182, %cst_68 [0] : vector<128x128xf32> to vector<128xf32>
    %184 = vector.shape_cast %183 : vector<128xf32> to vector<1x128xf32>
    %185 = arith.addf %112, %184 : vector<1x128xf32>
    %186 = tpu.concatenate %181, %185 in 0 : vector<1x128xf32>, vector<1x128xf32> -> vector<2x128xf32>
    %c0_69 = arith.constant 0 : index
    %c0_70 = arith.constant 0 : index
    %c0_71 = arith.constant 0 : index
    %187 = vector.load %arg8[%c0_69, %c0_70, %c0_71] : memref<1x2x128xf32, #tpu.memory_space<vmem>>, vector<1x2x128xf32>
    %188 = vector.shape_cast %187 : vector<1x2x128xf32> to vector<2x128xf32>
    %189 = vector.shape_cast %186 : vector<2x128xf32> to vector<1x2x128xf32>
    tpu.vector_store %arg8[%c0_69, %c0_70, %c0_71], %189 {strides = array<i32>} : memref<1x2x128xf32, #tpu.memory_space<vmem>>, vector<1x2x128xf32>,
    return
  }
  func.func @transform_0(%arg0: i32, %arg1: i32) -> (i32, i32, i32, i32) {
    %c0_i32 = arith.constant 0 : i32
    %c0_i32_0 = arith.constant 0 : i32
    %c0_i32_1 = arith.constant 0 : i32
    return %arg0, %c0_i32, %c0_i32_0, %arg1 : i32, i32, i32, i32
  }
  func.func @transform_1(%arg0: i32, %arg1: i32) -> (i32, i32) {
    %c0_i32 = arith.constant 0 : i32
    %c0_i32_0 = arith.constant 0 : i32
    return %c0_i32, %arg1 : i32, i32
  }
  func.func @transform_2(%arg0: i32, %arg1: i32) -> (i32, i32) {
    %c0_i32 = arith.constant 0 : i32
    %c0_i32_0 = arith.constant 0 : i32
    return %c0_i32, %arg1 : i32, i32
  }
  func.func @transform_3(%arg0: i32, %arg1: i32) -> (i32, i32, i32) {
    %c0_i32 = arith.constant 0 : i32
    %c0_i32_0 = arith.constant 0 : i32
    %c0_i32_1 = arith.constant 0 : i32
    return %c0_i32, %c0_i32_0, %arg1 : i32, i32, i32
  }
  func.func @transform_4(%arg0: i32, %arg1: i32) -> (i32, i32) {
    %c0_i32 = arith.constant 0 : i32
    %c0_i32_0 = arith.constant 0 : i32
    return %c0_i32, %arg1 : i32, i32
  }
  func.func @transform_5(%arg0: i32, %arg1: i32) -> (i32, i32, i32, i32) {
    %c0_i32 = arith.constant 0 : i32
    %c0_i32_0 = arith.constant 0 : i32
    %c0_i32_1 = arith.constant 0 : i32
    return %arg0, %c0_i32, %c0_i32_0, %arg1 : i32, i32, i32, i32
  }
  func.func @transform_6(%arg0: i32, %arg1: i32) -> (i32, i32, i32) {
    %c0_i32 = arith.constant 0 : i32
    %c0_i32_0 = arith.constant 0 : i32
    return %arg0, %c0_i32, %arg1 : i32, i32, i32
  }
}

module attributes {stable_mosaic.version = 11 : i64} {
  func.func @_bn3_kernel(%arg0: i32, %arg1: memref<512x128xbf16, #tpu.memory_space<vmem>>, %arg2: memref<1x128xf32, #tpu.memory_space<vmem>>, %arg3: memref<1x128xf32, #tpu.memory_space<vmem>>, %arg4: memref<512x128xf32, #tpu.memory_space<vmem>>) attributes {dimension_semantics = [#tpu.dimension_semantics<parallel>], iteration_bounds = array<i64: 1>, scalar_prefetch = 0 : i64, scratch_operands = 0 : i64, tpu.core_type = #tpu.core_type<tc>, window_params = [{transform_indices = @transform_0, window_bounds = array<i64: 512, 128>}, {pipeline_mode = #tpu.pipeline_mode<synchronous>, transform_indices = @transform_1, window_bounds = array<i64: 1, 128>}, {pipeline_mode = #tpu.pipeline_mode<synchronous>, transform_indices = @transform_2, window_bounds = array<i64: 1, 128>}, {transform_indices = @transform_3, window_bounds = array<i64: 512, 128>}]} {
    %c0 = arith.constant 0 : index
    %c0_0 = arith.constant 0 : index
    %0 = vector.load %arg2[%c0, %c0_0] : memref<1x128xf32, #tpu.memory_space<vmem>>, vector<1x128xf32>
    %c0_1 = arith.constant 0 : index
    %c0_2 = arith.constant 0 : index
    %1 = vector.load %arg3[%c0_1, %c0_2] : memref<1x128xf32, #tpu.memory_space<vmem>>, vector<1x128xf32>
    %c0_3 = arith.constant 0 : index
    %c0_4 = arith.constant 0 : index
    %2 = vector.load %arg1[%c0_3, %c0_4] : memref<512x128xbf16, #tpu.memory_space<vmem>>, vector<128x128xbf16>
    %3 = arith.extf %2 : vector<128x128xbf16> to vector<128x128xf32>
    %4 = vector.broadcast %0 : vector<1x128xf32> to vector<128x128xf32>
    %5 = arith.mulf %3, %4 : vector<128x128xf32>
    %6 = vector.broadcast %1 : vector<1x128xf32> to vector<128x128xf32>
    %7 = arith.addf %5, %6 : vector<128x128xf32>
    %c0_5 = arith.constant 0 : index
    %c0_6 = arith.constant 0 : index
    %8 = vector.load %arg4[%c0_5, %c0_6] : memref<512x128xf32, #tpu.memory_space<vmem>>, vector<128x128xf32>
    tpu.vector_store %arg4[%c0_5, %c0_6], %7 {strides = array<i32>} : memref<512x128xf32, #tpu.memory_space<vmem>>, vector<128x128xf32>,
    %c128 = arith.constant 128 : index
    %c0_7 = arith.constant 0 : index
    %9 = vector.load %arg1[%c128, %c0_7] : memref<512x128xbf16, #tpu.memory_space<vmem>>, vector<128x128xbf16>
    %10 = arith.extf %9 : vector<128x128xbf16> to vector<128x128xf32>
    %11 = vector.broadcast %0 : vector<1x128xf32> to vector<128x128xf32>
    %12 = arith.mulf %10, %11 : vector<128x128xf32>
    %13 = vector.broadcast %1 : vector<1x128xf32> to vector<128x128xf32>
    %14 = arith.addf %12, %13 : vector<128x128xf32>
    %c128_8 = arith.constant 128 : index
    %c0_9 = arith.constant 0 : index
    %15 = vector.load %arg4[%c128_8, %c0_9] : memref<512x128xf32, #tpu.memory_space<vmem>>, vector<128x128xf32>
    tpu.vector_store %arg4[%c128_8, %c0_9], %14 {strides = array<i32>} : memref<512x128xf32, #tpu.memory_space<vmem>>, vector<128x128xf32>,
    %c256 = arith.constant 256 : index
    %c0_10 = arith.constant 0 : index
    %16 = vector.load %arg1[%c256, %c0_10] : memref<512x128xbf16, #tpu.memory_space<vmem>>, vector<128x128xbf16>
    %17 = arith.extf %16 : vector<128x128xbf16> to vector<128x128xf32>
    %18 = vector.broadcast %0 : vector<1x128xf32> to vector<128x128xf32>
    %19 = arith.mulf %17, %18 : vector<128x128xf32>
    %20 = vector.broadcast %1 : vector<1x128xf32> to vector<128x128xf32>
    %21 = arith.addf %19, %20 : vector<128x128xf32>
    %c256_11 = arith.constant 256 : index
    %c0_12 = arith.constant 0 : index
    %22 = vector.load %arg4[%c256_11, %c0_12] : memref<512x128xf32, #tpu.memory_space<vmem>>, vector<128x128xf32>
    tpu.vector_store %arg4[%c256_11, %c0_12], %21 {strides = array<i32>} : memref<512x128xf32, #tpu.memory_space<vmem>>, vector<128x128xf32>,
    %c384 = arith.constant 384 : index
    %c0_13 = arith.constant 0 : index
    %23 = vector.load %arg1[%c384, %c0_13] : memref<512x128xbf16, #tpu.memory_space<vmem>>, vector<128x128xbf16>
    %24 = arith.extf %23 : vector<128x128xbf16> to vector<128x128xf32>
    %25 = vector.broadcast %0 : vector<1x128xf32> to vector<128x128xf32>
    %26 = arith.mulf %24, %25 : vector<128x128xf32>
    %27 = vector.broadcast %1 : vector<1x128xf32> to vector<128x128xf32>
    %28 = arith.addf %26, %27 : vector<128x128xf32>
    %c384_14 = arith.constant 384 : index
    %c0_15 = arith.constant 0 : index
    %29 = vector.load %arg4[%c384_14, %c0_15] : memref<512x128xf32, #tpu.memory_space<vmem>>, vector<128x128xf32>
    tpu.vector_store %arg4[%c384_14, %c0_15], %28 {strides = array<i32>} : memref<512x128xf32, #tpu.memory_space<vmem>>, vector<128x128xf32>,
    return
  }
  func.func @transform_0(%arg0: i32) -> (i32, i32) {
    %c0_i32 = arith.constant 0 : i32
    %c0_i32_0 = arith.constant 0 : i32
    return %arg0, %c0_i32 : i32, i32
  }
  func.func @transform_1(%arg0: i32) -> (i32, i32) {
    %c0_i32 = arith.constant 0 : i32
    %c0_i32_0 = arith.constant 0 : i32
    %c0_i32_1 = arith.constant 0 : i32
    return %c0_i32, %c0_i32_0 : i32, i32
  }
  func.func @transform_2(%arg0: i32) -> (i32, i32) {
    %c0_i32 = arith.constant 0 : i32
    %c0_i32_0 = arith.constant 0 : i32
    %c0_i32_1 = arith.constant 0 : i32
    return %c0_i32, %c0_i32_0 : i32, i32
  }
  func.func @transform_3(%arg0: i32) -> (i32, i32) {
    %c0_i32 = arith.constant 0 : i32
    %c0_i32_0 = arith.constant 0 : i32
    return %arg0, %c0_i32 : i32, i32
  }
}

module attributes {stable_mosaic.version = 11 : i64} {
  func.func @_pw_kernel(%arg0: i32, %arg1: memref<512x128xbf16, #tpu.memory_space<vmem>>, %arg2: memref<512x128xf32, #tpu.memory_space<vmem>>, %arg3: memref<1x128xf32, #tpu.memory_space<vmem>>, %arg4: memref<1x128xf32, #tpu.memory_space<vmem>>, %arg5: memref<128x128xbf16, #tpu.memory_space<vmem>>, %arg6: memref<1x128xf32, #tpu.memory_space<vmem>>, %arg7: memref<512x128xbf16, #tpu.memory_space<vmem>>, %arg8: memref<1x2x128xf32, #tpu.memory_space<vmem>>) attributes {dimension_semantics = [#tpu.dimension_semantics<parallel>], iteration_bounds = array<i64: 1>, scalar_prefetch = 0 : i64, scratch_operands = 0 : i64, tpu.core_type = #tpu.core_type<tc>, window_params = [{transform_indices = @transform_0, window_bounds = array<i64: 512, 128>}, {transform_indices = @transform_1, window_bounds = array<i64: 512, 128>}, {pipeline_mode = #tpu.pipeline_mode<synchronous>, transform_indices = @transform_2, window_bounds = array<i64: 1, 128>}, {pipeline_mode = #tpu.pipeline_mode<synchronous>, transform_indices = @transform_3, window_bounds = array<i64: 1, 128>}, {pipeline_mode = #tpu.pipeline_mode<synchronous>, transform_indices = @transform_4, window_bounds = array<i64: 128, 128>}, {pipeline_mode = #tpu.pipeline_mode<synchronous>, transform_indices = @transform_5, window_bounds = array<i64: 1, 128>}, {transform_indices = @transform_6, window_bounds = array<i64: 512, 128>}, {transform_indices = @transform_7, window_bounds = array<i64: 1, 2, 128>}]} {
    %c0 = arith.constant 0 : index
    %c0_0 = arith.constant 0 : index
    %0 = vector.load %arg5[%c0, %c0_0] : memref<128x128xbf16, #tpu.memory_space<vmem>>, vector<128x128xbf16>
    %c0_1 = arith.constant 0 : index
    %c0_2 = arith.constant 0 : index
    %1 = vector.load %arg6[%c0_1, %c0_2] : memref<1x128xf32, #tpu.memory_space<vmem>>, vector<1x128xf32>
    %c0_3 = arith.constant 0 : index
    %c0_4 = arith.constant 0 : index
    %2 = vector.load %arg3[%c0_3, %c0_4] : memref<1x128xf32, #tpu.memory_space<vmem>>, vector<1x128xf32>
    %c0_5 = arith.constant 0 : index
    %c0_6 = arith.constant 0 : index
    %3 = vector.load %arg4[%c0_5, %c0_6] : memref<1x128xf32, #tpu.memory_space<vmem>>, vector<1x128xf32>
    %cst = arith.constant 0.000000e+00 : f32
    %4 = vector.broadcast %cst : f32 to vector<1x128xf32>
    %cst_7 = arith.constant 0.000000e+00 : f32
    %5 = vector.broadcast %cst_7 : f32 to vector<1x128xf32>
    %c0_8 = arith.constant 0 : index
    %c0_9 = arith.constant 0 : index
    %6 = vector.load %arg1[%c0_8, %c0_9] : memref<512x128xbf16, #tpu.memory_space<vmem>>, vector<128x128xbf16>
    %7 = arith.extf %6 : vector<128x128xbf16> to vector<128x128xf32>
    %8 = vector.broadcast %2 : vector<1x128xf32> to vector<128x128xf32>
    %9 = arith.mulf %7, %8 : vector<128x128xf32>
    %10 = vector.broadcast %3 : vector<1x128xf32> to vector<128x128xf32>
    %11 = arith.addf %9, %10 : vector<128x128xf32>
    %cst_10 = arith.constant 5.000000e-01 : f32
    %12 = vector.broadcast %cst_10 : f32 to vector<128x128xf32>
    %13 = arith.mulf %12, %11 : vector<128x128xf32>
    %cst_11 = arith.constant 0.707106769 : f32
    %14 = vector.broadcast %cst_11 : f32 to vector<128x128xf32>
    %15 = arith.mulf %11, %14 : vector<128x128xf32>
    %16 = math.erf %15 : vector<128x128xf32>
    %cst_12 = arith.constant 1.000000e+00 : f32
    %17 = vector.broadcast %cst_12 : f32 to vector<128x128xf32>
    %18 = arith.addf %17, %16 : vector<128x128xf32>
    %19 = arith.mulf %13, %18 : vector<128x128xf32>
    %c0_13 = arith.constant 0 : index
    %c0_14 = arith.constant 0 : index
    %20 = vector.load %arg2[%c0_13, %c0_14] : memref<512x128xf32, #tpu.memory_space<vmem>>, vector<128x128xf32>
    %21 = arith.addf %19, %20 : vector<128x128xf32>
    %22 = arith.truncf %21 : vector<128x128xf32> to vector<128x128xbf16>
    %cst_15 = arith.constant dense<0.000000e+00> : vector<128x128xf32>
    %23 = tpu.matmul %22, %0, %cst_15 {dimension_numbers = #tpu.dot_dimension_numbers<[1], [0], [0], [1], [0, 0, 1, 1], [], []>} : vector<128x128xbf16>, vector<128x128xbf16>, vector<128x128xf32> -> vector<128x128xf32>
    %24 = vector.broadcast %1 : vector<1x128xf32> to vector<128x128xf32>
    %25 = arith.addf %23, %24 : vector<128x128xf32>
    %cst_16 = arith.constant 5.000000e-01 : f32
    %26 = vector.broadcast %cst_16 : f32 to vector<128x128xf32>
    %27 = arith.mulf %26, %25 : vector<128x128xf32>
    %cst_17 = arith.constant 0.707106769 : f32
    %28 = vector.broadcast %cst_17 : f32 to vector<128x128xf32>
    %29 = arith.mulf %25, %28 : vector<128x128xf32>
    %30 = math.erf %29 : vector<128x128xf32>
    %cst_18 = arith.constant 1.000000e+00 : f32
    %31 = vector.broadcast %cst_18 : f32 to vector<128x128xf32>
    %32 = arith.addf %31, %30 : vector<128x128xf32>
    %33 = arith.mulf %27, %32 : vector<128x128xf32>
    %34 = arith.truncf %33 : vector<128x128xf32> to vector<128x128xbf16>
    %c0_19 = arith.constant 0 : index
    %c0_20 = arith.constant 0 : index
    %35 = vector.load %arg7[%c0_19, %c0_20] : memref<512x128xbf16, #tpu.memory_space<vmem>>, vector<128x128xbf16>
    tpu.vector_store %arg7[%c0_19, %c0_20], %34 {strides = array<i32>} : memref<512x128xbf16, #tpu.memory_space<vmem>>, vector<128x128xbf16>,
    %cst_21 = arith.constant dense<0.000000e+00> : vector<128xf32>
    %36 = vector.multi_reduction <add>, %33, %cst_21 [0] : vector<128x128xf32> to vector<128xf32>
    %37 = vector.shape_cast %36 : vector<128xf32> to vector<1x128xf32>
    %38 = arith.addf %4, %37 : vector<1x128xf32>
    %39 = arith.mulf %33, %33 : vector<128x128xf32>
    %cst_22 = arith.constant dense<0.000000e+00> : vector<128xf32>
    %40 = vector.multi_reduction <add>, %39, %cst_22 [0] : vector<128x128xf32> to vector<128xf32>
    %41 = vector.shape_cast %40 : vector<128xf32> to vector<1x128xf32>
    %42 = arith.addf %5, %41 : vector<1x128xf32>
    %c128 = arith.constant 128 : index
    %c0_23 = arith.constant 0 : index
    %43 = vector.load %arg1[%c128, %c0_23] : memref<512x128xbf16, #tpu.memory_space<vmem>>, vector<128x128xbf16>
    %44 = arith.extf %43 : vector<128x128xbf16> to vector<128x128xf32>
    %45 = vector.broadcast %2 : vector<1x128xf32> to vector<128x128xf32>
    %46 = arith.mulf %44, %45 : vector<128x128xf32>
    %47 = vector.broadcast %3 : vector<1x128xf32> to vector<128x128xf32>
    %48 = arith.addf %46, %47 : vector<128x128xf32>
    %cst_24 = arith.constant 5.000000e-01 : f32
    %49 = vector.broadcast %cst_24 : f32 to vector<128x128xf32>
    %50 = arith.mulf %49, %48 : vector<128x128xf32>
    %cst_25 = arith.constant 0.707106769 : f32
    %51 = vector.broadcast %cst_25 : f32 to vector<128x128xf32>
    %52 = arith.mulf %48, %51 : vector<128x128xf32>
    %53 = math.erf %52 : vector<128x128xf32>
    %cst_26 = arith.constant 1.000000e+00 : f32
    %54 = vector.broadcast %cst_26 : f32 to vector<128x128xf32>
    %55 = arith.addf %54, %53 : vector<128x128xf32>
    %56 = arith.mulf %50, %55 : vector<128x128xf32>
    %c128_27 = arith.constant 128 : index
    %c0_28 = arith.constant 0 : index
    %57 = vector.load %arg2[%c128_27, %c0_28] : memref<512x128xf32, #tpu.memory_space<vmem>>, vector<128x128xf32>
    %58 = arith.addf %56, %57 : vector<128x128xf32>
    %59 = arith.truncf %58 : vector<128x128xf32> to vector<128x128xbf16>
    %cst_29 = arith.constant dense<0.000000e+00> : vector<128x128xf32>
    %60 = tpu.matmul %59, %0, %cst_29 {dimension_numbers = #tpu.dot_dimension_numbers<[1], [0], [0], [1], [0, 0, 1, 1], [], []>} : vector<128x128xbf16>, vector<128x128xbf16>, vector<128x128xf32> -> vector<128x128xf32>
    %61 = vector.broadcast %1 : vector<1x128xf32> to vector<128x128xf32>
    %62 = arith.addf %60, %61 : vector<128x128xf32>
    %cst_30 = arith.constant 5.000000e-01 : f32
    %63 = vector.broadcast %cst_30 : f32 to vector<128x128xf32>
    %64 = arith.mulf %63, %62 : vector<128x128xf32>
    %cst_31 = arith.constant 0.707106769 : f32
    %65 = vector.broadcast %cst_31 : f32 to vector<128x128xf32>
    %66 = arith.mulf %62, %65 : vector<128x128xf32>
    %67 = math.erf %66 : vector<128x128xf32>
    %cst_32 = arith.constant 1.000000e+00 : f32
    %68 = vector.broadcast %cst_32 : f32 to vector<128x128xf32>
    %69 = arith.addf %68, %67 : vector<128x128xf32>
    %70 = arith.mulf %64, %69 : vector<128x128xf32>
    %71 = arith.truncf %70 : vector<128x128xf32> to vector<128x128xbf16>
    %c128_33 = arith.constant 128 : index
    %c0_34 = arith.constant 0 : index
    %72 = vector.load %arg7[%c128_33, %c0_34] : memref<512x128xbf16, #tpu.memory_space<vmem>>, vector<128x128xbf16>
    tpu.vector_store %arg7[%c128_33, %c0_34], %71 {strides = array<i32>} : memref<512x128xbf16, #tpu.memory_space<vmem>>, vector<128x128xbf16>,
    %cst_35 = arith.constant dense<0.000000e+00> : vector<128xf32>
    %73 = vector.multi_reduction <add>, %70, %cst_35 [0] : vector<128x128xf32> to vector<128xf32>
    %74 = vector.shape_cast %73 : vector<128xf32> to vector<1x128xf32>
    %75 = arith.addf %38, %74 : vector<1x128xf32>
    %76 = arith.mulf %70, %70 : vector<128x128xf32>
    %cst_36 = arith.constant dense<0.000000e+00> : vector<128xf32>
    %77 = vector.multi_reduction <add>, %76, %cst_36 [0] : vector<128x128xf32> to vector<128xf32>
    %78 = vector.shape_cast %77 : vector<128xf32> to vector<1x128xf32>
    %79 = arith.addf %42, %78 : vector<1x128xf32>
    %c256 = arith.constant 256 : index
    %c0_37 = arith.constant 0 : index
    %80 = vector.load %arg1[%c256, %c0_37] : memref<512x128xbf16, #tpu.memory_space<vmem>>, vector<128x128xbf16>
    %81 = arith.extf %80 : vector<128x128xbf16> to vector<128x128xf32>
    %82 = vector.broadcast %2 : vector<1x128xf32> to vector<128x128xf32>
    %83 = arith.mulf %81, %82 : vector<128x128xf32>
    %84 = vector.broadcast %3 : vector<1x128xf32> to vector<128x128xf32>
    %85 = arith.addf %83, %84 : vector<128x128xf32>
    %cst_38 = arith.constant 5.000000e-01 : f32
    %86 = vector.broadcast %cst_38 : f32 to vector<128x128xf32>
    %87 = arith.mulf %86, %85 : vector<128x128xf32>
    %cst_39 = arith.constant 0.707106769 : f32
    %88 = vector.broadcast %cst_39 : f32 to vector<128x128xf32>
    %89 = arith.mulf %85, %88 : vector<128x128xf32>
    %90 = math.erf %89 : vector<128x128xf32>
    %cst_40 = arith.constant 1.000000e+00 : f32
    %91 = vector.broadcast %cst_40 : f32 to vector<128x128xf32>
    %92 = arith.addf %91, %90 : vector<128x128xf32>
    %93 = arith.mulf %87, %92 : vector<128x128xf32>
    %c256_41 = arith.constant 256 : index
    %c0_42 = arith.constant 0 : index
    %94 = vector.load %arg2[%c256_41, %c0_42] : memref<512x128xf32, #tpu.memory_space<vmem>>, vector<128x128xf32>
    %95 = arith.addf %93, %94 : vector<128x128xf32>
    %96 = arith.truncf %95 : vector<128x128xf32> to vector<128x128xbf16>
    %cst_43 = arith.constant dense<0.000000e+00> : vector<128x128xf32>
    %97 = tpu.matmul %96, %0, %cst_43 {dimension_numbers = #tpu.dot_dimension_numbers<[1], [0], [0], [1], [0, 0, 1, 1], [], []>} : vector<128x128xbf16>, vector<128x128xbf16>, vector<128x128xf32> -> vector<128x128xf32>
    %98 = vector.broadcast %1 : vector<1x128xf32> to vector<128x128xf32>
    %99 = arith.addf %97, %98 : vector<128x128xf32>
    %cst_44 = arith.constant 5.000000e-01 : f32
    %100 = vector.broadcast %cst_44 : f32 to vector<128x128xf32>
    %101 = arith.mulf %100, %99 : vector<128x128xf32>
    %cst_45 = arith.constant 0.707106769 : f32
    %102 = vector.broadcast %cst_45 : f32 to vector<128x128xf32>
    %103 = arith.mulf %99, %102 : vector<128x128xf32>
    %104 = math.erf %103 : vector<128x128xf32>
    %cst_46 = arith.constant 1.000000e+00 : f32
    %105 = vector.broadcast %cst_46 : f32 to vector<128x128xf32>
    %106 = arith.addf %105, %104 : vector<128x128xf32>
    %107 = arith.mulf %101, %106 : vector<128x128xf32>
    %108 = arith.truncf %107 : vector<128x128xf32> to vector<128x128xbf16>
    %c256_47 = arith.constant 256 : index
    %c0_48 = arith.constant 0 : index
    %109 = vector.load %arg7[%c256_47, %c0_48] : memref<512x128xbf16, #tpu.memory_space<vmem>>, vector<128x128xbf16>
    tpu.vector_store %arg7[%c256_47, %c0_48], %108 {strides = array<i32>} : memref<512x128xbf16, #tpu.memory_space<vmem>>, vector<128x128xbf16>,
    %cst_49 = arith.constant dense<0.000000e+00> : vector<128xf32>
    %110 = vector.multi_reduction <add>, %107, %cst_49 [0] : vector<128x128xf32> to vector<128xf32>
    %111 = vector.shape_cast %110 : vector<128xf32> to vector<1x128xf32>
    %112 = arith.addf %75, %111 : vector<1x128xf32>
    %113 = arith.mulf %107, %107 : vector<128x128xf32>
    %cst_50 = arith.constant dense<0.000000e+00> : vector<128xf32>
    %114 = vector.multi_reduction <add>, %113, %cst_50 [0] : vector<128x128xf32> to vector<128xf32>
    %115 = vector.shape_cast %114 : vector<128xf32> to vector<1x128xf32>
    %116 = arith.addf %79, %115 : vector<1x128xf32>
    %c384 = arith.constant 384 : index
    %c0_51 = arith.constant 0 : index
    %117 = vector.load %arg1[%c384, %c0_51] : memref<512x128xbf16, #tpu.memory_space<vmem>>, vector<128x128xbf16>
    %118 = arith.extf %117 : vector<128x128xbf16> to vector<128x128xf32>
    %119 = vector.broadcast %2 : vector<1x128xf32> to vector<128x128xf32>
    %120 = arith.mulf %118, %119 : vector<128x128xf32>
    %121 = vector.broadcast %3 : vector<1x128xf32> to vector<128x128xf32>
    %122 = arith.addf %120, %121 : vector<128x128xf32>
    %cst_52 = arith.constant 5.000000e-01 : f32
    %123 = vector.broadcast %cst_52 : f32 to vector<128x128xf32>
    %124 = arith.mulf %123, %122 : vector<128x128xf32>
    %cst_53 = arith.constant 0.707106769 : f32
    %125 = vector.broadcast %cst_53 : f32 to vector<128x128xf32>
    %126 = arith.mulf %122, %125 : vector<128x128xf32>
    %127 = math.erf %126 : vector<128x128xf32>
    %cst_54 = arith.constant 1.000000e+00 : f32
    %128 = vector.broadcast %cst_54 : f32 to vector<128x128xf32>
    %129 = arith.addf %128, %127 : vector<128x128xf32>
    %130 = arith.mulf %124, %129 : vector<128x128xf32>
    %c384_55 = arith.constant 384 : index
    %c0_56 = arith.constant 0 : index
    %131 = vector.load %arg2[%c384_55, %c0_56] : memref<512x128xf32, #tpu.memory_space<vmem>>, vector<128x128xf32>
    %132 = arith.addf %130, %131 : vector<128x128xf32>
    %133 = arith.truncf %132 : vector<128x128xf32> to vector<128x128xbf16>
    %cst_57 = arith.constant dense<0.000000e+00> : vector<128x128xf32>
    %134 = tpu.matmul %133, %0, %cst_57 {dimension_numbers = #tpu.dot_dimension_numbers<[1], [0], [0], [1], [0, 0, 1, 1], [], []>} : vector<128x128xbf16>, vector<128x128xbf16>, vector<128x128xf32> -> vector<128x128xf32>
    %135 = vector.broadcast %1 : vector<1x128xf32> to vector<128x128xf32>
    %136 = arith.addf %134, %135 : vector<128x128xf32>
    %cst_58 = arith.constant 5.000000e-01 : f32
    %137 = vector.broadcast %cst_58 : f32 to vector<128x128xf32>
    %138 = arith.mulf %137, %136 : vector<128x128xf32>
    %cst_59 = arith.constant 0.707106769 : f32
    %139 = vector.broadcast %cst_59 : f32 to vector<128x128xf32>
    %140 = arith.mulf %136, %139 : vector<128x128xf32>
    %141 = math.erf %140 : vector<128x128xf32>
    %cst_60 = arith.constant 1.000000e+00 : f32
    %142 = vector.broadcast %cst_60 : f32 to vector<128x128xf32>
    %143 = arith.addf %142, %141 : vector<128x128xf32>
    %144 = arith.mulf %138, %143 : vector<128x128xf32>
    %145 = arith.truncf %144 : vector<128x128xf32> to vector<128x128xbf16>
    %c384_61 = arith.constant 384 : index
    %c0_62 = arith.constant 0 : index
    %146 = vector.load %arg7[%c384_61, %c0_62] : memref<512x128xbf16, #tpu.memory_space<vmem>>, vector<128x128xbf16>
    tpu.vector_store %arg7[%c384_61, %c0_62], %145 {strides = array<i32>} : memref<512x128xbf16, #tpu.memory_space<vmem>>, vector<128x128xbf16>,
    %cst_63 = arith.constant dense<0.000000e+00> : vector<128xf32>
    %147 = vector.multi_reduction <add>, %144, %cst_63 [0] : vector<128x128xf32> to vector<128xf32>
    %148 = vector.shape_cast %147 : vector<128xf32> to vector<1x128xf32>
    %149 = arith.addf %112, %148 : vector<1x128xf32>
    %150 = arith.mulf %144, %144 : vector<128x128xf32>
    %cst_64 = arith.constant dense<0.000000e+00> : vector<128xf32>
    %151 = vector.multi_reduction <add>, %150, %cst_64 [0] : vector<128x128xf32> to vector<128xf32>
    %152 = vector.shape_cast %151 : vector<128xf32> to vector<1x128xf32>
    %153 = arith.addf %116, %152 : vector<1x128xf32>
    %154 = tpu.concatenate %149, %153 in 0 : vector<1x128xf32>, vector<1x128xf32> -> vector<2x128xf32>
    %c0_65 = arith.constant 0 : index
    %c0_66 = arith.constant 0 : index
    %c0_67 = arith.constant 0 : index
    %155 = vector.load %arg8[%c0_65, %c0_66, %c0_67] : memref<1x2x128xf32, #tpu.memory_space<vmem>>, vector<1x2x128xf32>
    %156 = vector.shape_cast %155 : vector<1x2x128xf32> to vector<2x128xf32>
    %157 = vector.shape_cast %154 : vector<2x128xf32> to vector<1x2x128xf32>
    tpu.vector_store %arg8[%c0_65, %c0_66, %c0_67], %157 {strides = array<i32>} : memref<1x2x128xf32, #tpu.memory_space<vmem>>, vector<1x2x128xf32>,
    return
  }
  func.func @transform_0(%arg0: i32) -> (i32, i32) {
    %c0_i32 = arith.constant 0 : i32
    %c0_i32_0 = arith.constant 0 : i32
    return %arg0, %c0_i32 : i32, i32
  }
  func.func @transform_1(%arg0: i32) -> (i32, i32) {
    %c0_i32 = arith.constant 0 : i32
    %c0_i32_0 = arith.constant 0 : i32
    return %arg0, %c0_i32 : i32, i32
  }
  func.func @transform_2(%arg0: i32) -> (i32, i32) {
    %c0_i32 = arith.constant 0 : i32
    %c0_i32_0 = arith.constant 0 : i32
    %c0_i32_1 = arith.constant 0 : i32
    return %c0_i32, %c0_i32_0 : i32, i32
  }
  func.func @transform_3(%arg0: i32) -> (i32, i32) {
    %c0_i32 = arith.constant 0 : i32
    %c0_i32_0 = arith.constant 0 : i32
    %c0_i32_1 = arith.constant 0 : i32
    return %c0_i32, %c0_i32_0 : i32, i32
  }
  func.func @transform_4(%arg0: i32) -> (i32, i32) {
    %c0_i32 = arith.constant 0 : i32
    %c0_i32_0 = arith.constant 0 : i32
    %c0_i32_1 = arith.constant 0 : i32
    return %c0_i32, %c0_i32_0 : i32, i32
  }
  func.func @transform_5(%arg0: i32) -> (i32, i32) {
    %c0_i32 = arith.constant 0 : i32
    %c0_i32_0 = arith.constant 0 : i32
    %c0_i32_1 = arith.constant 0 : i32
    return %c0_i32, %c0_i32_0 : i32, i32
  }
  func.func @transform_6(%arg0: i32) -> (i32, i32) {
    %c0_i32 = arith.constant 0 : i32
    %c0_i32_0 = arith.constant 0 : i32
    return %arg0, %c0_i32 : i32, i32
  }
  func.func @transform_7(%arg0: i32) -> (i32, i32, i32) {
    %c0_i32 = arith.constant 0 : i32
    %c0_i32_0 = arith.constant 0 : i32
    %c0_i32_1 = arith.constant 0 : i32
    return %arg0, %c0_i32, %c0_i32_0 : i32, i32, i32
  }
}

</mosaic_0001>

<bundles_post_ra>
// kernel: convmixer_block_forward.7
= control target key start
LH: loop header
LB: loop body
LE: loop exit
PB: predicated region body
PF: predicated region fallthrough
CT: control target
= control target key end

     0   :  { %8 = vsyncpa [#allocation3], 0  ;;  %s882_s0 = inlined_call_operand.hbm [shape: bf16[512,128], index: 0, kind: input, shape index: {}]   ;;  %s883_s1 = inlined_call_operand.hbm [shape: f32[1,128], index: 1, kind: input, shape index: {}]   ;;  %s884_s2 = inlined_call_operand.hbm [shape: f32[1,128], index: 2, kind: input, shape index: {}]   ;;  %s885_s3 = inlined_call_operand.hbm [shape: f32[512,128], index: 3, kind: output, shape index: {}]  }
   0x1   :  { %9 = vsyncpa [#allocation6], 0 }
   0x2   :  { %10 = vsyncpa [#allocation4], 0  ;;  %s667_s12 = smov [#allocation5]   ;;  %s668_s14 = smov [#allocation2]  }
   0x3   :  { %s29_s13 = sshll.u32 %s667_s12, 4  ;;  %s16_s15 = sshll.u32 %s668_s14, 4  ;;  %s30_s13 = int_to_ptr.vmem [resolvable:$true] %s29_s13  ;;  %s695_s15 = int_to_ptr.vmem [resolvable:$true] %s16_s15 }
   0x4   :  { %s573_s18 = scalar_lea.hbm %s883_s1, 16 }
   0x5   :  { %p574_p0 = scmp.ne.s32.totalorder %s883_s1, %s573_s18  ;;  %p577_p1 = scmp.lt.u32.totalorder %s573_s18, %s883_s1 }
   0x7   :  { %p579_p2 = pnand %p577_p1, %p574_p0 }
   0x9   :  { %582 = shalt.err (!%p579_p2)
}
   0xa   :  { %s583_s23 = scalar_lea.vmem %s30_s13, 16  ;;  %s587_s24 = scalar_lea.vmem %s30_s13, 32 }
   0xb   :  { %p584_p3 = scmp.ne.s32.totalorder %s30_s13, %s583_s23  ;;  %p588_p4 = scmp.lt.s32.totalorder %s30_s13, %s30_s13 }
   0xc   :  { %p589_p5 = scmp.lt.s32.totalorder %s587_s24, %s583_s23 }
   0xe   :  { %p590_p6 = por %p589_p5, %p588_p4 }
  0x10   :  { %p591_p7 = pnand %p590_p6, %p584_p3 }
  0x12   :  { %594 = shalt.err (!%p591_p7)
}
  0x13   :  { %32 = dma.hbm_to_vmem [thread:$0]  %s883_s1, 16, %s30_s13, [#allocation6]  }
  0x14   :  { %s595_s29 = scalar_lea.hbm %s882_s0, 4096 }
  0x15   :  { %p596_p8 = scmp.ne.s32.totalorder %s882_s0, %s595_s29  ;;  %p599_p9 = scmp.lt.u32.totalorder %s595_s29, %s882_s0 }
  0x17   :  { %p601_p10 = pnand %p599_p9, %p596_p8 }
  0x19   :  { %604 = shalt.err (!%p601_p10)
}
  0x1a   :  { %s605_s7 = scalar_lea.vmem %s695_s15, 4096  ;;  %p610_p12 = scmp.lt.s32.totalorder %s695_s15, %s695_s15 }
  0x1b   :  { %p606_p11 = scmp.ne.s32.totalorder %s695_s15, %s605_s7  ;;  %p611_p13 = scmp.lt.s32.totalorder %s605_s7, %s605_s7 }
  0x1d   :  { %p612_p0 = por %p611_p13, %p610_p12 }
  0x1f   :  { %p613_p1 = pnand %p612_p0, %p606_p11 }
  0x21   :  { %616 = shalt.err (!%p613_p1)
}
  0x22   :  { %s669_s1 = smov 64   ;;  %s670_s8 = smov 4  }
  0x23   :  { %22 = dma.hbm_to_vmem [thread:$0]  %s882_s0, 4096, %s695_s15, [#allocation3], %s669_s1, %s669_s1, %s670_s8  }
  0x24   :  { %s671_s11 = smov [#allocation7]   ;;  %s617_s16 = scalar_lea.hbm %s884_s2, 16 }
  0x25   :  { %s39_s12 = sshll.u32 %s671_s11, 4  ;;  %p618_p2 = scmp.ne.s32.totalorder %s884_s2, %s617_s16  ;;  %s40_s12 = int_to_ptr.vmem [resolvable:$true] %s39_s12 }
  0x26   :  { %p621_p3 = scmp.lt.u32.totalorder %s617_s16, %s884_s2 }
  0x28   :  { %p623_p4 = pnand %p621_p3, %p618_p2 }
  0x2a   :  { %626 = shalt.err (!%p623_p4)
}
  0x2b   :  { %s627_s21 = scalar_lea.vmem %s40_s12, 16  ;;  %s631_s0 = scalar_lea.vmem %s40_s12, 32 }
  0x2c   :  { %p628_p5 = scmp.ne.s32.totalorder %s40_s12, %s627_s21  ;;  %p632_p6 = scmp.lt.s32.totalorder %s40_s12, %s40_s12 }
  0x2d   :  { %p633_p7 = scmp.lt.s32.totalorder %s631_s0, %s627_s21 }
  0x2f   :  { %p634_p8 = por %p633_p7, %p632_p6 }
  0x31   :  { %p635_p9 = pnand %p634_p8, %p628_p5 }
  0x33   :  { %638 = shalt.err (!%p635_p9)
}
  0x34   :  { %42 = dma.hbm_to_vmem [thread:$0]  %s884_s2, 16, %s40_s12, [#allocation6]  }
  0x35   :  { %661 = dma.done.wait [#allocation3], 4096  }
  0x36   :  { %662 = vsyncadd [#allocation3], 4294963200 }
  0x37   :  { %663 = dma.done.wait [#allocation6], 32  }
  0x38   :  { %664 = vsyncadd [#allocation6], 4294967264  ;;  %v738_v0 = vld [vmem:[#allocation5] ss:$0 sm:$0xff]  ;;  %v534_v4 = vld [vmem:[#allocation2 + $0x8] sm:$0xff]   ;;  %s672_s2 = smov [#allocation8]  }
  0x39   :  { %v407_v1 = vld [vmem:[#allocation2] sm:$0xff]   ;;  %v535_v5 = vld [vmem:[#allocation2 + $0x10] sm:$0xff]   ;;  %v536_v6 = vld [vmem:[#allocation2 + $0x18] sm:$0xff]   ;;  %v412_v8 = vunpack.c.l.bf16 %v534_v4  ;;  %v413_v9 = vunpack.c.h.bf16 %v534_v4  ;;  %s391_s23 = sshll.u32 %s672_s2, 4  ;;  %s392_s23 = int_to_ptr.vmem [resolvable:$true] %s391_s23 }
  0x3a   :  { %v408_v2 = vunpack.c.l.bf16 %v407_v1  ;;  %v409_v3 = vunpack.c.h.bf16 %v407_v1  ;;  %v740_v7 = vld [vmem:[#allocation7] ss:$0 sm:$0xff]  ;;  %v416_v10 = vunpack.c.l.bf16 %v535_v5  ;;  %v417_v11 = vunpack.c.h.bf16 %v535_v5  ;;  %v538_v25 = vld [vmem:[#allocation2 + $0x28] sm:$0xff]   ;;  %v539_v26 = vld [vmem:[#allocation2 + $0x30] sm:$0xff]   ;;  %s639_s24 = scalar_lea.vmem %s392_s23, 8192  ;;  %p644_p11 = scmp.lt.s32.totalorder %s392_s23, %s392_s23 }
  0x3b   :  { %v420_v14 = vunpack.c.l.bf16 %v536_v6  ;;  %v421_v15 = vunpack.c.h.bf16 %v536_v6  ;;  %v94_v16 = vmul.f32 %v412_v8, %v738_v0  ;;  %v95_v17 = vmul.f32 %v413_v9, %v738_v0  ;;  %v537_v20 = vld [vmem:[#allocation2 + $0x20] sm:$0xff]   ;;  %v540_v31 = vld [vmem:[#allocation2 + $0x38] sm:$0xff]   ;;  %v542_v53 = vld [vmem:[#allocation2 + $0x48] sm:$0xff]   ;;  %p640_p10 = scmp.ne.s32.totalorder %s392_s23, %s639_s24  ;;  %p645_p12 = scmp.lt.s32.totalorder %s639_s24, %s639_s24 }
  0x3c   :  { %v92_v12 = vmul.f32 %v408_v2, %v738_v0  ;;  %v93_v13 = vmul.f32 %v409_v3, %v738_v0  ;;  %v96_v18 = vmul.f32 %v416_v10, %v738_v0  ;;  %v97_v19 = vmul.f32 %v417_v11, %v738_v0  ;;  %v541_v48 = vld [vmem:[#allocation2 + $0x40] sm:$0xff]   ;;  %v543_v54 = vld [vmem:[#allocation2 + $0x50] sm:$0xff]   ;;  %v544_v59 = vld [vmem:[#allocation2 + $0x58] sm:$0xff]  }
  0x3d   :  { %v98_v23 = vmul.f32 %v420_v14, %v738_v0  ;;  %v99_v24 = vmul.f32 %v421_v15, %v738_v0  ;;  %v116_v27 = vadd.f32 %v740_v7, %v94_v16  ;;  %v117_v28 = vadd.f32 %v740_v7, %v95_v17  ;;  %v545_v14 = vld [vmem:[#allocation2 + $0x60] sm:$0xff]   ;;  %p646_p13 = por %p645_p12, %p644_p11 }
  0x3e   :  { %v114_v21 = vadd.f32 %v740_v7, %v92_v12  ;;  %v115_v22 = vadd.f32 %v740_v7, %v93_v13  ;;  %v118_v29 = vadd.f32 %v740_v7, %v96_v18  ;;  %v119_v30 = vadd.f32 %v740_v7, %v97_v19  ;;  %v546_v19 = vld [vmem:[#allocation2 + $0x68] sm:$0xff]  }
  0x3f   :  { %v120_v32 = vadd.f32 %v740_v7, %v98_v23  ;;  %v121_v33 = vadd.f32 %v740_v7, %v99_v24  ;;  %v424_v34 = vunpack.c.l.bf16 %v537_v20  ;;  %v425_v35 = vunpack.c.h.bf16 %v537_v20  ;;  %132 = vst [vmem:[#allocation8 + $0x10] sm:$0xff] %v116_v27  ;;  %133 = vst [vmem:[#allocation8 + $0x18] sm:$0xff] %v117_v28  ;;  %v547_v20 = vld [vmem:[#allocation2 + $0x70] sm:$0xff]   ;;  %p647_p0 = pnand %p646_p13, %p640_p10 }
  0x40   :  { %130 = vst [vmem:[#allocation8] sm:$0xff] %v114_v21  ;;  %131 = vst [vmem:[#allocation8 + $0x8] sm:$0xff] %v115_v22  ;;  %v428_v36 = vunpack.c.l.bf16 %v538_v25  ;;  %v429_v37 = vunpack.c.h.bf16 %v538_v25  ;;  %v432_v38 = vunpack.c.l.bf16 %v539_v26  ;;  %v433_v39 = vunpack.c.h.bf16 %v539_v26  ;;  %v548_v25 = vld [vmem:[#allocation2 + $0x78] sm:$0xff]  }
  0x41   :  { %134 = vst [vmem:[#allocation8 + $0x20] sm:$0xff] %v118_v29  ;;  %135 = vst [vmem:[#allocation8 + $0x28] sm:$0xff] %v119_v30  ;;  %v100_v40 = vmul.f32 %v424_v34, %v738_v0  ;;  %v101_v41 = vmul.f32 %v425_v35, %v738_v0  ;;  %v436_v42 = vunpack.c.l.bf16 %v540_v31  ;;  %v437_v43 = vunpack.c.h.bf16 %v540_v31 }
  0x42   :  { %136 = vst [vmem:[#allocation8 + $0x30] sm:$0xff] %v120_v32  ;;  %137 = vst [vmem:[#allocation8 + $0x38] sm:$0xff] %v121_v33  ;;  %v102_v44 = vmul.f32 %v428_v36, %v738_v0  ;;  %v103_v45 = vmul.f32 %v429_v37, %v738_v0  ;;  %v104_v46 = vmul.f32 %v432_v38, %v738_v0  ;;  %v440_v62 = vunpack.c.l.bf16 %v541_v48 }
  0x43   :  { %v105_v47 = vmul.f32 %v433_v39, %v738_v0  ;;  %v122_v49 = vadd.f32 %v740_v7, %v100_v40  ;;  %v123_v50 = vadd.f32 %v740_v7, %v101_v41  ;;  %v106_v51 = vmul.f32 %v436_v42, %v738_v0  ;;  %v549_v42 = vld [vmem:[#allocation2 + $0x80] sm:$0xff]  }
  0x44   :  { %v107_v52 = vmul.f32 %v437_v43, %v738_v0  ;;  %v124_v55 = vadd.f32 %v740_v7, %v102_v44  ;;  %v125_v56 = vadd.f32 %v740_v7, %v103_v45  ;;  %v126_v57 = vadd.f32 %v740_v7, %v104_v46 }
  0x45   :  { %v127_v58 = vadd.f32 %v740_v7, %v105_v47  ;;  %138 = vst [vmem:[#allocation8 + $0x40] sm:$0xff] %v122_v49  ;;  %139 = vst [vmem:[#allocation8 + $0x48] sm:$0xff] %v123_v50  ;;  %v128_v60 = vadd.f32 %v740_v7, %v106_v51  ;;  %v441_v63 = vunpack.c.h.bf16 %v541_v48  ;;  %v444_v1 = vunpack.c.l.bf16 %v542_v53  ;;  %v550_v47 = vld [vmem:[#allocation2 + $0x88] sm:$0xff]   ;;  %v551_v48 = vld [vmem:[#allocation2 + $0x90] sm:$0xff]  }
  0x46   :  { %v129_v61 = vadd.f32 %v740_v7, %v107_v52  ;;  %140 = vst [vmem:[#allocation8 + $0x50] sm:$0xff] %v124_v55  ;;  %141 = vst [vmem:[#allocation8 + $0x58] sm:$0xff] %v125_v56  ;;  %v445_v2 = vunpack.c.h.bf16 %v542_v53  ;;  %v448_v3 = vunpack.c.l.bf16 %v543_v54  ;;  %v449_v4 = vunpack.c.h.bf16 %v543_v54  ;;  %v552_v53 = vld [vmem:[#allocation2 + $0x98] sm:$0xff]  }
  0x47   :  { %142 = vst [vmem:[#allocation8 + $0x60] sm:$0xff] %v126_v57  ;;  %143 = vst [vmem:[#allocation8 + $0x68] sm:$0xff] %v127_v58  ;;  %v178_v5 = vmul.f32 %v440_v62, %v738_v0  ;;  %v179_v6 = vmul.f32 %v441_v63, %v738_v0  ;;  %v452_v8 = vunpack.c.l.bf16 %v544_v59  ;;  %v453_v9 = vunpack.c.h.bf16 %v544_v59 }
  0x48   :  { %144 = vst [vmem:[#allocation8 + $0x70] sm:$0xff] %v128_v60  ;;  %145 = vst [vmem:[#allocation8 + $0x78] sm:$0xff] %v129_v61  ;;  %v180_v10 = vmul.f32 %v444_v1, %v738_v0  ;;  %v181_v11 = vmul.f32 %v445_v2, %v738_v0  ;;  %v182_v12 = vmul.f32 %v448_v3, %v738_v0  ;;  %v456_v28 = vunpack.c.l.bf16 %v545_v14 }
  0x49   :  { %v183_v13 = vmul.f32 %v449_v4, %v738_v0  ;;  %v194_v15 = vadd.f32 %v740_v7, %v178_v5  ;;  %v195_v16 = vadd.f32 %v740_v7, %v179_v6  ;;  %v184_v17 = vmul.f32 %v452_v8, %v738_v0  ;;  %v553_v8 = vld [vmem:[#allocation2 + $0xa0] sm:$0xff]  }
  0x4a   :  { %v185_v18 = vmul.f32 %v453_v9, %v738_v0  ;;  %v196_v21 = vadd.f32 %v740_v7, %v180_v10  ;;  %v197_v22 = vadd.f32 %v740_v7, %v181_v11  ;;  %v198_v23 = vadd.f32 %v740_v7, %v182_v12 }
  0x4b   :  { %v199_v24 = vadd.f32 %v740_v7, %v183_v13  ;;  %210 = vst [vmem:[#allocation8 + $0x80] sm:$0xff] %v194_v15  ;;  %211 = vst [vmem:[#allocation8 + $0x88] sm:$0xff] %v195_v16  ;;  %v200_v26 = vadd.f32 %v740_v7, %v184_v17  ;;  %v457_v29 = vunpack.c.h.bf16 %v545_v14  ;;  %v460_v30 = vunpack.c.l.bf16 %v546_v19  ;;  %v554_v13 = vld [vmem:[#allocation2 + $0xa8] sm:$0xff]   ;;  %v555_v14 = vld [vmem:[#allocation2 + $0xb0] sm:$0xff]  }
  0x4c   :  { %v201_v27 = vadd.f32 %v740_v7, %v185_v18  ;;  %212 = vst [vmem:[#allocation8 + $0x90] sm:$0xff] %v196_v21  ;;  %213 = vst [vmem:[#allocation8 + $0x98] sm:$0xff] %v197_v22  ;;  %v461_v31 = vunpack.c.h.bf16 %v546_v19  ;;  %v464_v32 = vunpack.c.l.bf16 %v547_v20  ;;  %v465_v33 = vunpack.c.h.bf16 %v547_v20  ;;  %v556_v19 = vld [vmem:[#allocation2 + $0xb8] sm:$0xff]  }
  0x4d   :  { %214 = vst [vmem:[#allocation8 + $0xa0] sm:$0xff] %v198_v23  ;;  %215 = vst [vmem:[#allocation8 + $0xa8] sm:$0xff] %v199_v24  ;;  %v186_v34 = vmul.f32 %v456_v28, %v738_v0  ;;  %v187_v35 = vmul.f32 %v457_v29, %v738_v0  ;;  %v468_v36 = vunpack.c.l.bf16 %v548_v25  ;;  %v469_v37 = vunpack.c.h.bf16 %v548_v25 }
  0x4e   :  { %216 = vst [vmem:[#allocation8 + $0xb0] sm:$0xff] %v200_v26  ;;  %217 = vst [vmem:[#allocation8 + $0xb8] sm:$0xff] %v201_v27  ;;  %v188_v38 = vmul.f32 %v460_v30, %v738_v0  ;;  %v189_v39 = vmul.f32 %v461_v31, %v738_v0  ;;  %v190_v40 = vmul.f32 %v464_v32, %v738_v0  ;;  %v472_v56 = vunpack.c.l.bf16 %v549_v42 }
  0x4f   :  { %v191_v41 = vmul.f32 %v465_v33, %v738_v0  ;;  %v202_v43 = vadd.f32 %v740_v7, %v186_v34  ;;  %v203_v44 = vadd.f32 %v740_v7, %v187_v35  ;;  %v192_v45 = vmul.f32 %v468_v36, %v738_v0  ;;  %v557_v36 = vld [vmem:[#allocation2 + $0xc0] sm:$0xff]  }
  0x50   :  { %v193_v46 = vmul.f32 %v469_v37, %v738_v0  ;;  %v204_v49 = vadd.f32 %v740_v7, %v188_v38  ;;  %v205_v50 = vadd.f32 %v740_v7, %v189_v39  ;;  %v206_v51 = vadd.f32 %v740_v7, %v190_v40 }
  0x51   :  { %v207_v52 = vadd.f32 %v740_v7, %v191_v41  ;;  %218 = vst [vmem:[#allocation8 + $0xc0] sm:$0xff] %v202_v43  ;;  %219 = vst [vmem:[#allocation8 + $0xc8] sm:$0xff] %v203_v44  ;;  %v208_v54 = vadd.f32 %v740_v7, %v192_v45  ;;  %v473_v57 = vunpack.c.h.bf16 %v549_v42  ;;  %v476_v58 = vunpack.c.l.bf16 %v550_v47  ;;  %v558_v41 = vld [vmem:[#allocation2 + $0xc8] sm:$0xff]   ;;  %v559_v42 = vld [vmem:[#allocation2 + $0xd0] sm:$0xff]  }
  0x52   :  { %v209_v55 = vadd.f32 %v740_v7, %v193_v46  ;;  %220 = vst [vmem:[#allocation8 + $0xd0] sm:$0xff] %v204_v49  ;;  %221 = vst [vmem:[#allocation8 + $0xd8] sm:$0xff] %v205_v50  ;;  %v477_v59 = vunpack.c.h.bf16 %v550_v47  ;;  %v480_v60 = vunpack.c.l.bf16 %v551_v48  ;;  %v481_v61 = vunpack.c.h.bf16 %v551_v48  ;;  %v560_v47 = vld [vmem:[#allocation2 + $0xd8] sm:$0xff]  }
  0x53   :  { %222 = vst [vmem:[#allocation8 + $0xe0] sm:$0xff] %v206_v51  ;;  %223 = vst [vmem:[#allocation8 + $0xe8] sm:$0xff] %v207_v52  ;;  %v258_v62 = vmul.f32 %v472_v56, %v738_v0  ;;  %v259_v63 = vmul.f32 %v473_v57, %v738_v0  ;;  %v484_v1 = vunpack.c.l.bf16 %v552_v53  ;;  %v485_v2 = vunpack.c.h.bf16 %v552_v53 }
  0x54   :  { %224 = vst [vmem:[#allocation8 + $0xf0] sm:$0xff] %v208_v54  ;;  %225 = vst [vmem:[#allocation8 + $0xf8] sm:$0xff] %v209_v55  ;;  %v260_v3 = vmul.f32 %v476_v58, %v738_v0  ;;  %v261_v4 = vmul.f32 %v477_v59, %v738_v0  ;;  %v262_v5 = vmul.f32 %v480_v60, %v738_v0  ;;  %v488_v22 = vunpack.c.l.bf16 %v553_v8 }
  0x55   :  { %v263_v6 = vmul.f32 %v481_v61, %v738_v0  ;;  %v274_v9 = vadd.f32 %v740_v7, %v258_v62  ;;  %v275_v10 = vadd.f32 %v740_v7, %v259_v63  ;;  %v264_v11 = vmul.f32 %v484_v1, %v738_v0  ;;  %v561_v1 = vld [vmem:[#allocation2 + $0xe0] sm:$0xff]  }
  0x56   :  { %v265_v12 = vmul.f32 %v485_v2, %v738_v0  ;;  %v276_v15 = vadd.f32 %v740_v7, %v260_v3  ;;  %v277_v16 = vadd.f32 %v740_v7, %v261_v4  ;;  %v278_v17 = vadd.f32 %v740_v7, %v262_v5 }
  0x57   :  { %v279_v18 = vadd.f32 %v740_v7, %v263_v6  ;;  %290 = vst [vmem:[#allocation8 + $0x100] sm:$0xff] %v274_v9  ;;  %291 = vst [vmem:[#allocation8 + $0x108] sm:$0xff] %v275_v10  ;;  %v280_v20 = vadd.f32 %v740_v7, %v264_v11  ;;  %v489_v23 = vunpack.c.h.bf16 %v553_v8  ;;  %v492_v24 = vunpack.c.l.bf16 %v554_v13  ;;  %v562_v6 = vld [vmem:[#allocation2 + $0xe8] sm:$0xff]   ;;  %v563_v8 = vld [vmem:[#allocation2 + $0xf0] sm:$0xff]  }
  0x58   :  { %v281_v21 = vadd.f32 %v740_v7, %v265_v12  ;;  %292 = vst [vmem:[#allocation8 + $0x110] sm:$0xff] %v276_v15  ;;  %293 = vst [vmem:[#allocation8 + $0x118] sm:$0xff] %v277_v16  ;;  %v493_v25 = vunpack.c.h.bf16 %v554_v13  ;;  %v496_v26 = vunpack.c.l.bf16 %v555_v14  ;;  %v497_v27 = vunpack.c.h.bf16 %v555_v14  ;;  %v564_v13 = vld [vmem:[#allocation2 + $0xf8] sm:$0xff]  }
  0x59   :  { %294 = vst [vmem:[#allocation8 + $0x120] sm:$0xff] %v278_v17  ;;  %295 = vst [vmem:[#allocation8 + $0x128] sm:$0xff] %v279_v18  ;;  %v266_v28 = vmul.f32 %v488_v22, %v738_v0  ;;  %v267_v29 = vmul.f32 %v489_v23, %v738_v0  ;;  %v500_v30 = vunpack.c.l.bf16 %v556_v19  ;;  %v501_v31 = vunpack.c.h.bf16 %v556_v19 }
  0x5a   :  { %296 = vst [vmem:[#allocation8 + $0x130] sm:$0xff] %v280_v20  ;;  %297 = vst [vmem:[#allocation8 + $0x138] sm:$0xff] %v281_v21  ;;  %v268_v32 = vmul.f32 %v492_v24, %v738_v0  ;;  %v269_v33 = vmul.f32 %v493_v25, %v738_v0  ;;  %v270_v34 = vmul.f32 %v496_v26, %v738_v0  ;;  %v504_v50 = vunpack.c.l.bf16 %v557_v36 }
  0x5b   :  { %v271_v35 = vmul.f32 %v497_v27, %v738_v0  ;;  %v282_v37 = vadd.f32 %v740_v7, %v266_v28  ;;  %v283_v38 = vadd.f32 %v740_v7, %v267_v29  ;;  %v272_v39 = vmul.f32 %v500_v30, %v738_v0 }
  0x5c   :  { %v273_v40 = vmul.f32 %v501_v31, %v738_v0  ;;  %v284_v43 = vadd.f32 %v740_v7, %v268_v32  ;;  %v285_v44 = vadd.f32 %v740_v7, %v269_v33  ;;  %v286_v45 = vadd.f32 %v740_v7, %v270_v34 }
  0x5d   :  { %v287_v46 = vadd.f32 %v740_v7, %v271_v35  ;;  %298 = vst [vmem:[#allocation8 + $0x140] sm:$0xff] %v282_v37  ;;  %299 = vst [vmem:[#allocation8 + $0x148] sm:$0xff] %v283_v38  ;;  %v288_v48 = vadd.f32 %v740_v7, %v272_v39  ;;  %v505_v51 = vunpack.c.h.bf16 %v557_v36  ;;  %v508_v52 = vunpack.c.l.bf16 %v558_v41 }
  0x5e   :  { %v289_v49 = vadd.f32 %v740_v7, %v273_v40  ;;  %300 = vst [vmem:[#allocation8 + $0x150] sm:$0xff] %v284_v43  ;;  %301 = vst [vmem:[#allocation8 + $0x158] sm:$0xff] %v285_v44  ;;  %v509_v53 = vunpack.c.h.bf16 %v558_v41  ;;  %v512_v54 = vunpack.c.l.bf16 %v559_v42  ;;  %v513_v55 = vunpack.c.h.bf16 %v559_v42 }
  0x5f   :  { %302 = vst [vmem:[#allocation8 + $0x160] sm:$0xff] %v286_v45  ;;  %303 = vst [vmem:[#allocation8 + $0x168] sm:$0xff] %v287_v46  ;;  %v338_v56 = vmul.f32 %v504_v50, %v738_v0  ;;  %v339_v57 = vmul.f32 %v505_v51, %v738_v0  ;;  %v516_v58 = vunpack.c.l.bf16 %v560_v47  ;;  %v517_v59 = vunpack.c.h.bf16 %v560_v47 }
  0x60   :  { %304 = vst [vmem:[#allocation8 + $0x170] sm:$0xff] %v288_v48  ;;  %305 = vst [vmem:[#allocation8 + $0x178] sm:$0xff] %v289_v49  ;;  %v340_v60 = vmul.f32 %v508_v52, %v738_v0  ;;  %v341_v61 = vmul.f32 %v509_v53, %v738_v0  ;;  %v342_v62 = vmul.f32 %v512_v54, %v738_v0  ;;  %v520_v16 = vunpack.c.l.bf16 %v561_v1 }
  0x61   :  { %v343_v63 = vmul.f32 %v513_v55, %v738_v0  ;;  %v354_v2 = vadd.f32 %v740_v7, %v338_v56  ;;  %v355_v3 = vadd.f32 %v740_v7, %v339_v57  ;;  %v344_v4 = vmul.f32 %v516_v58, %v738_v0 }
  0x62   :  { %v345_v5 = vmul.f32 %v517_v59, %v738_v0  ;;  %v356_v9 = vadd.f32 %v740_v7, %v340_v60  ;;  %v357_v10 = vadd.f32 %v740_v7, %v341_v61  ;;  %v358_v11 = vadd.f32 %v740_v7, %v342_v62 }
  0x63   :  { %v359_v12 = vadd.f32 %v740_v7, %v343_v63  ;;  %370 = vst [vmem:[#allocation8 + $0x180] sm:$0xff] %v354_v2  ;;  %371 = vst [vmem:[#allocation8 + $0x188] sm:$0xff] %v355_v3  ;;  %v360_v14 = vadd.f32 %v740_v7, %v344_v4  ;;  %v521_v17 = vunpack.c.h.bf16 %v561_v1  ;;  %v524_v18 = vunpack.c.l.bf16 %v562_v6 }
  0x64   :  { %v361_v15 = vadd.f32 %v740_v7, %v345_v5  ;;  %372 = vst [vmem:[#allocation8 + $0x190] sm:$0xff] %v356_v9  ;;  %373 = vst [vmem:[#allocation8 + $0x198] sm:$0xff] %v357_v10  ;;  %v525_v19 = vunpack.c.h.bf16 %v562_v6  ;;  %v528_v20 = vunpack.c.l.bf16 %v563_v8  ;;  %v529_v21 = vunpack.c.h.bf16 %v563_v8 }
  0x65   :  { %374 = vst [vmem:[#allocation8 + $0x1a0] sm:$0xff] %v358_v11  ;;  %375 = vst [vmem:[#allocation8 + $0x1a8] sm:$0xff] %v359_v12  ;;  %v346_v22 = vmul.f32 %v520_v16, %v738_v0  ;;  %v347_v23 = vmul.f32 %v521_v17, %v738_v0  ;;  %v532_v24 = vunpack.c.l.bf16 %v564_v13  ;;  %v533_v25 = vunpack.c.h.bf16 %v564_v13 }
  0x66   :  { %376 = vst [vmem:[#allocation8 + $0x1b0] sm:$0xff] %v360_v14  ;;  %377 = vst [vmem:[#allocation8 + $0x1b8] sm:$0xff] %v361_v15  ;;  %v348_v26 = vmul.f32 %v524_v18, %v738_v0  ;;  %v349_v27 = vmul.f32 %v525_v19, %v738_v0  ;;  %v350_v28 = vmul.f32 %v528_v20, %v738_v0 }
  0x67   :  { %v351_v29 = vmul.f32 %v529_v21, %v738_v0  ;;  %v362_v30 = vadd.f32 %v740_v7, %v346_v22  ;;  %v363_v31 = vadd.f32 %v740_v7, %v347_v23  ;;  %v352_v32 = vmul.f32 %v532_v24, %v738_v0 }
  0x68   :  { %v353_v33 = vmul.f32 %v533_v25, %v738_v0  ;;  %v364_v34 = vadd.f32 %v740_v7, %v348_v26  ;;  %v365_v35 = vadd.f32 %v740_v7, %v349_v27  ;;  %v366_v36 = vadd.f32 %v740_v7, %v350_v28 }
  0x69   :  { %v367_v37 = vadd.f32 %v740_v7, %v351_v29  ;;  %378 = vst [vmem:[#allocation8 + $0x1c0] sm:$0xff] %v362_v30  ;;  %379 = vst [vmem:[#allocation8 + $0x1c8] sm:$0xff] %v363_v31  ;;  %v368_v38 = vadd.f32 %v740_v7, %v352_v32 }
  0x6a   :  { %v369_v39 = vadd.f32 %v740_v7, %v353_v33  ;;  %380 = vst [vmem:[#allocation8 + $0x1d0] sm:$0xff] %v364_v34  ;;  %381 = vst [vmem:[#allocation8 + $0x1d8] sm:$0xff] %v365_v35 }
  0x6b   :  { %382 = vst [vmem:[#allocation8 + $0x1e0] sm:$0xff] %v366_v36  ;;  %383 = vst [vmem:[#allocation8 + $0x1e8] sm:$0xff] %v367_v37 }
  0x6c   :  { %384 = vst [vmem:[#allocation8 + $0x1f0] sm:$0xff] %v368_v38  ;;  %385 = vst [vmem:[#allocation8 + $0x1f8] sm:$0xff] %v369_v39 }
  0x6d   :  { %650 = shalt.err (!%p647_p0)
}
  0x6e   :  { %s651_s27 = scalar_lea.hbm %s885_s3, 8192 }
  0x6f   :  { %p652_p1 = scmp.ne.s32.totalorder %s885_s3, %s651_s27  ;;  %p655_p2 = scmp.lt.u32.totalorder %s651_s27, %s885_s3 }
  0x71   :  { %p657_p3 = pnand %p655_p2, %p652_p1 }
  0x73   :  { %660 = shalt.err (!%p657_p3)
}
  0x74   :  { %s673_s5 = smov 128   ;;  %s674_s6 = smov 8  }
  0x75   :  { %397 = dma.vmem_to_hbm [thread:$0]  %s392_s23, 8192, %s885_s3, [#allocation4], %s673_s5, %s673_s5, %s674_s6  }
  0x76   :  { %665 = dma.done.wait [#allocation4], 8192  }
  0x77   :  { %666 = vsyncadd [#allocation4], 4294959104 }
  0x78   :  { %401 = vsyncpa [#allocation3], 1 }
  0x79   :  { %402 = vsyncpa [#allocation6], 1 }
  0x7a   :  { %403 = vsyncpa [#allocation4], 1 }

// kernel: convmixer_block_forward.4
= control target key start
LH: loop header
LB: loop body
LE: loop exit
PB: predicated region body
PF: predicated region fallthrough
CT: control target
= control target key end

     0   :  { %10 = vsyncpa [#allocation3], 0  ;;  %s3725_s0 = inlined_call_operand.hbm [shape: f32[2,16,16,128], index: 0, kind: input, shape index: {}]   ;;  %s3726_s1 = inlined_call_operand.hbm [shape: f32[3,3,128], index: 1, kind: input, shape index: {}]   ;;  %s3727_s2 = inlined_call_operand.hbm [shape: f32[1,128], index: 2, kind: input, shape index: {}]   ;;  %s3728_s3 = inlined_call_operand.hbm [shape: bf16[2,16,16,128], index: 3, kind: output, shape index: {0}]   ;;  %s3729_s4 = inlined_call_operand.hbm [shape: f32[2,2,128], index: 4, kind: output, shape index: {1}]  }
   0x1   :  { %12 = vsyncpa [#allocation3 + $0x1], 0 }
   0x2   :  { %13 = vsyncpa [#allocation6], 0 }
   0x3   :  { %14 = vsyncpa [#allocation4], 0 }
   0x4   :  { %16 = vsyncpa [#allocation4 + $0x1], 0 }
   0x5   :  { %17 = vsyncpa [#allocation10], 0 }
   0x6   :  { %19 = vsyncpa [#allocation10 + $0x1], 0  ;;  %s2607_s15 = smov 0   ;;  %s2609_s16 = smov 0  }
   0x7   :  { %s2611_s17 = smov 0   ;;  %s2613_s18 = smov 0  }
   0x8   :  { %s2615_s19 = smov 0   ;;  %s2617_s20 = smov 0  }
   0x9 LB: > { %s2006_s21 = sadd.s32 4294967295, %s2568_s20   ;;  %s2007_s22 = sadd.s32 4294967294, %s2568_s20   ;;  %s2568_s20 = sphi %s2617_s20, %s25_s20   ;;  %s2564_s19 = sphi %s2615_s19, %s3751_s19   ;;  %s2560_s18 = sphi %s2613_s18, %s3750_s18   ;;  %s2556_s17 = sphi %s2611_s17, %s3749_s17   ;;  %s2552_s16 = sphi %s2609_s16, %s3748_s16   ;;  %s2548_s15 = sphi %s2607_s15, %s3747_s15  }
   0xa   : > { %p59_p0 = scmp.ne.s32.totalorder %s2552_s16, %s2548_s15  ;;  %p2641_p1 = scmp.eq.s32.totalorder %s2006_s21, 0 }
   0xb   : > { %p2645_p2 = scmp.eq.s32.totalorder %s2006_s21, 1  ;;  %p143_p3 = scmp.eq.s32.totalorder %s2007_s22, 1 }
   0xc   : > { %s3734_s23 = scalar_select %p2641_p1, 1, 0 }
   0xd   : > { %p2651_p4 = por %p2641_p1, %p59_p0  ;;  %p2008_p5 = scmp.ge.s32.totalorder %s2568_s20, 1 }
   0xe   : > { %p2656_p6 = por %p143_p3, %p59_p0  ;;  %p178_p7 = scmp.lt.s32.totalorder %s2568_s20, 3 }
   0xf   : > { %s3736_s25 = scalar_select %p2651_p4, 1, 0 }
  0x10   : > { %s3737_s26 = scalar_select %p2656_p6, 1, 0 }
  0x11   : > { %p2661_p8 = pnand %p2008_p5, %p178_p7  ;;  %s2570_s28 = smov [#allocation5]  }
  0x12   : > { %s192_s29 = sshll.u32 %s2570_s28, 4  ;;  %s2571_s5 = smov [#allocation7]   ;;  %s2665_s29 = int_to_ptr.vmem [resolvable:$true] %s192_s29 }
  0x13   : > { %p2282_p9 = pneg %p2661_p8  ;;  %s208_s6 = sshll.u32 %s2571_s5, 4  ;;  %s2676_s6 = int_to_ptr.vmem [resolvable:$true] %s208_s6 }
  0x14   : > { %s2364_s9 = scalar_lea.hbm %s3726_s1, 192 }
  0x15   : > { %p2672_p11 = pnand %p2282_p9, %p2641_p1  ;;  %p2365_p12 = scmp.ne.s32.totalorder %s3726_s1, %s2364_s9 }
  0x16   : > { %p2371_p5 = scmp.lt.u32.totalorder %s2364_s9, %s3726_s1 }
  0x17   : > { %p2366_p13 = pneg %p2672_p11 }
  0x19   : > { %p2367_p0 = pnand %p2366_p13, %p2365_p12 }
  0x1b   : > { %p2368_p3 = pneg %p2367_p0 }
  0x1d   : > { %p2373_p7 = pnand %p2371_p5, %p2368_p3 }
  0x1f   : > { %2376 = shalt.err (!%p2373_p7)
}
  0x20   : > { %s2377_s14 = scalar_lea.vmem %s2665_s29, 192  ;;  %p2385_p1 = scmp.lt.s32.totalorder %s2665_s29, %s2665_s29 }
  0x21   : > { %p2378_p9 = scmp.ne.s32.totalorder %s2665_s29, %s2377_s14  ;;  %p2386_p12 = scmp.lt.s32.totalorder %s2377_s14, %s2377_s14 }
  0x23   : > { %p2380_p10 = pnand %p2378_p9, %p2366_p13  ;;  %p2387_p0 = por %p2386_p12, %p2385_p1 }
  0x25   : > { %p2381_p6 = pneg %p2380_p10 }
  0x27   : > { %p2388_p4 = pnand %p2387_p0, %p2381_p6 }
  0x29   : > { %2391 = shalt.err (!%p2388_p4)
}
  0x2a   : > { %s2572_s21 = smov 64   ;;  %s2573_s22 = smov 4  }
  0x2b   : > { %2285 = dma.hbm_to_vmem [thread:$0]  (!%p2672_p11), %s3726_s1, 192, %s2665_s29, [#allocation6], %s2572_s21, %s2572_s21, %s2573_s22  }
  0x2c   : > { %s2392_s9 = scalar_lea.hbm %s3727_s2, 16 }
  0x2d   : > { %p2393_p1 = scmp.ne.s32.totalorder %s3727_s2, %s2392_s9  ;;  %p2399_p10 = scmp.lt.u32.totalorder %s2392_s9, %s3727_s2 }
  0x2f   : > { %p2395_p4 = pnand %p2393_p1, %p2366_p13 }
  0x31   : > { %p2396_p6 = pneg %p2395_p4 }
  0x33   : > { %p2401_p3 = pnand %p2399_p10, %p2396_p6 }
  0x35   : > { %2404 = shalt.err (!%p2401_p3)
}
  0x36   : > { %s2405_s29 = scalar_lea.vmem %s2676_s6, 16  ;;  %s2412_s14 = scalar_lea.vmem %s2676_s6, 32 }
  0x37   : > { %p2406_p5 = scmp.ne.s32.totalorder %s2676_s6, %s2405_s29  ;;  %p2413_p12 = scmp.lt.s32.totalorder %s2676_s6, %s2676_s6 }
  0x38   : > { %p2414_p0 = scmp.lt.s32.totalorder %s2412_s14, %s2405_s29 }
  0x39   : > { %p2408_p7 = pnand %p2406_p5, %p2366_p13 }
  0x3a   : > { %p2415_p1 = por %p2414_p0, %p2413_p12 }
  0x3b   : > { %p2409_p9 = pneg %p2408_p7 }
  0x3d   : > { %p2416_p4 = pnand %p2415_p1, %p2409_p9 }
  0x3f   : > { %2419 = shalt.err (!%p2416_p4)
}
  0x40   : > { %2288 = dma.hbm_to_vmem [thread:$0]  (!%p2672_p11), %s3727_s2, 16, %s2676_s6, [#allocation6]  }
  0x41   : > { %s37_s28 = sadd.s32 1, %s2564_s19  ;;  %s46_s5 = sadd.s32 1, %s2556_s17 }
  0x42   : > { %p39_p13 = scmp.ge.s32.totalorder %s37_s28, 2  ;;  %p53_p6 = scmp.ne.s32.totalorder %s2556_s17, %s2552_s16 }
  0x43   : > { %p54_p10 = scmp.eq.s32.totalorder %s2568_s20, 0  ;;  %p2302_p3 = scmp.lt.s32.totalorder %s2568_s20, 2 }
  0x44   : > { %s3753_s28 = smov (%p39_p13, %s37_s28), 0  ;;  %p2741_p7 = por %p2645_p2, %p53_p6 }
  0x45   : > { %p55_p5 = por %p54_p10, %p53_p6  ;;  %s41_s7 = ssub.s32 %s2564_s19, %s3753_s28 }
  0x46   : > { %s3740_s30 = scalar_select %p2741_p7, 1, 0 }
  0x47   : > { %s219_s8 = sand.u32 1, %s2556_s17   ;;  %p44_p9 = scmp.eq.s32.totalorder %s41_s7, 0 }
  0x48   : > { %s2012_s6 = sshll.u32 %s219_s8, 8  ;;  %s2139_s9 = sshll.u32 %s2564_s19, 12 }
  0x49   : > { %s2750_s10 = scalar_select %p44_p9, %s2556_s17, %s46_s5  }
  0x4a   : > { %s2755_s13 = scalar_lea.hbm %s3725_s0, %s2139_s9  ;;  %s223_s24 = scalar_lea.vmem [#allocation2], %s2012_s6 }
  0x4b   : > { %s231_s29 = sshll.u32 %s223_s24, 4  ;;  %p2759_p2 = pnand %p2302_p3, %p55_p5  ;;  %s2763_s29 = int_to_ptr.vmem [resolvable:$true] %s231_s29 }
  0x4c   : > { %s2765_s21 = scalar_lea.sflag [#allocation3], %s219_s8  ;;  %s2420_s22 = scalar_lea.hbm %s2755_s13, 4096 }
  0x4d   : > { %p2421_p11 = scmp.ne.s32.totalorder %s2755_s13, %s2420_s22  ;;  %p2422_p12 = pneg %p2759_p2 }
  0x4e   : > { %s2425_s6 = scalar_lea.hbm %s3725_s0, 8192  ;;  %p2426_p4 = scmp.lt.u32.totalorder %s2755_s13, %s3725_s0 }
  0x4f   : > { %p2423_p0 = pnand %p2422_p12, %p2421_p11  ;;  %p2427_p13 = scmp.lt.u32.totalorder %s2425_s6, %s2420_s22 }
  0x50   : > { %p2429_p10 = scmp.lt.u32.totalorder %s2420_s22, %s2755_s13 }
  0x51   : > { %p2424_p1 = pneg %p2423_p0  ;;  %p2428_p6 = por %p2427_p13, %p2426_p4 }
  0x53   : > { %p2430_p3 = por %p2429_p10, %p2428_p6 }
  0x55   : > { %p2431_p5 = pnand %p2430_p3, %p2424_p1 }
  0x57   : > { %2434 = shalt.err (!%p2431_p5)
}
  0x58   : > { %s2435_s8 = scalar_lea.vmem %s2763_s29, 4096  ;;  %s2574_s12 = smov [#allocation2]  }
  0x59   : > { %p2436_p9 = scmp.ne.s32.totalorder %s2763_s29, %s2435_s8  ;;  %s2440_s24 = sshll.u32 %s2574_s12, 4  ;;  %s2441_s24 = int_to_ptr.vmem [resolvable:$false] %s2440_s24 }
  0x5a   : > { %s2442_s5 = scalar_lea.vmem %s2441_s24, 8192  ;;  %p2443_p7 = scmp.lt.s32.totalorder %s2763_s29, %s2441_s24 }
  0x5b   : > { %p2438_p11 = pnand %p2436_p9, %p2422_p12  ;;  %p2444_p4 = scmp.lt.s32.totalorder %s2442_s5, %s2435_s8 }
  0x5d   : > { %p2439_p0 = pneg %p2438_p11  ;;  %p2445_p13 = por %p2444_p4, %p2443_p7 }
  0x5f   : > { %p2446_p6 = pnand %p2445_p13, %p2439_p0 }
  0x61   : > { %2449 = shalt.err (!%p2446_p6)
}
  0x62   : > { %s2575_s22 = smov 128   ;;  %s2576_s7 = smov 8  }
  0x63   : > { %2292 = dma.hbm_to_vmem [thread:$0]  (!%p2759_p2), %s2755_s13, 4096, %s2763_s29, %s2765_s21, %s2575_s22, %s2575_s22, %s2576_s7  }
  0x64   : > { %243 = sbr.rel (%p2661_p8) target bundleno = 370 (0x172), region = 32  ;;  %s2796_s6 = sand.u32 (!%p2661_p8), 1, %s2552_s16  }
  0x65   : > { %s2016_s9 = sshll.u32 (!%p2661_p8), %s2796_s6, 8  ;;  %s246_s11 = scalar_lea.sflag (!%p2661_p8), [#allocation3], %s2796_s6 }
  0x66   : > { %s2800_s8 = scalar_lea.vmem (!%p2661_p8), [#allocation2], %s2016_s9  ;;  %p3742_p7 = scmp.ne.s32.totalorder (!%p2661_p8), %s3736_s25, 0 }
  0x6b   : > { %2531 = dma.done.wait (%p3742_p7), %s246_s11, 4096  }
  0x6c   : > { %2533 = vsyncadd (%p3742_p7), %s246_s11, 4294963200  ;;  %p3743_p2 = scmp.ne.s32.totalorder %s3734_s23, 0 }
  0x6e   : > { %2535 = dma.done.wait (%p3743_p2), [#allocation6], 208  }
  0x6f   : > { %2537 = vsyncadd (%p3743_p2), [#allocation6], 4294967088  ;;  %v368_v0 = vlaneseq  ;;  %vm320_vm0 = vcmask 1040384   ;;  %v2577_v2 = vmov 0.0   ;;  %vm423_vm1 = vcmask 1046528   ;;  %v2823_v12 = vld [vmem:[%s2800_s8] sm:$0xff] }
  0x70   : > { %v2810_v3 = vrot.slane %v2577_v2, 7  ;;  %v2812_v4 = vrot.slane %v2577_v2, 1  ;;  %v287_v8 = vld [vmem:[#allocation5] sm:$0x7]  ;;  %v288_v9 = vld [vmem:[#allocation5 + $0x4] sm:$0x7] }
  0x71   : > { %v369_v1 = vshrl.u32 %v368_v0, 7  ;;  %v2826_v13 = vld [vmem:[%s2800_s8 + $0x8] sm:$0xff]  ;;  %v323_v18 = vrot.slane %v2823_v12, 7  ;;  %v426_v20 = vrot.slane %v2823_v12, 1  ;;  %v2854_v35 = vld [vmem:[%s2800_s8 + $0x10] sm:$0xff]  ;;  %v2857_v36 = vld [vmem:[%s2800_s8 + $0x18] sm:$0xff] }
  0x72   : > { %v2816_v10 = vsel %vm320_vm0, 0.0, %v2810_v3  ;;  %v2820_v11 = vsel %vm423_vm1, %v2812_v4, 0.0  ;;  %v324_v19 = vrot.slane %v2826_v13, 7  ;;  %v427_v21 = vrot.slane %v2826_v13, 1  ;;  %v289_v30 = vld [vmem:[#allocation5 + $0x8] sm:$0x7] }
  0x73   : > { %v370_v5 = vsub.s32 0, %v369_v1  ;;  %v390_v6 = vsub.s32 1, %v369_v1  ;;  %v473_v7 = vsub.s32 2, %v369_v1  ;;  %v361_v27 = vsel %vm320_vm0, 0.0, %v323_v18  ;;  %s2019_s23 = sshll.u32 %s2796_s6, 7  ;;  %s2172_s27 = sshll.u32 %s2560_s18, 11 }
  0x74   : > { %v325_v26 = vsel %vm320_vm0, %v323_v18, %v324_v19  ;;  %v428_v28 = vsel %vm423_vm1, %v426_v20, %v427_v21  ;;  %v464_v29 = vsel %vm423_vm1, %v427_v21, 0.0  ;;  %v664_v46 = vrot.slane %v2854_v35, 7  ;;  %s2945_s25 = scalar_lea.vmem [#allocation8], %s2019_s23  ;;  %s3641_s21 = scalar_lea.hbm %s3728_s3, %s2172_s27 }
  0x75   : > { %v2828_v14 = vrot.slane %v287_v8, %v370_v5  ;;  %v2830_v15 = vrot.slane %v287_v8, %v390_v6  ;;  %v2832_v16 = vrot.slane %v287_v8, %v473_v7  ;;  %v2834_v17 = vrot.slane %v288_v9, %v370_v5  ;;  %s1851_s13 = sshll.u32 %s2945_s25, 4  ;;  %s1832_s12 = scalar_lea.sflag [#allocation4], %s2796_s6  ;;  %s3643_s13 = int_to_ptr.vmem [resolvable:$true] %s1851_s13 }
  0x76   : > { %v2865_v43 = vrot.slane %v288_v9, %v390_v6  ;;  %v2867_v44 = vrot.slane %v288_v9, %v473_v7  ;;  %v665_v47 = vrot.slane %v2857_v36, 7  ;;  %v2871_v48 = vrot.slane %v289_v30, %v370_v5  ;;  %s2450_s24 = scalar_lea.vmem %s3643_s13, 2048  ;;  %p3744_p12 = scmp.ne.s32.totalorder %s3740_s30, 0 }
  0x77   : > { %v372_v22 = vmul.f32 %v2828_v14, %v2816_v10  ;;  %v373_v23 = vmul.f32 %v2828_v14, %v2810_v3  ;;  %v392_v24 = vmul.f32 0.0, %v2830_v15  ;;  %v475_v25 = vmul.f32 %v2832_v16, %v2812_v4  ;;  %p2451_p8 = scmp.ne.s32.totalorder %s3643_s13, %s2450_s24  ;;  %s2578_s5 = smov [#allocation8]  }
  0x78   : > { %v374_v31 = vmul.f32 %v2828_v14, %v361_v27  ;;  %v375_v32 = vmul.f32 %v2828_v14, %v325_v26  ;;  %v476_v37 = vmul.f32 %v2832_v16, %v2820_v11  ;;  %v477_v38 = vmul.f32 %v2832_v16, %v428_v28  ;;  %s2454_s22 = sshll.u32 %s2578_s5, 4  ;;  %s2455_s22 = int_to_ptr.vmem [resolvable:$false] %s2454_s22 }
  0x79   : > { %v407_v33 = vadd.f32 %v392_v24, %v372_v22  ;;  %v408_v34 = vadd.f32 %v392_v24, %v373_v23  ;;  %v478_v39 = vmul.f32 %v2832_v16, %v464_v29  ;;  %v521_v40 = vmul.f32 %v2834_v17, %v361_v27  ;;  %p2452_p1 = pnand %p2451_p8, %p3744_p12  ;;  %s2456_s7 = scalar_lea.vmem %s2455_s22, 4096 }
  0x7a   : > { %v522_v42 = vmul.f32 %v2834_v17, %v325_v26  ;;  %v557_v50 = vmul.f32 %v2865_v43, %v2823_v12  ;;  %v558_v51 = vmul.f32 %v2865_v43, %v2826_v13  ;;  %v599_v52 = vmul.f32 %v2867_v44, %v428_v28  ;;  %p2457_p3 = scmp.lt.s32.totalorder %s3643_s13, %s2455_s22  ;;  %p2458_p5 = scmp.lt.s32.totalorder %s2456_s7, %s2450_s24 }
  0x7b   : > { %v491_v41 = vadd.f32 %v475_v25, %v407_v33  ;;  %v492_v45 = vadd.f32 %v476_v37, %v408_v34  ;;  %v600_v54 = vmul.f32 %v2867_v44, %v464_v29  ;;  %v666_v55 = vsel %vm320_vm0, %v664_v46, %v665_v47  ;;  %v2914_v33 = vld [vmem:[%s2800_s8 + $0x20] sm:$0xff]  ;;  %v2917_v34 = vld [vmem:[%s2800_s8 + $0x28] sm:$0xff]  ;;  %p2453_p10 = pneg %p2452_p1 }
  0x7c   : > { %v704_v56 = vsel %vm320_vm0, 0.0, %v664_v46  ;;  %v717_v59 = vmul.f32 %v2871_v48, %v666_v55  ;;  %v2883_v60 = vrot.slane %v289_v30, %v390_v6  ;;  %v784_v62 = vrot.slane %v2854_v35, 1  ;;  %p2459_p9 = por %p2458_p5, %p2457_p3 }
  0x7d   : > { %v537_v49 = vadd.f32 %v521_v40, %v491_v41  ;;  %v538_v53 = vadd.f32 %v522_v42, %v492_v45  ;;  %v716_v58 = vmul.f32 %v2871_v48, %v704_v56  ;;  %v785_v63 = vrot.slane %v2857_v36, 1 }
  0x7e   : > { %v2887_v0 = vrot.slane %v289_v30, %v473_v7  ;;  %v752_v2 = vmul.f32 %v2854_v35, %v2883_v60  ;;  %v753_v5 = vmul.f32 %v2857_v36, %v2883_v60  ;;  %v2894_v8 = vmul.f32 %v704_v56, %v2828_v14  ;;  %p2460_p11 = pnand %p2459_p9, %p2453_p10 }
  0x7f   : > { %v573_v57 = vadd.f32 %v557_v50, %v537_v49  ;;  %v574_v61 = vadd.f32 %v558_v51, %v538_v53  ;;  %v786_v6 = vsel %vm423_vm1, %v784_v62, %v785_v63  ;;  %v824_v18 = vsel %vm423_vm1, %v785_v63, 0.0 }
  0x80   : > { %v2899_v7 = vmul.f32 %v666_v55, %v2828_v14  ;;  %v836_v20 = vmul.f32 %v2887_v0, %v786_v6  ;;  %v837_v21 = vmul.f32 %v2887_v0, %v824_v18  ;;  %v393_v22 = vmul.f32 %v2830_v15, %v2823_v12  ;;  %v2919_v12 = vld [vmem:[#allocation7] ss:$0 sm:$0xff] }
  0x81   : > { %v615_v1 = vadd.f32 %v599_v52, %v573_v57  ;;  %v616_v9 = vadd.f32 %v600_v54, %v574_v61  ;;  %v394_v24 = vmul.f32 %v2830_v15, %v2826_v13  ;;  %v479_v25 = vmul.f32 %v786_v6, %v2832_v16 }
  0x82   : > { %v2909_v26 = vmul.f32 %v824_v18, %v2832_v16  ;;  %v409_v28 = vadd.f32 %v393_v22, %v374_v31  ;;  %v523_v29 = vmul.f32 %v704_v56, %v2834_v17  ;;  %v524_v30 = vmul.f32 %v666_v55, %v2834_v17 }
  0x83   : > { %v732_v19 = vadd.f32 %v716_v58, %v615_v1  ;;  %v733_v23 = vadd.f32 %v717_v59, %v616_v9  ;;  %v410_v13 = vadd.f32 %v394_v24, %v375_v32  ;;  %v559_v40 = vmul.f32 %v2854_v35, %v2865_v43 }
  0x84   : > { %v560_v41 = vmul.f32 %v2857_v36, %v2865_v43  ;;  %v493_v31 = vadd.f32 %v477_v38, %v409_v28  ;;  %v601_v45 = vmul.f32 %v786_v6, %v2867_v44  ;;  %v602_v46 = vmul.f32 %v824_v18, %v2867_v44 }
  0x85   : > { %v768_v27 = vadd.f32 %v752_v2, %v732_v19  ;;  %v769_v37 = vadd.f32 %v753_v5, %v733_v23  ;;  %v494_v49 = vadd.f32 %v478_v39, %v410_v13  ;;  %v667_v50 = vrot.slane %v2914_v33, 7 }
  0x86   : > { %v668_v51 = vrot.slane %v2917_v34, 7  ;;  %v539_v52 = vadd.f32 %v523_v29, %v493_v31  ;;  %v754_v53 = vmul.f32 %v2914_v33, %v2883_v60  ;;  %v755_v38 = vmul.f32 %v2917_v34, %v2883_v60 }
  0x87   : > { %v852_v42 = vadd.f32 %v836_v20, %v768_v27  ;;  %v853_v47 = vadd.f32 %v837_v21, %v769_v37  ;;  %v540_v55 = vadd.f32 %v524_v30, %v494_v49  ;;  %v705_v39 = vsel %vm320_vm0, 0.0, %v667_v50  ;;  %v2971_v49 = vld [vmem:[%s2800_s8 + $0x38] sm:$0xff] }
  0x88   : > { %v669_v56 = vsel %vm320_vm0, %v667_v50, %v668_v51  ;;  %v575_v58 = vadd.f32 %v559_v40, %v539_v52  ;;  %v718_v59 = vmul.f32 %v2871_v48, %v705_v39  ;;  %v787_v9 = vrot.slane %v2914_v33, 1 }
  0x89   : > { %v874_v32 = vadd.f32 %v2919_v12, %v852_v42  ;;  %v875_v54 = vadd.f32 %v2919_v12, %v853_v47  ;;  %v719_v61 = vmul.f32 %v2871_v48, %v669_v56  ;;  %v576_v2 = vadd.f32 %v560_v41, %v540_v55  ;;  %v2968_v47 = vld [vmem:[%s2800_s8 + $0x30] sm:$0xff] }
  0x8a   : > { %v617_v5 = vadd.f32 %v601_v45, %v575_v58  ;;  %v788_v6 = vrot.slane %v2917_v34, 1  ;;  %v2943_v18 = vmul.f32 %v705_v39, %v2828_v14  ;;  %v2949_v21 = vmul.f32 %v669_v56, %v2828_v14 }
  0x8b   : > { %v992_v57 = vmul.f32 %v874_v32, %v874_v32  ;;  %v2176_v62 = vpack.c.bf16 %v875_v54, %v874_v32  ;;  %v970_v63 = vadd.f32 %v875_v54, %v874_v32  ;;  %v993_v1 = vmul.f32 %v875_v54, %v875_v54 }
  0x8c   : > { %v618_v20 = vadd.f32 %v602_v46, %v576_v2  ;;  %v395_v22 = vmul.f32 %v2854_v35, %v2830_v15  ;;  %v734_v23 = vadd.f32 %v718_v59, %v617_v5  ;;  %v789_v24 = vsel %vm423_vm1, %v787_v9, %v788_v6 }
  0x8d   : > { %2177 = vst [vmem:[%s2945_s25] sm:$0xff] %v2176_v62   ;;  %v1008_v19 = vadd.f32 %v993_v1, %v992_v57  ;;  %v825_v27 = vsel %vm423_vm1, %v788_v6, 0.0  ;;  %v396_v28 = vmul.f32 %v2857_v36, %v2830_v15  ;;  %v838_v30 = vmul.f32 %v2887_v0, %v789_v24 }
  0x8e   : > { %v735_v29 = vadd.f32 %v719_v61, %v618_v20  ;;  %v839_v37 = vmul.f32 %v2887_v0, %v825_v27  ;;  %v411_v13 = vadd.f32 %v395_v22, %v2894_v8  ;;  %v770_v40 = vadd.f32 %v754_v53, %v734_v23 }
  0x8f   : > { %v412_v35 = vadd.f32 %v396_v28, %v2899_v7  ;;  %v481_v41 = vmul.f32 %v789_v24, %v2832_v16  ;;  %v2963_v42 = vmul.f32 %v825_v27, %v2832_v16  ;;  %v525_v46 = vmul.f32 %v705_v39, %v2834_v17 }
  0x90   : > { %v771_v31 = vadd.f32 %v755_v38, %v735_v29  ;;  %v495_v45 = vadd.f32 %v479_v25, %v411_v13  ;;  %v526_v36 = vmul.f32 %v669_v56, %v2834_v17  ;;  %v854_v50 = vadd.f32 %v838_v30, %v770_v40 }
  0x91   : > { %v496_v8 = vadd.f32 %v2909_v26, %v412_v35  ;;  %v561_v7 = vmul.f32 %v2914_v33, %v2865_v43  ;;  %v562_v51 = vmul.f32 %v2917_v34, %v2865_v43  ;;  %v603_v25 = vmul.f32 %v789_v24, %v2867_v44 }
  0x92   : > { %v855_v32 = vadd.f32 %v839_v37, %v771_v31  ;;  %v541_v52 = vadd.f32 %v525_v46, %v495_v45  ;;  %v604_v53 = vmul.f32 %v825_v27, %v2867_v44  ;;  %v876_v38 = vadd.f32 %v2919_v12, %v854_v50 }
  0x93   : > { %v542_v54 = vadd.f32 %v526_v36, %v496_v8  ;;  %v670_v55 = vrot.slane %v2968_v47, 7  ;;  %v671_v56 = vrot.slane %v2971_v49, 7  ;;  %v756_v57 = vmul.f32 %v2968_v47, %v2883_v60 }
  0x94   : > { %v877_v26 = vadd.f32 %v2919_v12, %v855_v32  ;;  %v577_v39 = vadd.f32 %v561_v7, %v541_v52  ;;  %v757_v58 = vmul.f32 %v2971_v49, %v2883_v60  ;;  %v971_v59 = vadd.f32 %v970_v63, %v876_v38 }
  0x95   : > { %v994_v61 = vmul.f32 %v876_v38, %v876_v38  ;;  %v578_v62 = vadd.f32 %v562_v51, %v542_v54  ;;  %v672_v1 = vsel %vm320_vm0, %v670_v55, %v671_v56  ;;  %v706_v6 = vsel %vm320_vm0, 0.0, %v670_v55  ;;  %v3023_v54 = vld [vmem:[%s2800_s8 + $0x48] sm:$0xff] }
  0x96   : > { %v2181_v2 = vpack.c.bf16 %v877_v26, %v876_v38  ;;  %v995_v5 = vmul.f32 %v877_v26, %v877_v26  ;;  %v619_v9 = vadd.f32 %v603_v25, %v577_v39  ;;  %v972_v20 = vadd.f32 %v971_v59, %v877_v26  ;;  %v3020_v38 = vld [vmem:[%s2800_s8 + $0x40] sm:$0xff] }
  0x97   : > { %v1009_v22 = vadd.f32 %v1008_v19, %v994_v61  ;;  %v620_v23 = vadd.f32 %v604_v53, %v578_v62  ;;  %v720_v24 = vmul.f32 %v2871_v48, %v706_v6  ;;  %v721_v27 = vmul.f32 %v2871_v48, %v672_v1 }
  0x98   : > { %2253 = vst [vmem:[%s2945_s25 + $0x8] sm:$0xff] %v2181_v2   ;;  %v790_v28 = vrot.slane %v2968_v47, 1  ;;  %v791_v63 = vrot.slane %v2971_v49, 1  ;;  %v2996_v29 = vmul.f32 %v706_v6, %v2828_v14  ;;  %v2999_v13 = vmul.f32 %v672_v1, %v2828_v14 }
  0x99   : > { %v1010_v30 = vadd.f32 %v1009_v22, %v995_v5  ;;  %v736_v37 = vadd.f32 %v720_v24, %v619_v9  ;;  %v397_v19 = vmul.f32 %v2914_v33, %v2830_v15  ;;  %v737_v40 = vadd.f32 %v721_v27, %v620_v23 }
  0x9a   : > { %v792_v35 = vsel %vm423_vm1, %v790_v28, %v791_v63  ;;  %v826_v31 = vsel %vm423_vm1, %v791_v63, 0.0  ;;  %v398_v45 = vmul.f32 %v2917_v34, %v2830_v15  ;;  %v527_v34 = vmul.f32 %v706_v6, %v2834_v17 }
  0x9b   : > { %v772_v46 = vadd.f32 %v756_v57, %v736_v37  ;;  %v840_v36 = vmul.f32 %v2887_v0, %v792_v35  ;;  %v841_v50 = vmul.f32 %v2887_v0, %v826_v31  ;;  %v413_v8 = vadd.f32 %v397_v19, %v2943_v18 }
  0x9c   : > { %v773_v7 = vadd.f32 %v757_v58, %v737_v40  ;;  %v414_v33 = vadd.f32 %v398_v45, %v2949_v21  ;;  %v3012_v51 = vmul.f32 %v792_v35, %v2832_v16  ;;  %v3015_v32 = vmul.f32 %v826_v31, %v2832_v16 }
  0x9d   : > { %v856_v52 = vadd.f32 %v840_v36, %v772_v46  ;;  %v497_v25 = vadd.f32 %v481_v41, %v413_v8  ;;  %v528_v53 = vmul.f32 %v672_v1, %v2834_v17  ;;  %v563_v21 = vmul.f32 %v2968_v47, %v2865_v43 }
  0x9e   : > { %v857_v18 = vadd.f32 %v841_v50, %v773_v7  ;;  %v498_v55 = vadd.f32 %v2963_v42, %v414_v33  ;;  %v564_v56 = vmul.f32 %v2971_v49, %v2865_v43  ;;  %v605_v39 = vmul.f32 %v792_v35, %v2867_v44 }
  0x9f   : > { %v878_v26 = vadd.f32 %v2919_v12, %v856_v52  ;;  %v543_v41 = vadd.f32 %v527_v34, %v497_v25  ;;  %v606_v57 = vmul.f32 %v826_v31, %v2867_v44  ;;  %v673_v61 = vrot.slane %v3020_v38, 7 }
  0xa0   : > { %v879_v58 = vadd.f32 %v2919_v12, %v857_v18  ;;  %v544_v59 = vadd.f32 %v528_v53, %v498_v55  ;;  %v674_v42 = vrot.slane %v3023_v54, 7  ;;  %v758_v5 = vmul.f32 %v3020_v38, %v2883_v60 }
  0xa1   : > { %v973_v62 = vadd.f32 %v972_v20, %v878_v26  ;;  %v996_v1 = vmul.f32 %v878_v26, %v878_v26  ;;  %v579_v2 = vadd.f32 %v563_v21, %v543_v41  ;;  %v707_v63 = vsel %vm320_vm0, 0.0, %v673_v61  ;;  %v3071_v41 = vld [vmem:[%s2800_s8 + $0x50] sm:$0xff] }
  0xa2   : > { %v2186_v9 = vpack.c.bf16 %v879_v58, %v878_v26  ;;  %v997_v6 = vmul.f32 %v879_v58, %v879_v58  ;;  %v580_v22 = vadd.f32 %v564_v56, %v544_v59  ;;  %v675_v23 = vsel %vm320_vm0, %v673_v61, %v674_v42  ;;  %v3077_v59 = vld [vmem:[%s2800_s8 + $0x58] sm:$0xff] }
  0xa3   : > { %v974_v24 = vadd.f32 %v973_v62, %v879_v58  ;;  %v1011_v27 = vadd.f32 %v1010_v30, %v996_v1  ;;  %v621_v28 = vadd.f32 %v605_v39, %v579_v2  ;;  %v722_v19 = vmul.f32 %v2871_v48, %v707_v63 }
  0xa4   : > { %2254 = vst [vmem:[%s2945_s25 + $0x10] sm:$0xff] %v2186_v9   ;;  %v622_v37 = vadd.f32 %v606_v57, %v580_v22  ;;  %v723_v20 = vmul.f32 %v2871_v48, %v675_v23  ;;  %v759_v40 = vmul.f32 %v3023_v54, %v2883_v60  ;;  %v793_v31 = vrot.slane %v3020_v38, 1 }
  0xa5   : > { %v1012_v35 = vadd.f32 %v1011_v27, %v997_v6  ;;  %v794_v45 = vrot.slane %v3023_v54, 1  ;;  %v3048_v46 = vmul.f32 %v707_v63, %v2828_v14  ;;  %v738_v30 = vadd.f32 %v722_v19, %v621_v28 }
  0xa6   : > { %v739_v36 = vadd.f32 %v723_v20, %v622_v37  ;;  %v3051_v50 = vmul.f32 %v675_v23, %v2828_v14  ;;  %v399_v8 = vmul.f32 %v2968_v47, %v2830_v15  ;;  %v400_v52 = vmul.f32 %v2971_v49, %v2830_v15 }
  0xa7   : > { %v795_v7 = vsel %vm423_vm1, %v793_v31, %v794_v45  ;;  %v827_v33 = vsel %vm423_vm1, %v794_v45, 0.0  ;;  %v529_v25 = vmul.f32 %v707_v63, %v2834_v17  ;;  %v774_v34 = vadd.f32 %v758_v5, %v738_v30 }
  0xa8   : > { %v775_v53 = vadd.f32 %v759_v40, %v739_v36  ;;  %v842_v18 = vmul.f32 %v2887_v0, %v795_v7  ;;  %v843_v55 = vmul.f32 %v2887_v0, %v827_v33  ;;  %v415_v21 = vadd.f32 %v399_v8, %v2996_v29 }
  0xa9   : > { %v416_v47 = vadd.f32 %v400_v52, %v2999_v13  ;;  %v3065_v56 = vmul.f32 %v795_v7, %v2832_v16  ;;  %v3068_v26 = vmul.f32 %v827_v33, %v2832_v16  ;;  %v530_v57 = vmul.f32 %v675_v23, %v2834_v17 }
  0xaa   : > { %v858_v49 = vadd.f32 %v842_v18, %v774_v34  ;;  %v859_v39 = vadd.f32 %v843_v55, %v775_v53  ;;  %v565_v58 = vmul.f32 %v3020_v38, %v2865_v43  ;;  %v499_v29 = vadd.f32 %v3012_v51, %v415_v21 }
  0xab   : > { %v500_v13 = vadd.f32 %v3015_v32, %v416_v47  ;;  %v566_v61 = vmul.f32 %v3023_v54, %v2865_v43  ;;  %v607_v42 = vmul.f32 %v795_v7, %v2867_v44  ;;  %v608_v2 = vmul.f32 %v827_v33, %v2867_v44 }
  0xac   : > { %v880_v62 = vadd.f32 %v2919_v12, %v858_v49  ;;  %v881_v1 = vadd.f32 %v2919_v12, %v859_v39  ;;  %v676_v5 = vrot.slane %v3071_v41, 7  ;;  %v545_v9 = vadd.f32 %v529_v25, %v499_v29 }
  0xad   : > { %v546_v6 = vadd.f32 %v530_v57, %v500_v13  ;;  %v677_v51 = vrot.slane %v3077_v59, 7  ;;  %v760_v32 = vmul.f32 %v3071_v41, %v2883_v60  ;;  %v796_v7 = vrot.slane %v3071_v41, 1 }
  0xae   : > { %v2191_v22 = vpack.c.bf16 %v881_v1, %v880_v62  ;;  %v975_v23 = vadd.f32 %v974_v24, %v880_v62  ;;  %v998_v27 = vmul.f32 %v880_v62, %v880_v62  ;;  %v999_v28 = vmul.f32 %v881_v1, %v881_v1  ;;  %v3121_v62 = vld [vmem:[%s2800_s8 + $0x60] sm:$0xff] }
  0xaf   : > { %v581_v63 = vadd.f32 %v565_v58, %v545_v9  ;;  %v582_v37 = vadd.f32 %v566_v61, %v546_v6  ;;  %v678_v19 = vsel %vm320_vm0, %v676_v5, %v677_v51  ;;  %v708_v20 = vsel %vm320_vm0, 0.0, %v676_v5 }
  0xb0   : > { %2255 = vst [vmem:[%s2945_s25 + $0x18] sm:$0xff] %v2191_v22   ;;  %v976_v40 = vadd.f32 %v975_v23, %v881_v1  ;;  %v1013_v31 = vadd.f32 %v1012_v35, %v998_v27  ;;  %v724_v45 = vmul.f32 %v2871_v48, %v708_v20  ;;  %v725_v30 = vmul.f32 %v2871_v48, %v678_v19  ;;  %v3124_v1 = vld [vmem:[%s2800_s8 + $0x68] sm:$0xff] }
  0xb1   : > { %v623_v36 = vadd.f32 %v607_v42, %v581_v63  ;;  %v624_v8 = vadd.f32 %v608_v2, %v582_v37  ;;  %v761_v24 = vmul.f32 %v3077_v59, %v2883_v60  ;;  %v797_v52 = vrot.slane %v3077_v59, 1 }
  0xb2   : > { %v1014_v33 = vadd.f32 %v1013_v31, %v999_v28  ;;  %v3101_v25 = vmul.f32 %v708_v20, %v2828_v14  ;;  %v3104_v34 = vmul.f32 %v678_v19, %v2828_v14  ;;  %v401_v18 = vmul.f32 %v3020_v38, %v2830_v15 }
  0xb3   : > { %v740_v35 = vadd.f32 %v724_v45, %v623_v36  ;;  %v741_v53 = vadd.f32 %v725_v30, %v624_v8  ;;  %v402_v55 = vmul.f32 %v3023_v54, %v2830_v15  ;;  %v798_v21 = vsel %vm423_vm1, %v796_v7, %v797_v52 }
  0xb4   : > { %v828_v47 = vsel %vm423_vm1, %v797_v52, 0.0  ;;  %v531_v49 = vmul.f32 %v708_v20, %v2834_v17  ;;  %v532_v39 = vmul.f32 %v678_v19, %v2834_v17  ;;  %v844_v29 = vmul.f32 %v2887_v0, %v798_v21 }
  0xb5   : > { %v776_v57 = vadd.f32 %v760_v32, %v740_v35  ;;  %v777_v58 = vadd.f32 %v761_v24, %v741_v53  ;;  %v845_v13 = vmul.f32 %v2887_v0, %v828_v47  ;;  %v417_v61 = vadd.f32 %v401_v18, %v3048_v46 }
  0xb6   : > { %v418_v38 = vadd.f32 %v402_v55, %v3051_v50  ;;  %v487_v54 = vmul.f32 %v798_v21, %v2832_v16  ;;  %v488_v42 = vmul.f32 %v828_v47, %v2832_v16  ;;  %v567_v9 = vmul.f32 %v3071_v41, %v2865_v43 }
  0xb7   : > { %v860_v2 = vadd.f32 %v844_v29, %v776_v57  ;;  %v861_v5 = vadd.f32 %v845_v13, %v777_v58  ;;  %v568_v6 = vmul.f32 %v3077_v59, %v2865_v43  ;;  %v501_v46 = vadd.f32 %v3065_v56, %v417_v61 }
  0xb8   : > { %v502_v50 = vadd.f32 %v3068_v26, %v418_v38  ;;  %v609_v51 = vmul.f32 %v798_v21, %v2867_v44  ;;  %v610_v32 = vmul.f32 %v828_v47, %v2867_v44  ;;  %v679_v27 = vrot.slane %v3121_v62, 7 }
  0xb9   : > { %v882_v22 = vadd.f32 %v2919_v12, %v860_v2  ;;  %v883_v23 = vadd.f32 %v2919_v12, %v861_v5  ;;  %v680_v28 = vrot.slane %v3124_v1, 7  ;;  %v547_v63 = vadd.f32 %v531_v49, %v501_v46 }
  0xba   : > { %v548_v37 = vadd.f32 %v532_v39, %v502_v50  ;;  %v762_v56 = vmul.f32 %v3121_v62, %v2883_v60  ;;  %v763_v26 = vmul.f32 %v3124_v1, %v2883_v60  ;;  %v709_v24 = vsel %vm320_vm0, 0.0, %v679_v27 }
  0xbb   : > { %v2196_v19 = vpack.c.bf16 %v883_v23, %v882_v22  ;;  %v977_v20 = vadd.f32 %v976_v40, %v882_v22  ;;  %v1000_v31 = vmul.f32 %v882_v22, %v882_v22  ;;  %v1001_v45 = vmul.f32 %v883_v23, %v883_v23 }
  0xbc   : > { %v583_v30 = vadd.f32 %v567_v9, %v547_v63  ;;  %v584_v36 = vadd.f32 %v568_v6, %v548_v37  ;;  %v681_v8 = vsel %vm320_vm0, %v679_v27, %v680_v28  ;;  %v726_v35 = vmul.f32 %v2871_v48, %v709_v24  ;;  %v3171_v27 = vld [vmem:[%s2800_s8 + $0x78] sm:$0xff] }
  0xbd   : > { %2256 = vst [vmem:[%s2945_s25 + $0x20] sm:$0xff] %v2196_v19   ;;  %v978_v7 = vadd.f32 %v977_v20, %v883_v23  ;;  %v1015_v52 = vadd.f32 %v1014_v33, %v1000_v31  ;;  %v727_v53 = vmul.f32 %v2871_v48, %v681_v8  ;;  %v799_v21 = vrot.slane %v3121_v62, 1  ;;  %v3168_v23 = vld [vmem:[%s2800_s8 + $0x70] sm:$0xff] }
  0xbe   : > { %v625_v18 = vadd.f32 %v609_v51, %v583_v30  ;;  %v626_v55 = vadd.f32 %v610_v32, %v584_v36  ;;  %v800_v40 = vrot.slane %v3124_v1, 1  ;;  %v386_v49 = vmul.f32 %v709_v24, %v2828_v14 }
  0xbf   : > { %v1016_v47 = vadd.f32 %v1015_v52, %v1001_v45  ;;  %v3151_v39 = vmul.f32 %v681_v8, %v2828_v14  ;;  %v403_v57 = vmul.f32 %v3071_v41, %v2830_v15  ;;  %v404_v2 = vmul.f32 %v3077_v59, %v2830_v15 }
  0xc0   : > { %v742_v33 = vadd.f32 %v726_v35, %v625_v18  ;;  %v743_v58 = vadd.f32 %v727_v53, %v626_v55  ;;  %v801_v29 = vsel %vm423_vm1, %v799_v21, %v800_v40  ;;  %v829_v13 = vsel %vm423_vm1, %v800_v40, 0.0 }
  0xc1   : > { %v846_v61 = vmul.f32 %v2887_v0, %v801_v29  ;;  %v847_v38 = vmul.f32 %v2887_v0, %v829_v13  ;;  %v419_v5 = vadd.f32 %v403_v57, %v3101_v25  ;;  %v489_v41 = vmul.f32 %v801_v29, %v2832_v16 }
  0xc2   : > { %v778_v9 = vadd.f32 %v762_v56, %v742_v33  ;;  %v779_v6 = vadd.f32 %v763_v26, %v743_v58  ;;  %v490_v46 = vmul.f32 %v829_v13, %v2832_v16  ;;  %v420_v50 = vadd.f32 %v404_v2, %v3104_v34 }
  0xc3   : > { %v503_v51 = vadd.f32 %v487_v54, %v419_v5  ;;  %v533_v32 = vmul.f32 %v709_v24, %v2834_v17  ;;  %v534_v22 = vmul.f32 %v681_v8, %v2834_v17  ;;  %v569_v25 = vmul.f32 %v3121_v62, %v2865_v43 }
  0xc4   : > { %v862_v59 = vadd.f32 %v846_v61, %v778_v9  ;;  %v863_v28 = vadd.f32 %v847_v38, %v779_v6  ;;  %v570_v63 = vmul.f32 %v3124_v1, %v2865_v43  ;;  %v504_v37 = vadd.f32 %v488_v42, %v420_v50 }
  0xc5   : > { %v549_v56 = vadd.f32 %v533_v32, %v503_v51  ;;  %v611_v34 = vmul.f32 %v801_v29, %v2867_v44  ;;  %v612_v54 = vmul.f32 %v829_v13, %v2867_v44  ;;  %v682_v20 = vrot.slane %v3168_v23, 7 }
  0xc6   : > { %v884_v26 = vadd.f32 %v2919_v12, %v862_v59  ;;  %v885_v19 = vadd.f32 %v2919_v12, %v863_v28  ;;  %v683_v31 = vrot.slane %v3171_v27, 7  ;;  %v550_v45 = vadd.f32 %v534_v22, %v504_v37  ;;  %v3208_v28 = vld [vmem:[%s2800_s8 + $0x80] sm:$0xff] }
  0xc7   : > { %v585_v30 = vadd.f32 %v569_v25, %v549_v56  ;;  %v764_v36 = vmul.f32 %v3168_v23, %v2883_v60  ;;  %v765_v42 = vmul.f32 %v3171_v27, %v2883_v60  ;;  %v710_v21 = vsel %vm320_vm0, 0.0, %v682_v20  ;;  %v3215_v56 = vld [vmem:[%s2800_s8 + $0x88] sm:$0xff] }
  0xc8   : > { %v2201_v8 = vpack.c.bf16 %v885_v19, %v884_v26  ;;  %v979_v24 = vadd.f32 %v978_v7, %v884_v26  ;;  %v1002_v52 = vmul.f32 %v884_v26, %v884_v26  ;;  %v1003_v35 = vmul.f32 %v885_v19, %v885_v19 }
  0xc9   : > { %v586_v53 = vadd.f32 %v570_v63, %v550_v45  ;;  %v627_v18 = vadd.f32 %v611_v34, %v585_v30  ;;  %v3188_v55 = vsel %vm320_vm0, %v682_v20, %v683_v31  ;;  %v728_v33 = vmul.f32 %v2871_v48, %v710_v21 }
  0xca   : > { %2257 = vst [vmem:[%s2945_s25 + $0x28] sm:$0xff] %v2201_v8   ;;  %v980_v40 = vadd.f32 %v979_v24, %v885_v19  ;;  %v1017_v57 = vadd.f32 %v1016_v47, %v1002_v52  ;;  %v729_v58 = vmul.f32 %v2871_v48, %v3188_v55  ;;  %v802_v7 = vrot.slane %v3168_v23, 1 }
  0xcb   : > { %v628_v29 = vadd.f32 %v612_v54, %v586_v53  ;;  %v803_v13 = vrot.slane %v3171_v27, 1  ;;  %v405_v61 = vmul.f32 %v3121_v62, %v2830_v15  ;;  %v744_v2 = vadd.f32 %v728_v33, %v627_v18 }
  0xcc   : > { %v1018_v38 = vadd.f32 %v1017_v57, %v1003_v35  ;;  %v406_v47 = vmul.f32 %v3124_v1, %v2830_v15  ;;  %v535_v5 = vmul.f32 %v710_v21, %v2834_v17  ;;  %v536_v1 = vmul.f32 %v3188_v55, %v2834_v17 }
  0xcd   : > { %v745_v9 = vadd.f32 %v729_v58, %v628_v29  ;;  %v804_v6 = vsel %vm423_vm1, %v802_v7, %v803_v13  ;;  %v830_v50 = vsel %vm423_vm1, %v803_v13, 0.0  ;;  %v421_v51 = vadd.f32 %v405_v61, %v386_v49 }
  0xce   : > { %v780_v32 = vadd.f32 %v764_v36, %v744_v2  ;;  %v848_v22 = vmul.f32 %v2887_v0, %v804_v6  ;;  %v849_v59 = vmul.f32 %v2887_v0, %v830_v50  ;;  %v422_v62 = vadd.f32 %v406_v47, %v3151_v39 }
  0xcf   : > { %v781_v25 = vadd.f32 %v765_v42, %v745_v9  ;;  %v505_v63 = vadd.f32 %v489_v41, %v421_v51  ;;  %v571_v37 = vmul.f32 %v3168_v23, %v2865_v43  ;;  %v572_v54 = vmul.f32 %v3171_v27, %v2865_v43 }
  0xd0   : > { %v864_v49 = vadd.f32 %v848_v22, %v780_v32  ;;  %v506_v34 = vadd.f32 %v490_v46, %v422_v62  ;;  %v613_v26 = vmul.f32 %v804_v6, %v2867_v44  ;;  %v614_v20 = vmul.f32 %v830_v50, %v2867_v44 }
  0xd1   : > { %v865_v39 = vadd.f32 %v849_v59, %v781_v25  ;;  %v551_v19 = vadd.f32 %v535_v5, %v505_v63  ;;  %v685_v41 = vrot.slane %v3208_v28, 7  ;;  %v686_v30 = vrot.slane %v3215_v56, 7 }
  0xd2   : > { %v886_v31 = vadd.f32 %v2919_v12, %v864_v49  ;;  %v552_v45 = vadd.f32 %v536_v1, %v506_v34  ;;  %v766_v36 = vmul.f32 %v3208_v28, %v2883_v60  ;;  %v767_v24 = vmul.f32 %v3215_v56, %v2883_v60 }
  0xd3   : > { %v887_v46 = vadd.f32 %v2919_v12, %v865_v39  ;;  %v587_v42 = vadd.f32 %v571_v37, %v551_v19  ;;  %v3228_v8 = vsel %vm320_vm0, 0.0, %v685_v41  ;;  %v3233_v18 = vsel %vm320_vm0, %v685_v41, %v686_v30 }
  0xd4   : > { %v981_v52 = vadd.f32 %v980_v40, %v886_v31  ;;  %v1004_v35 = vmul.f32 %v886_v31, %v886_v31  ;;  %v588_v53 = vadd.f32 %v572_v54, %v552_v45  ;;  %v730_v29 = vmul.f32 %v2871_v48, %v3228_v8 }
  0xd5   : > { %v2206_v57 = vpack.c.bf16 %v887_v46, %v886_v31  ;;  %v1005_v33 = vmul.f32 %v887_v46, %v887_v46  ;;  %v629_v58 = vadd.f32 %v613_v26, %v587_v42  ;;  %v731_v2 = vmul.f32 %v2871_v48, %v3233_v18  ;;  %v3258_v26 = vld [vmem:[%s2800_s8 + $0x90] sm:$0xff] }
  0xd6   : > { %v982_v7 = vadd.f32 %v981_v52, %v887_v46  ;;  %v1019_v13 = vadd.f32 %v1018_v38, %v1004_v35  ;;  %v630_v61 = vadd.f32 %v614_v20, %v588_v53  ;;  %v805_v40 = vrot.slane %v3208_v28, 1  ;;  %v3263_v20 = vld [vmem:[%s2800_s8 + $0x98] sm:$0xff] }
  0xd7   : > { %2258 = vst [vmem:[%s2945_s25 + $0x30] sm:$0xff] %v2206_v57   ;;  %v746_v47 = vadd.f32 %v730_v29, %v629_v58  ;;  %v806_v5 = vrot.slane %v3215_v56, 1  ;;  %v1111_v9 = vmul.f32 %v710_v21, %v2828_v14  ;;  %v1112_v22 = vmul.f32 %v3188_v55, %v2828_v14 }
  0xd8   : > { %v1020_v51 = vadd.f32 %v1019_v13, %v1005_v33  ;;  %v747_v32 = vadd.f32 %v731_v2, %v630_v61  ;;  %v1127_v38 = vmul.f32 %v3168_v23, %v2830_v15  ;;  %v1128_v63 = vmul.f32 %v3171_v27, %v2830_v15 }
  0xd9   : > { %v782_v59 = vadd.f32 %v766_v36, %v746_v47  ;;  %v807_v62 = vsel %vm423_vm1, %v805_v40, %v806_v5  ;;  %v831_v25 = vsel %vm423_vm1, %v806_v5, 0.0  ;;  %v1207_v55 = vmul.f32 %v804_v6, %v2832_v16 }
  0xda   : > { %v783_v1 = vadd.f32 %v767_v24, %v747_v32  ;;  %v850_v21 = vmul.f32 %v2887_v0, %v807_v62  ;;  %v851_v37 = vmul.f32 %v2887_v0, %v831_v25  ;;  %v1143_v49 = vadd.f32 %v1127_v38, %v1111_v9 }
  0xdb   : > { %v1144_v34 = vadd.f32 %v1128_v63, %v1112_v22  ;;  %v1208_v23 = vmul.f32 %v830_v50, %v2832_v16  ;;  %v1320_v54 = vmul.f32 %v3228_v8, %v2834_v17  ;;  %v1321_v27 = vmul.f32 %v3233_v18, %v2834_v17 }
  0xdc   : > { %v866_v39 = vadd.f32 %v850_v21, %v782_v59  ;;  %v867_v19 = vadd.f32 %v851_v37, %v783_v1  ;;  %v1223_v41 = vadd.f32 %v1207_v55, %v1143_v49  ;;  %v1352_v45 = vmul.f32 %v3208_v28, %v2865_v43 }
  0xdd   : > { %v1224_v31 = vadd.f32 %v1208_v23, %v1144_v34  ;;  %v1353_v6 = vmul.f32 %v3215_v56, %v2865_v43  ;;  %v1432_v36 = vmul.f32 %v807_v62, %v2867_v44  ;;  %v1493_v46 = vrot.slane %v3258_v26, 7 }
  0xde   : > { %v888_v50 = vadd.f32 %v2919_v12, %v866_v39  ;;  %v3271_v30 = vadd.f32 %v2919_v12, %v867_v19  ;;  %v1336_v42 = vadd.f32 %v1320_v54, %v1223_v41  ;;  %v1433_v52 = vmul.f32 %v831_v25, %v2867_v44 }
  0xdf   : > { %v1337_v24 = vadd.f32 %v1321_v27, %v1224_v31  ;;  %v1494_v35 = vrot.slane %v3263_v20, 7  ;;  %v1567_v58 = vmul.f32 %v3258_v26, %v2883_v60  ;;  %v3284_v2 = vsel %vm320_vm0, 0.0, %v1493_v46  ;;  %v3319_v31 = vld [vmem:[%s2800_s8 + $0xa0] sm:$0xff] }
  0xe0   : > { %v2211_v53 = vpack.c.bf16 %v3271_v30, %v888_v50  ;;  %v983_v57 = vadd.f32 %v982_v7, %v888_v50  ;;  %v1006_v33 = vmul.f32 %v888_v50, %v888_v50  ;;  %v1368_v29 = vadd.f32 %v1352_v45, %v1336_v42  ;;  %v3322_v45 = vld [vmem:[%s2800_s8 + $0xa8] sm:$0xff] }
  0xe1   : > { %v1369_v13 = vadd.f32 %v1353_v6, %v1337_v24  ;;  %v3281_v61 = vsel %vm320_vm0, %v1493_v46, %v1494_v35  ;;  %v1535_v7 = vmul.f32 %v3284_v2, %v2871_v48  ;;  %v1568_v22 = vmul.f32 %v3263_v20, %v2883_v60 }
  0xe2   : > { %2259 = vst [vmem:[%s2945_s25 + $0x38] sm:$0xff] %v2211_v53   ;;  %v3288_v47 = vadd.f32 %v983_v57, %v3271_v30  ;;  %v3290_v40 = vadd.f32 %v1020_v51, %v1006_v33  ;;  %v1536_v5 = vmul.f32 %v3281_v61, %v2871_v48  ;;  %v1448_v9 = vadd.f32 %v1432_v36, %v1368_v29 }
  0xe3   : > { %v1449_v32 = vadd.f32 %v1433_v52, %v1369_v13  ;;  %v1598_v38 = vrot.slane %v3258_v26, 1  ;;  %v1599_v59 = vrot.slane %v3263_v20, 1  ;;  %v1113_v63 = vmul.f32 %v3228_v8, %v2828_v14 }
  0xe4   : > { %v1114_v51 = vmul.f32 %v3233_v18, %v2828_v14  ;;  %v1129_v1 = vmul.f32 %v3208_v28, %v2830_v15  ;;  %v1551_v21 = vadd.f32 %v1535_v7, %v1448_v9  ;;  %v1130_v49 = vmul.f32 %v3215_v56, %v2830_v15 }
  0xe5   : > { %v1552_v37 = vadd.f32 %v1536_v5, %v1449_v32  ;;  %v1209_v34 = vmul.f32 %v807_v62, %v2832_v16  ;;  %v1600_v55 = vsel %vm423_vm1, %v1598_v38, %v1599_v59  ;;  %v1633_v23 = vsel %vm423_vm1, %v1599_v59, 0.0 }
  0xe6   : > { %v1145_v8 = vadd.f32 %v1129_v1, %v1113_v63  ;;  %v1210_v54 = vmul.f32 %v831_v25, %v2832_v16  ;;  %v1582_v18 = vadd.f32 %v1567_v58, %v1551_v21  ;;  %v1640_v28 = vmul.f32 %v1600_v55, %v2887_v0 }
  0xe7   : > { %v1583_v39 = vadd.f32 %v1568_v22, %v1552_v37  ;;  %v1641_v19 = vmul.f32 %v1633_v23, %v2887_v0  ;;  %v1146_v27 = vadd.f32 %v1130_v49, %v1114_v51  ;;  %v1322_v56 = vmul.f32 %v3284_v2, %v2834_v17 }
  0xe8   : > { %v1225_v41 = vadd.f32 %v1209_v34, %v1145_v8  ;;  %v1323_v62 = vmul.f32 %v3281_v61, %v2834_v17  ;;  %v1656_v6 = vadd.f32 %v1640_v28, %v1582_v18  ;;  %v1354_v50 = vmul.f32 %v3258_v26, %v2865_v43 }
  0xe9   : > { %v1657_v25 = vadd.f32 %v1641_v19, %v1583_v39  ;;  %v1355_v36 = vmul.f32 %v3263_v20, %v2865_v43  ;;  %v1226_v46 = vadd.f32 %v1210_v54, %v1146_v27  ;;  %v1434_v24 = vmul.f32 %v1600_v55, %v2867_v44 }
  0xea   : > { %v1338_v42 = vadd.f32 %v1322_v56, %v1225_v41  ;;  %v1435_v52 = vmul.f32 %v1633_v23, %v2867_v44  ;;  %v1672_v35 = vadd.f32 %v2919_v12, %v1656_v6  ;;  %v1496_v57 = vrot.slane %v3319_v31, 7 }
  0xeb   : > { %v1673_v53 = vadd.f32 %v2919_v12, %v1657_v25  ;;  %v1497_v33 = vrot.slane %v3322_v45, 7  ;;  %v1339_v58 = vadd.f32 %v1323_v62, %v1226_v46  ;;  %v1569_v13 = vmul.f32 %v3319_v31, %v2883_v60 }
  0xec   : > { %v1370_v29 = vadd.f32 %v1354_v50, %v1338_v42  ;;  %v1570_v7 = vmul.f32 %v3322_v45, %v2883_v60  ;;  %v1791_v32 = vmul.f32 %v1672_v35, %v1672_v35  ;;  %v1529_v51 = vsel %vm320_vm0, 0.0, %v1496_v57  ;;  %v3369_v42 = vld [vmem:[%s2800_s8 + $0xb8] sm:$0xff] }
  0xed   : > { %v2216_v5 = vpack.c.bf16 %v1673_v53, %v1672_v35  ;;  %v1769_v9 = vadd.f32 %v1673_v53, %v1672_v35  ;;  %v1792_v22 = vmul.f32 %v1673_v53, %v1673_v53  ;;  %v1371_v38 = vadd.f32 %v1355_v36, %v1339_v58 }
  0xee   : > { %v1450_v59 = vadd.f32 %v1434_v24, %v1370_v29  ;;  %v3339_v63 = vsel %vm320_vm0, %v1496_v57, %v1497_v33  ;;  %v1537_v21 = vmul.f32 %v1529_v51, %v2871_v48  ;;  %v1601_v49 = vrot.slane %v3319_v31, 1 }
  0xef   : > { %2260 = vst [vmem:[%s2945_s25 + $0x40] sm:$0xff] %v2216_v5   ;;  %v1807_v1 = vadd.f32 %v1792_v22, %v1791_v32  ;;  %v1538_v37 = vmul.f32 %v3339_v63, %v2871_v48  ;;  %v1451_v34 = vadd.f32 %v1435_v52, %v1371_v38  ;;  %v1602_v8 = vrot.slane %v3322_v45, 1 }
  0xf0   : > { %v1115_v54 = vmul.f32 %v3284_v2, %v2828_v14  ;;  %v1116_v18 = vmul.f32 %v3281_v61, %v2828_v14  ;;  %v1553_v39 = vadd.f32 %v1537_v21, %v1450_v59  ;;  %v1131_v28 = vmul.f32 %v3258_v26, %v2830_v15 }
  0xf1   : > { %v1132_v19 = vmul.f32 %v3263_v20, %v2830_v15  ;;  %v1211_v27 = vmul.f32 %v1600_v55, %v2832_v16  ;;  %v1554_v41 = vadd.f32 %v1538_v37, %v1451_v34  ;;  %v1603_v56 = vsel %vm423_vm1, %v1601_v49, %v1602_v8  ;;  %v3366_v55 = vld [vmem:[%s2800_s8 + $0xb0] sm:$0xff] }
  0xf2   : > { %v1634_v62 = vsel %vm423_vm1, %v1602_v8, 0.0  ;;  %v1212_v2 = vmul.f32 %v1633_v23, %v2832_v16  ;;  %v1584_v6 = vadd.f32 %v1569_v13, %v1553_v39  ;;  %v1642_v61 = vmul.f32 %v1603_v56, %v2887_v0 }
  0xf3   : > { %v1643_v25 = vmul.f32 %v1634_v62, %v2887_v0  ;;  %v1147_v50 = vadd.f32 %v1131_v28, %v1115_v54  ;;  %v1585_v26 = vadd.f32 %v1570_v7, %v1554_v41  ;;  %v1148_v36 = vadd.f32 %v1132_v19, %v1116_v18 }
  0xf4   : > { %v1324_v46 = vmul.f32 %v1529_v51, %v2834_v17  ;;  %v1325_v20 = vmul.f32 %v3339_v63, %v2834_v17  ;;  %v1658_v24 = vadd.f32 %v1642_v61, %v1584_v6  ;;  %v1356_v23 = vmul.f32 %v3319_v31, %v2865_v43 }
  0xf5   : > { %v1227_v52 = vadd.f32 %v1211_v27, %v1147_v50  ;;  %v1659_v35 = vadd.f32 %v1643_v25, %v1585_v26  ;;  %v1228_v53 = vadd.f32 %v1212_v2, %v1148_v36  ;;  %v1357_v57 = vmul.f32 %v3322_v45, %v2865_v43 }
  0xf6   : > { %v1436_v33 = vmul.f32 %v1603_v56, %v2867_v44  ;;  %v1674_v58 = vadd.f32 %v2919_v12, %v1658_v24  ;;  %v1499_v13 = vrot.slane %v3366_v55, 7  ;;  %v1500_v7 = vrot.slane %v3369_v42, 7 }
  0xf7   : > { %v1340_v29 = vadd.f32 %v1324_v46, %v1227_v52  ;;  %v1675_v5 = vadd.f32 %v2919_v12, %v1659_v35  ;;  %v1341_v32 = vadd.f32 %v1325_v20, %v1228_v53  ;;  %v1437_v22 = vmul.f32 %v1634_v62, %v2867_v44 }
  0xf8   : > { %v1571_v38 = vmul.f32 %v3366_v55, %v2883_v60  ;;  %v1770_v59 = vadd.f32 %v1769_v9, %v1674_v58  ;;  %v1793_v21 = vmul.f32 %v1674_v58, %v1674_v58  ;;  %v1572_v49 = vmul.f32 %v3369_v42, %v2883_v60 }
  0xf9   : > { %v1372_v37 = vadd.f32 %v1356_v23, %v1340_v29  ;;  %v2221_v34 = vpack.c.bf16 %v1675_v5, %v1674_v58  ;;  %v1373_v8 = vadd.f32 %v1357_v57, %v1341_v32  ;;  %v3386_v54 = vsel %vm320_vm0, %v1499_v13, %v1500_v7  ;;  %v3422_v29 = vld [vmem:[%s2800_s8 + $0xc0] sm:$0xff]  ;;  %v3429_v32 = vld [vmem:[#allocation7] ss:$0 sm:$0xff] }
  0xfa   : > { %v3389_v12 = vsel %vm320_vm0, 0.0, %v1499_v13  ;;  %v1771_v18 = vadd.f32 %v1770_v59, %v1675_v5  ;;  %v1794_v39 = vmul.f32 %v1675_v5, %v1675_v5  ;;  %v1540_v27 = vmul.f32 %v3386_v54, %v2871_v48  ;;  %v3425_v13 = vld [vmem:[%s2800_s8 + $0xc8] sm:$0xff] }
  0xfb   : > { %v1452_v28 = vadd.f32 %v1436_v33, %v1372_v37  ;;  %v1539_v19 = vmul.f32 %v3389_v12, %v2871_v48  ;;  %2261 = vst [vmem:[%s2945_s25 + $0x48] sm:$0xff] %v2221_v34   ;;  %v1453_v9 = vadd.f32 %v1437_v22, %v1373_v8  ;;  %v1604_v41 = vrot.slane %v3366_v55, 1 }
  0xfc   : > { %v1605_v2 = vrot.slane %v3369_v42, 1  ;;  %v1808_v6 = vadd.f32 %v1807_v1, %v1793_v21  ;;  %v1117_v25 = vmul.f32 %v1529_v51, %v2828_v14  ;;  %v1118_v50 = vmul.f32 %v3339_v63, %v2828_v14 }
  0xfd   : > { %v1555_v61 = vadd.f32 %v1539_v19, %v1452_v28  ;;  %v1556_v26 = vadd.f32 %v1540_v27, %v1453_v9  ;;  %v1133_v20 = vmul.f32 %v3319_v31, %v2830_v15  ;;  %v1134_v63 = vmul.f32 %v3322_v45, %v2830_v15 }
  0xfe   : > { %v3402_v36 = vsel %vm423_vm1, %v1604_v41, %v1605_v2  ;;  %v3405_v46 = vsel %vm423_vm1, %v1605_v2, 0.0  ;;  %v1213_v35 = vmul.f32 %v1603_v56, %v2832_v16  ;;  %v1214_v53 = vmul.f32 %v1634_v62, %v2832_v16 }
  0xff   : > { %v1586_v24 = vadd.f32 %v1571_v38, %v1555_v61  ;;  %v1644_v1 = vmul.f32 %v3402_v36, %v2887_v0  ;;  %v1645_v51 = vmul.f32 %v3405_v46, %v2887_v0  ;;  %v1587_v52 = vadd.f32 %v1572_v49, %v1556_v26 }
 0x100   : > { %v1149_v23 = vadd.f32 %v1133_v20, %v1117_v25  ;;  %v1150_v33 = vadd.f32 %v1134_v63, %v1118_v50  ;;  %v1326_v31 = vmul.f32 %v3389_v12, %v2834_v17  ;;  %v1327_v58 = vmul.f32 %v3386_v54, %v2834_v17 }
 0x101   : > { %v1660_v57 = vadd.f32 %v1644_v1, %v1586_v24  ;;  %v1809_v7 = vadd.f32 %v1808_v6, %v1794_v39  ;;  %v1661_v45 = vadd.f32 %v1645_v51, %v1587_v52  ;;  %v1358_v56 = vmul.f32 %v3366_v55, %v2865_v43 }
 0x102   : > { %v1229_v5 = vadd.f32 %v1213_v35, %v1149_v23  ;;  %v1230_v22 = vadd.f32 %v1214_v53, %v1150_v33  ;;  %v1359_v38 = vmul.f32 %v3369_v42, %v2865_v43  ;;  %v1438_v59 = vmul.f32 %v3402_v36, %v2867_v44 }
 0x103   : > { %v1676_v62 = vadd.f32 %v3429_v32, %v1660_v57  ;;  %v1677_v21 = vadd.f32 %v3429_v32, %v1661_v45  ;;  %v1502_v49 = vrot.slane %v3422_v29, 7  ;;  %v1503_v34 = vrot.slane %v3425_v13, 7 }
 0x104   : > { %v1342_v37 = vadd.f32 %v1326_v31, %v1229_v5  ;;  %v1343_v28 = vadd.f32 %v1327_v58, %v1230_v22  ;;  %v1439_v19 = vmul.f32 %v3405_v46, %v2867_v44  ;;  %v1573_v2 = vmul.f32 %v3422_v29, %v2883_v60 }
 0x105   : > { %v1772_v8 = vadd.f32 %v1771_v18, %v1676_v62  ;;  %v1795_v39 = vmul.f32 %v1676_v62, %v1676_v62  ;;  %v2226_v9 = vpack.c.bf16 %v1677_v21, %v1676_v62  ;;  %v1796_v27 = vmul.f32 %v1677_v21, %v1677_v21 }
 0x106   : > { %v1374_v41 = vadd.f32 %v1358_v56, %v1342_v37  ;;  %v1375_v61 = vadd.f32 %v1359_v38, %v1343_v28  ;;  %v3444_v25 = vsel %vm320_vm0, %v1502_v49, %v1503_v34  ;;  %v3447_v50 = vsel %vm320_vm0, 0.0, %v1502_v49  ;;  %v3475_v38 = vld [vmem:[%s2800_s8 + $0xd0] sm:$0xff]  ;;  %v3484_v49 = vld [vmem:[%s2800_s8 + $0xd8] sm:$0xff] }
 0x107   : > { %v1773_v6 = vadd.f32 %v1772_v8, %v1677_v21  ;;  %2262 = vst [vmem:[%s2945_s25 + $0x50] sm:$0xff] %v2226_v9   ;;  %v1810_v18 = vadd.f32 %v1809_v7, %v1795_v39  ;;  %v1541_v20 = vmul.f32 %v3447_v50, %v2871_v48  ;;  %v1542_v24 = vmul.f32 %v3444_v25, %v2871_v48 }
 0x108   : > { %v1454_v26 = vadd.f32 %v1438_v59, %v1374_v41  ;;  %v1455_v1 = vadd.f32 %v1439_v19, %v1375_v61  ;;  %v1574_v51 = vmul.f32 %v3425_v13, %v2883_v60  ;;  %v1607_v63 = vrot.slane %v3422_v29, 1 }
 0x109   : > { %v1608_v52 = vrot.slane %v3425_v13, 1  ;;  %v1119_v35 = vmul.f32 %v3389_v12, %v2828_v14  ;;  %v1120_v53 = vmul.f32 %v3386_v54, %v2828_v14  ;;  %v1135_v57 = vmul.f32 %v3366_v55, %v2830_v15 }
 0x10a   : > { %v1557_v23 = vadd.f32 %v1541_v20, %v1454_v26  ;;  %v1558_v33 = vadd.f32 %v1542_v24, %v1455_v1  ;;  %v1136_v7 = vmul.f32 %v3369_v42, %v2830_v15  ;;  %v1215_v55 = vmul.f32 %v3402_v36, %v2832_v16 }
 0x10b   : > { %v1609_v31 = vsel %vm423_vm1, %v1607_v63, %v1608_v52  ;;  %v1636_v58 = vsel %vm423_vm1, %v1608_v52, 0.0  ;;  %v1151_v56 = vadd.f32 %v1135_v57, %v1119_v35  ;;  %v1216_v22 = vmul.f32 %v3405_v46, %v2832_v16 }
 0x10c   : > { %v1588_v45 = vadd.f32 %v1573_v2, %v1557_v23  ;;  %v1646_v5 = vmul.f32 %v1609_v31, %v2887_v0  ;;  %v1647_v12 = vmul.f32 %v1636_v58, %v2887_v0  ;;  %v1589_v62 = vadd.f32 %v1574_v51, %v1558_v33 }
 0x10d   : > { %v1152_v54 = vadd.f32 %v1136_v7, %v1120_v53  ;;  %v1328_v42 = vmul.f32 %v3447_v50, %v2834_v17  ;;  %v1329_v21 = vmul.f32 %v3444_v25, %v2834_v17  ;;  %v1360_v37 = vmul.f32 %v3422_v29, %v2865_v43 }
 0x10e   : > { %v1662_v59 = vadd.f32 %v1646_v5, %v1588_v45  ;;  %v1663_v34 = vadd.f32 %v1647_v12, %v1589_v62  ;;  %v1231_v8 = vadd.f32 %v1215_v55, %v1151_v56  ;;  %v1361_v46 = vmul.f32 %v3425_v13, %v2865_v43 }
 0x10f   : > { %v1232_v36 = vadd.f32 %v1216_v22, %v1152_v54  ;;  %v1440_v28 = vmul.f32 %v1609_v31, %v2867_v44  ;;  %v1441_v19 = vmul.f32 %v1636_v58, %v2867_v44  ;;  %v1505_v9 = vrot.slane %v3475_v38, 7 }
 0x110   : > { %v1678_v39 = vadd.f32 %v3429_v32, %v1662_v59  ;;  %v1679_v41 = vadd.f32 %v3429_v32, %v1663_v34  ;;  %v1344_v2 = vadd.f32 %v1328_v42, %v1231_v8  ;;  %v1506_v26 = vrot.slane %v3484_v49, 7 }
 0x111   : > { %v1345_v61 = vadd.f32 %v1329_v21, %v1232_v36  ;;  %v1811_v20 = vadd.f32 %v1810_v18, %v1796_v27  ;;  %v3495_v23 = vsel %vm320_vm0, 0.0, %v1505_v9  ;;  %v1575_v33 = vmul.f32 %v3475_v38, %v2883_v60 }
 0x112   : > { %v1774_v24 = vadd.f32 %v1773_v6, %v1678_v39  ;;  %v1797_v1 = vmul.f32 %v1678_v39, %v1678_v39  ;;  %v2231_v51 = vpack.c.bf16 %v1679_v41, %v1678_v39  ;;  %v1376_v63 = vadd.f32 %v1360_v37, %v1344_v2 }
 0x113   : > { %v1377_v52 = vadd.f32 %v1361_v46, %v1345_v61  ;;  %v1798_v35 = vmul.f32 %v1679_v41, %v1679_v41  ;;  %v3498_v53 = vsel %vm320_vm0, %v1505_v9, %v1506_v26  ;;  %v1543_v57 = vmul.f32 %v3495_v23, %v2871_v48 }
 0x114   : > { %2263 = vst [vmem:[%s2945_s25 + $0x58] sm:$0xff] %v2231_v51   ;;  %v1456_v27 = vadd.f32 %v1440_v28, %v1376_v63  ;;  %v1544_v18 = vmul.f32 %v3498_v53, %v2871_v48  ;;  %v1576_v7 = vmul.f32 %v3484_v49, %v2883_v60  ;;  %v1775_v45 = vadd.f32 %v1774_v24, %v1679_v41  ;;  %v3528_v28 = vld [vmem:[%s2800_s8 + $0xe0] sm:$0xff]  ;;  %v3533_v41 = vld [vmem:[%s2800_s8 + $0xe8] sm:$0xff] }
 0x115   : > { %v1457_v6 = vadd.f32 %v1441_v19, %v1377_v52  ;;  %v1610_v5 = vrot.slane %v3475_v38, 1  ;;  %v1611_v12 = vrot.slane %v3484_v49, 1  ;;  %v1121_v56 = vmul.f32 %v3447_v50, %v2828_v14 }
 0x116   : > { %v1559_v62 = vadd.f32 %v1543_v57, %v1456_v27  ;;  %v1122_v55 = vmul.f32 %v3444_v25, %v2828_v14  ;;  %v1137_v22 = vmul.f32 %v3422_v29, %v2830_v15  ;;  %v1138_v21 = vmul.f32 %v3425_v13, %v2830_v15 }
 0x117   : > { %v1560_v54 = vadd.f32 %v1544_v18, %v1457_v6  ;;  %v1612_v59 = vsel %vm423_vm1, %v1610_v5, %v1611_v12  ;;  %v1637_v42 = vsel %vm423_vm1, %v1611_v12, 0.0  ;;  %v1217_v37 = vmul.f32 %v1609_v31, %v2832_v16 }
 0x118   : > { %v1590_v50 = vadd.f32 %v1575_v33, %v1559_v62  ;;  %v1648_v8 = vmul.f32 %v1612_v59, %v2887_v0  ;;  %v1649_v36 = vmul.f32 %v1637_v42, %v2887_v0  ;;  %v1153_v25 = vadd.f32 %v1137_v22, %v1121_v56 }
 0x119   : > { %v1591_v34 = vadd.f32 %v1576_v7, %v1560_v54  ;;  %v1154_v46 = vadd.f32 %v1138_v21, %v1122_v55  ;;  %v1218_v29 = vmul.f32 %v1636_v58, %v2832_v16  ;;  %v1330_v39 = vmul.f32 %v3495_v23, %v2834_v17 }
 0x11a   : > { %v1812_v19 = vadd.f32 %v1811_v20, %v1797_v1  ;;  %v1664_v9 = vadd.f32 %v1648_v8, %v1590_v50  ;;  %v1331_v31 = vmul.f32 %v3498_v53, %v2834_v17  ;;  %v1233_v2 = vadd.f32 %v1217_v37, %v1153_v25 }
 0x11b   : > { %v1665_v13 = vadd.f32 %v1649_v36, %v1591_v34  ;;  %v1234_v61 = vadd.f32 %v1218_v29, %v1154_v46  ;;  %v1362_v26 = vmul.f32 %v3475_v38, %v2865_v43  ;;  %v1363_v58 = vmul.f32 %v3484_v49, %v2865_v43 }
 0x11c   : > { %v1680_v24 = vadd.f32 %v3429_v32, %v1664_v9  ;;  %v1442_v1 = vmul.f32 %v1612_v59, %v2867_v44  ;;  %v1508_v51 = vrot.slane %v3528_v28, 7  ;;  %v1346_v63 = vadd.f32 %v1330_v39, %v1233_v2 }
 0x11d   : > { %v1681_v20 = vadd.f32 %v3429_v32, %v1665_v13  ;;  %v1347_v52 = vadd.f32 %v1331_v31, %v1234_v61  ;;  %v1443_v57 = vmul.f32 %v1637_v42, %v2867_v44  ;;  %v1509_v33 = vrot.slane %v3533_v41, 7 }
 0x11e   : > { %v1813_v27 = vadd.f32 %v1812_v19, %v1798_v35  ;;  %v1378_v18 = vadd.f32 %v1362_v26, %v1346_v63  ;;  %v3549_v12 = vsel %vm320_vm0, 0.0, %v1508_v51  ;;  %v1776_v56 = vadd.f32 %v1775_v45, %v1680_v24 }
 0x11f   : > { %v2236_v6 = vpack.c.bf16 %v1681_v20, %v1680_v24  ;;  %v1379_v7 = vadd.f32 %v1363_v58, %v1347_v52  ;;  %v3546_v5 = vsel %vm320_vm0, %v1508_v51, %v1509_v33  ;;  %v1545_v62 = vmul.f32 %v3549_v12, %v2871_v48  ;;  %v2098_v58 = vld [vmem:[%s2800_s8 + $0xf0] sm:$0xff] }
 0x120   : > { %v1546_v54 = vmul.f32 %v3546_v5, %v2871_v48  ;;  %v1577_v35 = vmul.f32 %v3528_v28, %v2883_v60  ;;  %v1458_v55 = vadd.f32 %v1442_v1, %v1378_v18  ;;  %v1578_v21 = vmul.f32 %v3533_v41, %v2883_v60 }
 0x121   : > { %2264 = vst [vmem:[%s2945_s25 + $0x60] sm:$0xff] %v2236_v6   ;;  %v1459_v22 = vadd.f32 %v1443_v57, %v1379_v7  ;;  %v1613_v37 = vrot.slane %v3528_v28, 1  ;;  %v1799_v50 = vmul.f32 %v1680_v24, %v1680_v24  ;;  %v1614_v34 = vrot.slane %v3533_v41, 1  ;;  %v2099_v24 = vld [vmem:[%s2800_s8 + $0xf8] sm:$0xff] }
 0x122   : > { %v1123_v45 = vmul.f32 %v3495_v23, %v2828_v14  ;;  %v1124_v8 = vmul.f32 %v3498_v53, %v2828_v14  ;;  %v1561_v36 = vadd.f32 %v1545_v62, %v1458_v55  ;;  %v1139_v46 = vmul.f32 %v3475_v38, %v2830_v15 }
 0x123   : > { %v1562_v25 = vadd.f32 %v1546_v54, %v1459_v22  ;;  %v1140_v29 = vmul.f32 %v3484_v49, %v2830_v15  ;;  %v1615_v39 = vsel %vm423_vm1, %v1613_v37, %v1614_v34  ;;  %v1638_v19 = vsel %vm423_vm1, %v1614_v34, 0.0 }
 0x124   : > { %v1219_v9 = vmul.f32 %v1612_v59, %v2832_v16  ;;  %v1220_v23 = vmul.f32 %v1637_v42, %v2832_v16  ;;  %v1592_v13 = vadd.f32 %v1577_v35, %v1561_v36  ;;  %v1650_v31 = vmul.f32 %v1615_v39, %v2887_v0 }
 0x125   : > { %v1593_v53 = vadd.f32 %v1578_v21, %v1562_v25  ;;  %v1651_v2 = vmul.f32 %v1638_v19, %v2887_v0  ;;  %v1155_v61 = vadd.f32 %v1139_v46, %v1123_v45  ;;  %v1156_v26 = vadd.f32 %v1140_v29, %v1124_v8 }
 0x126   : > { %v1332_v38 = vmul.f32 %v3549_v12, %v2834_v17  ;;  %v1333_v49 = vmul.f32 %v3546_v5, %v2834_v17  ;;  %v1800_v1 = vmul.f32 %v1681_v20, %v1681_v20  ;;  %v1814_v59 = vadd.f32 %v1813_v27, %v1799_v50 }
 0x127   : > { %v1666_v51 = vadd.f32 %v1650_v31, %v1592_v13  ;;  %v1667_v42 = vadd.f32 %v1651_v2, %v1593_v53  ;;  %v1235_v63 = vadd.f32 %v1219_v9, %v1155_v61  ;;  %v1236_v52 = vadd.f32 %v1220_v23, %v1156_v26 }
 0x128   : > { %v1364_v57 = vmul.f32 %v3528_v28, %v2865_v43  ;;  %v1365_v33 = vmul.f32 %v3533_v41, %v2865_v43  ;;  %v1511_v7 = vrot.slane %v2098_v58, 7  ;;  %v1512_v62 = vrot.slane %v2099_v24, 7 }
 0x129   : > { %v1682_v6 = vadd.f32 %v3429_v32, %v1666_v51  ;;  %v1683_v18 = vadd.f32 %v3429_v32, %v1667_v42  ;;  %v1348_v54 = vadd.f32 %v1332_v38, %v1235_v63  ;;  %v1349_v35 = vadd.f32 %v1333_v49, %v1236_v52 }
 0x12a   : > { %v1444_v27 = vmul.f32 %v1615_v39, %v2867_v44  ;;  %v1445_v55 = vmul.f32 %v1638_v19, %v2867_v44  ;;  %v1777_v22 = vadd.f32 %v1776_v56, %v1681_v20  ;;  %v1815_v21 = vadd.f32 %v1814_v59, %v1800_v1 }
 0x12b   : > { %v2241_v37 = vpack.c.bf16 %v1683_v18, %v1682_v6  ;;  %v1380_v50 = vadd.f32 %v1364_v57, %v1348_v54  ;;  %v1381_v34 = vadd.f32 %v1365_v33, %v1349_v35  ;;  %v1513_v45 = vsel %vm320_vm0, %v1511_v7, %v1512_v62 }
 0x12c   : > { %v1534_v8 = vsel %vm320_vm0, 0.0, %v1511_v7  ;;  %v1548_v25 = vmul.f32 %v1513_v45, %v2871_v48  ;;  %v1579_v46 = vmul.f32 %v2098_v58, %v2883_v60  ;;  %v1580_v29 = vmul.f32 %v2099_v24, %v2883_v60 }
 0x12d   : > { %2265 = vst [vmem:[%s2945_s25 + $0x68] sm:$0xff] %v2241_v37   ;;  %v1547_v36 = vmul.f32 %v1534_v8, %v2871_v48  ;;  %v1460_v9 = vadd.f32 %v1444_v27, %v1380_v50  ;;  %v1461_v23 = vadd.f32 %v1445_v55, %v1381_v34  ;;  %v1616_v20 = vrot.slane %v2098_v58, 1 }
 0x12e   : > { %v1617_v56 = vrot.slane %v2099_v24, 1  ;;  %v1801_v13 = vmul.f32 %v1682_v6, %v1682_v6  ;;  %v1125_v53 = vmul.f32 %v3549_v12, %v2828_v14  ;;  %v1126_v31 = vmul.f32 %v3546_v5, %v2828_v14 }
 0x12f   : > { %v1141_v2 = vmul.f32 %v3528_v28, %v2830_v15  ;;  %v1563_v61 = vadd.f32 %v1547_v36, %v1460_v9  ;;  %v1564_v26 = vadd.f32 %v1548_v25, %v1461_v23  ;;  %v1142_v51 = vmul.f32 %v3533_v41, %v2830_v15 }
 0x130   : > { %v1618_v38 = vsel %vm423_vm1, %v1616_v20, %v1617_v56  ;;  %v1639_v49 = vsel %vm423_vm1, %v1617_v56, 0.0  ;;  %v1221_v14 = vmul.f32 %v1615_v39, %v2832_v16  ;;  %v1222_v28 = vmul.f32 %v1638_v19, %v2832_v16 }
 0x131   : > { %v1652_v1 = vmul.f32 %v1618_v38, %v2887_v0  ;;  %v1653_v59 = vmul.f32 %v1639_v49, %v2887_v0  ;;  %v1157_v12 = vadd.f32 %v1141_v2, %v1125_v53  ;;  %v1594_v42 = vadd.f32 %v1579_v46, %v1563_v61 }
 0x132   : > { %v1595_v63 = vadd.f32 %v1580_v29, %v1564_v26  ;;  %v1007_v5 = vmul.f32 %v3271_v30, %v3271_v30  ;;  %v1158_v52 = vadd.f32 %v1142_v51, %v1126_v31  ;;  %v1334_v57 = vmul.f32 %v1534_v8, %v2834_v17 }
 0x133   : > { %v1335_v33 = vmul.f32 %v1513_v45, %v2834_v17  ;;  %v1778_v7 = vadd.f32 %v1777_v22, %v1682_v6  ;;  %v1668_v62 = vadd.f32 %v1652_v1, %v1594_v42  ;;  %v1237_v35 = vadd.f32 %v1221_v14, %v1157_v12 }
 0x134   : > { %v1669_v54 = vadd.f32 %v1653_v59, %v1595_v63  ;;  %v1802_v15 = vmul.f32 %v1683_v18, %v1683_v18  ;;  %v1238_v41 = vadd.f32 %v1222_v28, %v1158_v52  ;;  %v1366_v27 = vmul.f32 %v2098_v58, %v2865_v43 }
 0x135   : > { %v1367_v39 = vmul.f32 %v2099_v24, %v2865_v43  ;;  %v1816_v16 = vadd.f32 %v1815_v21, %v1801_v13  ;;  %v1684_v19 = vadd.f32 %v3429_v32, %v1668_v62  ;;  %v1350_v55 = vadd.f32 %v1334_v57, %v1237_v35 }
 0x136   : > { %v1685_v30 = vadd.f32 %v3429_v32, %v1669_v54  ;;  %v1351_v37 = vadd.f32 %v1335_v33, %v1238_v41  ;;  %v1446_v17 = vmul.f32 %v1618_v38, %v2867_v44  ;;  %v1447_v6 = vmul.f32 %v1639_v49, %v2867_v44 }
 0x137   : > { %v1779_v22 = vadd.f32 %v1778_v7, %v1683_v18  ;;  %v1549_v34 = vmul.f32 %v2871_v48, %v2816_v10  ;;  %v1382_v58 = vadd.f32 %v1366_v27, %v1350_v55  ;;  %v1550_v43 = vmul.f32 %v2871_v48, %v2810_v3 }
 0x138   : > { %v2246_v50 = vpack.c.bf16 %v1685_v30, %v1684_v19  ;;  %v1383_v45 = vadd.f32 %v1367_v39, %v1351_v37  ;;  %v1022_v24 = vadd.f32 %v3290_v40, %v1007_v5  ;;  %v1817_v21 = vadd.f32 %v1816_v16, %v1802_v15 }
 0x139   : > { %v1803_v8 = vmul.f32 %v1684_v19, %v1684_v19  ;;  %v1462_v36 = vadd.f32 %v1446_v17, %v1382_v58  ;;  %v1581_v46 = vmul.f32 0.0, %v2883_v60  ;;  %v1654_v44 = vmul.f32 %v2887_v0, %v2812_v4 }
 0x13a   : > { %2266 = vst [vmem:[%s2945_s25 + $0x70] sm:$0xff] %v2246_v50   ;;  %v1463_v25 = vadd.f32 %v1447_v6, %v1383_v45  ;;  %v985_v10 = vrot.slane %v3288_v47, 4  ;;  %v1780_v18 = vadd.f32 %v1779_v22, %v1684_v19  ;;  %v1655_v3 = vmul.f32 %v2887_v0, %v2820_v11 }
 0x13b   : > { %v1565_v29 = vadd.f32 %v1549_v34, %v1462_v36  ;;  %v1804_v48 = vmul.f32 %v1685_v30, %v1685_v30  ;;  %v1818_v40 = vadd.f32 %v1817_v21, %v1803_v8  ;;  %v1023_v56 = vrot.slane %v1022_v24, 4 }
 0x13c   : > { %v1566_v9 = vadd.f32 %v1550_v43, %v1463_v25  ;;  %v986_v60 = vadd.f32 %v985_v10, %v3288_v47  ;;  %v1781_v13 = vadd.f32 %v1780_v18, %v1685_v30 }
 0x13d   : > { %v1596_v23 = vadd.f32 %v1581_v46, %v1565_v29  ;;  %v1819_v31 = vadd.f32 %v1818_v40, %v1804_v48  ;;  %v1024_v11 = vadd.f32 %v1023_v56, %v1022_v24 }
 0x13e   : > { %v1597_v20 = vadd.f32 %v1581_v46, %v1566_v9  ;;  %v987_v0 = vrot.slane %v986_v60, 2 }
 0x13f   : > { %v1670_v53 = vadd.f32 %v1654_v44, %v1596_v23  ;;  %v1025_v59 = vrot.slane %v1024_v11, 2 }
 0x140   : > { %v1671_v4 = vadd.f32 %v1655_v3, %v1597_v20 }
 0x141   : > { %v1686_v2 = vadd.f32 %v3429_v32, %v1670_v53 }
 0x142   : > { %v1687_v61 = vadd.f32 %v3429_v32, %v1671_v4 }
 0x143   : > { %v1782_v26 = vadd.f32 %v1781_v13, %v1686_v2  ;;  %v1805_v38 = vmul.f32 %v1686_v2, %v1686_v2 }
 0x144   : > { %v2251_v47 = vpack.c.bf16 %v1687_v61, %v1686_v2  ;;  %v1806_v49 = vmul.f32 %v1687_v61, %v1687_v61 }
 0x145   : > { %v1783_v1 = vadd.f32 %v1782_v26, %v1687_v61  ;;  %v1820_v32 = vadd.f32 %v1819_v31, %v1805_v38 }
 0x146   : > { %2267 = vst [vmem:[%s2945_s25 + $0x78] sm:$0xff] %v2251_v47  }
 0x147   : > { %2463 = shalt.err (!%p2460_p11)
}
 0x148   : > { %s2464_s9 = scalar_lea.hbm %s3641_s21, 2048  ;;  %s2468_s23 = scalar_lea.hbm %s3728_s3, 4096 }
 0x149   : > { %p2465_p0 = scmp.ne.s32.totalorder %s3641_s21, %s2464_s9  ;;  %p2469_p6 = scmp.lt.u32.totalorder %s3641_s21, %s3728_s3 }
 0x14a   : > { %p2470_p7 = scmp.lt.u32.totalorder %s2468_s23, %s2464_s9  ;;  %p2472_p8 = scmp.lt.u32.totalorder %s2464_s9, %s3641_s21 }
 0x14b   : > { %p2466_p4 = pnand %p2465_p0, %p3744_p12 }
 0x14c   : > { %p2471_p2 = por %p2470_p7, %p2469_p6 }
 0x14d   : > { %p2467_p13 = pneg %p2466_p4 }
 0x14e   : > { %p2473_p1 = por %p2472_p8, %p2471_p2 }
 0x150   : > { %p2474_p10 = pnand %p2473_p1, %p2467_p13 }
 0x152   : > { %2477 = shalt.err (!%p2474_p10)
}
 0x153   : > { %s2579_s29 = smov 64   ;;  %s2580_s14 = smov 4   ;;  %v988_v51 = vadd.f32 %v987_v0, %v986_v60  ;;  %v1784_v12 = vrot.slane %v1783_v1, 4  ;;  %v1821_v42 = vadd.f32 %v1820_v32, %v1806_v49  ;;  %v1026_v63 = vadd.f32 %v1025_v59, %v1024_v11 }
 0x154   : > { %2278 = dma.vmem_to_hbm [thread:$0]  (%p3744_p12), %s3643_s13, 2048, %s3641_s21, %s1832_s12, %s2579_s29, %s2579_s29, %s2580_s14  }
 0x155   : > { %v1785_v14 = vadd.f32 %v1784_v12, %v1783_v1  ;;  %v1822_v28 = vrot.slane %v1821_v42, 4  ;;  %v989_v5 = vrot.slane %v988_v51, 1  ;;  %s2020_s24 = sshll.u32 %s2796_s6, 1  ;;  %v1027_v33 = vrot.slane %v1026_v63, 1  ;;  %s2136_s12 = sshll.u32 %s2560_s18, 5 }
 0x156   : > { %s286_s13 = scalar_lea.vmem [#allocation9], %s2020_s24  ;;  %s3677_s7 = scalar_lea.hbm %s3729_s4, %s2136_s12 }
 0x157   : > { %v1786_v52 = vrot.slane %v1785_v14, 2  ;;  %v1823_v57 = vadd.f32 %v1822_v28, %v1821_v42  ;;  %v990_v54 = vadd.f32 %v989_v5, %v988_v51  ;;  %v1028_v41 = vadd.f32 %v1027_v33, %v1026_v63  ;;  %s1868_s21 = sshll.u32 %s286_s13, 4  ;;  %s1837_s9 = scalar_lea.sflag [#allocation10], %s2796_s6  ;;  %s3672_s21 = int_to_ptr.vmem [resolvable:$true] %s1868_s21 }
 0x158   : > { %s2478_s11 = scalar_lea.vmem %s3672_s21, 32  ;;  %s2581_s18 = smov [#allocation9]  }
 0x159   : > { %v1787_v7 = vadd.f32 %v1786_v52, %v1785_v14  ;;  %v1824_v62 = vrot.slane %v1823_v57, 2  ;;  %p2479_p3 = scmp.ne.s32.totalorder %s3672_s21, %s2478_s11  ;;  %s2482_s8 = sshll.u32 %s2581_s18, 4  ;;  %s2483_s8 = int_to_ptr.vmem [resolvable:$false] %s2482_s8 }
 0x15a   : > { %s2484_s23 = scalar_lea.vmem %s2483_s8, 64  ;;  %p2485_p11 = scmp.lt.s32.totalorder %s3672_s21, %s2483_s8 }
 0x15b   : > { %v1788_v35 = vrot.slane %v1787_v7, 1  ;;  %v1825_v15 = vadd.f32 %v1824_v62, %v1823_v57  ;;  %p2480_p5 = pnand %p2479_p3, %p3744_p12  ;;  %p2486_p0 = scmp.lt.s32.totalorder %s2484_s23, %s2478_s11 }
 0x15d   : > { %v1789_v27 = vadd.f32 %v1788_v35, %v1787_v7  ;;  %v1826_v39 = vrot.slane %v1825_v15, 1  ;;  %p2481_p9 = pneg %p2480_p5  ;;  %p2487_p4 = por %p2486_p0, %p2485_p11 }
 0x15f   : > { %v1790_v16 = vadd.f32 %v1789_v27, %v990_v54  ;;  %v1827_v19 = vadd.f32 %v1826_v39, %v1825_v15  ;;  %p2488_p13 = pnand %p2487_p4, %p2481_p9 }
 0x161   : > { %v1828_v30 = vadd.f32 %v1827_v19, %v1028_v41 }
 0x163   : > { %v1829_v55 = vsel %vm320_vm0, %v1790_v16, %v1828_v30 }
 0x164   : > { %1830 = vst [vmem:[%s286_s13] sm:$0x3] %v1829_v55 }
 0x165   : > { %2491 = shalt.err (!%p2488_p13)
}
 0x166   : > { %s2492_s6 = scalar_lea.hbm %s3677_s7, 32  ;;  %s2496_s29 = scalar_lea.hbm %s3729_s4, 64 }
 0x167   : > { %p2493_p6 = scmp.ne.s32.totalorder %s3677_s7, %s2492_s6  ;;  %p2497_p8 = scmp.lt.u32.totalorder %s3677_s7, %s3729_s4 }
 0x168   : > { %p2498_p1 = scmp.lt.u32.totalorder %s2496_s29, %s2492_s6  ;;  %p2500_p3 = scmp.lt.u32.totalorder %s2492_s6, %s3677_s7 }
 0x169   : > { %p2494_p7 = pnand %p2493_p6, %p3744_p12 }
 0x16a   : > { %p2499_p10 = por %p2498_p1, %p2497_p8 }
 0x16b   : > { %p2495_p2 = pneg %p2494_p7 }
 0x16c   : > { %p2501_p5 = por %p2500_p3, %p2499_p10 }
 0x16e   : > { %p2502_p9 = pnand %p2501_p5, %p2495_p2 }
 0x170   : > { %2505 = shalt.err (!%p2502_p9)
}
 0x171   : > { %2279 = dma.vmem_to_hbm [thread:$0]  (%p3744_p12), %s3672_s21, 32, %s3677_s7, %s1837_s9  }
 0x172 PF: > { %s1880_s13 = sand.u32 1, %s2548_s15   ;;  %p3745_p11 = scmp.ne.s32.totalorder %s3737_s26, 0 }
 0x173   : > { %p3746_p0 = scmp.ge.s32.totalorder %s2568_s20, 2  ;;  %s1881_s12 = scalar_lea.sflag [#allocation4], %s1880_s13 }
 0x175   : > { %p2294_p4 = pnand %p3746_p0, %p3745_p11 }
 0x177   : > { %2539 = dma.done.wait (!%p2294_p4), %s1881_s12, 2048  }
 0x178   : > { %2541 = vsyncadd (!%p2294_p4), %s1881_s12, 4294965248  ;;  %s1890_s5 = scalar_lea.sflag [#allocation10], %s1880_s13 }
 0x179   : > { %2543 = dma.done.wait (!%p2294_p4), %s1890_s5, 32  }
 0x17a   : > { %2545 = vsyncadd (!%p2294_p4), %s1890_s5, 4294967264  ;;  %s25_s20 = sadd.s32 1, %s2568_s20   ;;  %s3747_s15 = smov %s2552_s16 }
 0x17b   : > { %p22_p13 = scmp.ge.s32.totalorder %s25_s20, 4   ;;  %s3748_s16 = smov %s2556_s17 }
 0x17c   : > { %s3749_s17 = smov %s2750_s10  ;;  %s3750_s18 = smov %s2564_s19 }
 0x17d   : > { %s3751_s19 = smov %s3753_s28  ;;  %24 = sbr.rel (!%p22_p13) target bundleno = 9 (0x9), region = 109 }
 0x184   :  { %1895 = vsyncpa [#allocation3], 1 }
 0x185   :  { %1897 = vsyncpa [#allocation3 + $0x1], 1 }
 0x186   :  { %1898 = vsyncpa [#allocation6], 1 }
 0x187   :  { %1899 = vsyncpa [#allocation4], 1 }
 0x188   :  { %1901 = vsyncpa [#allocation4 + $0x1], 1 }
 0x189   :  { %1902 = vsyncpa [#allocation10], 1 }
 0x18a   :  { %1904 = vsyncpa [#allocation10 + $0x1], 1 }

// kernel: convmixer_block_forward.5
= control target key start
LH: loop header
LB: loop body
LE: loop exit
PB: predicated region body
PF: predicated region fallthrough
CT: control target
= control target key end

     0   :  { %s4482_s0 = inlined_call_operand.hbm [shape: bf16[2,16,16,128], index: 0, kind: input, shape index: {}]   ;;  %s4483_s1 = inlined_call_operand.hbm [shape: f32[1,128], index: 1, kind: input, shape index: {}]   ;;  %s4484_s2 = inlined_call_operand.hbm [shape: f32[1,128], index: 2, kind: input, shape index: {}]   ;;  %s4485_s3 = inlined_call_operand.hbm [shape: f32[3,3,128], index: 3, kind: input, shape index: {}]   ;;  %s4486_s4 = inlined_call_operand.hbm [shape: f32[1,128], index: 4, kind: input, shape index: {}]   ;;  %s4487_s5 = inlined_call_operand.hbm [shape: bf16[2,16,16,128], index: 5, kind: output, shape index: {0}]   ;;  %s4488_s6 = inlined_call_operand.hbm [shape: f32[2,2,128], index: 6, kind: output, shape index: {1}]  }
   0x1   :  { %4495 = sst [smem:[#allocation21_spill]] %s4483_s1 }
   0x2   :  { %12 = vsyncpa [#allocation4], 0 }
   0x3   :  { %14 = vsyncpa [#allocation4 + $0x1], 0 }
   0x4   :  { %15 = vsyncpa [#allocation7], 0 }
   0x5   :  { %16 = vsyncpa [#allocation10], 0 }
   0x6   :  { %17 = vsyncpa [#allocation5], 0 }
   0x7   :  { %19 = vsyncpa [#allocation5 + $0x1], 0 }
   0x8   :  { %20 = vsyncpa [#allocation14], 0 }
   0x9   :  { %22 = vsyncpa [#allocation14 + $0x1], 0  ;;  %s3251_s21 = smov 0   ;;  %s3253_s22 = smov 0  }
   0xa   :  { %s3255_s23 = smov 0   ;;  %s3257_s24 = smov 0  }
   0xb   :  { %s3259_s25 = smov 0   ;;  %s3261_s26 = smov 0  }
   0xc LB: > { %s2457_s27 = sadd.s32 4294967295, %s3202_s26   ;;  %s2458_s28 = sadd.s32 4294967294, %s3202_s26   ;;  %s3202_s26 = sphi %s3261_s26, %s28_s26   ;;  %s3198_s25 = sphi %s3259_s25, %s4519_s25   ;;  %s3194_s24 = sphi %s3257_s24, %s4518_s24   ;;  %s3190_s23 = sphi %s3255_s23, %s4517_s23   ;;  %s3186_s22 = sphi %s3253_s22, %s4516_s22   ;;  %s3182_s21 = sphi %s3251_s21, %s4515_s21  }
   0xd   : > { %p62_p0 = scmp.ne.s32.totalorder %s3186_s22, %s3182_s21  ;;  %p3285_p1 = scmp.eq.s32.totalorder %s2457_s27, 0 }
   0xe   : > { %p3289_p2 = scmp.eq.s32.totalorder %s2457_s27, 1  ;;  %p198_p3 = scmp.eq.s32.totalorder %s2458_s28, 1 }
   0xf   : > { %s4496_s29 = scalar_select %p3285_p1, 1, 0 }
  0x10   : > { %s4497_s30 = scalar_select %p3289_p2, 1, 0 }
  0x11   : > { %p3295_p4 = por %p3285_p1, %p62_p0  ;;  %p2459_p5 = scmp.ge.s32.totalorder %s3202_s26, 1 }
  0x12   : > { %p3300_p6 = por %p198_p3, %p62_p0  ;;  %p233_p7 = scmp.lt.s32.totalorder %s3202_s26, 3 }
  0x13   : > { %s4498_s7 = scalar_select %p3295_p4, 1, 0 }
  0x14   : > { %s4499_s8 = scalar_select %p3300_p6, 1, 0 }
  0x15   : > { %p3305_p8 = pnand %p2459_p5, %p233_p7  ;;  %s3204_s10 = smov [#allocation6]  }
  0x16   : > { %4500 = sst [smem:[#allocation20_spill]] %s4499_s8  ;;  %s248_s11 = sshll.u32 %s3204_s10, 4  ;;  %s249_s11 = int_to_ptr.vmem [resolvable:$true] %s248_s11 }
  0x17   : > { %s4501_s9 = scalar_select %p3305_p8, 1, 0 }
  0x18   : > { %p2780_p10 = pneg %p3305_p8  ;;  %s3205_s12 = smov [#allocation9]  }
  0x19   : > { %s273_s13 = sshll.u32 %s3205_s12, 4  ;;  %s3206_s15 = smov [#allocation8]   ;;  %s3318_s13 = int_to_ptr.vmem [resolvable:$true] %s273_s13 }
  0x1a   : > { %p3314_p11 = pnand %p2780_p10, %p3285_p1  ;;  %s3320_s16 = sshll.u32 %s3206_s15, 4  ;;  %s262_s16 = int_to_ptr.vmem [resolvable:$true] %s3320_s16 }
  0x1b   : > { %s4503_s1 = sld [smem:[#allocation21_spill]] }
  0x1c   : > { %p3330_p13 = pneg %p3314_p11 }
  0x21   : > { %s2938_s19 = scalar_lea.hbm %s4503_s1, 16 }
  0x22   : > { %p2939_p12 = scmp.ne.s32.totalorder %s4503_s1, %s2938_s19  ;;  %p2945_p5 = scmp.lt.u32.totalorder %s2938_s19, %s4503_s1 }
  0x24   : > { %p2941_p0 = pnand %p3330_p13, %p2939_p12 }
  0x26   : > { %p2942_p3 = pneg %p2941_p0 }
  0x28   : > { %p2947_p7 = pnand %p2945_p5, %p2942_p3 }
  0x2a   : > { %2950 = shalt.err (!%p2947_p7)
}
  0x2b   : > { %s2951_s15 = scalar_lea.vmem %s249_s11, 16  ;;  %s2958_s17 = scalar_lea.vmem %s249_s11, 32 }
  0x2c   : > { %p2952_p10 = scmp.ne.s32.totalorder %s249_s11, %s2951_s15  ;;  %p2959_p1 = scmp.lt.s32.totalorder %s249_s11, %s249_s11 }
  0x2d   : > { %p2960_p4 = scmp.lt.s32.totalorder %s2958_s17, %s2951_s15 }
  0x2e   : > { %p2954_p9 = pnand %p2952_p10, %p3330_p13 }
  0x2f   : > { %p2961_p8 = por %p2960_p4, %p2959_p1 }
  0x30   : > { %p2955_p6 = pneg %p2954_p9 }
  0x32   : > { %p2962_p2 = pnand %p2961_p8, %p2955_p6 }
  0x34   : > { %2965 = shalt.err (!%p2962_p2)
}
  0x35   : > { %2783 = dma.hbm_to_vmem [thread:$0]  (!%p3314_p11), %s4503_s1, 16, %s249_s11, [#allocation7]  }
  0x36   : > { %s2966_s10 = scalar_lea.hbm %s4485_s3, 192 }
  0x37   : > { %p2967_p9 = scmp.ne.s32.totalorder %s4485_s3, %s2966_s10  ;;  %p2973_p2 = scmp.lt.u32.totalorder %s2966_s10, %s4485_s3 }
  0x39   : > { %p2969_p12 = pnand %p2967_p9, %p3330_p13 }
  0x3b   : > { %p2970_p1 = pneg %p2969_p12 }
  0x3d   : > { %p2975_p4 = pnand %p2973_p2, %p2970_p1 }
  0x3f   : > { %2978 = shalt.err (!%p2975_p4)
}
  0x40   : > { %s2979_s11 = scalar_lea.vmem %s3318_s13, 192  ;;  %p2987_p3 = scmp.lt.s32.totalorder %s3318_s13, %s3318_s13 }
  0x41   : > { %p2980_p6 = scmp.ne.s32.totalorder %s3318_s13, %s2979_s11  ;;  %p2988_p5 = scmp.lt.s32.totalorder %s2979_s11, %s2979_s11 }
  0x43   : > { %p2982_p8 = pnand %p2980_p6, %p3330_p13  ;;  %p2989_p7 = por %p2988_p5, %p2987_p3 }
  0x45   : > { %p2983_p0 = pneg %p2982_p8 }
  0x47   : > { %p2990_p10 = pnand %p2989_p7, %p2983_p0 }
  0x49   : > { %2993 = shalt.err (!%p2990_p10)
}
  0x4a   : > { %s4494_s8 = smov 64   ;;  %s3208_s18 = smov 4  }
  0x4b   : > { %2789 = dma.hbm_to_vmem [thread:$0]  (!%p3314_p11), %s4485_s3, 192, %s3318_s13, [#allocation10], %s4494_s8, %s4494_s8, %s3208_s18  }
  0x4c   : > { %s2994_s12 = scalar_lea.hbm %s4484_s2, 16 }
  0x4d   : > { %p2995_p9 = scmp.ne.s32.totalorder %s4484_s2, %s2994_s12  ;;  %p3001_p2 = scmp.lt.u32.totalorder %s2994_s12, %s4484_s2 }
  0x4f   : > { %p2997_p12 = pnand %p2995_p9, %p3330_p13 }
  0x51   : > { %p2998_p1 = pneg %p2997_p12 }
  0x53   : > { %p3003_p4 = pnand %p3001_p2, %p2998_p1 }
  0x55   : > { %3006 = shalt.err (!%p3003_p4)
}
  0x56   : > { %s3007_s20 = scalar_lea.vmem %s262_s16, 16  ;;  %s3014_s13 = scalar_lea.vmem %s262_s16, 32 }
  0x57   : > { %p3008_p6 = scmp.ne.s32.totalorder %s262_s16, %s3007_s20  ;;  %p3015_p3 = scmp.lt.s32.totalorder %s262_s16, %s262_s16 }
  0x58   : > { %p3016_p5 = scmp.lt.s32.totalorder %s3014_s13, %s3007_s20 }
  0x59   : > { %p3010_p8 = pnand %p3008_p6, %p3330_p13 }
  0x5a   : > { %p3017_p7 = por %p3016_p5, %p3015_p3 }
  0x5b   : > { %p3011_p0 = pneg %p3010_p8 }
  0x5d   : > { %p3018_p10 = pnand %p3017_p7, %p3011_p0 }
  0x5f   : > { %3021 = shalt.err (!%p3018_p10)
}
  0x60   : > { %2786 = dma.hbm_to_vmem [thread:$0]  (!%p3314_p11), %s4484_s2, 16, %s262_s16, [#allocation7]  }
  0x61   : > { %s3209_s1 = smov [#allocation11]   ;;  %s3022_s17 = scalar_lea.hbm %s4486_s4, 16 }
  0x62   : > { %s289_s10 = sshll.u32 %s3209_s1, 4  ;;  %p3023_p9 = scmp.ne.s32.totalorder %s4486_s4, %s3022_s17  ;;  %s290_s10 = int_to_ptr.vmem [resolvable:$true] %s289_s10 }
  0x63   : > { %p3029_p2 = scmp.lt.u32.totalorder %s3022_s17, %s4486_s4 }
  0x64   : > { %p3025_p12 = pnand %p3023_p9, %p3330_p13 }
  0x66   : > { %p3026_p1 = pneg %p3025_p12 }
  0x68   : > { %p3031_p4 = pnand %p3029_p2, %p3026_p1 }
  0x6a   : > { %3034 = shalt.err (!%p3031_p4)
}
  0x6b   : > { %s3035_s16 = scalar_lea.vmem %s290_s10, 16  ;;  %s3042_s19 = scalar_lea.vmem %s290_s10, 32 }
  0x6c   : > { %p3036_p6 = scmp.ne.s32.totalorder %s290_s10, %s3035_s16  ;;  %p3043_p3 = scmp.lt.s32.totalorder %s290_s10, %s290_s10 }
  0x6d   : > { %p3044_p5 = scmp.lt.s32.totalorder %s3042_s19, %s3035_s16 }
  0x6e   : > { %p3038_p8 = pnand %p3036_p6, %p3330_p13 }
  0x6f   : > { %p3045_p7 = por %p3044_p5, %p3043_p3 }
  0x70   : > { %p3039_p0 = pneg %p3038_p8 }
  0x72   : > { %p3046_p10 = pnand %p3045_p7, %p3039_p0 }
  0x74   : > { %3049 = shalt.err (!%p3046_p10)
}
  0x75   : > { %2792 = dma.hbm_to_vmem [thread:$0]  (!%p3314_p11), %s4486_s4, 16, %s290_s10, [#allocation10]  }
  0x76   : > { %s40_s28 = sadd.s32 1, %s3198_s25  ;;  %s49_s1 = sadd.s32 1, %s3190_s23 }
  0x77   : > { %p42_p13 = scmp.ge.s32.totalorder %s40_s28, 2  ;;  %p56_p9 = scmp.ne.s32.totalorder %s3190_s23, %s3186_s22 }
  0x78   : > { %p57_p12 = scmp.eq.s32.totalorder %s3202_s26, 0  ;;  %p2808_p1 = scmp.lt.s32.totalorder %s3202_s26, 2 }
  0x79   : > { %s4521_s28 = smov (%p42_p13, %s40_s28), 0  ;;  %p4505_p4 = scmp.ne.s32.totalorder %s4497_s30, 0 }
  0x7a   : > { %p58_p2 = por %p57_p12, %p56_p9  ;;  %s44_s12 = ssub.s32 %s3198_s25, %s4521_s28 }
  0x7b   : > { %p3419_p6 = por %p4505_p4, %p56_p9  ;;  %s300_s15 = sand.u32 1, %s3190_s23  }
  0x7c   : > { %p47_p8 = scmp.eq.s32.totalorder %s44_s12, 0  ;;  %s2465_s10 = sshll.u32 %s300_s15, 7 }
  0x7d   : > { %s2550_s17 = sshll.u32 %s3198_s25, 11  ;;  %s304_s30 = scalar_lea.vmem [#allocation3], %s2465_s10 }
  0x7e   : > { %s3428_s11 = scalar_select %p47_p8, %s3190_s23, %s49_s1  }
  0x7f   : > { %s3433_s16 = scalar_lea.hbm %s4482_s0, %s2550_s17  ;;  %s312_s19 = sshll.u32 %s304_s30, 4  ;;  %s3441_s19 = int_to_ptr.vmem [resolvable:$true] %s312_s19 }
  0x80   : > { %p3437_p11 = pnand %p2808_p1, %p58_p2  ;;  %s3443_s27 = scalar_lea.sflag [#allocation4], %s300_s15 }
  0x81   : > { %s3050_s1 = scalar_lea.hbm %s3433_s16, 2048  ;;  %s3055_s17 = scalar_lea.hbm %s4482_s0, 4096 }
  0x82   : > { %p3051_p0 = scmp.ne.s32.totalorder %s3433_s16, %s3050_s1  ;;  %p3052_p3 = pneg %p3437_p11 }
  0x83   : > { %p3056_p10 = scmp.lt.u32.totalorder %s3433_s16, %s4482_s0  ;;  %p3057_p13 = scmp.lt.u32.totalorder %s3055_s17, %s3050_s1 }
  0x84   : > { %p3053_p5 = pnand %p3052_p3, %p3051_p0  ;;  %p3059_p12 = scmp.lt.u32.totalorder %s3050_s1, %s3433_s16 }
  0x85   : > { %p3058_p9 = por %p3057_p13, %p3056_p10 }
  0x86   : > { %p3054_p7 = pneg %p3053_p5 }
  0x87   : > { %p3060_p1 = por %p3059_p12, %p3058_p9 }
  0x89   : > { %p3061_p2 = pnand %p3060_p1, %p3054_p7 }
  0x8b   : > { %3064 = shalt.err (!%p3061_p2)
}
  0x8c   : > { %s3065_s15 = scalar_lea.vmem %s3441_s19, 2048  ;;  %s3210_s30 = smov [#allocation3]  }
  0x8d   : > { %p3066_p4 = scmp.ne.s32.totalorder %s3441_s19, %s3065_s15  ;;  %s3070_s12 = sshll.u32 %s3210_s30, 4  ;;  %s3071_s12 = int_to_ptr.vmem [resolvable:$false] %s3070_s12 }
  0x8e   : > { %s3072_s10 = scalar_lea.vmem %s3071_s12, 4096  ;;  %p3073_p5 = scmp.lt.s32.totalorder %s3441_s19, %s3071_s12 }
  0x8f   : > { %p3068_p8 = pnand %p3066_p4, %p3052_p3  ;;  %p3074_p10 = scmp.lt.s32.totalorder %s3072_s10, %s3065_s15 }
  0x91   : > { %p3069_p0 = pneg %p3068_p8  ;;  %p3075_p13 = por %p3074_p10, %p3073_p5 }
  0x93   : > { %p3076_p9 = pnand %p3075_p13, %p3069_p0 }
  0x95   : > { %3079 = shalt.err (!%p3076_p9)
}
  0x96   : > { %s4508_s1 = smov 64   ;;  %p4509_p3 = scmp.ne.s32.totalorder %s4501_s9, 0 }
  0x97   : > { %2796 = dma.hbm_to_vmem [thread:$0]  (!%p3437_p11), %s3433_s16, 2048, %s3441_s19, %s3443_s27, %s4508_s1, %s4508_s1, %s3208_s18  }
  0x98   : > { %324 = sbr.rel (%p4509_p3) target bundleno = 488 (0x1e8), region = 40  ;;  %s3477_s17 = sand.u32 (!%p4509_p3), 1, %s3186_s22  }
  0x99   : > { %s2469_s20 = sshll.u32 (!%p4509_p3), %s3477_s17, 7  ;;  %s327_s13 = scalar_lea.sflag (!%p4509_p3), [#allocation4], %s3477_s17 }
  0x9a   : > { %s3483_s8 = scalar_lea.vmem (!%p4509_p3), [#allocation3], %s2469_s20  ;;  %p4510_p7 = scmp.ne.s32.totalorder (!%p4509_p3), %s4498_s7, 0 }
  0x9f   : > { %3161 = dma.done.wait (%p4510_p7), %s327_s13, 2048  }
  0xa0   : > { %3163 = vsyncadd (%p4510_p7), %s327_s13, 4294965248  ;;  %p4511_p11 = scmp.ne.s32.totalorder %s4496_s29, 0 }
  0xa2   : > { %3165 = dma.done.wait (%p4511_p11), [#allocation7], 32  }
  0xa3   : > { %3167 = vsyncadd (%p4511_p11), [#allocation7], 4294967264 }
  0xa4   : > { %3169 = dma.done.wait (%p4511_p11), [#allocation10], 208  }
  0xa5   : > { %3171 = vsyncadd (%p4511_p11), [#allocation10], 4294967088  ;;  %v797_v0 = vlaneseq  ;;  %v2585_v2 = vld [vmem:[%s3483_s8] sm:$0xff]   ;;  %v2728_v5 = vld [vmem:[%s3483_s8 + $0x8] sm:$0xff]   ;;  %v3211_v12 = vmov 0.0   ;;  %vm749_vm0 = vcmask 1040384  }
  0xa6   : > { %v2586_v3 = vunpack.c.l.bf16 %v2585_v2  ;;  %v2587_v4 = vunpack.c.h.bf16 %v2585_v2  ;;  %v3503_v8 = vld [vmem:[#allocation6] ss:$0 sm:$0xff]  ;;  %v2590_v9 = vunpack.c.l.bf16 %v2728_v5  ;;  %v2591_v10 = vunpack.c.h.bf16 %v2728_v5  ;;  %v716_v11 = vld [vmem:[#allocation9] sm:$0x7]  ;;  %v3513_v18 = vld [vmem:[#allocation8] ss:$0 sm:$0xff] }
  0xa7   : > { %v798_v1 = vshrl.u32 %v797_v0, 7  ;;  %v3505_v13 = vrot.slane %v3211_v12, 7  ;;  %v3511_v17 = vrot.slane %v3211_v12, 1  ;;  %vm852_vm1 = vcmask 1046528   ;;  %v717_v23 = vld [vmem:[#allocation9 + $0x4] sm:$0x7] }
  0xa8   : > { %v420_v15 = vmul.f32 %v2586_v3, %v3503_v8  ;;  %v421_v16 = vmul.f32 %v2587_v4, %v3503_v8  ;;  %v422_v19 = vmul.f32 %v2590_v9, %v3503_v8  ;;  %v423_v20 = vmul.f32 %v2591_v10, %v3503_v8  ;;  %v2729_v36 = vld [vmem:[%s3483_s8 + $0x10] sm:$0xff]   ;;  %v2730_v40 = vld [vmem:[%s3483_s8 + $0x18] sm:$0xff]   ;;  %v2731_v44 = vld [vmem:[%s3483_s8 + $0x20] sm:$0xff]   ;;  %s3705_s29 = scalar_lea.vmem [#allocation12], %s2469_s20  ;;  %s2583_s7 = sshll.u32 %s3194_s24, 11 }
  0xa9   : > { %v3499_v6 = vsub.s32 0, %v798_v1  ;;  %v3501_v7 = vsub.s32 1, %v798_v1  ;;  %v3507_v14 = vsub.s32 2, %v798_v1  ;;  %v3529_v28 = vsel %vm749_vm0, 0.0, %v3505_v13  ;;  %v2732_v51 = vld [vmem:[%s3483_s8 + $0x28] sm:$0xff]   ;;  %s2279_s9 = sshll.u32 %s3705_s29, 4  ;;  %s4398_s19 = scalar_lea.hbm %s4487_s5, %s2583_s7  ;;  %s4400_s9 = int_to_ptr.vmem [resolvable:$true] %s2279_s9 }
  0xaa   : > { %v442_v21 = vadd.f32 %v3513_v18, %v420_v15  ;;  %v443_v22 = vadd.f32 %v3513_v18, %v421_v16  ;;  %v444_v26 = vadd.f32 %v3513_v18, %v422_v19  ;;  %v445_v27 = vadd.f32 %v3513_v18, %v423_v20  ;;  %v718_v56 = vld [vmem:[#allocation9 + $0x8] sm:$0x7]  ;;  %s2260_s27 = scalar_lea.sflag [#allocation5], %s3477_s17  ;;  %s3080_s15 = scalar_lea.vmem %s4400_s9, 2048 }
  0xab   : > { %v3520_v24 = vrot.slane %v716_v11, %v3499_v6  ;;  %v3523_v25 = vrot.slane %v716_v11, %v3501_v7  ;;  %v3532_v29 = vrot.slane %v716_v11, %v3507_v14  ;;  %v3536_v32 = vsel %vm852_vm1, %v3511_v17, 0.0  ;;  %p3081_p12 = scmp.ne.s32.totalorder %s4400_s9, %s3080_s15  ;;  %s3212_s30 = smov [#allocation12]  }
  0xac   : > { %v474_v30 = vmul.f32 0.70710677, %v442_v21  ;;  %v475_v31 = vmul.f32 0.70710677, %v443_v22  ;;  %v476_v33 = vmul.f32 0.70710677, %v444_v26  ;;  %v3539_v35 = vrot.slane %v717_v23, %v3499_v6 }
  0xad   : > { %v477_v34 = vmul.f32 0.70710677, %v445_v27  ;;  %v801_v37 = vmul.f32 %v3520_v24, %v3529_v28  ;;  %v802_v38 = vmul.f32 %v3520_v24, %v3505_v13  ;;  %v821_v39 = vmul.f32 0.0, %v3523_v25  ;;  %p3082_p1 = pnand %p3081_p12, %p3419_p6  ;;  %s3084_s12 = sshll.u32 %s3212_s30, 4  ;;  %s3085_s12 = int_to_ptr.vmem [resolvable:$false] %s3084_s12 }
  0xae   : > { %2871 = verf.f32 %v474_v30  ;;  %v904_v41 = vmul.f32 %v3532_v29, %v3511_v17  ;;  %v905_v42 = vmul.f32 %v3532_v29, %v3536_v32  ;;  %v3553_v43 = vrot.slane %v717_v23, %v3501_v7  ;;  %s3086_s10 = scalar_lea.vmem %s3085_s12, 4096  ;;  %p3087_p4 = scmp.lt.s32.totalorder %s4400_s9, %s3085_s12 }
  0xaf   : > { %2873 = verf.f32 %v475_v31  ;;  %v458_v45 = vmul.f32 0.5, %v442_v21  ;;  %v459_v46 = vmul.f32 0.5, %v443_v22  ;;  %v2594_v47 = vunpack.c.l.bf16 %v2729_v36  ;;  %p3083_p2 = pneg %p3082_p1  ;;  %p3088_p8 = scmp.lt.s32.totalorder %s3086_s10, %s3080_s15 }
  0xb0   : > { %2875 = verf.f32 %v476_v33  ;;  %v2595_v48 = vunpack.c.h.bf16 %v2729_v36  ;;  %v2598_v49 = vunpack.c.l.bf16 %v2730_v40  ;;  %v2599_v50 = vunpack.c.h.bf16 %v2730_v40 }
  0xb1   : > { %2877 = verf.f32 %v477_v34  ;;  %v460_v52 = vmul.f32 0.5, %v444_v26  ;;  %v424_v53 = vmul.f32 %v2594_v47, %v3503_v8  ;;  %v2602_v54 = vunpack.c.l.bf16 %v2731_v44  ;;  %p3089_p0 = por %p3088_p8, %p3087_p4 }
  0xb2   : > { %v2603_v55 = vunpack.c.h.bf16 %v2731_v44  ;;  %v836_v57 = vadd.f32 %v821_v39, %v801_v37  ;;  %v837_v58 = vadd.f32 %v821_v39, %v802_v38  ;;  %v425_v59 = vmul.f32 %v2595_v48, %v3503_v8 }
  0xb3   : > { %v426_v60 = vmul.f32 %v2598_v49, %v3503_v8  ;;  %v446_v61 = vadd.f32 %v3513_v18, %v424_v53  ;;  %v427_v62 = vmul.f32 %v2599_v50, %v3503_v8  ;;  %v2606_v63 = vunpack.c.l.bf16 %v2732_v51  ;;  %p3090_p5 = pnand %p3089_p0, %p3083_p2 }
  0xb4   : > { %v2607_v0 = vunpack.c.h.bf16 %v2732_v51  ;;  %v461_v1 = vmul.f32 0.5, %v445_v27  ;;  %v447_v2 = vadd.f32 %v3513_v18, %v425_v59  ;;  %v428_v4 = vmul.f32 %v2602_v54, %v3503_v8 }
  0xb5   : > { %v448_v3 = vadd.f32 %v3513_v18, %v426_v60  ;;  %v3566_v5 = vrot.slane %v717_v23, %v3507_v14  ;;  %v3569_v9 = vrot.slane %v718_v56, %v3499_v6  ;;  %v3572_v10 = vrot.slane %v718_v56, %v3501_v7 }
  0xb6   : > { %v429_v11 = vmul.f32 %v2603_v55, %v3503_v8  ;;  %v3575_v12 = vadd.f32 %v904_v41, %v836_v57  ;;  %v3577_v15 = vadd.f32 %v905_v42, %v837_v58  ;;  %v3580_v16 = vrot.slane %v718_v56, %v3507_v14 }
  0xb7   : > { %v478_v19 = vmul.f32 0.70710677, %v446_v61  ;;  %v479_v21 = vmul.f32 0.70710677, %v447_v2  ;;  %v449_v22 = vadd.f32 %v3513_v18, %v427_v62  ;;  %v430_v6 = vmul.f32 %v2606_v63, %v3503_v8 }
  0xb8   : > { %v2872_v20 = vpop.eup %2871  ;;  %v431_v23 = vmul.f32 %v2607_v0, %v3503_v8  ;;  %v3585_v27 = vmul.f32 0.5, %v446_v61  ;;  %v480_v30 = vmul.f32 0.70710677, %v448_v3  ;;  %v450_v31 = vadd.f32 %v3513_v18, %v428_v4 }
  0xb9   : > { %v2874_v7 = vpop.eup %2873  ;;  %v506_v26 = vadd.f32 1.0, %v2872_v20  ;;  %v3588_v14 = vmul.f32 0.5, %v447_v2  ;;  %v3590_v36 = vmul.f32 0.5, %v448_v3  ;;  %v3593_v37 = vadd.f32 %v3513_v18, %v429_v11 }
  0xba   : > { %v2876_v33 = vpop.eup %2875  ;;  %v507_v34 = vadd.f32 1.0, %v2874_v7  ;;  %2879 = verf.f32 %v478_v19  ;;  %v3597_v41 = vmul.f32 0.5, %v449_v22  ;;  %v481_v47 = vmul.f32 0.70710677, %v449_v22 }
  0xbb   : > { %v2878_v38 = vpop.eup %2877  ;;  %v508_v39 = vadd.f32 1.0, %v2876_v33  ;;  %v3595_v40 = vmul.f32 %v506_v26, %v458_v45  ;;  %2881 = verf.f32 %v479_v21  ;;  %v3603_v49 = vmul.f32 0.5, %v450_v31 }
  0xbc   : > { %v509_v42 = vadd.f32 1.0, %v2878_v38  ;;  %v3599_v44 = vmul.f32 %v507_v34, %v459_v46  ;;  %2883 = verf.f32 %v480_v30  ;;  %v482_v50 = vmul.f32 0.70710677, %v450_v31 }
  0xbd   : > { %v3601_v48 = vmul.f32 %v508_v39, %v460_v52  ;;  %v752_v53 = vrot.slane %v3595_v40, 7  ;;  %v3610_v54 = vmul.f32 0.70710677, %v3593_v37  ;;  %v855_v55 = vrot.slane %v3595_v40, 1 }
  0xbe   : > { %v3605_v51 = vmul.f32 %v509_v42, %v461_v1  ;;  %v753_v45 = vrot.slane %v3599_v44, 7  ;;  %v856_v52 = vrot.slane %v3599_v44, 1  ;;  %v3616_v56 = vadd.f32 %v3513_v18, %v430_v6 }
  0xbf   : > { %v755_v46 = vrot.slane %v3601_v48, 7  ;;  %v858_v58 = vrot.slane %v3601_v48, 1  ;;  %2885 = verf.f32 %v481_v47  ;;  %v3621_v59 = vadd.f32 %v3513_v18, %v431_v23 }
  0xc0   : > { %v756_v57 = vrot.slane %v3605_v51, 7  ;;  %v859_v61 = vrot.slane %v3605_v51, 1  ;;  %v986_v62 = vmul.f32 %v3553_v43, %v3595_v40  ;;  %2887 = verf.f32 %v482_v50 }
  0xc1   : > { %v791_v60 = vsel %vm749_vm0, 0.0, %v755_v46  ;;  %v754_v63 = vsel %vm749_vm0, %v752_v53, %v753_v45  ;;  %v790_v1 = vsel %vm749_vm0, 0.0, %v752_v53  ;;  %v987_v2 = vmul.f32 %v3553_v43, %v3599_v44 }
  0xc2   : > { %v757_v0 = vsel %vm749_vm0, %v755_v46, %v756_v57  ;;  %v805_v3 = vmul.f32 %v3520_v24, %v791_v60  ;;  %v824_v4 = vmul.f32 %v3523_v25, %v3601_v48  ;;  %v857_v11 = vsel %vm852_vm1, %v855_v55, %v856_v52 }
  0xc3   : > { %v893_v19 = vsel %vm852_vm1, %v856_v52, 0.0  ;;  %v806_v20 = vmul.f32 %v3520_v24, %v757_v0  ;;  %v825_v21 = vmul.f32 %v3523_v25, %v3605_v51  ;;  %v860_v22 = vsel %vm852_vm1, %v858_v58, %v859_v61 }
  0xc4   : > { %v950_v6 = vmul.f32 %v3539_v35, %v790_v1  ;;  %v2880_v23 = vpop.eup %2879  ;;  %v803_v7 = vmul.f32 %v3520_v24, %v790_v1  ;;  %v804_v26 = vmul.f32 %v3520_v24, %v754_v63  ;;  %v894_v30 = vsel %vm852_vm1, %v859_v61, 0.0 }
  0xc5   : > { %v951_v31 = vmul.f32 %v3539_v35, %v754_v63  ;;  %v2882_v33 = vpop.eup %2881  ;;  %v906_v34 = vmul.f32 %v3532_v29, %v857_v11  ;;  %v907_v38 = vmul.f32 %v3532_v29, %v893_v19  ;;  %v1028_v42 = vmul.f32 %v3566_v5, %v857_v11 }
  0xc6   : > { %v966_v39 = vadd.f32 %v950_v6, %v3575_v12  ;;  %v2884_v47 = vpop.eup %2883  ;;  %v840_v50 = vadd.f32 %v824_v4, %v805_v3  ;;  %v908_v53 = vmul.f32 %v3532_v29, %v860_v22  ;;  %v1029_v46 = vmul.f32 %v3566_v5, %v893_v19 }
  0xc7   : > { %v967_v45 = vadd.f32 %v951_v31, %v3577_v15  ;;  %v841_v55 = vadd.f32 %v825_v21, %v806_v20  ;;  %v909_v52 = vmul.f32 %v3532_v29, %v894_v30  ;;  %v1145_v58 = vmul.f32 %v3569_v9, %v791_v60 }
  0xc8   : > { %v1002_v57 = vadd.f32 %v986_v62, %v966_v39  ;;  %v952_v61 = vmul.f32 %v3539_v35, %v791_v60  ;;  %v1146_v12 = vmul.f32 %v3569_v9, %v757_v0  ;;  %v1181_v1 = vmul.f32 %v3572_v10, %v3601_v48 }
  0xc9   : > { %v1003_v63 = vadd.f32 %v987_v2, %v967_v45  ;;  %v2886_v3 = vpop.eup %2885  ;;  %v510_v11 = vadd.f32 1.0, %v2880_v23  ;;  %v511_v15 = vadd.f32 1.0, %v2882_v33  ;;  %v822_v19 = vmul.f32 %v3523_v25, %v3595_v40 }
  0xca   : > { %v1044_v4 = vadd.f32 %v1028_v42, %v1002_v57  ;;  %v3661_v20 = vpop.eup %2887  ;;  %v1182_v21 = vmul.f32 %v3572_v10, %v3605_v51  ;;  %v1265_v60 = vmul.f32 %v3580_v16, %v860_v22  ;;  %v823_v2 = vmul.f32 %v3523_v25, %v3599_v44 }
  0xcb   : > { %v1045_v62 = vadd.f32 %v1029_v46, %v1003_v63  ;;  %v3669_v31 = vmul.f32 %v510_v11, %v3585_v27  ;;  %v3672_v23 = vmul.f32 %v511_v15, %v3588_v14  ;;  %v838_v33 = vadd.f32 %v822_v19, %v803_v7  ;;  %v3680_v63 = vld [vmem:[#allocation11] ss:$0 sm:$0xff] }
  0xcc   : > { %v1161_v6 = vadd.f32 %v1145_v58, %v1044_v4  ;;  %v3674_v40 = vadd.f32 %v908_v53, %v840_v50  ;;  %v953_v39 = vmul.f32 %v3539_v35, %v757_v0  ;;  %v1266_v45 = vmul.f32 %v3580_v16, %v894_v30 }
  0xcd   : > { %v1162_v42 = vadd.f32 %v1146_v12, %v1045_v62  ;;  %v758_v57 = vrot.slane %v3669_v31, 7  ;;  %v759_v44 = vrot.slane %v3672_v23, 7  ;;  %v839_v58 = vadd.f32 %v823_v2, %v804_v26 }
  0xce   : > { %v1197_v46 = vadd.f32 %v1181_v1, %v1161_v6  ;;  %v925_v27 = vadd.f32 %v909_v52, %v841_v55  ;;  %v861_v14 = vrot.slane %v3669_v31, 1  ;;  %v862_v7 = vrot.slane %v3672_v23, 1 }
  0xcf   : > { %v1198_v4 = vadd.f32 %v1182_v21, %v1162_v42  ;;  %v1030_v50 = vmul.f32 %v3566_v5, %v860_v22  ;;  %v1031_v0 = vmul.f32 %v3566_v5, %v894_v30  ;;  %v922_v12 = vadd.f32 %v906_v34, %v838_v33 }
  0xd0   : > { %v1281_v53 = vadd.f32 %v1265_v60, %v1197_v46  ;;  %v792_v11 = vsel %vm749_vm0, 0.0, %v758_v57  ;;  %v988_v26 = vmul.f32 %v3553_v43, %v3601_v48  ;;  %v989_v55 = vmul.f32 %v3553_v43, %v3605_v51 }
  0xd1   : > { %v1282_v1 = vadd.f32 %v1266_v45, %v1198_v4  ;;  %v760_v15 = vsel %vm749_vm0, %v758_v57, %v759_v44  ;;  %v923_v19 = vadd.f32 %v907_v38, %v839_v58  ;;  %v512_v62 = vadd.f32 1.0, %v2884_v47 }
  0xd2   : > { %v1303_v52 = vadd.f32 %v3680_v63, %v1281_v53  ;;  %v826_v30 = vmul.f32 %v3523_v25, %v3669_v31  ;;  %v863_v34 = vsel %vm852_vm1, %v861_v14, %v862_v7  ;;  %v513_v21 = vadd.f32 1.0, %v2886_v3 }
  0xd3   : > { %v1304_v22 = vadd.f32 %v3680_v63, %v1282_v1  ;;  %v807_v48 = vmul.f32 %v3520_v24, %v792_v11  ;;  %v827_v51 = vmul.f32 %v3523_v25, %v3672_v23  ;;  %v968_v2 = vadd.f32 %v952_v61, %v922_v12 }
  0xd4   : > { %v1421_v60 = vmul.f32 %v1303_v52, %v1303_v52  ;;  %v808_v47 = vmul.f32 %v3520_v24, %v760_v15  ;;  %v895_v42 = vsel %vm852_vm1, %v862_v7, 0.0  ;;  %v910_v45 = vmul.f32 %v3532_v29, %v863_v34 }
  0xd5   : > { %v2651_v6 = vpack.c.bf16 %v1304_v22, %v1303_v52  ;;  %v1399_v33 = vadd.f32 %v1304_v22, %v1303_v52  ;;  %v1422_v38 = vmul.f32 %v1304_v22, %v1304_v22  ;;  %v969_v46 = vadd.f32 %v953_v39, %v923_v19 }
  0xd6   : > { %v1004_v57 = vadd.f32 %v988_v26, %v968_v2  ;;  %v954_v44 = vmul.f32 %v3539_v35, %v792_v11  ;;  %v955_v61 = vmul.f32 %v3539_v35, %v760_v15  ;;  %v1147_v58 = vmul.f32 %v3569_v9, %v792_v11 }
  0xd7   : > { %2652 = vst [vmem:[%s3705_s29] sm:$0xff] %v2651_v6   ;;  %v1437_v3 = vadd.f32 %v1422_v38, %v1421_v60  ;;  %v1005_v4 = vadd.f32 %v989_v55, %v969_v46  ;;  %v1148_v7 = vmul.f32 %v3569_v9, %v760_v15  ;;  %v1183_v39 = vmul.f32 %v3572_v10, %v3669_v31 }
  0xd8   : > { %v1046_v14 = vadd.f32 %v1030_v50, %v1004_v57  ;;  %v842_v53 = vadd.f32 %v826_v30, %v807_v48  ;;  %v843_v12 = vadd.f32 %v827_v51, %v808_v47  ;;  %v528_v1 = vmul.f32 %v512_v62, %v3590_v36 }
  0xd9   : > { %v3716_v26 = vmul.f32 %v513_v21, %v3597_v41  ;;  %v1047_v52 = vadd.f32 %v1031_v0, %v1005_v4  ;;  %v1184_v22 = vmul.f32 %v3572_v10, %v3672_v23  ;;  %v1267_v11 = vmul.f32 %v3580_v16, %v863_v34 }
  0xda   : > { %v1163_v19 = vadd.f32 %v1147_v58, %v1046_v14  ;;  %v911_v50 = vmul.f32 %v3532_v29, %v895_v42  ;;  %v1268_v55 = vmul.f32 %v3580_v16, %v895_v42  ;;  %v761_v15 = vrot.slane %v528_v1, 7 }
  0xdb   : > { %v762_v30 = vrot.slane %v3716_v26, 7  ;;  %v1164_v60 = vadd.f32 %v1148_v7, %v1047_v52  ;;  %v970_v36 = vadd.f32 %v954_v44, %v3674_v40  ;;  %v971_v41 = vadd.f32 %v955_v61, %v925_v27 }
  0xdc   : > { %v1199_v48 = vadd.f32 %v1183_v39, %v1163_v19  ;;  %v864_v62 = vrot.slane %v528_v1, 1  ;;  %v865_v0 = vrot.slane %v3716_v26, 1  ;;  %v990_v21 = vmul.f32 %v3553_v43, %v3669_v31 }
  0xdd   : > { %v991_v51 = vmul.f32 %v3553_v43, %v3672_v23  ;;  %v1200_v2 = vadd.f32 %v1184_v22, %v1164_v60  ;;  %v763_v38 = vsel %vm749_vm0, %v761_v15, %v762_v30  ;;  %v793_v47 = vsel %vm749_vm0, 0.0, %v761_v15 }
  0xde   : > { %v1283_v6 = vadd.f32 %v1267_v11, %v1199_v48  ;;  %v926_v46 = vadd.f32 %v910_v45, %v842_v53  ;;  %v927_v57 = vadd.f32 %v911_v50, %v843_v12  ;;  %v1032_v40 = vmul.f32 %v3566_v5, %v863_v34 }
  0xdf   : > { %v1033_v27 = vmul.f32 %v3566_v5, %v895_v42  ;;  %v1284_v44 = vadd.f32 %v1268_v55, %v1200_v2  ;;  %v828_v31 = vmul.f32 %v3523_v25, %v528_v1  ;;  %v829_v23 = vmul.f32 %v3523_v25, %v3716_v26 }
  0xe0   : > { %v1305_v61 = vadd.f32 %v3680_v63, %v1283_v6  ;;  %v809_v58 = vmul.f32 %v3520_v24, %v793_v47  ;;  %v810_v4 = vmul.f32 %v3520_v24, %v763_v38  ;;  %v1006_v14 = vadd.f32 %v990_v21, %v970_v36 }
  0xe1   : > { %v1007_v7 = vadd.f32 %v991_v51, %v971_v41  ;;  %v1306_v45 = vadd.f32 %v3680_v63, %v1284_v44  ;;  %v866_v42 = vsel %vm852_vm1, %v864_v62, %v865_v0  ;;  %v896_v53 = vsel %vm852_vm1, %v865_v0, 0.0 }
  0xe2   : > { %v1400_v34 = vadd.f32 %v1399_v33, %v1305_v61  ;;  %v1423_v39 = vmul.f32 %v1305_v61, %v1305_v61  ;;  %v956_v12 = vmul.f32 %v3539_v35, %v793_v47  ;;  %v957_v52 = vmul.f32 %v3539_v35, %v763_v38 }
  0xe3   : > { %v1048_v19 = vadd.f32 %v1032_v40, %v1006_v14  ;;  %v2656_v22 = vpack.c.bf16 %v1306_v45, %v1305_v61  ;;  %v1424_v50 = vmul.f32 %v1306_v45, %v1306_v45  ;;  %v1049_v15 = vadd.f32 %v1033_v27, %v1007_v7 }
  0xe4   : > { %v1401_v11 = vadd.f32 %v1400_v34, %v1306_v45  ;;  %v1438_v55 = vadd.f32 %v1437_v3, %v1423_v39  ;;  %v1149_v30 = vmul.f32 %v3569_v9, %v793_v47  ;;  %v1150_v60 = vmul.f32 %v3569_v9, %v763_v38 }
  0xe5   : > { %v1185_v33 = vmul.f32 %v3572_v10, %v528_v1  ;;  %2743 = vst [vmem:[%s3705_s29 + $0x8] sm:$0xff] %v2656_v22   ;;  %v1186_v36 = vmul.f32 %v3572_v10, %v3716_v26  ;;  %v1269_v41 = vmul.f32 %v3580_v16, %v866_v42  ;;  %v1270_v62 = vmul.f32 %v3580_v16, %v896_v53 }
  0xe6   : > { %v1439_v48 = vadd.f32 %v1438_v55, %v1424_v50  ;;  %v1165_v0 = vadd.f32 %v1149_v30, %v1048_v19  ;;  %v1166_v21 = vadd.f32 %v1150_v60, %v1049_v15  ;;  %2889 = verf.f32 %v3610_v54  ;;  %v2734_v30 = vld [vmem:[%s3483_s8 + $0x38] sm:$0xff]  }
  0xe7   : > { %v514_v3 = vadd.f32 1.0, %v3661_v20  ;;  %v844_v51 = vadd.f32 %v828_v31, %v809_v58  ;;  %v912_v2 = vmul.f32 %v3532_v29, %v866_v42  ;;  %v972_v6 = vadd.f32 %v956_v12, %v926_v46 }
  0xe8   : > { %v992_v38 = vmul.f32 %v3553_v43, %v528_v1  ;;  %v1201_v47 = vadd.f32 %v1185_v33, %v1165_v0  ;;  %v1202_v40 = vadd.f32 %v1186_v36, %v1166_v21  ;;  %v467_v27 = vmul.f32 0.5, %v3593_v37 }
  0xe9   : > { %v3759_v44 = vmul.f32 %v514_v3, %v3603_v49  ;;  %v1034_v61 = vmul.f32 %v3566_v5, %v866_v42  ;;  %v484_v54 = vmul.f32 0.70710677, %v3616_v56  ;;  %v485_v20 = vmul.f32 0.70710677, %v3621_v59 }
  0xea   : > { %v1008_v14 = vadd.f32 %v992_v38, %v972_v6  ;;  %v1285_v31 = vadd.f32 %v1269_v41, %v1201_v47  ;;  %v1286_v58 = vadd.f32 %v1270_v62, %v1202_v40  ;;  %v3766_v1 = vmul.f32 0.5, %v3616_v56 }
  0xeb   : > { %v764_v46 = vrot.slane %v3759_v44, 7  ;;  %v845_v7 = vadd.f32 %v829_v23, %v810_v4  ;;  %v928_v37 = vadd.f32 %v912_v2, %v844_v51  ;;  %v973_v45 = vadd.f32 %v957_v52, %v927_v57  ;;  %v2733_v23 = vld [vmem:[%s3483_s8 + $0x30] sm:$0xff]  }
  0xec   : > { %v993_v49 = vmul.f32 %v3553_v43, %v3716_v26  ;;  %v1307_v34 = vadd.f32 %v3680_v63, %v1285_v31  ;;  %v1308_v39 = vadd.f32 %v3680_v63, %v1286_v58  ;;  %2891 = verf.f32 %v484_v54 }
  0xed   : > { %v794_v42 = vsel %vm749_vm0, 0.0, %v764_v46  ;;  %v1050_v19 = vadd.f32 %v1034_v61, %v1008_v14  ;;  %2893 = verf.f32 %v485_v20  ;;  %v913_v22 = vmul.f32 %v3532_v29, %v896_v53  ;;  %v3794_v61 = vld [vmem:[%s3483_s8 + $0x40] sm:$0xff]  }
  0xee   : > { %v958_v12 = vmul.f32 %v3539_v35, %v794_v42  ;;  %v1151_v56 = vmul.f32 %v3569_v9, %v794_v42  ;;  %v2661_v57 = vpack.c.bf16 %v1308_v39, %v1307_v34  ;;  %v1402_v4 = vadd.f32 %v1401_v11, %v1307_v34 }
  0xef   : > { %v1425_v52 = vmul.f32 %v1307_v34, %v1307_v34  ;;  %v1426_v26 = vmul.f32 %v1308_v39, %v1308_v39  ;;  %v1035_v50 = vmul.f32 %v3566_v5, %v896_v53  ;;  %v830_v55 = vmul.f32 %v3523_v25, %v3759_v44 }
  0xf0   : > { %v1009_v15 = vadd.f32 %v993_v49, %v973_v45  ;;  %v2890_v60 = vpop.eup %2889  ;;  %2744 = vst [vmem:[%s3705_s29 + $0x10] sm:$0xff] %v2661_v57   ;;  %v3782_v33 = vadd.f32 %v1402_v4, %v1308_v39  ;;  %v2610_v41 = vunpack.c.l.bf16 %v2733_v23  ;;  %v2611_v62 = vunpack.c.h.bf16 %v2733_v23  ;;  %v3807_v23 = vld [vmem:[%s3483_s8 + $0x48] sm:$0xff]  }
  0xf1   : > { %v1440_v36 = vadd.f32 %v1439_v48, %v1425_v52  ;;  %v515_v11 = vadd.f32 1.0, %v2890_v60  ;;  %v811_v0 = vmul.f32 %v3520_v24, %v794_v42  ;;  %v1167_v21 = vadd.f32 %v1151_v56, %v1050_v19 }
  0xf2   : > { %v1187_v53 = vmul.f32 %v3572_v10, %v3759_v44  ;;  %v974_v51 = vadd.f32 %v958_v12, %v928_v37  ;;  %v994_v2 = vmul.f32 %v3553_v43, %v3759_v44  ;;  %v2614_v6 = vunpack.c.l.bf16 %v2734_v30 }
  0xf3   : > { %v3787_v3 = vadd.f32 %v1440_v36, %v1426_v26  ;;  %v929_v38 = vadd.f32 %v913_v22, %v845_v7  ;;  %v531_v47 = vmul.f32 %v515_v11, %v467_v27  ;;  %v432_v48 = vmul.f32 %v2610_v41, %v3503_v8 }
  0xf4   : > { %v433_v40 = vmul.f32 %v2611_v62, %v3503_v8  ;;  %v867_v14 = vrot.slane %v3759_v44, 1  ;;  %v1051_v54 = vadd.f32 %v1035_v50, %v1009_v15  ;;  %v469_v20 = vmul.f32 0.5, %v3621_v59 }
  0xf5   : > { %v2615_v31 = vunpack.c.h.bf16 %v2734_v30  ;;  %v765_v58 = vrot.slane %v531_v47, 7  ;;  %v846_v37 = vadd.f32 %v830_v55, %v811_v0  ;;  %v868_v45 = vrot.slane %v531_v47, 1 }
  0xf6   : > { %v1203_v49 = vadd.f32 %v1187_v53, %v1167_v21  ;;  %v2892_v34 = vpop.eup %2891  ;;  %v1010_v7 = vadd.f32 %v994_v2, %v974_v51  ;;  %v3799_v27 = vmul.f32 %v2614_v6, %v3503_v8  ;;  %v2618_v39 = vunpack.c.l.bf16 %v3794_v61 }
  0xf7   : > { %v2619_v42 = vunpack.c.h.bf16 %v3794_v61  ;;  %v2894_v12 = vpop.eup %2893  ;;  %v766_v44 = vsel %vm749_vm0, %v764_v46, %v765_v58  ;;  %v516_v19 = vadd.f32 1.0, %v2892_v34  ;;  %v454_v59 = vadd.f32 %v3513_v18, %v432_v48 }
  0xf8   : > { %v455_v56 = vadd.f32 %v3513_v18, %v433_v40  ;;  %v831_v57 = vmul.f32 %v3523_v25, %v531_v47  ;;  %v869_v4 = vsel %vm852_vm1, %v867_v14, %v868_v45  ;;  %v1188_v52 = vmul.f32 %v3572_v10, %v531_v47 }
  0xf9   : > { %v3813_v26 = vmul.f32 %v2615_v31, %v3503_v8  ;;  %v812_v22 = vmul.f32 %v3520_v24, %v766_v44  ;;  %v897_v46 = vsel %vm852_vm1, %v868_v45, 0.0  ;;  %v1152_v50 = vmul.f32 %v3569_v9, %v766_v44 }
  0xfa   : > { %v1271_v55 = vmul.f32 %v3580_v16, %v869_v4  ;;  %v517_v15 = vadd.f32 1.0, %v2894_v12  ;;  %v995_v30 = vmul.f32 %v3553_v43, %v531_v47  ;;  %v3820_v60 = vmul.f32 0.5, %v454_v59 }
  0xfb   : > { %v2622_v36 = vunpack.c.l.bf16 %v3807_v23  ;;  %v1168_v41 = vadd.f32 %v1152_v50, %v1051_v54  ;;  %v1272_v62 = vmul.f32 %v3580_v16, %v897_v46  ;;  %v3825_v0 = vmul.f32 %v516_v19, %v3766_v1 }
  0xfc   : > { %v1287_v11 = vadd.f32 %v1271_v55, %v1203_v49  ;;  %v914_v21 = vmul.f32 %v3532_v29, %v869_v4  ;;  %v915_v53 = vmul.f32 %v3532_v29, %v897_v46  ;;  %v959_v51 = vmul.f32 %v3539_v35, %v766_v44 }
  0xfd   : > { %v3830_v2 = vmul.f32 %v517_v15, %v469_v20  ;;  %v847_v6 = vadd.f32 %v831_v57, %v812_v22  ;;  %v1204_v47 = vadd.f32 %v1188_v52, %v1168_v41  ;;  %v767_v40 = vrot.slane %v3825_v0, 7 }
  0xfe   : > { %v1309_v48 = vadd.f32 %v3680_v63, %v1287_v11  ;;  %v1036_v14 = vmul.f32 %v3566_v5, %v869_v4  ;;  %v870_v1 = vrot.slane %v3825_v0, 1  ;;  %v3837_v31 = vmul.f32 0.5, %v455_v56 }
  0xff   : > { %v768_v54 = vrot.slane %v3830_v2, 7  ;;  %v1288_v58 = vadd.f32 %v1272_v62, %v1204_v47  ;;  %v871_v20 = vrot.slane %v3830_v2, 1  ;;  %v930_v34 = vadd.f32 %v914_v21, %v846_v37 }
 0x100   : > { %v1404_v45 = vadd.f32 %v3782_v33, %v1309_v48  ;;  %v1427_v49 = vmul.f32 %v1309_v48, %v1309_v48  ;;  %v1037_v12 = vmul.f32 %v3566_v5, %v897_v46  ;;  %v975_v44 = vadd.f32 %v959_v51, %v929_v38 }
 0x101   : > { %v486_v19 = vmul.f32 0.70710677, %v454_v59  ;;  %v931_v57 = vadd.f32 %v915_v53, %v847_v6  ;;  %v1310_v4 = vadd.f32 %v3680_v63, %v1288_v58  ;;  %v795_v22 = vsel %vm749_vm0, 0.0, %v767_v40 }
 0x102   : > { %v1442_v52 = vadd.f32 %v3787_v3, %v1427_v49  ;;  %v769_v50 = vsel %vm749_vm0, %v767_v40, %v768_v54  ;;  %v832_v33 = vmul.f32 %v3523_v25, %v3825_v0  ;;  %v1052_v55 = vadd.f32 %v1036_v14, %v1010_v7 }
 0x103   : > { %v487_v15 = vmul.f32 0.70710677, %v455_v56  ;;  %v2666_v37 = vpack.c.bf16 %v1310_v4, %v1309_v48  ;;  %v1405_v41 = vadd.f32 %v1404_v45, %v1310_v4  ;;  %v1428_v46 = vmul.f32 %v1310_v4, %v1310_v4 }
 0x104   : > { %v872_v38 = vsel %vm852_vm1, %v870_v1, %v871_v20  ;;  %v813_v59 = vmul.f32 %v3520_v24, %v795_v22  ;;  %v833_v62 = vmul.f32 %v3523_v25, %v3830_v2  ;;  %v898_v3 = vsel %vm852_vm1, %v871_v20, 0.0 }
 0x105   : > { %v1011_v11 = vadd.f32 %v995_v30, %v975_v44  ;;  %2745 = vst [vmem:[%s3705_s29 + $0x18] sm:$0xff] %v2666_v37   ;;  %v1443_v21 = vadd.f32 %v1442_v52, %v1428_v46  ;;  %v814_v53 = vmul.f32 %v3520_v24, %v769_v50  ;;  %v1153_v7 = vmul.f32 %v3569_v9, %v795_v22 }
 0x106   : > { %v1154_v56 = vmul.f32 %v3569_v9, %v769_v50  ;;  %v916_v51 = vmul.f32 %v3532_v29, %v872_v38  ;;  %v1189_v47 = vmul.f32 %v3572_v10, %v3825_v0  ;;  %v1190_v48 = vmul.f32 %v3572_v10, %v3830_v2 }
 0x107   : > { %v1053_v6 = vadd.f32 %v1037_v12, %v1011_v11  ;;  %v960_v40 = vmul.f32 %v3539_v35, %v795_v22  ;;  %v1169_v30 = vadd.f32 %v1153_v7, %v1052_v55  ;;  %v1273_v14 = vmul.f32 %v3580_v16, %v872_v38 }
 0x108   : > { %2895 = verf.f32 %v486_v19  ;;  %v848_v54 = vadd.f32 %v832_v33, %v813_v59  ;;  %v1274_v58 = vmul.f32 %v3580_v16, %v898_v3  ;;  %v961_v45 = vmul.f32 %v3539_v35, %v769_v50 }
 0x109   : > { %v1170_v1 = vadd.f32 %v1154_v56, %v1053_v6  ;;  %2897 = verf.f32 %v487_v15  ;;  %v1205_v49 = vadd.f32 %v1189_v47, %v1169_v30  ;;  %v456_v20 = vadd.f32 %v3513_v18, %v3799_v27 }
 0x10a   : > { %v457_v12 = vadd.f32 %v3513_v18, %v3813_v26  ;;  %v917_v44 = vmul.f32 %v3532_v29, %v898_v3  ;;  %v587_v19 = vmul.f32 %v2618_v39, %v3503_v8  ;;  %v588_v52 = vmul.f32 %v2619_v42, %v3503_v8 }
 0x10b   : > { %v1206_v4 = vadd.f32 %v1190_v48, %v1170_v1  ;;  %v849_v22 = vadd.f32 %v833_v62, %v814_v53  ;;  %v1038_v50 = vmul.f32 %v3566_v5, %v872_v38  ;;  %v1289_v33 = vadd.f32 %v1273_v14, %v1205_v49 }
 0x10c   : > { %v976_v55 = vadd.f32 %v960_v40, %v930_v34  ;;  %v996_v26 = vmul.f32 %v3553_v43, %v3825_v0  ;;  %v488_v15 = vmul.f32 0.70710677, %v456_v20  ;;  %v489_v37 = vmul.f32 0.70710677, %v457_v12 }
 0x10d   : > { %v1290_v27 = vadd.f32 %v1274_v58, %v1206_v4  ;;  %v1311_v46 = vadd.f32 %v3680_v63, %v1289_v33  ;;  %v977_v59 = vadd.f32 %v961_v45, %v931_v57  ;;  %v997_v39 = vmul.f32 %v3553_v43, %v3830_v2 }
 0x10e   : > { %v603_v61 = vadd.f32 %v3513_v18, %v587_v19  ;;  %v1039_v42 = vmul.f32 %v3566_v5, %v898_v3  ;;  %2899 = verf.f32 %v488_v15  ;;  %v604_v34 = vadd.f32 %v3513_v18, %v588_v52 }
 0x10f   : > { %v1312_v38 = vadd.f32 %v3680_v63, %v1290_v27  ;;  %v1406_v62 = vadd.f32 %v1405_v41, %v1311_v46  ;;  %v1429_v0 = vmul.f32 %v1311_v46, %v1311_v46  ;;  %v2623_v11 = vunpack.c.h.bf16 %v3807_v23 }
 0x110   : > { %v589_v57 = vmul.f32 %v2622_v36, %v3503_v8  ;;  %v1012_v7 = vadd.f32 %v996_v26, %v976_v55  ;;  %2901 = verf.f32 %v489_v37  ;;  %v1013_v47 = vadd.f32 %v997_v39, %v977_v59 }
 0x111   : > { %v2671_v53 = vpack.c.bf16 %v1312_v38, %v1311_v46  ;;  %v1430_v2 = vmul.f32 %v1312_v38, %v1312_v38  ;;  %v3891_v3 = vadd.f32 %v1406_v62, %v1312_v38  ;;  %v1444_v6 = vadd.f32 %v1443_v21, %v1429_v0 }
 0x112   : > { %v2896_v56 = vpop.eup %2895  ;;  %v635_v48 = vmul.f32 0.70710677, %v603_v61  ;;  %v932_v41 = vadd.f32 %v916_v51, %v848_v54  ;;  %v933_v30 = vadd.f32 %v917_v44, %v849_v22  ;;  %v636_v1 = vmul.f32 0.70710677, %v604_v34 }
 0x113   : > { %v2898_v40 = vpop.eup %2897  ;;  %2746 = vst [vmem:[%s3705_s29 + $0x20] sm:$0xff] %v2671_v53   ;;  %v518_v14 = vadd.f32 1.0, %v2896_v56  ;;  %v3894_v58 = vadd.f32 %v1444_v6, %v1430_v2  ;;  %v590_v36 = vmul.f32 %v2623_v11, %v3503_v8  ;;  %v3898_v45 = vadd.f32 %v3513_v18, %v589_v57 }
 0x114   : > { %v519_v23 = vadd.f32 1.0, %v2898_v40  ;;  %v1054_v4 = vadd.f32 %v1038_v50, %v1012_v7  ;;  %v472_v21 = vmul.f32 0.5, %v456_v20  ;;  %v473_v19 = vmul.f32 0.5, %v457_v12 }
 0x115   : > { %v534_v49 = vmul.f32 %v518_v14, %v3820_v60  ;;  %v1055_v51 = vadd.f32 %v1039_v42, %v1013_v47  ;;  %v3902_v54 = vmul.f32 0.5, %v603_v61  ;;  %2903 = verf.f32 %v635_v48 }
 0x116   : > { %v535_v52 = vmul.f32 %v519_v23, %v3837_v31  ;;  %v3904_v33 = vmul.f32 0.5, %v604_v34  ;;  %2905 = verf.f32 %v636_v1  ;;  %v3907_v27 = vadd.f32 %v3513_v18, %v590_v36 }
 0x117   : > { %v770_v44 = vrot.slane %v534_v49, 7  ;;  %v873_v22 = vrot.slane %v534_v49, 1  ;;  %v637_v60 = vmul.f32 0.70710677, %v3898_v45  ;;  %v834_v31 = vmul.f32 %v3523_v25, %v534_v49 }
 0x118   : > { %v771_v8 = vrot.slane %v535_v52, 7  ;;  %v874_v55 = vrot.slane %v535_v52, 1  ;;  %v2900_v20 = vpop.eup %2899  ;;  %v835_v50 = vmul.f32 %v3523_v25, %v535_v52  ;;  %v1191_v26 = vmul.f32 %v3572_v10, %v534_v49 }
 0x119   : > { %v796_v12 = vsel %vm749_vm0, 0.0, %v770_v44  ;;  %v1192_v42 = vmul.f32 %v3572_v10, %v535_v52  ;;  %v998_v38 = vmul.f32 %v3553_v43, %v534_v49  ;;  %v999_v11 = vmul.f32 %v3553_v43, %v535_v52 }
 0x11a   : > { %v772_v15 = vsel %vm749_vm0, %v770_v44, %v771_v8  ;;  %v815_v37 = vmul.f32 %v3520_v24, %v796_v12  ;;  %v875_v46 = vsel %vm852_vm1, %v873_v22, %v874_v55  ;;  %v899_v18 = vsel %vm852_vm1, %v874_v55, 0.0  ;;  %v2902_v59 = vpop.eup %2901 }
 0x11b   : > { %v816_v39 = vmul.f32 %v3520_v24, %v772_v15  ;;  %v962_v61 = vmul.f32 %v3539_v35, %v796_v12  ;;  %v918_v34 = vmul.f32 %v3532_v29, %v875_v46  ;;  %v919_v62 = vmul.f32 %v3532_v29, %v899_v18 }
 0x11c   : > { %v963_v0 = vmul.f32 %v3539_v35, %v772_v15  ;;  %v850_v57 = vadd.f32 %v834_v31, %v815_v37  ;;  %v1040_v53 = vmul.f32 %v3566_v5, %v875_v46  ;;  %v1155_v2 = vmul.f32 %v3569_v9, %v796_v12 }
 0x11d   : > { %v1156_v7 = vmul.f32 %v3569_v9, %v772_v15  ;;  %v851_v56 = vadd.f32 %v835_v50, %v816_v39  ;;  %v1275_v6 = vmul.f32 %v3580_v16, %v875_v46  ;;  %v520_v47 = vadd.f32 1.0, %v2900_v20 }
 0x11e   : > { %v521_v48 = vadd.f32 1.0, %v2902_v59  ;;  %v1171_v40 = vadd.f32 %v1155_v2, %v1054_v4  ;;  %v1276_v1 = vmul.f32 %v3580_v16, %v899_v18  ;;  %v978_v23 = vadd.f32 %v962_v61, %v932_v41 }
 0x11f   : > { %v1172_v14 = vadd.f32 %v1156_v7, %v1055_v51  ;;  %v2904_v36 = vpop.eup %2903  ;;  %v1041_v49 = vmul.f32 %v3566_v5, %v899_v18  ;;  %v536_v52 = vmul.f32 %v520_v47, %v472_v21  ;;  %v979_v22 = vadd.f32 %v963_v0, %v933_v30 }
 0x120   : > { %v3932_v44 = vmul.f32 %v521_v48, %v473_v19  ;;  %v2906_v8 = vpop.eup %2905  ;;  %v1207_v55 = vadd.f32 %v1191_v26, %v1171_v40  ;;  %v1014_v31 = vadd.f32 %v998_v38, %v978_v23  ;;  %2907 = verf.f32 %v637_v60 }
 0x121   : > { %v1208_v12 = vadd.f32 %v1192_v42, %v1172_v14  ;;  %v934_v50 = vadd.f32 %v918_v34, %v850_v57  ;;  %v940_v20 = vrot.slane %v536_v52, 7  ;;  %v1015_v51 = vadd.f32 %v999_v11, %v979_v22 }
 0x122   : > { %v941_v4 = vrot.slane %v3932_v44, 7  ;;  %v935_v15 = vadd.f32 %v919_v62, %v851_v56  ;;  %v1291_v37 = vadd.f32 %v1275_v6, %v1207_v55  ;;  %v667_v46 = vadd.f32 1.0, %v2904_v36 }
 0x123   : > { %v1292_v41 = vadd.f32 %v1276_v1, %v1208_v12  ;;  %v1018_v59 = vrot.slane %v536_v52, 1  ;;  %v1019_v21 = vrot.slane %v3932_v44, 1  ;;  %v1056_v19 = vadd.f32 %v1040_v53, %v1014_v31 }
 0x124   : > { %v1057_v18 = vadd.f32 %v1041_v49, %v1015_v51  ;;  %v1313_v30 = vadd.f32 %v3680_v63, %v1291_v37  ;;  %v942_v60 = vsel %vm749_vm0, %v940_v20, %v941_v4  ;;  %v945_v39 = vsel %vm749_vm0, 0.0, %v940_v20 }
 0x125   : > { %v1314_v26 = vadd.f32 %v3680_v63, %v1292_v41  ;;  %v1157_v61 = vmul.f32 %v3569_v9, %v945_v39  ;;  %v1158_v42 = vmul.f32 %v3569_v9, %v942_v60  ;;  %v1193_v38 = vmul.f32 %v3572_v10, %v536_v52 }
 0x126   : > { %v668_v34 = vadd.f32 1.0, %v2906_v8  ;;  %v1408_v0 = vadd.f32 %v3891_v3, %v1313_v30  ;;  %v1431_v11 = vmul.f32 %v1313_v30, %v1313_v30  ;;  %v1020_v53 = vsel %vm852_vm1, %v1018_v59, %v1019_v21 }
 0x127   : > { %v2676_v62 = vpack.c.bf16 %v1314_v26, %v1313_v30  ;;  %v1432_v57 = vmul.f32 %v1314_v26, %v1314_v26  ;;  %v1023_v2 = vsel %vm852_vm1, %v1019_v21, 0.0  ;;  %v1173_v7 = vadd.f32 %v1157_v61, %v1056_v19 }
 0x128   : > { %v1174_v56 = vadd.f32 %v1158_v42, %v1057_v18  ;;  %v1409_v6 = vadd.f32 %v1408_v0, %v1314_v26  ;;  %v1446_v47 = vadd.f32 %v3894_v58, %v1431_v11  ;;  %v1194_v48 = vmul.f32 %v3572_v10, %v3932_v44  ;;  %v2737_v11 = vld [vmem:[%s3483_s8 + $0x50] sm:$0xff]  }
 0x129   : > { %2747 = vst [vmem:[%s3705_s29 + $0x28] sm:$0xff] %v2676_v62   ;;  %v1277_v40 = vmul.f32 %v3580_v16, %v1020_v53  ;;  %v964_v14 = vmul.f32 %v3539_v35, %v945_v39  ;;  %v965_v3 = vmul.f32 %v3539_v35, %v942_v60  ;;  %v1209_v1 = vadd.f32 %v1193_v38, %v1173_v7 }
 0x12a   : > { %v1278_v23 = vmul.f32 %v3580_v16, %v1023_v2  ;;  %v2908_v36 = vpop.eup %2907  ;;  %v1447_v49 = vadd.f32 %v1446_v47, %v1432_v57  ;;  %v1210_v22 = vadd.f32 %v1194_v48, %v1174_v56  ;;  %v1540_v8 = vmul.f32 %v945_v39, %v3520_v24 }
 0x12b   : > { %v1556_v55 = vmul.f32 %v3523_v25, %v536_v52  ;;  %v1042_v58 = vmul.f32 %v3566_v5, %v1020_v53  ;;  %v1043_v12 = vmul.f32 %v3566_v5, %v1023_v2  ;;  %v1293_v31 = vadd.f32 %v1277_v40, %v1209_v1 }
 0x12c   : > { %v3959_v20 = vmul.f32 %v667_v46, %v3902_v54  ;;  %v1294_v4 = vadd.f32 %v1278_v23, %v1210_v22  ;;  %v1541_v51 = vmul.f32 %v942_v60, %v3520_v24  ;;  %v1557_v37 = vmul.f32 %v3523_v25, %v3932_v44 }
 0x12d   : > { %v3965_v41 = vmul.f32 %v668_v34, %v3904_v33  ;;  %v1315_v59 = vadd.f32 %v3680_v63, %v1293_v31  ;;  %v980_v21 = vadd.f32 %v964_v14, %v934_v50  ;;  %v981_v19 = vadd.f32 %v965_v3, %v935_v15 }
 0x12e   : > { %v1000_v18 = vmul.f32 %v3553_v43, %v536_v52  ;;  %v1316_v30 = vadd.f32 %v3680_v63, %v1294_v4  ;;  %v1572_v54 = vadd.f32 %v1556_v55, %v1540_v8  ;;  %v1636_v46 = vmul.f32 %v1020_v53, %v3532_v29 }
 0x12f   : > { %v1001_v26 = vmul.f32 %v3553_v43, %v3932_v44  ;;  %v1410_v60 = vadd.f32 %v1409_v6, %v1315_v59  ;;  %v1433_v39 = vmul.f32 %v1315_v59, %v1315_v59  ;;  %v1114_v61 = vrot.slane %v3959_v20, 7 }
 0x130   : > { %v1016_v33 = vadd.f32 %v1000_v18, %v980_v21  ;;  %v2681_v42 = vpack.c.bf16 %v1316_v30, %v1315_v59  ;;  %v1434_v50 = vmul.f32 %v1316_v30, %v1316_v30  ;;  %v1115_v52 = vrot.slane %v3965_v41, 7 }
 0x131   : > { %v1017_v15 = vadd.f32 %v1001_v26, %v981_v19  ;;  %v1411_v38 = vadd.f32 %v1410_v60, %v1316_v30  ;;  %v1448_v34 = vadd.f32 %v1447_v49, %v1433_v39  ;;  %v1140_v0 = vsel %vm749_vm0, 0.0, %v1114_v61  ;;  %v3995_v26 = vld [vmem:[#allocation6] ss:$0 sm:$0xff] }
 0x132   : > { %v1058_v62 = vadd.f32 %v1042_v58, %v1016_v33  ;;  %2748 = vst [vmem:[%s3705_s29 + $0x30] sm:$0xff] %v2681_v42   ;;  %v1116_v44 = vsel %vm749_vm0, %v1114_v61, %v1115_v52  ;;  %v1159_v53 = vmul.f32 %v3569_v9, %v1140_v0  ;;  %v1195_v7 = vmul.f32 %v3572_v10, %v3959_v20 }
 0x133   : > { %v1059_v57 = vadd.f32 %v1043_v12, %v1017_v15  ;;  %v1449_v56 = vadd.f32 %v1448_v34, %v1434_v50  ;;  %v1160_v6 = vmul.f32 %v3569_v9, %v1116_v44  ;;  %v1196_v47 = vmul.f32 %v3572_v10, %v3965_v41 }
 0x134   : > { %v1234_v48 = vrot.slane %v3959_v20, 1  ;;  %v1175_v40 = vadd.f32 %v1159_v53, %v1058_v62  ;;  %v1235_v14 = vrot.slane %v3965_v41, 1  ;;  %v2626_v3 = vunpack.c.l.bf16 %v2737_v11 }
 0x135   : > { %v1637_v1 = vmul.f32 %v1023_v2, %v3532_v29  ;;  %v1652_v23 = vadd.f32 %v1636_v46, %v1572_v54  ;;  %v1176_v49 = vadd.f32 %v1160_v6, %v1059_v57  ;;  %v638_v22 = vmul.f32 0.70710677, %v3907_v27  ;;  %v4013_v57 = vld [vmem:[#allocation8] ss:$0 sm:$0xff] }
 0x136   : > { %v1211_v8 = vadd.f32 %v1195_v7, %v1175_v40  ;;  %v1236_v55 = vsel %vm852_vm1, %v1234_v48, %v1235_v14  ;;  %v1260_v58 = vsel %vm852_vm1, %v1235_v14, 0.0  ;;  %v1748_v12 = vmul.f32 %v1140_v0, %v3539_v35 }
 0x137   : > { %v1573_v31 = vadd.f32 %v1557_v37, %v1541_v51  ;;  %v1212_v4 = vadd.f32 %v1196_v47, %v1176_v49  ;;  %v1279_v59 = vmul.f32 %v3580_v16, %v1236_v55  ;;  %v1280_v21 = vmul.f32 %v3580_v16, %v1260_v58  ;;  %v2738_v47 = vld [vmem:[%s3483_s8 + $0x58] sm:$0xff]  }
 0x138   : > { %v621_v19 = vmul.f32 0.5, %v3898_v45  ;;  %v2627_v2 = vunpack.c.h.bf16 %v2737_v11  ;;  %2909 = verf.f32 %v638_v22  ;;  %v669_v54 = vadd.f32 1.0, %v2908_v36 }
 0x139   : > { %v1295_v18 = vadd.f32 %v1279_v59, %v1211_v8  ;;  %v1296_v30 = vadd.f32 %v1280_v21, %v1212_v4  ;;  %v1764_v46 = vadd.f32 %v1748_v12, %v1652_v23  ;;  %v591_v60 = vmul.f32 %v3995_v26, %v2626_v3 }
 0x13a   : > { %v1653_v39 = vadd.f32 %v1637_v1, %v1573_v31  ;;  %v1780_v45 = vmul.f32 %v3553_v43, %v3959_v20  ;;  %v1542_v33 = vmul.f32 %v1140_v0, %v3520_v24  ;;  %v1543_v61 = vmul.f32 %v1116_v44, %v3520_v24 }
 0x13b   : > { %v1317_v51 = vadd.f32 %v3680_v63, %v1295_v18  ;;  %v4000_v37 = vadd.f32 %v3680_v63, %v1296_v30  ;;  %v4006_v36 = vmul.f32 %v669_v54, %v621_v19  ;;  %v592_v42 = vmul.f32 %v3995_v26, %v2627_v2 }
 0x13c   : > { %v1749_v34 = vmul.f32 %v1116_v44, %v3539_v35  ;;  %v1860_v63 = vmul.f32 %v1236_v55, %v3566_v5  ;;  %v1796_v11 = vadd.f32 %v1780_v45, %v1764_v46  ;;  %v607_v0 = vadd.f32 %v4013_v57, %v591_v60 }
 0x13d   : > { %v2686_v50 = vpack.c.bf16 %v4000_v37, %v1317_v51  ;;  %v1412_v15 = vadd.f32 %v1411_v38, %v1317_v51  ;;  %v1435_v52 = vmul.f32 %v1317_v51, %v1317_v51  ;;  %v1498_v62 = vrot.slane %v4006_v36, 7 }
 0x13e   : > { %v1558_v38 = vmul.f32 %v3523_v25, %v3959_v20  ;;  %v1559_v44 = vmul.f32 %v3523_v25, %v3965_v41  ;;  %v608_v6 = vadd.f32 %v4013_v57, %v592_v42  ;;  %v622_v48 = vmul.f32 0.5, %v3907_v27 }
 0x13f   : > { %2749 = vst [vmem:[%s3705_s29 + $0x38] sm:$0xff] %v2686_v50   ;;  %v4018_v53 = vadd.f32 %v1412_v15, %v4000_v37  ;;  %v4020_v7 = vadd.f32 %v1449_v56, %v1435_v52  ;;  %v1534_v40 = vsel %vm749_vm0, 0.0, %v1498_v62  ;;  %v1765_v14 = vadd.f32 %v1749_v34, %v1653_v39 }
 0x140   : > { %v1781_v3 = vmul.f32 %v3553_v43, %v3965_v41  ;;  %v1876_v1 = vadd.f32 %v1860_v63, %v1796_v11  ;;  %v1963_v56 = vmul.f32 %v1534_v40, %v3569_v9  ;;  %v639_v23 = vmul.f32 0.70710677, %v607_v0 }
 0x141   : > { %v640_v49 = vmul.f32 0.70710677, %v608_v6  ;;  %v1574_v22 = vadd.f32 %v1558_v38, %v1542_v33  ;;  %v1575_v8 = vadd.f32 %v1559_v44, %v1543_v61  ;;  %v2630_v12 = vunpack.c.l.bf16 %v2738_v47 }
 0x142   : > { %v2910_v20 = vpop.eup %2909  ;;  %v1638_v31 = vmul.f32 %v1236_v55, %v3532_v29  ;;  %2911 = verf.f32 %v639_v23  ;;  %v2631_v27 = vunpack.c.h.bf16 %v2738_v47  ;;  %v1639_v59 = vmul.f32 %v1260_v58, %v3532_v29 }
 0x143   : > { %v670_v4 = vadd.f32 1.0, %v2910_v20  ;;  %v1861_v21 = vmul.f32 %v1260_v58, %v3566_v5  ;;  %2913 = verf.f32 %v640_v49  ;;  %v593_v41 = vmul.f32 %v3995_v26, %v2630_v12 }
 0x144   : > { %v1797_v2 = vadd.f32 %v1781_v3, %v1765_v14  ;;  %v1979_v18 = vadd.f32 %v1963_v56, %v1876_v1  ;;  %v1995_v30 = vmul.f32 %v3572_v10, %v4006_v36  ;;  %v1594_v54 = vrot.slane %v4006_v36, 1 }
 0x145   : > { %v686_v19 = vmul.f32 %v670_v4, %v622_v48  ;;  %v594_v55 = vmul.f32 %v3995_v26, %v2631_v27  ;;  %v4042_v39 = vadd.f32 %v4013_v57, %v593_v41  ;;  %v1654_v51 = vadd.f32 %v1638_v31, %v1574_v22  ;;  %v2739_v4 = vld [vmem:[%s3483_s8 + $0x60] sm:$0xff]  }
 0x146   : > { %v1655_v58 = vadd.f32 %v1639_v59, %v1575_v8  ;;  %v1544_v45 = vmul.f32 %v1534_v40, %v3520_v24  ;;  %v1560_v33 = vmul.f32 %v3523_v25, %v4006_v36  ;;  %v1750_v42 = vmul.f32 %v1534_v40, %v3539_v35  ;;  %v4065_v59 = vld [vmem:[#allocation11] ss:$0 sm:$0xff] }
 0x147   : > { %v1499_v46 = vrot.slane %v686_v19, 7  ;;  %v1595_v60 = vrot.slane %v686_v19, 1  ;;  %v1877_v50 = vadd.f32 %v1861_v21, %v1797_v2  ;;  %v2010_v15 = vadd.f32 %v1995_v30, %v1979_v18 }
 0x148   : > { %v623_v63 = vmul.f32 0.5, %v607_v0  ;;  %v4052_v11 = vadd.f32 %v4013_v57, %v594_v55  ;;  %v1996_v44 = vmul.f32 %v3572_v10, %v686_v19  ;;  %v1576_v48 = vadd.f32 %v1560_v33, %v1544_v45 }
 0x149   : > { %v1500_v61 = vsel %vm749_vm0, %v1498_v62, %v1499_v46  ;;  %v1596_v52 = vsel %vm852_vm1, %v1594_v54, %v1595_v60  ;;  %v641_v62 = vmul.f32 0.70710677, %v4042_v39  ;;  %v1630_v40 = vsel %vm852_vm1, %v1595_v60, 0.0 }
 0x14a   : > { %v1751_v34 = vmul.f32 %v1500_v61, %v3539_v35  ;;  %v1964_v38 = vmul.f32 %v1500_v61, %v3569_v9  ;;  %v2068_v47 = vmul.f32 %v1596_v52, %v3580_v16  ;;  %v624_v14 = vmul.f32 0.5, %v608_v6 }
 0x14b   : > { %v1782_v3 = vmul.f32 %v3553_v43, %v4006_v36  ;;  %v2069_v56 = vmul.f32 %v1630_v40, %v3580_v16  ;;  %v1766_v49 = vadd.f32 %v1750_v42, %v1654_v51  ;;  %v1783_v12 = vmul.f32 %v3553_v43, %v686_v19 }
 0x14c   : > { %v2912_v0 = vpop.eup %2911  ;;  %v1980_v1 = vadd.f32 %v1964_v38, %v1877_v50  ;;  %v2084_v23 = vadd.f32 %v2068_v47, %v2010_v15  ;;  %v1767_v8 = vadd.f32 %v1751_v34, %v1655_v58  ;;  %v642_v31 = vmul.f32 0.70710677, %v4052_v11 }
 0x14d   : > { %v2914_v20 = vpop.eup %2913  ;;  %v671_v22 = vadd.f32 1.0, %v2912_v0  ;;  %2915 = verf.f32 %v641_v62  ;;  %v1545_v21 = vmul.f32 %v1500_v61, %v3520_v24  ;;  %v1561_v41 = vmul.f32 %v3523_v25, %v686_v19 }
 0x14e   : > { %v2011_v27 = vadd.f32 %v1996_v44, %v1980_v1  ;;  %v2100_v6 = vadd.f32 %v4065_v59, %v2084_v23  ;;  %v672_v36 = vadd.f32 1.0, %v2914_v20  ;;  %2917 = verf.f32 %v642_v31 }
 0x14f   : > { %v4070_v2 = vmul.f32 %v671_v22, %v623_v63  ;;  %v1798_v54 = vadd.f32 %v1782_v3, %v1766_v49  ;;  %v2634_v55 = vunpack.c.l.bf16 %v2739_v4  ;;  %v1640_v46 = vmul.f32 %v1596_v52, %v3532_v29 }
 0x150   : > { %v2085_v18 = vadd.f32 %v2069_v56, %v2011_v27  ;;  %v4072_v30 = vmul.f32 %v672_v36, %v624_v14  ;;  %v1862_v60 = vmul.f32 %v1596_v52, %v3566_v5  ;;  %v1863_v51 = vmul.f32 %v1630_v40, %v3566_v5 }
 0x151   : > { %v1501_v58 = vrot.slane %v4070_v2, 7  ;;  %v2219_v33 = vmul.f32 %v2100_v6, %v2100_v6  ;;  %v1799_v61 = vadd.f32 %v1783_v12, %v1767_v8  ;;  %v1577_v42 = vadd.f32 %v1561_v41, %v1545_v21 }
 0x152   : > { %v2101_v45 = vadd.f32 %v4065_v59, %v2085_v18  ;;  %v1502_v19 = vrot.slane %v4072_v30, 7  ;;  %v1641_v50 = vmul.f32 %v1630_v40, %v3532_v29  ;;  %v1597_v15 = vrot.slane %v4070_v2, 1 }
 0x153   : > { %v1598_v34 = vrot.slane %v4072_v30, 1  ;;  %v1535_v44 = vsel %vm749_vm0, 0.0, %v1501_v58  ;;  %v625_v62 = vmul.f32 0.5, %v4042_v39  ;;  %v2635_v14 = vunpack.c.h.bf16 %v2739_v4 }
 0x154   : > { %v2691_v63 = vpack.c.bf16 %v2101_v45, %v2100_v6  ;;  %v2197_v52 = vadd.f32 %v2101_v45, %v2100_v6  ;;  %v2220_v38 = vmul.f32 %v2101_v45, %v2101_v45  ;;  %v1503_v47 = vsel %vm749_vm0, %v1501_v58, %v1502_v19 }
 0x155   : > { %v595_v3 = vmul.f32 %v3995_v26, %v2634_v55  ;;  %v1656_v0 = vadd.f32 %v1640_v46, %v1576_v48  ;;  %v1878_v40 = vadd.f32 %v1862_v60, %v1798_v54  ;;  %v1879_v56 = vadd.f32 %v1863_v51, %v1799_v61  ;;  %v4102_v46 = vld [vmem:[%s3483_s8 + $0x68] sm:$0xff]  }
 0x156   : > { %2750 = vst [vmem:[%s3705_s29 + $0x40] sm:$0xff] %v2691_v63   ;;  %v2235_v1 = vadd.f32 %v2220_v38, %v2219_v33  ;;  %v1657_v23 = vadd.f32 %v1641_v50, %v1577_v42  ;;  %v1752_v49 = vmul.f32 %v1535_v44, %v3539_v35  ;;  %v1997_v20 = vmul.f32 %v3572_v10, %v4070_v2 }
 0x157   : > { %v1998_v22 = vmul.f32 %v3572_v10, %v4072_v30  ;;  %v2916_v8 = vpop.eup %2915  ;;  %v1599_v39 = vsel %vm852_vm1, %v1597_v15, %v1598_v34  ;;  %v1753_v12 = vmul.f32 %v1503_v47, %v3539_v35  ;;  %v1965_v48 = vmul.f32 %v1535_v44, %v3569_v9 }
 0x158   : > { %v1966_v31 = vmul.f32 %v1503_v47, %v3569_v9  ;;  %v2918_v4 = vpop.eup %2917  ;;  %v1631_v27 = vsel %vm852_vm1, %v1598_v34, 0.0  ;;  %v2070_v6 = vmul.f32 %v1599_v39, %v3580_v16  ;;  %v626_v36 = vmul.f32 0.5, %v4052_v11 }
 0x159   : > { %v673_v21 = vadd.f32 1.0, %v2916_v8  ;;  %v1981_v41 = vadd.f32 %v1965_v48, %v1878_v40  ;;  %v2071_v54 = vmul.f32 %v1631_v27, %v3580_v16  ;;  %v674_v55 = vadd.f32 1.0, %v2918_v4 }
 0x15a   : > { %v1982_v18 = vadd.f32 %v1966_v31, %v1879_v56  ;;  %v1768_v60 = vadd.f32 %v1752_v49, %v1656_v0  ;;  %v1784_v51 = vmul.f32 %v3553_v43, %v4070_v2  ;;  %v1785_v58 = vmul.f32 %v3553_v43, %v4072_v30 }
 0x15b   : > { %v596_v45 = vmul.f32 %v3995_v26, %v2635_v14  ;;  %v2012_v33 = vadd.f32 %v1997_v20, %v1981_v41  ;;  %v4109_v11 = vmul.f32 %v673_v21, %v625_v62  ;;  %v1769_v61 = vadd.f32 %v1753_v12, %v1657_v23 }
 0x15c   : > { %v2013_v19 = vadd.f32 %v1998_v22, %v1982_v18  ;;  %v4111_v42 = vmul.f32 %v674_v55, %v626_v36  ;;  %v2638_v50 = vunpack.c.l.bf16 %v4102_v46  ;;  %v4115_v63 = vadd.f32 %v4013_v57, %v595_v3 }
 0x15d   : > { %v2086_v15 = vadd.f32 %v2070_v6, %v2012_v33  ;;  %v2639_v38 = vunpack.c.h.bf16 %v4102_v46  ;;  %v1864_v0 = vmul.f32 %v1599_v39, %v3566_v5  ;;  %v1865_v14 = vmul.f32 %v1631_v27, %v3566_v5 }
 0x15e   : > { %v2087_v34 = vadd.f32 %v2071_v54, %v2013_v19  ;;  %v1800_v40 = vadd.f32 %v1784_v51, %v1768_v60  ;;  %v4121_v62 = vadd.f32 %v4013_v57, %v596_v45  ;;  %v1504_v49 = vrot.slane %v4109_v11, 7 }
 0x15f   : > { %v2102_v56 = vadd.f32 %v4065_v59, %v2086_v15  ;;  %v1801_v20 = vadd.f32 %v1785_v58, %v1769_v61  ;;  %v1562_v3 = vmul.f32 %v3523_v25, %v4070_v2  ;;  %v1505_v22 = vrot.slane %v4111_v42, 7 }
 0x160   : > { %v2103_v23 = vadd.f32 %v4065_v59, %v2087_v34  ;;  %v1600_v8 = vrot.slane %v4109_v11, 1  ;;  %v1601_v12 = vrot.slane %v4111_v42, 1  ;;  %v1546_v36 = vmul.f32 %v1535_v44, %v3520_v24 }
 0x161   : > { %v2198_v31 = vadd.f32 %v2197_v52, %v2102_v56  ;;  %v2221_v4 = vmul.f32 %v2102_v56, %v2102_v56  ;;  %v1547_v21 = vmul.f32 %v1503_v47, %v3520_v24  ;;  %v1563_v41 = vmul.f32 %v3523_v25, %v4072_v30 }
 0x162   : > { %v2696_v48 = vpack.c.bf16 %v2103_v23, %v2102_v56  ;;  %v2222_v6 = vmul.f32 %v2103_v23, %v2103_v23  ;;  %v1880_v18 = vadd.f32 %v1864_v0, %v1800_v40  ;;  %v1536_v55 = vsel %vm749_vm0, 0.0, %v1504_v49 }
 0x163   : > { %v2199_v2 = vadd.f32 %v2198_v31, %v2103_v23  ;;  %v2236_v54 = vadd.f32 %v2235_v1, %v2221_v4  ;;  %v1881_v46 = vadd.f32 %v1865_v14, %v1801_v20  ;;  %v1642_v60 = vmul.f32 %v1599_v39, %v3532_v29  ;;  %v2741_v23 = vld [vmem:[%s3483_s8 + $0x70] sm:$0xff]  }
 0x164   : > { %2751 = vst [vmem:[%s3705_s29 + $0x48] sm:$0xff] %v2696_v48   ;;  %v1506_v52 = vsel %vm749_vm0, %v1504_v49, %v1505_v22  ;;  %v4140_v51 = vsel %vm852_vm1, %v1600_v8, %v1601_v12  ;;  %v1967_v44 = vmul.f32 %v1536_v55, %v3569_v9  ;;  %v1999_v1 = vmul.f32 %v3572_v10, %v4109_v11 }
 0x165   : > { %v4143_v47 = vadd.f32 %v2236_v54, %v2222_v6  ;;  %v1968_v30 = vmul.f32 %v1506_v52, %v3569_v9  ;;  %v2000_v58 = vmul.f32 %v3572_v10, %v4111_v42  ;;  %v1632_v39 = vsel %vm852_vm1, %v1601_v12, 0.0 }
 0x166   : > { %v1983_v45 = vadd.f32 %v1967_v44, %v1880_v18  ;;  %v2072_v33 = vmul.f32 %v4140_v51, %v3580_v16  ;;  %v643_v19 = vmul.f32 0.70710677, %v4115_v63  ;;  %v1643_v61 = vmul.f32 %v1631_v27, %v3532_v29 }
 0x167   : > { %v1984_v15 = vadd.f32 %v1968_v30, %v1881_v46  ;;  %v2073_v34 = vmul.f32 %v1632_v39, %v3580_v16  ;;  %v644_v0 = vmul.f32 0.70710677, %v4121_v62  ;;  %v1578_v14 = vadd.f32 %v1562_v3, %v1546_v36 }
 0x168   : > { %v1579_v40 = vadd.f32 %v1563_v41, %v1547_v21  ;;  %v2014_v56 = vadd.f32 %v1999_v1, %v1983_v45  ;;  %2919 = verf.f32 %v643_v19  ;;  %v597_v20 = vmul.f32 %v3995_v26, %v2638_v50 }
 0x169   : > { %v2015_v49 = vadd.f32 %v2000_v58, %v1984_v15  ;;  %2921 = verf.f32 %v644_v0  ;;  %v598_v22 = vmul.f32 %v3995_v26, %v2639_v38  ;;  %v2642_v31 = vunpack.c.l.bf16 %v2741_v23 }
 0x16a   : > { %v2088_v8 = vadd.f32 %v2072_v33, %v2014_v56  ;;  %v4161_v27 = vadd.f32 %v4013_v57, %v597_v20  ;;  %v1658_v4 = vadd.f32 %v1642_v60, %v1578_v14  ;;  %v2643_v6 = vunpack.c.h.bf16 %v2741_v23 }
 0x16b   : > { %v2089_v12 = vadd.f32 %v2073_v34, %v2015_v49  ;;  %v614_v48 = vadd.f32 %v4013_v57, %v598_v22  ;;  %v1659_v36 = vadd.f32 %v1643_v61, %v1579_v40  ;;  %v1564_v21 = vmul.f32 %v3523_v25, %v4109_v11 }
 0x16c   : > { %v2104_v3 = vadd.f32 %v4065_v59, %v2088_v8  ;;  %v645_v38 = vmul.f32 0.70710677, %v4161_v27  ;;  %v1754_v41 = vmul.f32 %v1536_v55, %v3539_v35  ;;  %v1755_v18 = vmul.f32 %v1506_v52, %v3539_v35 }
 0x16d   : > { %v4168_v50 = vadd.f32 %v4065_v59, %v2089_v12  ;;  %v646_v46 = vmul.f32 0.70710677, %v614_v48  ;;  %v1548_v60 = vmul.f32 %v1536_v55, %v3520_v24  ;;  %v1565_v44 = vmul.f32 %v3523_v25, %v4111_v42 }
 0x16e   : > { %v2200_v54 = vadd.f32 %v2199_v2, %v2104_v3  ;;  %v599_v1 = vmul.f32 %v3995_v26, %v2642_v31  ;;  %v1549_v58 = vmul.f32 %v1506_v52, %v3520_v24  ;;  %2923 = verf.f32 %v645_v38 }
 0x16f   : > { %v2701_v30 = vpack.c.bf16 %v4168_v50, %v2104_v3  ;;  %v600_v33 = vmul.f32 %v3995_v26, %v2643_v6  ;;  %v1436_v2 = vmul.f32 %v4000_v37, %v4000_v37  ;;  %v627_v55 = vmul.f32 0.5, %v4115_v63 }
 0x170   : > { %v4180_v45 = vadd.f32 %v2200_v54, %v4168_v50  ;;  %v628_v19 = vmul.f32 0.5, %v4121_v62  ;;  %2925 = verf.f32 %v646_v46  ;;  %v1770_v15 = vadd.f32 %v1754_v41, %v1658_v4 }
 0x171   : > { %2752 = vst [vmem:[%s3705_s29 + $0x50] sm:$0xff] %v2701_v30   ;;  %v1771_v34 = vadd.f32 %v1755_v18, %v1659_v36  ;;  %v1786_v52 = vmul.f32 %v3553_v43, %v4109_v11  ;;  %v1787_v0 = vmul.f32 %v3553_v43, %v4111_v42  ;;  %v1580_v40 = vadd.f32 %v1564_v21, %v1548_v60 }
 0x172   : > { %v2920_v61 = vpop.eup %2919  ;;  %v4193_v37 = vadd.f32 %v4013_v57, %v599_v1  ;;  %v1581_v23 = vadd.f32 %v1565_v44, %v1549_v58  ;;  %v1644_v63 = vmul.f32 %v4140_v51, %v3532_v29  ;;  %v4198_v49 = vadd.f32 %v4013_v57, %v600_v33 }
 0x173   : > { %v2922_v14 = vpop.eup %2921  ;;  %v675_v56 = vadd.f32 1.0, %v2920_v61  ;;  %v1645_v20 = vmul.f32 %v1632_v39, %v3532_v29  ;;  %v1866_v11 = vmul.f32 %v4140_v51, %v3566_v5  ;;  %v1867_v42 = vmul.f32 %v1632_v39, %v3566_v5 }
 0x174   : > { %v676_v62 = vadd.f32 1.0, %v2922_v14  ;;  %v1802_v12 = vadd.f32 %v1786_v52, %v1770_v15  ;;  %v1803_v31 = vadd.f32 %v1787_v0, %v1771_v34  ;;  %v4205_v4 = vadd.f32 %v4020_v7, %v1436_v2 }
 0x175   : > { %v691_v22 = vmul.f32 %v675_v56, %v627_v55  ;;  %v647_v36 = vmul.f32 0.70710677, %v4193_v37  ;;  %v648_v38 = vmul.f32 0.70710677, %v4198_v49  ;;  %v1660_v46 = vadd.f32 %v1644_v63, %v1580_v40 }
 0x176   : > { %v692_v8 = vmul.f32 %v676_v62, %v628_v19  ;;  %v1661_v39 = vadd.f32 %v1645_v20, %v1581_v23  ;;  %v1882_v60 = vadd.f32 %v1866_v11, %v1802_v12  ;;  %v1883_v44 = vadd.f32 %v1867_v42, %v1803_v31 }
 0x177   : > { %v1507_v6 = vrot.slane %v691_v22, 7  ;;  %v1603_v18 = vrot.slane %v691_v22, 1  ;;  %v629_v7 = vmul.f32 0.5, %v4161_v27  ;;  %v630_v58 = vmul.f32 0.5, %v614_v48 }
 0x178   : > { %v1508_v21 = vrot.slane %v692_v8, 7  ;;  %v1604_v54 = vrot.slane %v692_v8, 1  ;;  %v2924_v51 = vpop.eup %2923  ;;  %2927 = verf.f32 %v647_v36  ;;  %v2223_v33 = vmul.f32 %v2104_v3, %v2104_v3 }
 0x179   : > { %v1537_v41 = vsel %vm749_vm0, 0.0, %v1507_v6  ;;  %v2001_v55 = vmul.f32 %v3572_v10, %v691_v22  ;;  %2929 = verf.f32 %v648_v38  ;;  %v2002_v34 = vmul.f32 %v3572_v10, %v692_v8 }
 0x17a   : > { %v2926_v30 = vpop.eup %2925  ;;  %v1509_v1 = vsel %vm749_vm0, %v1507_v6, %v1508_v21  ;;  %v1756_v2 = vmul.f32 %v1537_v41, %v3539_v35  ;;  %v1605_v19 = vsel %vm852_vm1, %v1603_v18, %v1604_v54  ;;  %v1969_v61 = vmul.f32 %v1537_v41, %v3569_v9 }
 0x17b   : > { %v1970_v15 = vmul.f32 %v1509_v1, %v3569_v9  ;;  %v1633_v52 = vsel %vm852_vm1, %v1604_v54, 0.0  ;;  %v1757_v27 = vmul.f32 %v1509_v1, %v3539_v35  ;;  %v677_v48 = vadd.f32 1.0, %v2924_v51 }
 0x17c   : > { %v678_v0 = vadd.f32 1.0, %v2926_v30  ;;  %v1985_v3 = vadd.f32 %v1969_v61, %v1882_v60  ;;  %v2074_v40 = vmul.f32 %v1605_v19, %v3580_v16  ;;  %v2075_v56 = vmul.f32 %v1633_v52, %v3580_v16 }
 0x17d   : > { %v1986_v14 = vadd.f32 %v1970_v15, %v1883_v44  ;;  %v1772_v23 = vadd.f32 %v1756_v2, %v1660_v46  ;;  %v1788_v63 = vmul.f32 %v3553_v43, %v691_v22  ;;  %v4223_v11 = vmul.f32 %v677_v48, %v629_v7 }
 0x17e   : > { %v2016_v62 = vadd.f32 %v2001_v55, %v1985_v3  ;;  %v2224_v42 = vmul.f32 %v4168_v50, %v4168_v50  ;;  %v4227_v12 = vmul.f32 %v678_v0, %v630_v58  ;;  %v1773_v31 = vadd.f32 %v1757_v27, %v1661_v39 }
 0x17f   : > { %v2017_v20 = vadd.f32 %v2002_v34, %v1986_v14  ;;  %v1789_v6 = vmul.f32 %v3553_v43, %v692_v8  ;;  %v2238_v36 = vadd.f32 %v4143_v47, %v2223_v33  ;;  %v1566_v21 = vmul.f32 %v3523_v25, %v691_v22  ;;  %v2742_v22 = vld [vmem:[%s3483_s8 + $0x78] sm:$0xff]  }
 0x180   : > { %v2090_v38 = vadd.f32 %v2074_v40, %v2016_v62  ;;  %v1550_v54 = vmul.f32 %v1537_v41, %v3520_v24  ;;  %v1567_v51 = vmul.f32 %v3523_v25, %v692_v8  ;;  %v1868_v46 = vmul.f32 %v1605_v19, %v3566_v5 }
 0x181   : > { %v2091_v18 = vadd.f32 %v2075_v56, %v2017_v20  ;;  %v1804_v60 = vadd.f32 %v1788_v63, %v1772_v23  ;;  %v1551_v44 = vmul.f32 %v1509_v1, %v3520_v24  ;;  %v1510_v47 = vrot.slane %v4223_v11, 7 }
 0x182   : > { %v2928_v50 = vpop.eup %2927  ;;  %v4237_v39 = vadd.f32 %v4065_v59, %v2090_v38  ;;  %v1869_v41 = vmul.f32 %v1633_v52, %v3566_v5  ;;  %v1511_v8 = vrot.slane %v4227_v12, 7  ;;  %v1805_v58 = vadd.f32 %v1789_v6, %v1773_v31 }
 0x183   : > { %v4240_v30 = vadd.f32 %v4065_v59, %v2091_v18  ;;  %v2930_v7 = vpop.eup %2929  ;;  %v631_v33 = vmul.f32 0.5, %v4193_v37  ;;  %v1606_v2 = vrot.slane %v4223_v11, 1  ;;  %v1607_v55 = vrot.slane %v4227_v12, 1 }
 0x184   : > { %v632_v61 = vmul.f32 0.5, %v4198_v49  ;;  %v1646_v15 = vmul.f32 %v1605_v19, %v3532_v29  ;;  %v1647_v34 = vmul.f32 %v1633_v52, %v3532_v29  ;;  %v1884_v27 = vadd.f32 %v1868_v46, %v1804_v60 }
 0x185   : > { %v2706_v1 = vpack.c.bf16 %v4240_v30, %v4237_v39  ;;  %v2646_v48 = vunpack.c.l.bf16 %v2742_v22  ;;  %v1582_v0 = vadd.f32 %v1566_v21, %v1550_v54  ;;  %v1583_v3 = vadd.f32 %v1567_v51, %v1551_v44 }
 0x186   : > { %v1538_v37 = vsel %vm749_vm0, 0.0, %v1510_v47  ;;  %v679_v14 = vadd.f32 1.0, %v2928_v50  ;;  %v1512_v40 = vsel %vm749_vm0, %v1510_v47, %v1511_v8  ;;  %v1885_v56 = vadd.f32 %v1869_v41, %v1805_v58 }
 0x187   : > { %2753 = vst [vmem:[%s3705_s29 + $0x58] sm:$0xff] %v2706_v1   ;;  %v1971_v23 = vmul.f32 %v1538_v37, %v3569_v9  ;;  %v680_v63 = vadd.f32 1.0, %v2930_v7  ;;  %v4259_v49 = vsel %vm852_vm1, %v1606_v2, %v1607_v55  ;;  %v1972_v19 = vmul.f32 %v1512_v40, %v3569_v9 }
 0x188   : > { %v2003_v52 = vmul.f32 %v3572_v10, %v4223_v11  ;;  %v2004_v62 = vmul.f32 %v3572_v10, %v4227_v12  ;;  %v1634_v20 = vsel %vm852_vm1, %v1607_v55, 0.0  ;;  %v2076_v6 = vmul.f32 %v4259_v49, %v3580_v16 }
 0x189   : > { %v1987_v31 = vadd.f32 %v1971_v23, %v1884_v27  ;;  %v2647_v21 = vunpack.c.h.bf16 %v2742_v22  ;;  %v1662_v38 = vadd.f32 %v1646_v15, %v1582_v0  ;;  %v1758_v18 = vmul.f32 %v1538_v37, %v3539_v35 }
 0x18a   : > { %v1988_v54 = vadd.f32 %v1972_v19, %v1885_v56  ;;  %v2077_v51 = vmul.f32 %v1634_v20, %v3580_v16  ;;  %v1663_v46 = vadd.f32 %v1647_v34, %v1583_v3  ;;  %v1759_v60 = vmul.f32 %v1512_v40, %v3539_v35 }
 0x18b   : > { %v2018_v50 = vadd.f32 %v2003_v52, %v1987_v31  ;;  %v4272_v44 = vmul.f32 %v679_v14, %v631_v33  ;;  %v4274_v7 = vmul.f32 %v680_v63, %v632_v61  ;;  %v2239_v41 = vadd.f32 %v2238_v36, %v2224_v42 }
 0x18c   : > { %v2019_v47 = vadd.f32 %v2004_v62, %v1988_v54  ;;  %v601_v58 = vmul.f32 %v3995_v26, %v2646_v48  ;;  %v602_v22 = vmul.f32 %v3995_v26, %v2647_v21  ;;  %v1568_v1 = vmul.f32 %v3523_v25, %v4223_v11 }
 0x18d   : > { %v2092_v8 = vadd.f32 %v2076_v6, %v2018_v50  ;;  %v1774_v55 = vadd.f32 %v1758_v18, %v1662_v38  ;;  %v1790_v15 = vmul.f32 %v3553_v43, %v4223_v11  ;;  %v1552_v33 = vmul.f32 %v1538_v37, %v3520_v24 }
 0x18e   : > { %v2093_v2 = vadd.f32 %v2077_v51, %v2019_v47  ;;  %v1513_v34 = vrot.slane %v4272_v44, 7  ;;  %v1775_v61 = vadd.f32 %v1759_v60, %v1663_v46  ;;  %v1791_v42 = vmul.f32 %v3553_v43, %v4227_v12 }
 0x18f   : > { %v1870_v36 = vmul.f32 %v4259_v49, %v3566_v5  ;;  %v4289_v26 = vadd.f32 %v4065_v59, %v2092_v8  ;;  %v1514_v11 = vrot.slane %v4274_v7, 7  ;;  %v1871_v48 = vmul.f32 %v1634_v20, %v3566_v5 }
 0x190   : > { %v4292_v27 = vadd.f32 %v4065_v59, %v2093_v2  ;;  %v1609_v0 = vrot.slane %v4272_v44, 1  ;;  %v1610_v3 = vrot.slane %v4274_v7, 1  ;;  %v617_v37 = vadd.f32 %v4013_v57, %v601_v58 }
 0x191   : > { %v1569_v14 = vmul.f32 %v3523_v25, %v4227_v12  ;;  %v1806_v23 = vadd.f32 %v1790_v15, %v1774_v55  ;;  %v618_v63 = vadd.f32 %v4013_v57, %v602_v22  ;;  %v2225_v19 = vmul.f32 %v4237_v39, %v4237_v39 }
 0x192   : > { %v2711_v56 = vpack.c.bf16 %v4292_v27, %v4289_v26  ;;  %v1553_v52 = vmul.f32 %v1512_v40, %v3520_v24  ;;  %v1539_v62 = vsel %vm749_vm0, 0.0, %v1513_v34  ;;  %v1807_v31 = vadd.f32 %v1791_v42, %v1775_v61 }
 0x193   : > { %v1584_v6 = vadd.f32 %v1568_v1, %v1552_v33  ;;  %v1515_v21 = vsel %vm749_vm0, %v1513_v34, %v1514_v11  ;;  %v1886_v38 = vadd.f32 %v1870_v36, %v1806_v23  ;;  %v1973_v12 = vmul.f32 %v1539_v62, %v3569_v9 }
 0x194   : > { %2754 = vst [vmem:[%s3705_s29 + $0x60] sm:$0xff] %v2711_v56   ;;  %v1611_v18 = vsel %vm852_vm1, %v1609_v0, %v1610_v3  ;;  %v1887_v54 = vadd.f32 %v1871_v48, %v1807_v31  ;;  %v1974_v57 = vmul.f32 %v1515_v21, %v3569_v9  ;;  %v2005_v51 = vmul.f32 %v3572_v10, %v4272_v44 }
 0x195   : > { %v1635_v40 = vsel %vm852_vm1, %v1610_v3, 0.0  ;;  %v1989_v46 = vadd.f32 %v1973_v12, %v1886_v38  ;;  %v2006_v60 = vmul.f32 %v3572_v10, %v4274_v7  ;;  %v2078_v50 = vmul.f32 %v1611_v18, %v3580_v16 }
 0x196   : > { %v1990_v47 = vadd.f32 %v1974_v57, %v1887_v54  ;;  %v2079_v8 = vmul.f32 %v1635_v40, %v3580_v16  ;;  %v649_v58 = vmul.f32 0.70710677, %v617_v37  ;;  %v650_v22 = vmul.f32 0.70710677, %v618_v63 }
 0x197   : > { %v1585_v1 = vadd.f32 %v1569_v14, %v1553_v52  ;;  %v1648_v2 = vmul.f32 %v4259_v49, %v3532_v29  ;;  %v1649_v55 = vmul.f32 %v1634_v20, %v3532_v29  ;;  %v2020_v15 = vadd.f32 %v2005_v51, %v1989_v46 }
 0x198   : > { %v2021_v33 = vadd.f32 %v2006_v60, %v1990_v47  ;;  %2931 = verf.f32 %v649_v58  ;;  %v2202_v34 = vadd.f32 %v4180_v45, %v4237_v39  ;;  %v2226_v36 = vmul.f32 %v4240_v30, %v4240_v30 }
 0x199   : > { %v2094_v61 = vadd.f32 %v2078_v50, %v2020_v15  ;;  %2933 = verf.f32 %v650_v22  ;;  %v2240_v11 = vadd.f32 %v2239_v41, %v2225_v19  ;;  %v1664_v48 = vadd.f32 %v1648_v2, %v1584_v6 }
 0x19a   : > { %v2095_v42 = vadd.f32 %v2079_v8, %v2021_v33  ;;  %v1665_v0 = vadd.f32 %v1649_v55, %v1585_v1  ;;  %v1760_v49 = vmul.f32 %v1539_v62, %v3539_v35  ;;  %v1761_v20 = vmul.f32 %v1515_v21, %v3539_v35 }
 0x19b   : > { %v2110_v3 = vadd.f32 %v4065_v59, %v2094_v61  ;;  %v2203_v45 = vadd.f32 %v2202_v34, %v4240_v30  ;;  %v1570_v39 = vmul.f32 %v3523_v25, %v4272_v44  ;;  %v1554_v56 = vmul.f32 %v1539_v62, %v3520_v24 }
 0x19c   : > { %v4331_v14 = vadd.f32 %v4065_v59, %v2095_v42  ;;  %v1555_v41 = vmul.f32 %v1515_v21, %v3520_v24  ;;  %v1571_v23 = vmul.f32 %v3523_v25, %v4274_v7  ;;  %v2241_v52 = vadd.f32 %v2240_v11, %v2226_v36 }
 0x19d   : > { %v2227_v31 = vmul.f32 %v4289_v26, %v4289_v26  ;;  %v1776_v6 = vadd.f32 %v1760_v49, %v1664_v48  ;;  %v1777_v38 = vadd.f32 %v1761_v20, %v1665_v0  ;;  %v1792_v30 = vmul.f32 %v3553_v43, %v4272_v44 }
 0x19e   : > { %v2716_v19 = vpack.c.bf16 %v4331_v14, %v2110_v3  ;;  %v1793_v62 = vmul.f32 %v3553_v43, %v4274_v7  ;;  %v2204_v24 = vadd.f32 %v2203_v45, %v4289_v26  ;;  %v1650_v21 = vmul.f32 %v1611_v18, %v3532_v29 }
 0x19f   : > { %v633_v25 = vmul.f32 0.5, %v617_v37  ;;  %v1586_v54 = vadd.f32 %v1570_v39, %v1554_v56  ;;  %v1587_v57 = vadd.f32 %v1571_v23, %v1555_v41  ;;  %v1651_v51 = vmul.f32 %v1635_v40, %v3532_v29 }
 0x1a0   : > { %2755 = vst [vmem:[%s3705_s29 + $0x68] sm:$0xff] %v2716_v19   ;;  %v634_v46 = vmul.f32 0.5, %v618_v63  ;;  %v2228_v50 = vmul.f32 %v4292_v27, %v4292_v27  ;;  %v2242_v47 = vadd.f32 %v2241_v52, %v2227_v31  ;;  %v1872_v44 = vmul.f32 %v1611_v18, %v3566_v5 }
 0x1a1   : > { %v1873_v7 = vmul.f32 %v1635_v40, %v3566_v5  ;;  %v1808_v58 = vadd.f32 %v1792_v30, %v1776_v6  ;;  %v1809_v22 = vadd.f32 %v1793_v62, %v1777_v38  ;;  %v2205_v37 = vadd.f32 %v2204_v24, %v4292_v27 }
 0x1a2   : > { %v2932_v12 = vpop.eup %2931  ;;  %v1666_v2 = vadd.f32 %v1650_v21, %v1586_v54  ;;  %v1977_v29 = vmul.f32 %v3569_v9, %v3529_v28  ;;  %v2243_v63 = vadd.f32 %v2242_v47, %v2228_v50  ;;  %v1667_v15 = vadd.f32 %v1651_v51, %v1587_v57 }
 0x1a3   : > { %v2934_v60 = vpop.eup %2933  ;;  %v681_v8 = vadd.f32 1.0, %v2932_v12  ;;  %v1888_v42 = vadd.f32 %v1872_v44, %v1808_v58  ;;  %v1889_v36 = vadd.f32 %v1873_v7, %v1809_v22  ;;  %v2206_v40 = vadd.f32 %v2205_v37, %v2110_v3 }
 0x1a4   : > { %v682_v26 = vadd.f32 1.0, %v2934_v60  ;;  %v2229_v11 = vmul.f32 %v2110_v3, %v2110_v3  ;;  %v2230_v21 = vmul.f32 %v4331_v14, %v4331_v14  ;;  %v1452_v22 = vrot.slane %v4205_v4, 4 }
 0x1a5   : > { %v697_v1 = vmul.f32 %v681_v8, %v633_v25  ;;  %v2082_v8 = vmul.f32 %v3580_v16, %v3511_v17 }
 0x1a6   : > { %v698_v55 = vmul.f32 %v682_v26, %v634_v46  ;;  %v2244_v25 = vadd.f32 %v2243_v63, %v2229_v11  ;;  %v2207_v46 = vadd.f32 %v2206_v40, %v4331_v14 }
 0x1a7   : > { %v1721_v33 = vrot.slane %v697_v1, 7  ;;  %v1833_v34 = vrot.slane %v697_v1, 1  ;;  %v1794_v27 = vmul.f32 %v3553_v43, %v697_v1  ;;  %v2007_v56 = vmul.f32 %v3572_v10, %v697_v1 }
 0x1a8   : > { %v1722_v61 = vrot.slane %v698_v55, 7  ;;  %v1834_v18 = vrot.slane %v698_v55, 1  ;;  %v1795_v3 = vmul.f32 %v3553_v43, %v698_v55  ;;  %v2008_v19 = vmul.f32 %v3572_v10, %v698_v55 }
 0x1a9   : > { %v1747_v48 = vsel %vm749_vm0, 0.0, %v1721_v33  ;;  %v1978_v43 = vmul.f32 %v3569_v9, %v3505_v13  ;;  %v1414_v13 = vrot.slane %v4018_v53, 4 }
 0x1aa   : > { %v1723_v0 = vsel %vm749_vm0, %v1721_v33, %v1722_v61  ;;  %v1762_v49 = vmul.f32 %v1747_v48, %v3539_v35  ;;  %v1835_v28 = vsel %vm852_vm1, %v1833_v34, %v1834_v18  ;;  %v1859_v20 = vsel %vm852_vm1, %v1834_v18, 0.0 }
 0x1ab   : > { %v1763_v45 = vmul.f32 %v1723_v0, %v3539_v35  ;;  %v1975_v39 = vmul.f32 %v1747_v48, %v3569_v9  ;;  %v1874_v41 = vmul.f32 %v1835_v28, %v3566_v5  ;;  %v1976_v23 = vmul.f32 %v1723_v0, %v3569_v9 }
 0x1ac   : > { %v1778_v52 = vadd.f32 %v1762_v49, %v1666_v2  ;;  %v1875_v31 = vmul.f32 %v1859_v20, %v3566_v5  ;;  %v2080_v38 = vmul.f32 %v1835_v28, %v3580_v16  ;;  %v2081_v62 = vmul.f32 %v1859_v20, %v3580_v16 }
 0x1ad   : > { %v1991_v6 = vadd.f32 %v1975_v39, %v1888_v42  ;;  %v1779_v30 = vadd.f32 %v1763_v45, %v1667_v15  ;;  %v1992_v35 = vadd.f32 %v1976_v23, %v1889_v36  ;;  %v2009_v5 = vmul.f32 0.0, %v3572_v10 }
 0x1ae   : > { %v1810_v24 = vadd.f32 %v1794_v27, %v1778_v52  ;;  %v2245_v9 = vadd.f32 %v2244_v25, %v2230_v21  ;;  %v2083_v10 = vmul.f32 %v3580_v16, %v3536_v32  ;;  %v1415_v63 = vadd.f32 %v1414_v13, %v4018_v53 }
 0x1af   : > { %v2022_v12 = vadd.f32 %v2007_v56, %v1991_v6  ;;  %v1811_v54 = vadd.f32 %v1795_v3, %v1779_v30  ;;  %v2023_v57 = vadd.f32 %v2008_v19, %v1992_v35  ;;  %v1453_v16 = vadd.f32 %v1452_v22, %v4205_v4 }
 0x1b0   : > { %v1890_v51 = vadd.f32 %v1874_v41, %v1810_v24  ;;  %v1416_v40 = vrot.slane %v1415_v63, 2 }
 0x1b1   : > { %v2096_v60 = vadd.f32 %v2080_v38, %v2022_v12  ;;  %v1891_v50 = vadd.f32 %v1875_v31, %v1811_v54  ;;  %v2097_v47 = vadd.f32 %v2081_v62, %v2023_v57  ;;  %v1454_v27 = vrot.slane %v1453_v16, 2 }
 0x1b2   : > { %v1993_v44 = vadd.f32 %v1977_v29, %v1890_v51 }
 0x1b3   : > { %v2112_v7 = vadd.f32 %v4065_v59, %v2096_v60  ;;  %v1994_v26 = vadd.f32 %v1978_v43, %v1891_v50  ;;  %v2113_v14 = vadd.f32 %v4065_v59, %v2097_v47 }
 0x1b4   : > { %v2024_v58 = vadd.f32 %v2009_v5, %v1993_v44 }
 0x1b5   : > { %v2208_v37 = vadd.f32 %v2207_v46, %v2112_v7  ;;  %v2231_v1 = vmul.f32 %v2112_v7, %v2112_v7  ;;  %v2025_v17 = vadd.f32 %v2009_v5, %v1994_v26  ;;  %v2721_v2 = vpack.c.bf16 %v2113_v14, %v2112_v7 }
 0x1b6   : > { %v2232_v55 = vmul.f32 %v2113_v14, %v2113_v14  ;;  %v2098_v29 = vadd.f32 %v2082_v8, %v2024_v58 }
 0x1b7   : > { %v2209_v15 = vadd.f32 %v2208_v37, %v2113_v14  ;;  %v2246_v33 = vadd.f32 %v2245_v9, %v2231_v1  ;;  %v2099_v34 = vadd.f32 %v2083_v10, %v2025_v17  ;;  %2756 = vst [vmem:[%s3705_s29 + $0x70] sm:$0xff] %v2721_v2  }
 0x1b8   : > { %v2114_v32 = vadd.f32 %v4065_v59, %v2098_v29 }
 0x1b9   : > { %v2247_v61 = vadd.f32 %v2246_v33, %v2232_v55  ;;  %v2115_v18 = vadd.f32 %v4065_v59, %v2099_v34  ;;  %v1417_v59 = vadd.f32 %v1416_v40, %v1415_v63 }
 0x1ba   : > { %v2210_v42 = vadd.f32 %v2209_v15, %v2114_v32  ;;  %v2233_v36 = vmul.f32 %v2114_v32, %v2114_v32 }
 0x1bb   : > { %v2726_v53 = vpack.c.bf16 %v2115_v18, %v2114_v32  ;;  %v2234_v11 = vmul.f32 %v2115_v18, %v2115_v18 }
 0x1bc   : > { %v2211_v4 = vadd.f32 %v2210_v42, %v2115_v18  ;;  %v2248_v48 = vadd.f32 %v2247_v61, %v2233_v36 }
 0x1bd   : > { %2757 = vst [vmem:[%s3705_s29 + $0x78] sm:$0xff] %v2726_v53  }
 0x1be   : > { %v2212_v0 = vrot.slane %v2211_v4, 4  ;;  %v2249_v49 = vadd.f32 %v2248_v48, %v2234_v11 }
 0x1bf   : > { %3093 = shalt.err (!%p3090_p5)
}
 0x1c0   : > { %s3094_s1 = scalar_lea.hbm %s4398_s19, 2048  ;;  %s3098_s8 = scalar_lea.hbm %s4487_s5, 4096 }
 0x1c1   : > { %p3095_p10 = scmp.ne.s32.totalorder %s4398_s19, %s3094_s1  ;;  %p3099_p3 = scmp.lt.u32.totalorder %s4398_s19, %s4487_s5 }
 0x1c2   : > { %p3100_p7 = scmp.lt.u32.totalorder %s3098_s8, %s3094_s1  ;;  %p3102_p12 = scmp.lt.u32.totalorder %s3094_s1, %s4398_s19 }
 0x1c3   : > { %p3096_p13 = pnand %p3095_p10, %p3419_p6 }
 0x1c4   : > { %p3101_p11 = por %p3100_p7, %p3099_p3 }
 0x1c5   : > { %p3097_p9 = pneg %p3096_p13 }
 0x1c6   : > { %p3103_p1 = por %p3102_p12, %p3101_p11 }
 0x1c8   : > { %p3104_p2 = pnand %p3103_p1, %p3097_p9 }
 0x1ca   : > { %3107 = shalt.err (!%p3104_p2)
}
 0x1cb   : > { %s3213_s18 = smov 64   ;;  %s3214_s16 = smov 4   ;;  %v1455_v28 = vadd.f32 %v1454_v27, %v1453_v16  ;;  %v2213_v20 = vadd.f32 %v2212_v0, %v2211_v4  ;;  %v2250_v45 = vrot.slane %v2249_v49, 4  ;;  %v1418_v39 = vrot.slane %v1417_v59, 1 }
 0x1cc   : > { %2776 = dma.vmem_to_hbm [thread:$0]  (%p3419_p6), %s4400_s9, 2048, %s4398_s19, %s2260_s27, %s3213_s18, %s3213_s18, %s3214_s16  }
 0x1cd   : > { %v2214_v56 = vrot.slane %v2213_v20, 2  ;;  %v2251_v3 = vadd.f32 %v2250_v45, %v2249_v49  ;;  %s2475_s15 = sshll.u32 %s3477_s17, 1  ;;  %v1456_v41 = vrot.slane %v1455_v28, 1  ;;  %v1419_v52 = vadd.f32 %v1418_v39, %v1417_v59  ;;  %s2547_s27 = sshll.u32 %s3194_s24, 5 }
 0x1ce   : > { %s379_s9 = scalar_lea.vmem [#allocation13], %s2475_s15  ;;  %s4434_s10 = scalar_lea.hbm %s4488_s6, %s2547_s27 }
 0x1cf   : > { %v2215_v23 = vadd.f32 %v2214_v56, %v2213_v20  ;;  %v2252_v19 = vrot.slane %v2251_v3, 2  ;;  %v1457_v38 = vadd.f32 %v1456_v41, %v1455_v28  ;;  %s2296_s19 = sshll.u32 %s379_s9, 4  ;;  %s2265_s1 = scalar_lea.sflag [#allocation14], %s3477_s17  ;;  %s4429_s19 = int_to_ptr.vmem [resolvable:$true] %s2296_s19 }
 0x1d0   : > { %s3108_s20 = scalar_lea.vmem %s4429_s19, 32  ;;  %s3215_s24 = smov [#allocation13]  }
 0x1d1   : > { %v2216_v31 = vrot.slane %v2215_v23, 1  ;;  %v2253_v6 = vadd.f32 %v2252_v19, %v2251_v3  ;;  %p3109_p4 = scmp.ne.s32.totalorder %s4429_s19, %s3108_s20  ;;  %s3112_s13 = sshll.u32 %s3215_s24, 4  ;;  %s3113_s13 = int_to_ptr.vmem [resolvable:$false] %s3112_s13 }
 0x1d2   : > { %s3114_s8 = scalar_lea.vmem %s3113_s13, 64  ;;  %p3115_p5 = scmp.lt.s32.totalorder %s4429_s19, %s3113_s13 }
 0x1d3   : > { %v2217_v30 = vadd.f32 %v2216_v31, %v2215_v23  ;;  %v2254_v35 = vrot.slane %v2253_v6, 1  ;;  %p3110_p8 = pnand %p3109_p4, %p3419_p6  ;;  %p3116_p10 = scmp.lt.s32.totalorder %s3114_s8, %s3108_s20 }
 0x1d5   : > { %v2218_v62 = vadd.f32 %v2217_v30, %v1419_v52  ;;  %v2255_v24 = vadd.f32 %v2254_v35, %v2253_v6  ;;  %p3111_p0 = pneg %p3110_p8  ;;  %p3117_p13 = por %p3116_p10, %p3115_p5 }
 0x1d7   : > { %v2256_v43 = vadd.f32 %v2255_v24, %v1457_v38  ;;  %p3118_p9 = pnand %p3117_p13, %p3111_p0 }
 0x1d9   : > { %v2257_v21 = vsel %vm749_vm0, %v2218_v62, %v2256_v43 }
 0x1da   : > { %2258 = vst [vmem:[%s379_s9] sm:$0x3] %v2257_v21 }
 0x1db   : > { %3121 = shalt.err (!%p3118_p9)
}
 0x1dc   : > { %s3122_s17 = scalar_lea.hbm %s4434_s10, 32  ;;  %s3126_s18 = scalar_lea.hbm %s4488_s6, 64 }
 0x1dd   : > { %p3123_p3 = scmp.ne.s32.totalorder %s4434_s10, %s3122_s17  ;;  %p3127_p12 = scmp.lt.u32.totalorder %s4434_s10, %s4488_s6 }
 0x1de   : > { %p3128_p1 = scmp.lt.u32.totalorder %s3126_s18, %s3122_s17  ;;  %p3130_p4 = scmp.lt.u32.totalorder %s3122_s17, %s4434_s10 }
 0x1df   : > { %p3124_p7 = pnand %p3123_p3, %p3419_p6 }
 0x1e0   : > { %p3129_p2 = por %p3128_p1, %p3127_p12 }
 0x1e1   : > { %p3125_p11 = pneg %p3124_p7 }
 0x1e2   : > { %p3131_p8 = por %p3130_p4, %p3129_p2 }
 0x1e4   : > { %p3132_p0 = pnand %p3131_p8, %p3125_p11 }
 0x1e6   : > { %3135 = shalt.err (!%p3132_p0)
}
 0x1e7   : > { %2777 = dma.vmem_to_hbm [thread:$0]  (%p3419_p6), %s4429_s19, 32, %s4434_s10, %s2265_s1  }
 0x1e8 PF: > { %s4512_s9 = sld [smem:[#allocation20_spill]]  ;;  %s2308_s27 = sand.u32 1, %s3182_s21  }
 0x1e9   : > { %p4514_p10 = scmp.ge.s32.totalorder %s3202_s26, 2  ;;  %s2309_s30 = scalar_lea.sflag [#allocation5], %s2308_s27 }
 0x1ee   : > { %p4513_p5 = scmp.ne.s32.totalorder %s4512_s9, 0 }
 0x1f0   : > { %p2798_p13 = pnand %p4514_p10, %p4513_p5 }
 0x1f2   : > { %3173 = dma.done.wait (!%p2798_p13), %s2309_s30, 2048  }
 0x1f3   : > { %3175 = vsyncadd (!%p2798_p13), %s2309_s30, 4294965248  ;;  %s2318_s12 = scalar_lea.sflag [#allocation14], %s2308_s27 }
 0x1f4   : > { %3177 = dma.done.wait (!%p2798_p13), %s2318_s12, 32  }
 0x1f5   : > { %3179 = vsyncadd (!%p2798_p13), %s2318_s12, 4294967264  ;;  %s28_s26 = sadd.s32 1, %s3202_s26   ;;  %s4515_s21 = smov %s3186_s22 }
 0x1f6   : > { %p25_p9 = scmp.ge.s32.totalorder %s28_s26, 4   ;;  %s4516_s22 = smov %s3190_s23 }
 0x1f7   : > { %s4517_s23 = smov %s3428_s11  ;;  %s4518_s24 = smov %s3198_s25 }
 0x1f8   : > { %s4519_s25 = smov %s4521_s28  ;;  %27 = sbr.rel (!%p25_p9) target bundleno = 12 (0xc), region = 128 }
 0x1ff   :  { %2323 = vsyncpa [#allocation4], 1 }
 0x200   :  { %2325 = vsyncpa [#allocation4 + $0x1], 1 }
 0x201   :  { %2326 = vsyncpa [#allocation7], 1 }
 0x202   :  { %2327 = vsyncpa [#allocation10], 1 }
 0x203   :  { %2328 = vsyncpa [#allocation5], 1 }
 0x204   :  { %2330 = vsyncpa [#allocation5 + $0x1], 1 }
 0x205   :  { %2331 = vsyncpa [#allocation14], 1 }
 0x206   :  { %2333 = vsyncpa [#allocation14 + $0x1], 1 }

// kernel: convmixer_block_forward.6
= control target key start
LH: loop header
LB: loop body
LE: loop exit
PB: predicated region body
PF: predicated region fallthrough
CT: control target
= control target key end

     0   :  { %13 = vsyncpa [#allocation3], 0  ;;  %s4143_s0 = inlined_call_operand.hbm [shape: bf16[512,128], index: 0, kind: input, shape index: {}]   ;;  %s4144_s1 = inlined_call_operand.hbm [shape: f32[512,128], index: 1, kind: input, shape index: {}]   ;;  %s4145_s2 = inlined_call_operand.hbm [shape: f32[1,128], index: 2, kind: input, shape index: {}]   ;;  %s4146_s3 = inlined_call_operand.hbm [shape: f32[1,128], index: 3, kind: input, shape index: {}]   ;;  %s4147_s4 = inlined_call_operand.hbm [shape: bf16[128,128], index: 4, kind: input, shape index: {}]   ;;  %s4148_s5 = inlined_call_operand.hbm [shape: f32[1,128], index: 5, kind: input, shape index: {}]   ;;  %s4149_s6 = inlined_call_operand.hbm [shape: bf16[512,128], index: 6, kind: output, shape index: {0}]   ;;  %s4150_s7 = inlined_call_operand.hbm [shape: f32[1,2,128], index: 7, kind: output, shape index: {1}]  }
   0x1   :  { %14 = vsyncpa [#allocation6], 0 }
   0x2   :  { %15 = vsyncpa [#allocation9], 0 }
   0x3   :  { %16 = vsyncpa [#allocation12], 0 }
   0x4   :  { %17 = vsyncpa [#allocation4], 0 }
   0x5   :  { %18 = vsyncpa [#allocation15], 0  ;;  %s3378_s24 = smov [#allocation5]   ;;  %s3190_s28 = scalar_lea.hbm %s4144_s1, 8192 }
   0x6   :  { %s36_s25 = sshll.u32 %s3378_s24, 4  ;;  %p3191_p0 = scmp.ne.s32.totalorder %s4144_s1, %s3190_s28  ;;  %s37_s25 = int_to_ptr.vmem [resolvable:$true] %s36_s25 }
   0x7   :  { %p3194_p1 = scmp.lt.u32.totalorder %s3190_s28, %s4144_s1 }
   0x9   :  { %p3196_p2 = pnand %p3194_p1, %p3191_p0 }
   0xb   :  { %3199 = shalt.err (!%p3196_p2)
}
   0xc   :  { %s3200_s10 = scalar_lea.vmem %s37_s25, 8192  ;;  %p3205_p4 = scmp.lt.s32.totalorder %s37_s25, %s37_s25 }
   0xd   :  { %p3201_p3 = scmp.ne.s32.totalorder %s37_s25, %s3200_s10  ;;  %p3206_p5 = scmp.lt.s32.totalorder %s3200_s10, %s3200_s10 }
   0xf   :  { %p3207_p6 = por %p3206_p5, %p3205_p4 }
  0x11   :  { %p3208_p7 = pnand %p3207_p6, %p3201_p3 }
  0x13   :  { %3211 = shalt.err (!%p3208_p7)
}
  0x14   :  { %s3379_s11 = smov 128   ;;  %s3380_s12 = smov 8  }
  0x15   :  { %42 = dma.hbm_to_vmem [thread:$0]  %s4144_s1, 8192, %s37_s25, [#allocation6], %s3379_s11, %s3379_s11, %s3380_s12  }
  0x16   :  { %s3381_s15 = smov [#allocation8]   ;;  %s3382_s17 = smov [#allocation2]  }
  0x17   :  { %s59_s16 = sshll.u32 %s3381_s15, 4  ;;  %s24_s18 = sshll.u32 %s3382_s17, 4  ;;  %s60_s16 = int_to_ptr.vmem [resolvable:$true] %s59_s16  ;;  %s25_s18 = int_to_ptr.vmem [resolvable:$true] %s24_s18 }
  0x18   :  { %s3212_s21 = scalar_lea.hbm %s4146_s3, 16 }
  0x19   :  { %p3213_p8 = scmp.ne.s32.totalorder %s4146_s3, %s3212_s21  ;;  %p3216_p9 = scmp.lt.u32.totalorder %s3212_s21, %s4146_s3 }
  0x1b   :  { %p3218_p10 = pnand %p3216_p9, %p3213_p8 }
  0x1d   :  { %3221 = shalt.err (!%p3218_p10)
}
  0x1e   :  { %s3222_s1 = scalar_lea.vmem %s60_s16, 16  ;;  %s3226_s25 = scalar_lea.vmem %s60_s16, 32 }
  0x1f   :  { %p3223_p11 = scmp.ne.s32.totalorder %s60_s16, %s3222_s1  ;;  %p3227_p12 = scmp.lt.s32.totalorder %s60_s16, %s60_s16 }
  0x20   :  { %p3228_p13 = scmp.lt.s32.totalorder %s3226_s25, %s3222_s1 }
  0x22   :  { %p3229_p0 = por %p3228_p13, %p3227_p12 }
  0x24   :  { %p3230_p1 = pnand %p3229_p0, %p3223_p11 }
  0x26   :  { %3233 = shalt.err (!%p3230_p1)
}
  0x27   :  { %62 = dma.hbm_to_vmem [thread:$0]  %s4146_s3, 16, %s60_s16, [#allocation9]  }
  0x28   :  { %s3234_s8 = scalar_lea.hbm %s4143_s0, 4096 }
  0x29   :  { %p3235_p2 = scmp.ne.s32.totalorder %s4143_s0, %s3234_s8  ;;  %p3238_p3 = scmp.lt.u32.totalorder %s3234_s8, %s4143_s0 }
  0x2b   :  { %p3240_p4 = pnand %p3238_p3, %p3235_p2 }
  0x2d   :  { %3243 = shalt.err (!%p3240_p4)
}
  0x2e   :  { %s3244_s13 = scalar_lea.vmem %s25_s18, 4096  ;;  %p3249_p6 = scmp.lt.s32.totalorder %s25_s18, %s25_s18 }
  0x2f   :  { %p3245_p5 = scmp.ne.s32.totalorder %s25_s18, %s3244_s13  ;;  %p3250_p7 = scmp.lt.s32.totalorder %s3244_s13, %s3244_s13 }
  0x31   :  { %p3251_p8 = por %p3250_p7, %p3249_p6 }
  0x33   :  { %p3252_p9 = pnand %p3251_p8, %p3245_p5 }
  0x35   :  { %3255 = shalt.err (!%p3252_p9)
}
  0x36   :  { %s3383_s3 = smov 64   ;;  %s3384_s14 = smov 4  }
  0x37   :  { %30 = dma.hbm_to_vmem [thread:$0]  %s4143_s0, 4096, %s25_s18, [#allocation3], %s3383_s3, %s3383_s3, %s3384_s14  }
  0x38   :  { %s3385_s17 = smov [#allocation7]   ;;  %s3386_s20 = smov [#allocation10]  }
  0x39   :  { %s49_s19 = sshll.u32 %s3385_s17, 4  ;;  %s68_s21 = sshll.u32 %s3386_s20, 4  ;;  %s50_s19 = int_to_ptr.vmem [resolvable:$true] %s49_s19  ;;  %s69_s21 = int_to_ptr.vmem [resolvable:$true] %s68_s21 }
  0x3a   :  { %s3256_s24 = scalar_lea.hbm %s4145_s2, 16 }
  0x3b   :  { %p3257_p10 = scmp.ne.s32.totalorder %s4145_s2, %s3256_s24  ;;  %p3260_p11 = scmp.lt.u32.totalorder %s3256_s24, %s4145_s2 }
  0x3d   :  { %p3262_p12 = pnand %p3260_p11, %p3257_p10 }
  0x3f   :  { %3265 = shalt.err (!%p3262_p12)
}
  0x40   :  { %s3266_s0 = scalar_lea.vmem %s50_s19, 16  ;;  %s3270_s18 = scalar_lea.vmem %s50_s19, 32 }
  0x41   :  { %p3267_p13 = scmp.ne.s32.totalorder %s50_s19, %s3266_s0  ;;  %p3271_p0 = scmp.lt.s32.totalorder %s50_s19, %s50_s19 }
  0x42   :  { %p3272_p1 = scmp.lt.s32.totalorder %s3270_s18, %s3266_s0 }
  0x44   :  { %p3273_p2 = por %p3272_p1, %p3271_p0 }
  0x46   :  { %p3274_p3 = pnand %p3273_p2, %p3267_p13 }
  0x48   :  { %3277 = shalt.err (!%p3274_p3)
}
  0x49   :  { %52 = dma.hbm_to_vmem [thread:$0]  %s4145_s2, 16, %s50_s19, [#allocation6]  }
  0x4a   :  { %s3278_s9 = scalar_lea.hbm %s4147_s4, 1024 }
  0x4b   :  { %p3279_p4 = scmp.ne.s32.totalorder %s4147_s4, %s3278_s9  ;;  %p3282_p5 = scmp.lt.u32.totalorder %s3278_s9, %s4147_s4 }
  0x4d   :  { %p3284_p6 = pnand %p3282_p5, %p3279_p4 }
  0x4f   :  { %3287 = shalt.err (!%p3284_p6)
}
  0x50   :  { %s3288_s15 = scalar_lea.vmem %s69_s21, 1024  ;;  %p3293_p8 = scmp.lt.s32.totalorder %s69_s21, %s69_s21 }
  0x51   :  { %p3289_p7 = scmp.ne.s32.totalorder %s69_s21, %s3288_s15  ;;  %p3294_p9 = scmp.lt.s32.totalorder %s3288_s15, %s3288_s15 }
  0x53   :  { %p3295_p10 = por %p3294_p9, %p3293_p8 }
  0x55   :  { %p3296_p11 = pnand %p3295_p10, %p3289_p7 }
  0x57   :  { %3299 = shalt.err (!%p3296_p11)
}
  0x58   :  { %74 = dma.hbm_to_vmem [thread:$0]  %s4147_s4, 1024, %s69_s21, [#allocation9], %s3383_s3, %s3383_s3, %s3384_s14  }
  0x59   :  { %s3387_s17 = smov [#allocation11]   ;;  %s3300_s23 = scalar_lea.hbm %s4148_s5, 16 }
  0x5a   :  { %s81_s19 = sshll.u32 %s3387_s17, 4  ;;  %p3301_p12 = scmp.ne.s32.totalorder %s4148_s5, %s3300_s23  ;;  %s82_s19 = int_to_ptr.vmem [resolvable:$true] %s81_s19 }
  0x5b   :  { %p3304_p13 = scmp.lt.u32.totalorder %s3300_s23, %s4148_s5 }
  0x5d   :  { %p3306_p0 = pnand %p3304_p13, %p3301_p12 }
  0x5f   :  { %3309 = shalt.err (!%p3306_p0)
}
  0x60   :  { %s3310_s27 = scalar_lea.vmem %s82_s19, 16  ;;  %s3314_s4 = scalar_lea.vmem %s82_s19, 32 }
  0x61   :  { %p3311_p1 = scmp.ne.s32.totalorder %s82_s19, %s3310_s27  ;;  %p3315_p2 = scmp.lt.s32.totalorder %s82_s19, %s82_s19 }
  0x62   :  { %p3316_p3 = scmp.lt.s32.totalorder %s3314_s4, %s3310_s27 }
  0x64   :  { %p3317_p4 = por %p3316_p3, %p3315_p2 }
  0x66   :  { %p3318_p5 = pnand %p3317_p4, %p3311_p1 }
  0x68   :  { %3321 = shalt.err (!%p3318_p5)
}
  0x69   :  { %84 = dma.hbm_to_vmem [thread:$0]  %s4148_s5, 16, %s82_s19, [#allocation12]  }
  0x6a   :  { %3366 = dma.done.wait [#allocation3], 4096  }
  0x6b   :  { %3367 = vsyncadd [#allocation3], 4294963200 }
  0x6c   :  { %3368 = dma.done.wait [#allocation6], 8208  }
  0x6d   :  { %3369 = vsyncadd [#allocation6], 4294959088 }
  0x6e   :  { %3370 = dma.done.wait [#allocation9], 1040  }
  0x6f   :  { %3371 = vsyncadd [#allocation9], 4294966256 }
  0x70   :  { %3372 = dma.done.wait [#allocation12], 16  }
  0x71   :  { %3373 = vsyncadd [#allocation12], 4294967280  ;;  %v3508_v0 = vld [vmem:[#allocation10] sm:$0xff]   ;;  %v3510_v1 = vld [vmem:[#allocation10 + $0x8] sm:$0xff]   ;;  %s3388_s5 = smov [#allocation13]  }
  0x72   :  { %2783 = vmatprep.subr.bf16.mxu0 %v3508_v0  ;;  %2815 = vmatprep.subr.bf16.mxu1 %v3508_v0  ;;  %v3518_v2 = vld [vmem:[#allocation10 + $0x10] sm:$0xff]   ;;  %v3524_v3 = vld [vmem:[#allocation10 + $0x18] sm:$0xff]   ;;  %v2657_v12 = vld [vmem:[#allocation2 + $0x8] sm:$0xff]   ;;  %s2201_s18 = sshll.u32 %s3388_s5, 4  ;;  %s2202_s18 = int_to_ptr.vmem [resolvable:$true] %s2201_s18 }
  0x73   :  { %2784 = vmatpush3.bf16.msra.mxu0 %v3508_v0  ;;  %2816 = vmatpush3.bf16.msra.mxu1 %v3508_v0  ;;  %v3526_v4 = vld [vmem:[#allocation7] ss:$0 sm:$0xff]  ;;  %v3528_v9 = vld [vmem:[#allocation8] ss:$0 sm:$0xff]  ;;  %v2375_v15 = vunpack.c.l.bf16 %v2657_v12  ;;  %v2376_v16 = vunpack.c.h.bf16 %v2657_v12  ;;  %v2672_v17 = vld [vmem:[#allocation2 + $0x48] sm:$0xff]   ;;  %s3322_s28 = scalar_lea.vmem %s2202_s18, 4096  ;;  %p3327_p7 = scmp.lt.s32.totalorder %s2202_s18, %s2202_s18 }
  0x74   :  { %2785 = vmatprep.subr.bf16.mxu0 %v3510_v1  ;;  %2817 = vmatprep.subr.bf16.mxu1 %v3510_v1  ;;  %v2370_v5 = vld [vmem:[#allocation2] sm:$0xff]   ;;  %v2447_v21 = vunpack.c.l.bf16 %v2672_v17  ;;  %v2448_v22 = vunpack.c.h.bf16 %v2672_v17  ;;  %v3550_v31 = vld [vmem:[#allocation10 + $0x28] sm:$0xff]   ;;  %v3570_v49 = vld [vmem:[#allocation10 + $0x30] sm:$0xff]   ;;  %p3323_p6 = scmp.ne.s32.totalorder %s2202_s18, %s3322_s28  ;;  %p3328_p8 = scmp.lt.s32.totalorder %s3322_s28, %s3322_s28 }
  0x75   :  { %v2371_v6 = vunpack.c.l.bf16 %v2370_v5  ;;  %v2372_v7 = vunpack.c.h.bf16 %v2370_v5  ;;  %v2671_v8 = vld [vmem:[#allocation2 + $0x40] sm:$0xff]   ;;  %v163_v25 = vmul.f32 %v2375_v15, %v3526_v4  ;;  %v164_v26 = vmul.f32 %v2376_v16, %v3526_v4  ;;  %v2658_v34 = vld [vmem:[#allocation2 + $0x10] sm:$0xff]   ;;  %v2659_v53 = vld [vmem:[#allocation2 + $0x18] sm:$0xff]  }
  0x76   :  { %v2443_v10 = vunpack.c.l.bf16 %v2671_v8  ;;  %v2444_v11 = vunpack.c.h.bf16 %v2671_v8  ;;  %v3536_v18 = vld [vmem:[#allocation10 + $0x20] sm:$0xff]   ;;  %v724_v29 = vmul.f32 %v2447_v21, %v3526_v4  ;;  %v725_v30 = vmul.f32 %v2448_v22, %v3526_v4  ;;  %v2673_v48 = vld [vmem:[#allocation2 + $0x50] sm:$0xff]   ;;  %v3583_v63 = vld [vmem:[#allocation10 + $0x38] sm:$0xff]   ;;  %p3329_p9 = por %p3328_p8, %p3327_p7 }
  0x77   :  { %2786 = vmatpush3.bf16.msra.mxu0 %v3510_v1  ;;  %2818 = vmatpush3.bf16.msra.mxu1 %v3510_v1  ;;  %v161_v13 = vmul.f32 %v2371_v6, %v3526_v4  ;;  %v162_v14 = vmul.f32 %v2372_v7, %v3526_v4  ;;  %v185_v39 = vadd.f32 %v3528_v9, %v163_v25  ;;  %v2379_v43 = vunpack.c.l.bf16 %v2658_v34  ;;  %v279_v25 = vld [vmem:[#allocation5] sm:$0xff] }
  0x78   :  { %2787 = vmatprep.subr.bf16.mxu0 %v3518_v2  ;;  %2819 = vmatprep.subr.bf16.mxu1 %v3518_v2  ;;  %v722_v19 = vmul.f32 %v2443_v10, %v3526_v4  ;;  %v723_v20 = vmul.f32 %v2444_v11, %v3526_v4  ;;  %v186_v40 = vadd.f32 %v3528_v9, %v164_v26  ;;  %v2380_v44 = vunpack.c.h.bf16 %v2658_v34  ;;  %p3330_p10 = pnand %p3329_p9, %p3323_p6 }
  0x79   :  { %v183_v23 = vadd.f32 %v3528_v9, %v161_v13  ;;  %v184_v24 = vadd.f32 %v3528_v9, %v162_v14  ;;  %v740_v41 = vadd.f32 %v3528_v9, %v724_v29  ;;  %v741_v42 = vadd.f32 %v3528_v9, %v725_v30  ;;  %v3592_v13 = vld [vmem:[#allocation2 + $0x58] sm:$0xff]  }
  0x7a   :  { %v738_v27 = vadd.f32 %v3528_v9, %v722_v19  ;;  %v739_v28 = vadd.f32 %v3528_v9, %v723_v20  ;;  %v217_v47 = vmul.f32 0.70710677, %v185_v39  ;;  %v3572_v50 = vmul.f32 0.5, %v185_v39 }
  0x7b   :  { %2788 = vmatpush3.bf16.msra.mxu0 %v3518_v2  ;;  %2820 = vmatpush3.bf16.msra.mxu1 %v3518_v2  ;;  %v215_v32 = vmul.f32 0.70710677, %v183_v23  ;;  %v216_v33 = vmul.f32 0.70710677, %v184_v24  ;;  %v3554_v35 = vmul.f32 0.5, %v183_v23  ;;  %v3556_v36 = vmul.f32 0.5, %v184_v24 }
  0x7c   :  { %2789 = vmatprep.subr.bf16.mxu0 %v3524_v3  ;;  %2821 = vmatprep.subr.bf16.mxu1 %v3524_v3  ;;  %v770_v37 = vmul.f32 0.70710677, %v738_v27  ;;  %v771_v38 = vmul.f32 0.70710677, %v739_v28  ;;  %v3564_v45 = vmul.f32 0.5, %v738_v27  ;;  %v3566_v46 = vmul.f32 0.5, %v739_v28 }
  0x7d   :  { %2931 = verf.f32 %v215_v32  ;;  %v3574_v51 = vmul.f32 0.5, %v186_v40  ;;  %v218_v52 = vmul.f32 0.70710677, %v186_v40  ;;  %v772_v54 = vmul.f32 0.70710677, %v740_v41 }
  0x7e   :  { %2933 = verf.f32 %v216_v33  ;;  %v773_v55 = vmul.f32 0.70710677, %v741_v42  ;;  %v165_v56 = vmul.f32 %v2379_v43, %v3526_v4  ;;  %v166_v57 = vmul.f32 %v2380_v44, %v3526_v4 }
  0x7f   :  { %2790 = vmatpush3.bf16.msra.mxu0 %v3524_v3  ;;  %2822 = vmatpush3.bf16.msra.mxu1 %v3524_v3  ;;  %2935 = verf.f32 %v770_v37  ;;  %v2451_v58 = vunpack.c.l.bf16 %v2673_v48  ;;  %v2452_v59 = vunpack.c.h.bf16 %v2673_v48  ;;  %v2383_v61 = vunpack.c.l.bf16 %v2659_v53 }
  0x80   :  { %2791 = vmatprep.subr.bf16.mxu0 %v3536_v18  ;;  %2823 = vmatprep.subr.bf16.mxu1 %v3536_v18  ;;  %2937 = verf.f32 %v771_v38  ;;  %v187_v60 = vadd.f32 %v3528_v9, %v165_v56  ;;  %v2384_v62 = vunpack.c.h.bf16 %v2659_v53  ;;  %v188_v5 = vadd.f32 %v3528_v9, %v166_v57  ;;  %v280_v38 = vld [vmem:[#allocation5 + $0x8] sm:$0xff] }
  0x81   :  { %2939 = verf.f32 %v217_v47  ;;  %v726_v6 = vmul.f32 %v2451_v58, %v3526_v4  ;;  %v727_v7 = vmul.f32 %v2452_v59, %v3526_v4  ;;  %v3588_v8 = vmul.f32 0.5, %v740_v41  ;;  %v834_v47 = vld [vmem:[#allocation5 + $0x80] sm:$0xff]  ;;  %v281_v59 = vld [vmem:[#allocation5 + $0x10] sm:$0xff] }
  0x82   :  { %2941 = verf.f32 %v218_v52  ;;  %v219_v10 = vmul.f32 0.70710677, %v187_v60  ;;  %v167_v11 = vmul.f32 %v2383_v61, %v3526_v4  ;;  %v168_v12 = vmul.f32 %v2384_v62, %v3526_v4 }
  0x83   :  { %2792 = vmatpush3.bf16.msra.mxu0 %v3536_v18  ;;  %2824 = vmatpush3.bf16.msra.mxu1 %v3536_v18  ;;  %2943 = verf.f32 %v772_v54  ;;  %v3594_v14 = vmul.f32 0.5, %v741_v42  ;;  %v220_v15 = vmul.f32 0.70710677, %v188_v5  ;;  %v742_v16 = vadd.f32 %v3528_v9, %v726_v6  ;;  %v835_v54 = vld [vmem:[#allocation5 + $0x88] sm:$0xff]  ;;  %v2660_v6 = vld [vmem:[#allocation2 + $0x20] sm:$0xff]  }
  0x84   :  { %2793 = vmatprep.subr.bf16.mxu0 %v3550_v31  ;;  %2825 = vmatprep.subr.bf16.mxu1 %v3550_v31  ;;  %2945 = verf.f32 %v773_v55  ;;  %v743_v17 = vadd.f32 %v3528_v9, %v727_v7  ;;  %v3600_v20 = vmul.f32 0.5, %v187_v60  ;;  %v3603_v21 = vadd.f32 %v3528_v9, %v167_v11 }
  0x85   :  { %2947 = verf.f32 %v219_v10  ;;  %v3606_v22 = vadd.f32 %v3528_v9, %v168_v12  ;;  %v3610_v26 = vmul.f32 0.5, %v188_v5  ;;  %v2455_v27 = vunpack.c.l.bf16 %v3592_v13  ;;  %v282_v5 = vld [vmem:[#allocation5 + $0x18] sm:$0xff] }
  0x86   :  { %2949 = verf.f32 %v220_v15  ;;  %v3613_v30 = vmul.f32 0.5, %v742_v16  ;;  %v774_v32 = vmul.f32 0.70710677, %v742_v16  ;;  %v775_v33 = vmul.f32 0.70710677, %v743_v17  ;;  %v836_v15 = vld [vmem:[#allocation5 + $0x90] sm:$0xff] }
  0x87   :  { %2794 = vmatpush3.bf16.msra.mxu0 %v3550_v31  ;;  %2826 = vmatpush3.bf16.msra.mxu1 %v3550_v31  ;;  %v2932_v19 = vpop.eup %2931  ;;  %v3616_v40 = vmul.f32 0.5, %v743_v17  ;;  %v221_v41 = vmul.f32 0.70710677, %v3603_v21  ;;  %v222_v48 = vmul.f32 0.70710677, %v3606_v22  ;;  %v837_v17 = vld [vmem:[#allocation5 + $0x98] sm:$0xff] }
  0x88   :  { %2795 = vmatprep.subr.bf16.mxu0 %v3570_v49  ;;  %2827 = vmatprep.subr.bf16.mxu1 %v3570_v49  ;;  %v2934_v23 = vpop.eup %2933  ;;  %v247_v24 = vadd.f32 1.0, %v2932_v19  ;;  %2951 = verf.f32 %v774_v32  ;;  %v2456_v19 = vunpack.c.h.bf16 %v3592_v13 }
  0x89   :  { %v2936_v28 = vpop.eup %2935  ;;  %v248_v29 = vadd.f32 1.0, %v2934_v23  ;;  %2953 = verf.f32 %v775_v33  ;;  %v728_v23 = vmul.f32 %v2455_v27, %v3526_v4  ;;  %v283_v27 = vld [vmem:[#allocation5 + $0x20] sm:$0xff] }
  0x8a   :  { %v2938_v34 = vpop.eup %2937  ;;  %v263_v37 = vmul.f32 %v247_v24, %v3554_v35  ;;  %v802_v39 = vadd.f32 1.0, %v2936_v28  ;;  %2955 = verf.f32 %v221_v41 }
  0x8b   :  { %2796 = vmatpush3.bf16.msra.mxu0 %v3570_v49  ;;  %2828 = vmatpush3.bf16.msra.mxu1 %v3570_v49  ;;  %v2940_v42 = vpop.eup %2939  ;;  %v264_v43 = vmul.f32 %v248_v29, %v3556_v36  ;;  %v803_v44 = vadd.f32 1.0, %v2938_v34  ;;  %2957 = verf.f32 %v222_v48  ;;  %v2387_v29 = vunpack.c.l.bf16 %v2660_v6 }
  0x8c   :  { %2797 = vmatprep.subr.bf16.mxu0 %v3583_v63  ;;  %2829 = vmatprep.subr.bf16.mxu1 %v3583_v63  ;;  %v2942_v52 = vpop.eup %2941  ;;  %v295_v35 = vadd.f32 %v279_v25, %v263_v37  ;;  %v818_v53 = vmul.f32 %v802_v39, %v3564_v45  ;;  %v249_v55 = vadd.f32 1.0, %v2940_v42  ;;  %v729_v34 = vmul.f32 %v2456_v19, %v3526_v4  ;;  %v284_v42 = vld [vmem:[#allocation5 + $0x28] sm:$0xff] }
  0x8d   :  { %v2944_v56 = vpop.eup %2943  ;;  %v296_v57 = vadd.f32 %v280_v38, %v264_v43  ;;  %v819_v36 = vmul.f32 %v803_v44, %v3566_v46  ;;  %v250_v58 = vadd.f32 1.0, %v2942_v52  ;;  %v3635_v37 = vadd.f32 %v3528_v9, %v728_v23 }
  0x8e   :  { %v2946_v60 = vpop.eup %2945  ;;  %v850_v61 = vadd.f32 %v834_v47, %v818_v53  ;;  %v265_v62 = vmul.f32 %v249_v55, %v3572_v50  ;;  %v804_v45 = vadd.f32 1.0, %v2944_v56  ;;  %v2388_v39 = vunpack.c.h.bf16 %v2660_v6 }
  0x8f   :  { %2798 = vmatpush3.bf16.msra.mxu0 %v3583_v63  ;;  %2830 = vmatpush3.bf16.msra.mxu1 %v3583_v63  ;;  %v311_v7 = vpack.c.bf16 %v296_v57, %v295_v35  ;;  %v851_v10 = vadd.f32 %v835_v54, %v819_v36  ;;  %v266_v11 = vmul.f32 %v250_v58, %v3574_v51  ;;  %v805_v12 = vadd.f32 1.0, %v2946_v60  ;;  %v2948_v24 = vpop.eup %2947 }
  0x90   :  { %2847 = vmatprep.subr.bf16.mxu0 %v3508_v0  ;;  %2879 = vmatprep.subr.bf16.mxu1 %v3508_v0  ;;  %v297_v16 = vadd.f32 %v281_v59, %v265_v62  ;;  %v820_v46 = vmul.f32 %v804_v45, %v3588_v8  ;;  %v2950_v32 = vpop.eup %2949  ;;  %v251_v51 = vadd.f32 1.0, %v2948_v24  ;;  %v3640_v43 = vadd.f32 %v3528_v9, %v729_v34  ;;  %v839_v62 = vld [vmem:[#allocation5 + $0xa8] sm:$0xff]  ;;  %v2675_v45 = vld [vmem:[#allocation2 + $0x60] sm:$0xff]  }
  0x91   :  { %2799 = vmatprep.mubr.bf16.mxu0 %v311_v7  ;;  %v866_v50 = vpack.c.bf16 %v851_v10, %v850_v61  ;;  %v298_v25 = vadd.f32 %v282_v5, %v266_v11  ;;  %v821_v28 = vmul.f32 %v805_v12, %v3594_v14  ;;  %v252_v38 = vadd.f32 1.0, %v2950_v32  ;;  %v285_v11 = vld [vmem:[#allocation5 + $0x30] sm:$0xff]  ;;  %v2661_v12 = vld [vmem:[#allocation2 + $0x28] sm:$0xff]  }
  0x92   :  { %v852_v33 = vadd.f32 %v836_v15, %v820_v46  ;;  %v267_v41 = vmul.f32 %v251_v51, %v3600_v20  ;;  %v205_v14 = vmul.f32 0.5, %v3603_v21  ;;  %v776_v44 = vmul.f32 0.70710677, %v3635_v37  ;;  %v2952_v47 = vpop.eup %2951  ;;  %v2676_v24 = vld [vmem:[#allocation2 + $0x68] sm:$0xff]  }
  0x93   :  { %2831 = vmatprep.mubr.bf16.mxu1 %v866_v50  ;;  %v312_v8 = vpack.c.bf16 %v298_v25, %v297_v16  ;;  %v853_v13 = vadd.f32 %v837_v17, %v821_v28  ;;  %v268_v52 = vmul.f32 %v252_v38, %v3610_v26  ;;  %v169_v35 = vmul.f32 %v2387_v29, %v3526_v4  ;;  %v2954_v54 = vpop.eup %2953  ;;  %v838_v26 = vld [vmem:[#allocation5 + $0xa0] sm:$0xff] }
  0x94   :  { %v170_v53 = vmul.f32 %v2388_v39, %v3526_v4  ;;  %v299_v20 = vadd.f32 %v283_v27, %v267_v41  ;;  %v806_v55 = vadd.f32 1.0, %v2952_v47  ;;  %v206_v21 = vmul.f32 0.5, %v3606_v22  ;;  %v2956_v57 = vpop.eup %2955 }
  0x95   :  { %2800 = vmatmul.mubr.bf16.vlgmr.msra.gmra.mrb[0].mxu0 %v312_v8  ;;  %v867_v48 = vpack.c.bf16 %v853_v13, %v852_v33  ;;  %v777_v56 = vmul.f32 0.70710677, %v3640_v43  ;;  %v300_v36 = vadd.f32 %v284_v42, %v268_v52  ;;  %v807_v58 = vadd.f32 1.0, %v2954_v54  ;;  %v2958_v60 = vpop.eup %2957 }
  0x96   :  { %2848 = vmatpush3.bf16.msra.mxu0 %v3508_v0  ;;  %2959 = verf.f32 %v776_v44  ;;  %v3651_v59 = vadd.f32 %v3528_v9, %v169_v35  ;;  %v822_v61 = vmul.f32 %v806_v55, %v3613_v30  ;;  %v253_v22 = vadd.f32 1.0, %v2956_v57  ;;  %v286_v30 = vld [vmem:[#allocation5 + $0x38] sm:$0xff] }
  0x97   :  { %2832 = vmatmul.mubr.bf16.vlgmr.msra.gmra.mrb[0].mxu1 %v867_v48  ;;  %2849 = vmatprep.subr.bf16.mxu0 %v3510_v1  ;;  %2961 = verf.f32 %v777_v56  ;;  %v3656_v5 = vadd.f32 %v3528_v9, %v170_v53  ;;  %v313_v6 = vpack.c.bf16 %v300_v36, %v299_v20  ;;  %v823_v7 = vmul.f32 %v807_v58, %v3616_v40  ;;  %v841_v58 = vld [vmem:[#allocation5 + $0xb8] sm:$0xff] }
  0x98   :  { %2880 = vmatpush3.bf16.msra.mxu1 %v3508_v0  ;;  %v254_v10 = vadd.f32 1.0, %v2958_v60  ;;  %v854_v0 = vadd.f32 %v838_v26, %v822_v61  ;;  %v269_v15 = vmul.f32 %v253_v22, %v205_v14  ;;  %v223_v16 = vmul.f32 0.70710677, %v3651_v59 }
  0x99   :  { %2881 = vmatprep.subr.bf16.mxu1 %v3510_v1  ;;  %2803 = vmatprep.mubr.bf16.mxu0 %v313_v6  ;;  %v855_v46 = vadd.f32 %v839_v62, %v823_v7  ;;  %v224_v19 = vmul.f32 0.70710677, %v3656_v5  ;;  %v2459_v23 = vunpack.c.l.bf16 %v2675_v45  ;;  %v2460_v50 = vunpack.c.h.bf16 %v2675_v45 }
  0x9a   :  { %2850 = vmatpush3.bf16.msra.mxu0 %v3510_v1  ;;  %v270_v17 = vmul.f32 %v254_v10, %v206_v21  ;;  %v301_v40 = vadd.f32 %v285_v11, %v269_v15  ;;  %2963 = verf.f32 %v223_v16  ;;  %v2391_v25 = vunpack.c.l.bf16 %v2661_v12  ;;  %v840_v21 = vld [vmem:[#allocation5 + $0xb0] sm:$0xff] }
  0x9b   :  { %2851 = vmatprep.subr.bf16.mxu0 %v3518_v2  ;;  %v868_v28 = vpack.c.bf16 %v855_v46, %v854_v0  ;;  %2965 = verf.f32 %v224_v19  ;;  %v730_v32 = vmul.f32 %v2459_v23, %v3526_v4  ;;  %v731_v33 = vmul.f32 %v2460_v50, %v3526_v4 }
  0x9c   :  { %2882 = vmatpush3.bf16.msra.mxu1 %v3510_v1  ;;  %v302_v29 = vadd.f32 %v286_v30, %v270_v17  ;;  %v2392_v51 = vunpack.c.h.bf16 %v2661_v12  ;;  %v171_v34 = vmul.f32 %v2391_v25, %v3526_v4  ;;  %v2463_v8 = vunpack.c.l.bf16 %v2676_v24  ;;  %v2662_v1 = vld [vmem:[#allocation2 + $0x30] sm:$0xff]   ;;  %v287_v30 = vld [vmem:[#allocation5 + $0x40] sm:$0xff] }
  0x9d   :  { %2883 = vmatprep.subr.bf16.mxu1 %v3518_v2  ;;  %2835 = vmatprep.mubr.bf16.mxu1 %v868_v28  ;;  %v760_v38 = vmul.f32 0.5, %v3635_v37  ;;  %v746_v27 = vadd.f32 %v3528_v9, %v730_v32  ;;  %v2464_v39 = vunpack.c.h.bf16 %v2676_v24  ;;  %v761_v41 = vmul.f32 0.5, %v3640_v43  ;;  %v288_v24 = vld [vmem:[#allocation5 + $0x48] sm:$0xff] }
  0x9e   :  { %2852 = vmatpush3.bf16.msra.mxu0 %v3518_v2  ;;  %v314_v13 = vpack.c.bf16 %v302_v29, %v301_v40  ;;  %v747_v42 = vadd.f32 %v3528_v9, %v731_v33  ;;  %v172_v14 = vmul.f32 %v2392_v51, %v3526_v4  ;;  %v193_v44 = vadd.f32 %v3528_v9, %v171_v34 }
  0x9f   :  { %2853 = vmatprep.subr.bf16.mxu0 %v3524_v3  ;;  %v778_v37 = vmul.f32 0.70710677, %v746_v27  ;;  %v732_v48 = vmul.f32 %v2463_v8, %v3526_v4  ;;  %v733_v52 = vmul.f32 %v2464_v39, %v3526_v4  ;;  %v2395_v35 = vunpack.c.l.bf16 %v2662_v1 }
  0xa0   :  { %2884 = vmatpush3.bf16.msra.mxu1 %v3518_v2  ;;  %v2960_v47 = vpop.eup %2959  ;;  %2804 = vmatmul.mubr.bf16.gmra.mrb[4].mxu0 %v314_v13  ;;  %v779_v2 = vmul.f32 0.70710677, %v747_v42  ;;  %v194_v54 = vadd.f32 %v3528_v9, %v172_v14  ;;  %v2396_v20 = vunpack.c.h.bf16 %v2662_v1  ;;  %v207_v56 = vmul.f32 0.5, %v3651_v59 }
  0xa1   :  { %2885 = vmatprep.subr.bf16.mxu1 %v3524_v3  ;;  %v2962_v53 = vpop.eup %2961  ;;  %v808_v43 = vadd.f32 1.0, %v2960_v47  ;;  %2967 = verf.f32 %v778_v37  ;;  %v225_v57 = vmul.f32 0.70710677, %v193_v44  ;;  %v208_v26 = vmul.f32 0.5, %v3656_v5  ;;  %v2677_v5 = vld [vmem:[#allocation2 + $0x70] sm:$0xff]  }
  0xa2   :  { %2854 = vmatpush3.bf16.msra.mxu0 %v3524_v3  ;;  %v809_v55 = vadd.f32 1.0, %v2962_v53  ;;  %2969 = verf.f32 %v779_v2  ;;  %v226_v60 = vmul.f32 0.70710677, %v194_v54  ;;  %v748_v62 = vadd.f32 %v3528_v9, %v732_v48 }
  0xa3   :  { %2855 = vmatprep.subr.bf16.mxu0 %v3536_v18  ;;  %v824_v36 = vmul.f32 %v808_v43, %v760_v38  ;;  %2971 = verf.f32 %v225_v57  ;;  %v749_v22 = vadd.f32 %v3528_v9, %v733_v52  ;;  %v173_v6 = vmul.f32 %v2395_v35, %v3526_v4  ;;  %v842_v52 = vld [vmem:[#allocation5 + $0xc0] sm:$0xff] }
  0xa4   :  { %2886 = vmatpush3.bf16.msra.mxu1 %v3524_v3  ;;  %v825_v61 = vmul.f32 %v809_v55, %v761_v41  ;;  %v2964_v59 = vpop.eup %2963  ;;  %2973 = verf.f32 %v226_v60  ;;  %v174_v3 = vmul.f32 %v2396_v20, %v3526_v4  ;;  %v762_v12 = vmul.f32 0.5, %v746_v27  ;;  %v3710_v41 = vld [vmem:[#allocation2 + $0x78] sm:$0xff]   ;;  %v843_v20 = vld [vmem:[#allocation5 + $0xc8] sm:$0xff] }
  0xa5   :  { %2887 = vmatprep.subr.bf16.mxu1 %v3536_v18  ;;  %v856_v45 = vadd.f32 %v840_v21, %v824_v36  ;;  %v2966_v7 = vpop.eup %2965  ;;  %v255_v11 = vadd.f32 1.0, %v2964_v59  ;;  %v763_v0 = vmul.f32 0.5, %v747_v42  ;;  %v780_v16 = vmul.f32 0.70710677, %v748_v62 }
  0xa6   :  { %2856 = vmatpush3.bf16.msra.mxu0 %v3536_v18  ;;  %v857_v10 = vadd.f32 %v841_v58, %v825_v61  ;;  %v256_v15 = vadd.f32 1.0, %v2966_v7  ;;  %v781_v46 = vmul.f32 0.70710677, %v749_v22  ;;  %v3696_v17 = vadd.f32 %v3528_v9, %v173_v6  ;;  %v289_v58 = vld [vmem:[#allocation5 + $0x50] sm:$0xff] }
  0xa7   :  { %2857 = vmatprep.subr.bf16.mxu0 %v3550_v31  ;;  %v271_v23 = vmul.f32 %v255_v11, %v207_v56  ;;  %v3700_v40 = vadd.f32 %v3528_v9, %v174_v3  ;;  %v2467_v50 = vunpack.c.l.bf16 %v2677_v5  ;;  %v209_v28 = vmul.f32 0.5, %v193_v44 }
  0xa8   :  { %2888 = vmatpush3.bf16.msra.mxu1 %v3536_v18  ;;  %v869_v19 = vpack.c.bf16 %v857_v10, %v856_v45  ;;  %v272_v25 = vmul.f32 %v256_v15, %v208_v26  ;;  %2975 = verf.f32 %v780_v16  ;;  %v227_v29 = vmul.f32 0.70710677, %v3696_v17  ;;  %v2663_v18 = vld [vmem:[#allocation2 + $0x38] sm:$0xff]  }
  0xa9   :  { %2889 = vmatprep.subr.bf16.mxu1 %v3550_v31  ;;  %v303_v32 = vadd.f32 %v287_v30, %v271_v23  ;;  %v210_v33 = vmul.f32 0.5, %v194_v54  ;;  %2977 = verf.f32 %v781_v46  ;;  %v228_v51 = vmul.f32 0.70710677, %v3700_v40  ;;  %v844_v23 = vld [vmem:[#allocation5 + $0xd0] sm:$0xff] }
  0xaa   :  { %2858 = vmatpush3.bf16.msra.mxu0 %v3550_v31  ;;  %2836 = vmatmul.mubr.bf16.gmra.mrb[4].mxu1 %v869_v19  ;;  %v304_v34 = vadd.f32 %v288_v24, %v272_v25  ;;  %2979 = verf.f32 %v227_v29  ;;  %v2468_v8 = vunpack.c.h.bf16 %v2677_v5  ;;  %v734_v1 = vmul.f32 %v2467_v50, %v3526_v4  ;;  %v845_v29 = vld [vmem:[#allocation5 + $0xd8] sm:$0xff] }
  0xab   :  { %2859 = vmatprep.subr.bf16.mxu0 %v3570_v49  ;;  %v2968_v13 = vpop.eup %2967  ;;  %v3708_v38 = vmul.f32 0.5, %v748_v62  ;;  %2981 = verf.f32 %v228_v51  ;;  %v2399_v27 = vunpack.c.l.bf16 %v2663_v18  ;;  %v2400_v39 = vunpack.c.h.bf16 %v2663_v18  ;;  %v291_v51 = vld [vmem:[#allocation5 + $0x60] sm:$0xff] }
  0xac   :  { %2890 = vmatpush3.bf16.msra.mxu1 %v3550_v31  ;;  %v2970_v42 = vpop.eup %2969  ;;  %v315_v14 = vpack.c.bf16 %v304_v34, %v303_v32  ;;  %v810_v44 = vadd.f32 1.0, %v2968_v13  ;;  %v735_v47 = vmul.f32 %v2468_v8, %v3526_v4  ;;  %v3715_v31 = vadd.f32 %v3528_v9, %v734_v1  ;;  %v292_v13 = vld [vmem:[#allocation5 + $0x68] sm:$0xff] }
  0xad   :  { %2891 = vmatprep.subr.bf16.mxu1 %v3570_v49  ;;  %v2972_v37 = vpop.eup %2971  ;;  %v811_v48 = vadd.f32 1.0, %v2970_v42  ;;  %v765_v35 = vmul.f32 0.5, %v749_v22  ;;  %v175_v53 = vmul.f32 %v2399_v27, %v3526_v4  ;;  %v176_v43 = vmul.f32 %v2400_v39, %v3526_v4  ;;  %v290_v22 = vld [vmem:[#allocation5 + $0x58] sm:$0xff] }
  0xae   :  { %2860 = vmatpush3.bf16.msra.mxu0 %v3570_v49  ;;  %v2974_v2 = vpop.eup %2973  ;;  %2807 = vmatprep.mubr.bf16.mxu0 %v315_v14  ;;  %v826_v54 = vmul.f32 %v810_v44, %v762_v12  ;;  %v257_v55 = vadd.f32 1.0, %v2972_v37  ;;  %v751_v21 = vadd.f32 %v3528_v9, %v735_v47  ;;  %v2471_v56 = vunpack.c.l.bf16 %v3710_v41  ;;  %v2703_v44 = vld [vmem:[#allocation2 + $0xc0] sm:$0xff]  }
  0xaf   :  { %2861 = vmatprep.subr.bf16.mxu0 %v3583_v63  ;;  %v827_v57 = vmul.f32 %v811_v48, %v763_v0  ;;  %v258_v36 = vadd.f32 1.0, %v2974_v2  ;;  %v782_v26 = vmul.f32 0.70710677, %v3715_v31  ;;  %v3726_v60 = vadd.f32 %v3528_v9, %v175_v53 }
  0xb0   :  { %2892 = vmatpush3.bf16.msra.mxu1 %v3570_v49  ;;  %v858_v61 = vadd.f32 %v842_v52, %v826_v54  ;;  %v273_v62 = vmul.f32 %v257_v55, %v209_v28  ;;  %v783_v59 = vmul.f32 0.70710677, %v751_v21  ;;  %v2472_v45 = vunpack.c.h.bf16 %v3710_v41 }
  0xb1   :  { %2893 = vmatprep.subr.bf16.mxu1 %v3583_v63  ;;  %v859_v6 = vadd.f32 %v843_v20, %v827_v57  ;;  %v274_v49 = vmul.f32 %v258_v36, %v210_v33  ;;  %2983 = verf.f32 %v782_v26  ;;  %v3732_v3 = vadd.f32 %v3528_v9, %v176_v43 }
  0xb2   :  { %2862 = vmatpush3.bf16.msra.mxu0 %v3583_v63  ;;  %v2976_v5 = vpop.eup %2975  ;;  %v305_v7 = vadd.f32 %v289_v58, %v273_v62  ;;  %v211_v10 = vmul.f32 0.5, %v3696_v17  ;;  %2985 = verf.f32 %v783_v59  ;;  %v229_v11 = vmul.f32 0.70710677, %v3726_v60  ;;  %v2687_v17 = vld [vmem:[#allocation2 + $0x80] sm:$0xff]  }
  0xb3   :  { %v2978_v12 = vpop.eup %2977  ;;  %v870_v0 = vpack.c.bf16 %v859_v6, %v858_v61  ;;  %v306_v15 = vadd.f32 %v290_v22, %v274_v49  ;;  %v812_v30 = vadd.f32 1.0, %v2976_v5  ;;  %v212_v16 = vmul.f32 0.5, %v3700_v40  ;;  %v846_v61 = vld [vmem:[#allocation5 + $0xe0] sm:$0xff]  ;;  %v847_v49 = vld [vmem:[#allocation5 + $0xe8] sm:$0xff] }
  0xb4   :  { %2894 = vmatpush3.bf16.msra.mxu1 %v3583_v63  ;;  %v2980_v46 = vpop.eup %2979  ;;  %v813_v19 = vadd.f32 1.0, %v2978_v12  ;;  %v230_v24 = vmul.f32 0.70710677, %v3732_v3  ;;  %2987 = verf.f32 %v229_v11  ;;  %v736_v50 = vmul.f32 %v2471_v56, %v3526_v4  ;;  %v2688_v56 = vld [vmem:[#allocation2 + $0x88] sm:$0xff]  }
  0xb5   :  { %v2982_v25 = vpop.eup %2981  ;;  %2839 = vmatprep.mubr.bf16.mxu1 %v870_v0  ;;  %v316_v28 = vpack.c.bf16 %v306_v15, %v305_v7  ;;  %v828_v63 = vmul.f32 %v812_v30, %v3708_v38  ;;  %v259_v18 = vadd.f32 1.0, %v2980_v46  ;;  %v737_v32 = vmul.f32 %v2472_v45, %v3526_v4 }
  0xb6   :  { %v829_v33 = vmul.f32 %v813_v19, %v765_v35  ;;  %v260_v40 = vadd.f32 1.0, %v2982_v25  ;;  %2989 = verf.f32 %v230_v24  ;;  %v752_v34 = vadd.f32 %v3528_v9, %v736_v50 }
  0xb7   :  { %2808 = vmatmul.mubr.bf16.gmra.mrb[8].mxu0 %v316_v28  ;;  %v860_v8 = vadd.f32 %v844_v23, %v828_v63  ;;  %v275_v1 = vmul.f32 %v259_v18, %v211_v10  ;;  %v753_v27 = vadd.f32 %v3528_v9, %v737_v32  ;;  %v2515_v39 = vunpack.c.l.bf16 %v2687_v17 }
  0xb8   :  { %v861_v41 = vadd.f32 %v845_v29, %v829_v33  ;;  %v276_v42 = vmul.f32 %v260_v40, %v212_v16  ;;  %v766_v38 = vmul.f32 0.5, %v3715_v31  ;;  %v784_v14 = vmul.f32 0.70710677, %v752_v34  ;;  %v293_v16 = vld [vmem:[#allocation5 + $0x70] sm:$0xff] }
  0xb9   :  { %v307_v47 = vadd.f32 %v291_v51, %v275_v1  ;;  %v767_v37 = vmul.f32 0.5, %v751_v21  ;;  %v785_v48 = vmul.f32 0.70710677, %v753_v27  ;;  %v2516_v52 = vunpack.c.h.bf16 %v2687_v17  ;;  %v294_v17 = vld [vmem:[#allocation5 + $0x78] sm:$0xff] }
  0xba   :  { %v871_v35 = vpack.c.bf16 %v861_v41, %v860_v8  ;;  %v308_v53 = vadd.f32 %v292_v13, %v276_v42  ;;  %2991 = verf.f32 %v784_v14  ;;  %v1223_v43 = vmul.f32 %v2515_v39, %v3526_v4 }
  0xbb   :  { %v2984_v2 = vpop.eup %2983  ;;  %2993 = verf.f32 %v785_v48  ;;  %v1224_v54 = vmul.f32 %v2516_v52, %v3526_v4  ;;  %v2587_v20 = vunpack.c.l.bf16 %v2703_v44  ;;  %v2588_v55 = vunpack.c.h.bf16 %v2703_v44 }
  0xbc   :  { %v2986_v57 = vpop.eup %2985  ;;  %2840 = vmatmul.mubr.bf16.gmra.mrb[8].mxu1 %v871_v35  ;;  %v317_v31 = vpack.c.bf16 %v308_v53, %v307_v47  ;;  %v814_v36 = vadd.f32 1.0, %v2984_v2  ;;  %v213_v21 = vmul.f32 0.5, %v3726_v60  ;;  %v1239_v58 = vadd.f32 %v3528_v9, %v1223_v43  ;;  %v849_v35 = vld [vmem:[#allocation5 + $0xf8] sm:$0xff] }
  0xbd   :  { %v815_v26 = vadd.f32 1.0, %v2986_v57  ;;  %v1240_v62 = vadd.f32 %v3528_v9, %v1224_v54  ;;  %v1724_v22 = vmul.f32 %v2587_v20, %v3526_v4  ;;  %v1725_v59 = vmul.f32 %v2588_v55, %v3526_v4 }
  0xbe   :  { %v2988_v45 = vpop.eup %2987  ;;  %2811 = vmatprep.mubr.bf16.mxu0 %v317_v31  ;;  %v830_v6 = vmul.f32 %v814_v36, %v766_v38  ;;  %v214_v5 = vmul.f32 0.5, %v3732_v3  ;;  %v1271_v7 = vmul.f32 0.70710677, %v1239_v58  ;;  %v2519_v10 = vunpack.c.l.bf16 %v2688_v56  ;;  %v2704_v3 = vld [vmem:[#allocation2 + $0xc8] sm:$0xff]   ;;  %v848_v38 = vld [vmem:[#allocation5 + $0xf0] sm:$0xff] }
  0xbf   :  { %v831_v11 = vmul.f32 %v815_v26, %v767_v37  ;;  %v261_v60 = vadd.f32 1.0, %v2988_v45  ;;  %v1272_v12 = vmul.f32 0.70710677, %v1240_v62  ;;  %v2520_v0 = vunpack.c.h.bf16 %v2688_v56  ;;  %v2689_v37 = vld [vmem:[#allocation2 + $0x90] sm:$0xff]  }
  0xc0   :  { %v2990_v15 = vpop.eup %2989  ;;  %v862_v30 = vadd.f32 %v846_v61, %v830_v6  ;;  %2995 = verf.f32 %v1271_v7  ;;  %v1740_v46 = vadd.f32 %v3528_v9, %v1724_v22  ;;  %v1741_v19 = vadd.f32 %v3528_v9, %v1725_v59  ;;  %v2705_v26 = vld [vmem:[#allocation2 + $0xd0] sm:$0xff]  }
  0xc1   :  { %v863_v23 = vadd.f32 %v847_v49, %v831_v11  ;;  %v262_v24 = vadd.f32 1.0, %v2990_v15  ;;  %v277_v50 = vmul.f32 %v261_v60, %v213_v21  ;;  %2997 = verf.f32 %v1272_v12  ;;  %v1336_v11 = vld [vmem:[#allocation5 + $0x108] sm:$0xff] }
  0xc2   :  { %v768_v25 = vmul.f32 0.5, %v752_v34  ;;  %v769_v28 = vmul.f32 0.5, %v753_v27  ;;  %v1772_v63 = vmul.f32 0.70710677, %v1740_v46  ;;  %v1773_v29 = vmul.f32 0.70710677, %v1741_v19 }
  0xc3   :  { %v872_v18 = vpack.c.bf16 %v863_v23, %v862_v30  ;;  %v278_v32 = vmul.f32 %v262_v24, %v214_v5  ;;  %v309_v33 = vadd.f32 %v293_v16, %v277_v50  ;;  %v1225_v40 = vmul.f32 %v2519_v10, %v3526_v4  ;;  %v1335_v5 = vld [vmem:[#allocation5 + $0x100] sm:$0xff]  ;;  %v2690_v23 = vld [vmem:[#allocation2 + $0x98] sm:$0xff]  }
  0xc4   :  { %v2992_v51 = vpop.eup %2991  ;;  %2999 = verf.f32 %v1772_v63  ;;  %v1226_v8 = vmul.f32 %v2520_v0, %v3526_v4  ;;  %v2591_v1 = vunpack.c.l.bf16 %v2704_v3  ;;  %v2592_v13 = vunpack.c.h.bf16 %v2704_v3  ;;  %v3773_v16 = vld [vmem:[#allocation8] ss:$0 sm:$0xff] }
  0xc5   :  { %v2994_v39 = vpop.eup %2993  ;;  %2843 = vmatprep.mubr.bf16.mxu1 %v872_v18  ;;  %v310_v41 = vadd.f32 %v294_v17, %v278_v32  ;;  %v816_v42 = vadd.f32 1.0, %v2992_v51  ;;  %3001 = verf.f32 %v1773_v29  ;;  %v1241_v34 = vadd.f32 %v3528_v9, %v1225_v40  ;;  %v1836_v29 = vld [vmem:[#allocation5 + $0x180] sm:$0xff]  ;;  %v1837_v40 = vld [vmem:[#allocation5 + $0x188] sm:$0xff] }
  0xc6   :  { %v817_v27 = vadd.f32 1.0, %v2994_v39  ;;  %v1242_v14 = vadd.f32 %v3528_v9, %v1226_v8  ;;  %v1726_v44 = vmul.f32 %v2591_v1, %v3526_v4  ;;  %v1727_v47 = vmul.f32 %v2592_v13, %v3526_v4 }
  0xc7   :  { %v318_v48 = vpack.c.bf16 %v310_v41, %v309_v33  ;;  %v832_v52 = vmul.f32 %v816_v42, %v768_v25  ;;  %v1255_v53 = vmul.f32 0.5, %v1239_v58  ;;  %v1273_v43 = vmul.f32 0.70710677, %v1241_v34 }
  0xc8   :  { %v833_v2 = vmul.f32 %v817_v27, %v769_v28  ;;  %v1256_v54 = vmul.f32 0.5, %v1240_v62  ;;  %v1274_v20 = vmul.f32 0.70710677, %v1242_v14  ;;  %v3762_v55 = vadd.f32 %v3528_v9, %v1726_v44 }
  0xc9   :  { %2812 = vmatmul.mubr.bf16.gmra.mrb[12].mxu0 %v318_v48  ;;  %v864_v56 = vadd.f32 %v848_v38, %v832_v52  ;;  %3003 = verf.f32 %v1273_v43  ;;  %v3765_v57 = vadd.f32 %v3528_v9, %v1727_v47  ;;  %v2523_v31 = vunpack.c.l.bf16 %v2689_v37  ;;  %v3769_v9 = vld [vmem:[#allocation7] ss:$0 sm:$0xff] }
  0xca   :  { %v2996_v4 = vpop.eup %2995  ;;  %v865_v36 = vadd.f32 %v849_v35, %v833_v2  ;;  %v1756_v21 = vmul.f32 0.5, %v1740_v46  ;;  %3005 = verf.f32 %v1274_v20  ;;  %v1774_v58 = vmul.f32 0.70710677, %v3762_v55  ;;  %v1337_v35 = vld [vmem:[#allocation5 + $0x110] sm:$0xff] }
  0xcb   :  { %v2998_v61 = vpop.eup %2997  ;;  %v1303_v62 = vadd.f32 1.0, %v2996_v4  ;;  %v1757_v22 = vmul.f32 0.5, %v1741_v19  ;;  %v1775_v59 = vmul.f32 0.70710677, %v3765_v57  ;;  %v2524_v45 = vunpack.c.h.bf16 %v2689_v37  ;;  %v1338_v4 = vld [vmem:[#allocation5 + $0x118] sm:$0xff] }
  0xcc   :  { %v873_v6 = vpack.c.bf16 %v865_v36, %v864_v56  ;;  %v1304_v49 = vadd.f32 1.0, %v2998_v61  ;;  %3007 = verf.f32 %v1774_v58  ;;  %v1227_v7 = vmul.f32 %v3769_v9, %v2523_v31 }
  0xcd   :  { %v1319_v10 = vmul.f32 %v1303_v62, %v1255_v53  ;;  %3009 = verf.f32 %v1775_v59  ;;  %v1228_v60 = vmul.f32 %v3769_v9, %v2524_v45  ;;  %v2595_v12 = vunpack.c.l.bf16 %v2705_v26  ;;  %v1838_v62 = vld [vmem:[#allocation5 + $0x190] sm:$0xff] }
  0xce   :  { %v3000_v0 = vpop.eup %2999  ;;  %2844 = vmatmul.mubr.bf16.gmra.mrb[12].mxu1 %v873_v6  ;;  %v1320_v15 = vmul.f32 %v1304_v49, %v1256_v54  ;;  %v1257_v30 = vmul.f32 0.5, %v1241_v34  ;;  %v1243_v46 = vadd.f32 %v3773_v16, %v1227_v7  ;;  %v2596_v19 = vunpack.c.h.bf16 %v2705_v26  ;;  %v2706_v54 = vld [vmem:[#allocation2 + $0xd8] sm:$0xff]  }
  0xcf   :  { %v3002_v24 = vpop.eup %3001  ;;  %v1351_v50 = vadd.f32 %v1335_v5, %v1319_v10  ;;  %v1804_v17 = vadd.f32 1.0, %v3000_v0  ;;  %v1244_v3 = vadd.f32 %v3773_v16, %v1228_v60  ;;  %v1728_v25 = vmul.f32 %v3769_v9, %v2595_v12  ;;  %v1839_v49 = vld [vmem:[#allocation5 + $0x198] sm:$0xff]  ;;  %v2691_v10 = vld [vmem:[#allocation2 + $0xa0] sm:$0xff]  }
  0xd0   :  { %v1352_v28 = vadd.f32 %v1336_v11, %v1320_v15  ;;  %v1805_v63 = vadd.f32 1.0, %v3002_v24  ;;  %v1258_v18 = vmul.f32 0.5, %v1242_v14  ;;  %v1275_v32 = vmul.f32 0.70710677, %v1243_v46 }
  0xd1   :  { %v1820_v33 = vmul.f32 %v1804_v17, %v1756_v21  ;;  %v1276_v51 = vmul.f32 0.70710677, %v1244_v3  ;;  %v1729_v8 = vmul.f32 %v3769_v9, %v2596_v19  ;;  %v2527_v1 = vunpack.c.l.bf16 %v2690_v23 }
  0xd2   :  { %v1367_v13 = vpack.c.bf16 %v1352_v28, %v1351_v50  ;;  %v1821_v39 = vmul.f32 %v1805_v63, %v1757_v22  ;;  %3011 = verf.f32 %v1275_v32  ;;  %v1744_v41 = vadd.f32 %v3773_v16, %v1728_v25 }
  0xd3   :  { %v3004_v42 = vpop.eup %3003  ;;  %v1852_v34 = vadd.f32 %v1836_v29, %v1820_v33  ;;  %3013 = verf.f32 %v1276_v51  ;;  %v3781_v27 = vadd.f32 %v3773_v16, %v1729_v8  ;;  %v2528_v38 = vunpack.c.h.bf16 %v2690_v23  ;;  %v2707_v29 = vld [vmem:[#allocation2 + $0xe0] sm:$0xff]  }
  0xd4   :  { %v3006_v14 = vpop.eup %3005  ;;  %2863 = vmatprep.mubr.bf16.mxu0 %v1367_v13  ;;  %v1853_v44 = vadd.f32 %v1837_v40, %v1821_v39  ;;  %v1305_v47 = vadd.f32 1.0, %v3004_v42  ;;  %v1758_v37 = vmul.f32 0.5, %v3762_v55  ;;  %v1776_v48 = vmul.f32 0.70710677, %v1744_v41  ;;  %v1339_v33 = vld [vmem:[#allocation5 + $0x120] sm:$0xff] }
  0xd5   :  { %v1306_v52 = vadd.f32 1.0, %v3006_v14  ;;  %v1759_v53 = vmul.f32 0.5, %v3765_v57  ;;  %v1777_v43 = vmul.f32 0.70710677, %v3781_v27  ;;  %v1229_v2 = vmul.f32 %v3769_v9, %v2527_v1  ;;  %v1340_v1 = vld [vmem:[#allocation5 + $0x128] sm:$0xff] }
  0xd6   :  { %v3008_v20 = vpop.eup %3007  ;;  %v1868_v56 = vpack.c.bf16 %v1853_v44, %v1852_v34  ;;  %v1321_v31 = vmul.f32 %v1305_v47, %v1257_v30  ;;  %3015 = verf.f32 %v1776_v48  ;;  %v1230_v36 = vmul.f32 %v3769_v9, %v2528_v38 }
  0xd7   :  { %v3010_v21 = vpop.eup %3009  ;;  %v1322_v58 = vmul.f32 %v1306_v52, %v1258_v18  ;;  %v1806_v55 = vadd.f32 1.0, %v3008_v20  ;;  %3017 = verf.f32 %v1777_v43  ;;  %v1245_v26 = vadd.f32 %v3773_v16, %v1229_v2  ;;  %v1840_v43 = vld [vmem:[#allocation5 + $0x1a0] sm:$0xff]  ;;  %v2692_v2 = vld [vmem:[#allocation2 + $0xa8] sm:$0xff]  }
  0xd8   :  { %2895 = vmatprep.mubr.bf16.mxu1 %v1868_v56  ;;  %v1353_v57 = vadd.f32 %v1337_v35, %v1321_v31  ;;  %v1807_v61 = vadd.f32 1.0, %v3010_v21  ;;  %v1246_v22 = vadd.f32 %v3773_v16, %v1230_v36  ;;  %v2599_v59 = vunpack.c.l.bf16 %v2706_v54  ;;  %v1841_v20 = vld [vmem:[#allocation5 + $0x1a8] sm:$0xff] }
  0xd9   :  { %v1354_v45 = vadd.f32 %v1338_v4, %v1322_v58  ;;  %v1822_v6 = vmul.f32 %v1806_v55, %v1758_v37  ;;  %v1259_v5 = vmul.f32 0.5, %v1243_v46  ;;  %v1277_v7 = vmul.f32 0.70710677, %v1245_v26 }
  0xda   :  { %v1823_v11 = vmul.f32 %v1807_v61, %v1759_v53  ;;  %v1260_v60 = vmul.f32 0.5, %v1244_v3  ;;  %v1278_v12 = vmul.f32 0.70710677, %v1246_v22  ;;  %v2600_v0 = vunpack.c.h.bf16 %v2706_v54 }
  0xdb   :  { %v1368_v15 = vpack.c.bf16 %v1354_v45, %v1353_v57  ;;  %v1854_v30 = vadd.f32 %v1838_v62, %v1822_v6  ;;  %3019 = verf.f32 %v1277_v7  ;;  %v1730_v19 = vmul.f32 %v3769_v9, %v2599_v59 }
  0xdc   :  { %v3012_v23 = vpop.eup %3011  ;;  %v1855_v24 = vadd.f32 %v1839_v49, %v1823_v11  ;;  %3021 = verf.f32 %v1278_v12  ;;  %v1731_v50 = vmul.f32 %v3769_v9, %v2600_v0  ;;  %v2531_v17 = vunpack.c.l.bf16 %v2691_v10 }
  0xdd   :  { %v3014_v25 = vpop.eup %3013  ;;  %2864 = vmatmul.mubr.bf16.vlgmr.msra.gmra.mrb[16].mxu0 %v1368_v15  ;;  %v1307_v46 = vadd.f32 1.0, %v3012_v23  ;;  %v1760_v28 = vmul.f32 0.5, %v1744_v41  ;;  %v1746_v63 = vadd.f32 %v3773_v16, %v1730_v19  ;;  %v2532_v3 = vunpack.c.h.bf16 %v2691_v10  ;;  %v1342_v15 = vld [vmem:[#allocation5 + $0x138] sm:$0xff] }
  0xde   :  { %v1869_v18 = vpack.c.bf16 %v1855_v24, %v1854_v30  ;;  %v1308_v32 = vadd.f32 1.0, %v3014_v25  ;;  %v1747_v40 = vadd.f32 %v3773_v16, %v1731_v50  ;;  %v1231_v51 = vmul.f32 %v3769_v9, %v2531_v17 }
  0xdf   :  { %v1323_v8 = vmul.f32 %v1307_v46, %v1259_v5  ;;  %v1761_v13 = vmul.f32 0.5, %v3781_v27  ;;  %v1778_v39 = vmul.f32 0.70710677, %v1746_v63  ;;  %v1232_v42 = vmul.f32 %v3769_v9, %v2532_v3  ;;  %v1341_v5 = vld [vmem:[#allocation5 + $0x130] sm:$0xff] }
  0xe0   :  { %v3016_v34 = vpop.eup %3015  ;;  %2896 = vmatmul.mubr.bf16.vlgmr.msra.gmra.mrb[16].mxu1 %v1869_v18  ;;  %v1324_v41 = vmul.f32 %v1308_v32, %v1260_v60  ;;  %v1779_v38 = vmul.f32 0.70710677, %v1747_v40  ;;  %v1247_v14 = vadd.f32 %v3773_v16, %v1231_v51  ;;  %v2603_v44 = vunpack.c.l.bf16 %v2707_v29  ;;  %v2708_v60 = vld [vmem:[#allocation2 + $0xe8] sm:$0xff]   ;;  %v2693_v51 = vld [vmem:[#allocation2 + $0xb0] sm:$0xff]  }
  0xe1   :  { %v3018_v47 = vpop.eup %3017  ;;  %v1355_v37 = vadd.f32 %v1339_v33, %v1323_v8  ;;  %v1808_v48 = vadd.f32 1.0, %v3016_v34  ;;  %3023 = verf.f32 %v1778_v39  ;;  %v1248_v52 = vadd.f32 %v3773_v16, %v1232_v42  ;;  %v1842_v42 = vld [vmem:[#allocation5 + $0x1b0] sm:$0xff] }
  0xe2   :  { %v1356_v35 = vadd.f32 %v1340_v1, %v1324_v41  ;;  %v1809_v53 = vadd.f32 1.0, %v3018_v47  ;;  %v1261_v27 = vmul.f32 0.5, %v1245_v26  ;;  %3025 = verf.f32 %v1779_v38  ;;  %v1843_v38 = vld [vmem:[#allocation5 + $0x1b8] sm:$0xff] }
  0xe3   :  { %v1824_v54 = vmul.f32 %v1808_v48, %v1760_v28  ;;  %v1262_v56 = vmul.f32 0.5, %v1246_v22  ;;  %v1279_v31 = vmul.f32 0.70710677, %v1247_v14  ;;  %v1280_v4 = vmul.f32 0.70710677, %v1248_v52 }
  0xe4   :  { %v1369_v36 = vpack.c.bf16 %v1356_v35, %v1355_v37  ;;  %v1825_v21 = vmul.f32 %v1809_v53, %v1761_v13  ;;  %v2604_v58 = vunpack.c.h.bf16 %v2707_v29  ;;  %v1732_v55 = vmul.f32 %v3769_v9, %v2603_v44  ;;  %v2709_v53 = vld [vmem:[#allocation2 + $0xf0] sm:$0xff]  }
  0xe5   :  { %v3020_v57 = vpop.eup %3019  ;;  %v1856_v61 = vadd.f32 %v1840_v43, %v1824_v54  ;;  %3027 = verf.f32 %v1279_v31  ;;  %v2535_v62 = vunpack.c.l.bf16 %v2692_v2  ;;  %v2536_v59 = vunpack.c.h.bf16 %v2692_v2 }
  0xe6   :  { %v3022_v45 = vpop.eup %3021  ;;  %2867 = vmatprep.mubr.bf16.mxu0 %v1369_v36  ;;  %v1857_v26 = vadd.f32 %v1841_v20, %v1825_v21  ;;  %v1309_v6 = vadd.f32 1.0, %v3020_v57  ;;  %3029 = verf.f32 %v1280_v4  ;;  %v1733_v49 = vmul.f32 %v3769_v9, %v2604_v58  ;;  %v1343_v4 = vld [vmem:[#allocation5 + $0x140] sm:$0xff] }
  0xe7   :  { %v1310_v22 = vadd.f32 1.0, %v3022_v45  ;;  %v1748_v7 = vadd.f32 %v3773_v16, %v1732_v55  ;;  %v1233_v10 = vmul.f32 %v3769_v9, %v2535_v62  ;;  %v1234_v11 = vmul.f32 %v3769_v9, %v2536_v59  ;;  %v1344_v55 = vld [vmem:[#allocation5 + $0x148] sm:$0xff] }
  0xe8   :  { %v1870_v12 = vpack.c.bf16 %v1857_v26, %v1856_v61  ;;  %v1325_v0 = vmul.f32 %v1309_v6, %v1261_v27  ;;  %v1762_v30 = vmul.f32 0.5, %v1746_v63  ;;  %v1749_v19 = vadd.f32 %v3773_v16, %v1733_v49 }
  0xe9   :  { %v1326_v23 = vmul.f32 %v1310_v22, %v1262_v56  ;;  %v1763_v24 = vmul.f32 0.5, %v1747_v40  ;;  %v1780_v50 = vmul.f32 0.70710677, %v1748_v7  ;;  %v1249_v17 = vadd.f32 %v3773_v16, %v1233_v10 }
  0xea   :  { %2899 = vmatprep.mubr.bf16.mxu1 %v1870_v12  ;;  %v1357_v25 = vadd.f32 %v1341_v5, %v1325_v0  ;;  %v1781_v46 = vmul.f32 0.70710677, %v1749_v19  ;;  %v1250_v28 = vadd.f32 %v3773_v16, %v1234_v11  ;;  %v2607_v3 = vunpack.c.l.bf16 %v2708_v60 }
  0xeb   :  { %v3024_v29 = vpop.eup %3023  ;;  %v1358_v18 = vadd.f32 %v1342_v15, %v1326_v23  ;;  %v1263_v32 = vmul.f32 0.5, %v1247_v14  ;;  %3031 = verf.f32 %v1780_v50  ;;  %v1281_v33 = vmul.f32 0.70710677, %v1249_v17  ;;  %v2694_v23 = vld [vmem:[#allocation2 + $0xb8] sm:$0xff]  }
  0xec   :  { %v3026_v63 = vpop.eup %3025  ;;  %v1810_v8 = vadd.f32 1.0, %v3024_v29  ;;  %v1264_v1 = vmul.f32 0.5, %v1248_v52  ;;  %3033 = verf.f32 %v1781_v46  ;;  %v1282_v40 = vmul.f32 0.70710677, %v1250_v28 }
  0xed   :  { %v1370_v13 = vpack.c.bf16 %v1358_v18, %v1357_v25  ;;  %v1811_v39 = vadd.f32 1.0, %v3026_v63  ;;  %3035 = verf.f32 %v1281_v33  ;;  %v2608_v34 = vunpack.c.h.bf16 %v2708_v60  ;;  %v1844_v25 = vld [vmem:[#allocation5 + $0x1c0] sm:$0xff]  ;;  %v1845_v18 = vld [vmem:[#allocation5 + $0x1c8] sm:$0xff]  ;;  %v1345_v63 = vld [vmem:[#allocation5 + $0x150] sm:$0xff] }
  0xee   :  { %v1826_v41 = vmul.f32 %v1810_v8, %v1762_v30  ;;  %3037 = verf.f32 %v1282_v40  ;;  %v1734_v44 = vmul.f32 %v3769_v9, %v2607_v3  ;;  %v2539_v47 = vunpack.c.l.bf16 %v2693_v51 }
  0xef   :  { %v3028_v14 = vpop.eup %3027  ;;  %2868 = vmatmul.mubr.bf16.gmra.mrb[20].mxu0 %v1370_v13  ;;  %v1827_v37 = vmul.f32 %v1811_v39, %v1763_v24  ;;  %v1764_v48 = vmul.f32 0.5, %v1748_v7  ;;  %v1735_v35 = vmul.f32 %v3769_v9, %v2608_v34  ;;  %v2540_v52 = vunpack.c.h.bf16 %v2693_v51  ;;  %v1346_v39 = vld [vmem:[#allocation5 + $0x158] sm:$0xff] }
  0xf0   :  { %v3030_v43 = vpop.eup %3029  ;;  %v1858_v27 = vadd.f32 %v1842_v42, %v1826_v41  ;;  %v1311_v2 = vadd.f32 1.0, %v3028_v14  ;;  %v1750_v54 = vadd.f32 %v3773_v16, %v1734_v44  ;;  %v1235_v20 = vmul.f32 %v3769_v9, %v2539_v47  ;;  %v2710_v34 = vld [vmem:[#allocation2 + $0xf8] sm:$0xff]  }
  0xf1   :  { %v1859_v56 = vadd.f32 %v1843_v38, %v1827_v37  ;;  %v1312_v31 = vadd.f32 1.0, %v3030_v43  ;;  %v1751_v36 = vadd.f32 %v3773_v16, %v1735_v35  ;;  %v1236_v21 = vmul.f32 %v3769_v9, %v2540_v52 }
  0xf2   :  { %v1327_v58 = vmul.f32 %v1311_v2, %v1263_v32  ;;  %v1782_v57 = vmul.f32 0.70710677, %v1750_v54  ;;  %v3814_v61 = vadd.f32 %v3773_v16, %v1235_v20  ;;  %v2611_v62 = vunpack.c.l.bf16 %v2709_v53 }
  0xf3   :  { %v1871_v59 = vpack.c.bf16 %v1859_v56, %v1858_v27  ;;  %v1328_v45 = vmul.f32 %v1312_v31, %v1264_v1  ;;  %v1765_v26 = vmul.f32 0.5, %v1749_v19  ;;  %v1783_v6 = vmul.f32 0.70710677, %v1751_v36 }
  0xf4   :  { %v1359_v49 = vadd.f32 %v1343_v4, %v1327_v58  ;;  %v1265_v22 = vmul.f32 0.5, %v1249_v17  ;;  %3039 = verf.f32 %v1782_v57  ;;  %v3817_v5 = vadd.f32 %v3773_v16, %v1236_v21 }
  0xf5   :  { %v3032_v7 = vpop.eup %3031  ;;  %2900 = vmatmul.mubr.bf16.gmra.mrb[20].mxu1 %v1871_v59  ;;  %v1360_v10 = vadd.f32 %v1344_v55, %v1328_v45  ;;  %3041 = verf.f32 %v1783_v6  ;;  %v1283_v11 = vmul.f32 0.70710677, %v3814_v61  ;;  %v2612_v60 = vunpack.c.h.bf16 %v2709_v53  ;;  %v1846_v55 = vld [vmem:[#allocation5 + $0x1d0] sm:$0xff] }
  0xf6   :  { %v3034_v12 = vpop.eup %3033  ;;  %v1812_v0 = vadd.f32 1.0, %v3032_v7  ;;  %v1266_v15 = vmul.f32 0.5, %v1250_v28  ;;  %v1284_v30 = vmul.f32 0.70710677, %v3817_v5  ;;  %v1736_v19 = vmul.f32 %v3769_v9, %v2611_v62 }
  0xf7   :  { %v3036_v24 = vpop.eup %3035  ;;  %v1371_v50 = vpack.c.bf16 %v1360_v10, %v1359_v49  ;;  %v1813_v17 = vadd.f32 1.0, %v3034_v12  ;;  %3043 = verf.f32 %v1283_v11  ;;  %v1737_v46 = vmul.f32 %v3769_v9, %v2612_v60 }
  0xf8   :  { %v3038_v3 = vpop.eup %3037  ;;  %v1828_v29 = vmul.f32 %v1812_v0, %v1764_v48  ;;  %v1313_v32 = vadd.f32 1.0, %v3036_v24  ;;  %3045 = verf.f32 %v1284_v30  ;;  %v1752_v33 = vadd.f32 %v3773_v16, %v1736_v19 }
  0xf9   :  { %2871 = vmatprep.mubr.bf16.mxu0 %v1371_v50  ;;  %v1829_v28 = vmul.f32 %v1813_v17, %v1765_v26  ;;  %v1314_v51 = vadd.f32 1.0, %v3038_v3  ;;  %v1753_v8 = vadd.f32 %v3773_v16, %v1737_v46  ;;  %v2543_v1 = vunpack.c.l.bf16 %v2694_v23  ;;  %v1847_v26 = vld [vmem:[#allocation5 + $0x1d8] sm:$0xff] }
  0xfa   :  { %v1860_v40 = vadd.f32 %v1844_v25, %v1828_v29  ;;  %v1329_v13 = vmul.f32 %v1313_v32, %v1265_v22  ;;  %v1784_v42 = vmul.f32 0.70710677, %v1752_v33  ;;  %v1766_v44 = vmul.f32 0.5, %v1750_v54 }
  0xfb   :  { %v1861_v41 = vadd.f32 %v1845_v18, %v1829_v28  ;;  %v1330_v38 = vmul.f32 %v1314_v51, %v1266_v15  ;;  %v1785_v47 = vmul.f32 0.70710677, %v1753_v8  ;;  %v2544_v37 = vunpack.c.h.bf16 %v2694_v23  ;;  %v1348_v23 = vld [vmem:[#allocation5 + $0x168] sm:$0xff]  ;;  %v1848_v51 = vld [vmem:[#allocation5 + $0x1e0] sm:$0xff] }
  0xfc   :  { %v1361_v14 = vadd.f32 %v1345_v63, %v1329_v13  ;;  %3047 = verf.f32 %v1784_v42  ;;  %v1237_v48 = vmul.f32 %v3769_v9, %v2543_v1  ;;  %v2615_v53 = vunpack.c.l.bf16 %v2710_v34  ;;  %v1849_v1 = vld [vmem:[#allocation5 + $0x1e8] sm:$0xff] }
  0xfd   :  { %v1872_v35 = vpack.c.bf16 %v1861_v41, %v1860_v40  ;;  %v1362_v52 = vadd.f32 %v1346_v39, %v1330_v38  ;;  %3049 = verf.f32 %v1785_v47  ;;  %v1767_v27 = vmul.f32 0.5, %v1751_v36  ;;  %v1349_v47 = vld [vmem:[#allocation5 + $0x170] sm:$0xff] }
  0xfe   :  { %v3040_v43 = vpop.eup %3039  ;;  %v1238_v2 = vmul.f32 %v3769_v9, %v2544_v37  ;;  %v1253_v20 = vadd.f32 %v3773_v16, %v1237_v48  ;;  %v2616_v56 = vunpack.c.h.bf16 %v2710_v34  ;;  %v1738_v21 = vmul.f32 %v3769_v9, %v2615_v53  ;;  %v1350_v37 = vld [vmem:[#allocation5 + $0x178] sm:$0xff] }
  0xff   :  { %v3042_v31 = vpop.eup %3041  ;;  %2903 = vmatprep.mubr.bf16.mxu1 %v1872_v35  ;;  %v1372_v54 = vpack.c.bf16 %v1362_v52, %v1361_v14  ;;  %v1814_v4 = vadd.f32 1.0, %v3040_v43  ;;  %v1267_v57 = vmul.f32 0.5, %v3814_v61  ;;  %v1268_v6 = vmul.f32 0.5, %v3817_v5  ;;  %v1347_v61 = vld [vmem:[#allocation5 + $0x160] sm:$0xff] }
 0x100   :  { %v1815_v58 = vadd.f32 1.0, %v3042_v31  ;;  %v1254_v62 = vadd.f32 %v3773_v16, %v1238_v2  ;;  %v1285_v59 = vmul.f32 0.70710677, %v1253_v20  ;;  %v1739_v49 = vmul.f32 %v3769_v9, %v2616_v56 }
 0x101   :  { %v3044_v45 = vpop.eup %3043  ;;  %2872 = vmatmul.mubr.bf16.gmra.mrb[24].mxu0 %v1372_v54  ;;  %v1830_v36 = vmul.f32 %v1814_v4, %v1766_v44  ;;  %v1754_v22 = vadd.f32 %v3773_v16, %v1738_v21  ;;  %v1768_v5 = vmul.f32 0.5, %v1752_v33  ;;  %v1769_v3 = vmul.f32 0.5, %v1753_v8  ;;  %v1851_v4 = vld [vmem:[#allocation5 + $0x1f8] sm:$0xff] }
 0x102   :  { %v3046_v7 = vpop.eup %3045  ;;  %v1831_v10 = vmul.f32 %v1815_v58, %v1767_v27  ;;  %v1315_v11 = vadd.f32 1.0, %v3044_v45  ;;  %v1286_v60 = vmul.f32 0.70710677, %v1254_v62  ;;  %3051 = verf.f32 %v1285_v59  ;;  %v3835_v59 = vld [vmem:[#allocation11] ss:$0 sm:$0xff] }
 0x103   :  { %v1862_v12 = vadd.f32 %v1846_v55, %v1830_v36  ;;  %v1316_v0 = vadd.f32 1.0, %v3046_v7  ;;  %v1755_v15 = vadd.f32 %v3773_v16, %v1739_v49  ;;  %v1786_v50 = vmul.f32 0.70710677, %v1754_v22 }
 0x104   :  { %v1863_v30 = vadd.f32 %v1847_v26, %v1831_v10  ;;  %v1331_v19 = vmul.f32 %v1315_v11, %v1267_v57  ;;  %3053 = verf.f32 %v1286_v60  ;;  %v1269_v39 = vmul.f32 0.5, %v1253_v20  ;;  %v1850_v20 = vld [vmem:[#allocation5 + $0x1f0] sm:$0xff] }
 0x105   :  { %v1332_v24 = vmul.f32 %v1316_v0, %v1268_v6  ;;  %v1787_v9 = vmul.f32 0.70710677, %v1755_v15  ;;  %3055 = verf.f32 %v1786_v50  ;;  %v1270_v34 = vmul.f32 0.5, %v1254_v62 }
 0x106   :  { %v3048_v17 = vpop.eup %3047  ;;  %v1873_v25 = vpack.c.bf16 %v1863_v30, %v1862_v12  ;;  %v1363_v46 = vadd.f32 %v1347_v61, %v1331_v19  ;;  %v1770_v48 = vmul.f32 0.5, %v1754_v22  ;;  %v1771_v53 = vmul.f32 0.5, %v1755_v15 }
 0x107   :  { %v3050_v29 = vpop.eup %3049  ;;  %v1364_v18 = vadd.f32 %v1348_v23, %v1332_v24  ;;  %v1816_v32 = vadd.f32 1.0, %v3048_v17  ;;  %3057 = verf.f32 %v1787_v9 }
 0x108   :  { %2904 = vmatmul.mubr.bf16.gmra.mrb[24].mxu1 %v1873_v25  ;;  %v1817_v28 = vadd.f32 1.0, %v3050_v29 }
 0x109   :  { %v1373_v16 = vpack.c.bf16 %v1364_v18, %v1363_v46  ;;  %v1832_v63 = vmul.f32 %v1816_v32, %v1768_v5 }
 0x10a   :  { %v1833_v40 = vmul.f32 %v1817_v28, %v1769_v3 }
 0x10b   :  { %2875 = vmatprep.mubr.bf16.mxu0 %v1373_v16  ;;  %v1864_v33 = vadd.f32 %v1848_v51, %v1832_v63 }
 0x10c   :  { %v1865_v13 = vadd.f32 %v1849_v1, %v1833_v40  ;;  %v3052_v42 = vpop.eup %3051 }
 0x10d   :  { %v1317_v38 = vadd.f32 1.0, %v3052_v42 }
 0x10e   :  { %v3054_v41 = vpop.eup %3053  ;;  %v1874_v8 = vpack.c.bf16 %v1865_v13, %v1864_v33 }
 0x10f   :  { %v1318_v44 = vadd.f32 1.0, %v3054_v41  ;;  %v1333_v14 = vmul.f32 %v1317_v38, %v1269_v39  ;;  %v3056_v35 = vpop.eup %3055 }
 0x110   :  { %2907 = vmatprep.mubr.bf16.mxu1 %v1874_v8  ;;  %v1818_v2 = vadd.f32 1.0, %v3056_v35 }
 0x111   :  { %v1334_v52 = vmul.f32 %v1318_v44, %v1270_v34  ;;  %v3058_v43 = vpop.eup %3057  ;;  %v1365_v27 = vadd.f32 %v1349_v47, %v1333_v14 }
 0x112   :  { %v1819_v31 = vadd.f32 1.0, %v3058_v43  ;;  %v1834_v54 = vmul.f32 %v1818_v2, %v1770_v48 }
 0x113   :  { %v1366_v56 = vadd.f32 %v1350_v37, %v1334_v52 }
 0x114   :  { %v1835_v58 = vmul.f32 %v1819_v31, %v1771_v53  ;;  %v1866_v55 = vadd.f32 %v1850_v20, %v1834_v54 }
 0x115   :  { %v1374_v21 = vpack.c.bf16 %v1366_v56, %v1365_v27 }
 0x116   :  { %v1867_v57 = vadd.f32 %v1851_v4, %v1835_v58 }
 0x117   :  { %2876 = vmatmul.mubr.bf16.gmra.mrb[28].mxu0 %v1374_v21 }
 0x118   :  { %v1875_v62 = vpack.c.bf16 %v1867_v57, %v1866_v55 }
 0x11a   :  { %2908 = vmatmul.mubr.bf16.gmra.mrb[28].mxu1 %v1875_v62 }
 0x168   :  { %v2801_v45 = vpop.f32.mrb[0].mxu0 }
 0x169   :  { %v416_v36 = vadd.f32 %v2801_v45, %v3835_v59  ;;  %v407_v26 = vpop.f32.mrb[1].mxu0 }
 0x16a   :  { %v2833_v6 = vpop.f32.mrb[0].mxu1  ;;  %v408_v49 = vadd.f32 %v3835_v59, %v407_v26  ;;  %v2802_v22 = vpop.f32.mrb[2].mxu0 }
 0x16b   :  { %v488_v7 = vmul.f32 0.70710677, %v416_v36  ;;  %v917_v10 = vadd.f32 %v2833_v6, %v3835_v59  ;;  %v908_v11 = vpop.f32.mrb[1].mxu1  ;;  %v419_v60 = vadd.f32 %v2802_v22, %v3835_v59  ;;  %v410_v12 = vpop.f32.mrb[3].mxu0  ;;  %v472_v32 = vmul.f32 0.5, %v416_v36 }
 0x16c   :  { %v486_v0 = vmul.f32 0.70710677, %v408_v49  ;;  %v909_v61 = vadd.f32 %v3835_v59, %v908_v11  ;;  %v2834_v15 = vpop.f32.mrb[2].mxu1  ;;  %v411_v30 = vadd.f32 %v3835_v59, %v410_v12  ;;  %v470_v1 = vmul.f32 0.5, %v408_v49 }
 0x16d   :  { %3059 = verf.f32 %v488_v7  ;;  %v989_v19 = vmul.f32 0.70710677, %v917_v10  ;;  %v911_v23 = vpop.f32.mrb[3].mxu1  ;;  %v489_v5 = vmul.f32 0.70710677, %v419_v60  ;;  %v920_v50 = vadd.f32 %v2834_v15, %v3835_v59 }
 0x16e   :  { %3061 = verf.f32 %v486_v0  ;;  %v987_v24 = vmul.f32 0.70710677, %v909_v61  ;;  %v487_v9 = vmul.f32 0.70710677, %v411_v30  ;;  %v912_v17 = vadd.f32 %v3835_v59, %v911_v23 }
 0x16f   :  { %3063 = verf.f32 %v989_v19  ;;  %v990_v25 = vmul.f32 0.70710677, %v920_v50  ;;  %v973_v63 = vmul.f32 0.5, %v917_v10  ;;  %v473_v34 = vmul.f32 0.5, %v419_v60 }
 0x170   :  { %3065 = verf.f32 %v987_v24  ;;  %v988_v46 = vmul.f32 0.70710677, %v912_v17  ;;  %v971_v47 = vmul.f32 0.5, %v909_v61  ;;  %v974_v35 = vmul.f32 0.5, %v920_v50 }
 0x171   :  { %3067 = verf.f32 %v489_v5  ;;  %v471_v52 = vmul.f32 0.5, %v411_v30  ;;  %v972_v4 = vmul.f32 0.5, %v912_v17 }
 0x172   :  { %3069 = verf.f32 %v487_v9 }
 0x173   :  { %3071 = verf.f32 %v990_v25  ;;  %v2805_v3 = vpop.f32.mrb[4].mxu0 }
 0x174   :  { %3073 = verf.f32 %v988_v46  ;;  %v432_v29 = vadd.f32 %v2805_v3, %v3835_v59  ;;  %v423_v18 = vpop.f32.mrb[5].mxu0 }
 0x175   :  { %v424_v28 = vadd.f32 %v3835_v59, %v423_v18  ;;  %v2806_v51 = vpop.f32.mrb[6].mxu0 }
 0x176   :  { %v492_v40 = vmul.f32 0.70710677, %v432_v29  ;;  %v435_v33 = vadd.f32 %v2806_v51, %v3835_v59  ;;  %v426_v13 = vpop.f32.mrb[7].mxu0  ;;  %v476_v55 = vmul.f32 0.5, %v432_v29 }
 0x177   :  { %v3060_v16 = vpop.eup %3059  ;;  %v490_v41 = vmul.f32 0.70710677, %v424_v28  ;;  %v3849_v8 = vadd.f32 %v3835_v59, %v426_v13  ;;  %v474_v57 = vmul.f32 0.5, %v424_v28 }
 0x178   :  { %v3062_v39 = vpop.eup %3061  ;;  %v520_v42 = vadd.f32 1.0, %v3060_v16  ;;  %3075 = verf.f32 %v492_v40  ;;  %v493_v14 = vmul.f32 0.70710677, %v435_v33  ;;  %v477_v49 = vmul.f32 0.5, %v435_v33 }
 0x179   :  { %v3064_v38 = vpop.eup %3063  ;;  %v518_v44 = vadd.f32 1.0, %v3062_v39  ;;  %3077 = verf.f32 %v490_v41  ;;  %v491_v2 = vmul.f32 0.70710677, %v3849_v8 }
 0x17a   :  { %v3066_v37 = vpop.eup %3065  ;;  %v1021_v48 = vadd.f32 1.0, %v3064_v38  ;;  %v536_v43 = vmul.f32 %v520_v42, %v472_v32  ;;  %3079 = verf.f32 %v493_v14 }
 0x17b   :  { %v3068_v53 = vpop.eup %3067  ;;  %v1019_v27 = vadd.f32 1.0, %v3066_v37  ;;  %v534_v20 = vmul.f32 %v518_v44, %v470_v1  ;;  %3081 = verf.f32 %v491_v2 }
 0x17c   :  { %v3070_v56 = vpop.eup %3069  ;;  %v1037_v31 = vmul.f32 %v1021_v48, %v973_v63  ;;  %v521_v54 = vadd.f32 1.0, %v3068_v53  ;;  %v654_v22 = vmul.f32 %v536_v43, %v536_v43 }
 0x17d   :  { %v3072_v21 = vpop.eup %3071  ;;  %v519_v58 = vadd.f32 1.0, %v3070_v56  ;;  %v1035_v45 = vmul.f32 %v1019_v27, %v971_v47  ;;  %v2837_v6 = vpop.f32.mrb[4].mxu1  ;;  %v652_v0 = vmul.f32 %v534_v20, %v534_v20 }
 0x17e   :  { %v3074_v62 = vpop.eup %3073  ;;  %v537_v36 = vmul.f32 %v521_v54, %v473_v34  ;;  %v1022_v26 = vadd.f32 1.0, %v3072_v21  ;;  %v3853_v11 = vadd.f32 %v2837_v6, %v3835_v59  ;;  %v924_v60 = vpop.f32.mrb[5].mxu1  ;;  %v1155_v12 = vmul.f32 %v1037_v31, %v1037_v31 }
 0x17f   :  { %v535_v7 = vmul.f32 %v519_v58, %v471_v52  ;;  %v1020_v10 = vadd.f32 1.0, %v3074_v62  ;;  %v2838_v30 = vpop.f32.mrb[6].mxu1  ;;  %v1153_v9 = vmul.f32 %v1035_v45, %v1035_v45  ;;  %v3857_v46 = vadd.f32 %v3835_v59, %v924_v60 }
 0x180   :  { %v2409_v61 = vpack.c.bf16 %v537_v36, %v536_v43  ;;  %v1038_v15 = vmul.f32 %v1022_v26, %v974_v35  ;;  %v927_v50 = vpop.f32.mrb[7].mxu1  ;;  %v993_v25 = vmul.f32 0.70710677, %v3853_v11  ;;  %v655_v16 = vmul.f32 %v537_v36, %v537_v36 }
 0x181   :  { %v2404_v19 = vpack.c.bf16 %v535_v7, %v534_v20  ;;  %v630_v23 = vadd.f32 %v535_v7, %v534_v20  ;;  %v653_v24 = vmul.f32 %v535_v7, %v535_v7  ;;  %v1036_v5 = vmul.f32 %v1020_v10, %v972_v4 }
 0x182   :  { %2664 = vst [vmem:[#allocation13 + $0x8] sm:$0xff] %v2409_v61   ;;  %v2481_v17 = vpack.c.bf16 %v1038_v15, %v1037_v31  ;;  %v3076_v3 = vpop.eup %3075  ;;  %v1156_v63 = vmul.f32 %v1038_v15, %v1038_v15  ;;  %3083 = verf.f32 %v993_v25  ;;  %v991_v38 = vmul.f32 0.70710677, %v3857_v46 }
 0x183   :  { %2405 = vst [vmem:[#allocation13] sm:$0xff] %v2404_v19   ;;  %v631_v29 = vadd.f32 %v630_v23, %v536_v43  ;;  %v668_v18 = vadd.f32 %v653_v24, %v652_v0  ;;  %v2476_v32 = vpack.c.bf16 %v1036_v5, %v1035_v45  ;;  %v1131_v28 = vadd.f32 %v1036_v5, %v1035_v45  ;;  %v3078_v51 = vpop.eup %3077 }
 0x184   :  { %2680 = vst [vmem:[#allocation13 + $0x48] sm:$0xff] %v2481_v17   ;;  %v1154_v1 = vmul.f32 %v1036_v5, %v1036_v5  ;;  %v524_v40 = vadd.f32 1.0, %v3076_v3  ;;  %v3080_v33 = vpop.eup %3079  ;;  %v522_v42 = vadd.f32 1.0, %v3078_v51  ;;  %v936_v35 = vadd.f32 %v2838_v30, %v3835_v59 }
 0x185   :  { %v669_v13 = vadd.f32 %v668_v18, %v654_v22  ;;  %2679 = vst [vmem:[#allocation13 + $0x40] sm:$0xff] %v2476_v32   ;;  %v1132_v39 = vadd.f32 %v1131_v28, %v1037_v31  ;;  %v632_v34 = vadd.f32 %v631_v29, %v537_v36  ;;  %v525_v44 = vadd.f32 1.0, %v3080_v33  ;;  %v3082_v47 = vpop.eup %3081 }
 0x186   :  { %v1169_v41 = vadd.f32 %v1154_v1, %v1153_v9  ;;  %v538_v14 = vmul.f32 %v522_v42, %v474_v57  ;;  %v540_v53 = vmul.f32 %v524_v40, %v476_v55  ;;  %3085 = verf.f32 %v991_v38 }
 0x187   :  { %v670_v37 = vadd.f32 %v669_v13, %v655_v16  ;;  %v3860_v48 = vadd.f32 %v1132_v39, %v1038_v15  ;;  %v541_v43 = vmul.f32 %v525_v44, %v477_v49  ;;  %v994_v56 = vmul.f32 0.70710677, %v936_v35 }
 0x188   :  { %v1170_v52 = vadd.f32 %v1169_v41, %v1155_v12  ;;  %v633_v27 = vadd.f32 %v632_v34, %v538_v14  ;;  %v656_v2 = vmul.f32 %v538_v14, %v538_v14  ;;  %v475_v54 = vmul.f32 0.5, %v3849_v8 }
 0x189   :  { %v2419_v20 = vpack.c.bf16 %v541_v43, %v540_v53  ;;  %v523_v4 = vadd.f32 1.0, %v3082_v47  ;;  %3087 = verf.f32 %v994_v56  ;;  %v928_v58 = vadd.f32 %v3835_v59, %v927_v50 }
 0x18a   :  { %v3863_v31 = vadd.f32 %v1170_v52, %v1156_v63  ;;  %v671_v21 = vadd.f32 %v670_v37, %v656_v2  ;;  %v2809_v62 = vpop.f32.mrb[8].mxu0  ;;  %v658_v12 = vmul.f32 %v540_v53, %v540_v53  ;;  %v659_v30 = vmul.f32 %v541_v43, %v541_v43 }
 0x18b   :  { %2666 = vst [vmem:[#allocation13 + $0x18] sm:$0xff] %v2419_v20   ;;  %v539_v57 = vmul.f32 %v523_v4, %v475_v54  ;;  %v992_v45 = vmul.f32 0.70710677, %v928_v58  ;;  %v3868_v55 = vadd.f32 %v2809_v62, %v3835_v59  ;;  %v439_v36 = vpop.f32.mrb[9].mxu0  ;;  %v975_v29 = vmul.f32 0.5, %v3857_v46 }
 0x18c   :  { %v440_v22 = vadd.f32 %v3835_v59, %v439_v36  ;;  %v2810_v7 = vpop.f32.mrb[10].mxu0  ;;  %v3084_v60 = vpop.eup %3083  ;;  %v977_v33 = vmul.f32 0.5, %v3853_v11  ;;  %v978_v34 = vmul.f32 0.5, %v936_v35  ;;  %v976_v35 = vmul.f32 0.5, %v928_v58 }
 0x18d   :  { %v2414_v26 = vpack.c.bf16 %v539_v57, %v538_v14  ;;  %v634_v6 = vadd.f32 %v633_v27, %v539_v57  ;;  %v657_v49 = vmul.f32 %v539_v57, %v539_v57  ;;  %3089 = verf.f32 %v992_v45  ;;  %v442_v10 = vpop.f32.mrb[11].mxu0 }
 0x18e   :  { %v496_v8 = vmul.f32 0.70710677, %v3868_v55  ;;  %v494_v15 = vmul.f32 0.70710677, %v440_v22  ;;  %v451_v23 = vadd.f32 %v2810_v7, %v3835_v59  ;;  %v3874_v24 = vadd.f32 %v3835_v59, %v442_v10 }
 0x18f   :  { %2665 = vst [vmem:[#allocation13 + $0x10] sm:$0xff] %v2414_v26   ;;  %v635_v0 = vadd.f32 %v634_v6, %v540_v53  ;;  %v672_v61 = vadd.f32 %v671_v21, %v657_v49  ;;  %v2841_v19 = vpop.f32.mrb[8].mxu1  ;;  %v1025_v3 = vadd.f32 1.0, %v3084_v60  ;;  %v480_v54 = vmul.f32 0.5, %v3868_v55 }
 0x190   :  { %3091 = verf.f32 %v496_v8  ;;  %v3086_v5 = vpop.eup %3085  ;;  %v949_v9 = vadd.f32 %v2841_v19, %v3835_v59  ;;  %v940_v25 = vpop.f32.mrb[9].mxu1  ;;  %v497_v63 = vmul.f32 0.70710677, %v451_v23  ;;  %v495_v46 = vmul.f32 0.70710677, %v3874_v24 }
 0x191   :  { %v673_v50 = vadd.f32 %v672_v61, %v658_v12  ;;  %3093 = verf.f32 %v494_v15  ;;  %v3877_v17 = vadd.f32 %v635_v0, %v541_v43  ;;  %v1023_v18 = vadd.f32 1.0, %v3086_v5  ;;  %v2842_v28 = vpop.f32.mrb[10].mxu1 }
 0x192   :  { %v941_v32 = vadd.f32 %v3835_v59, %v940_v25  ;;  %v997_v51 = vmul.f32 0.70710677, %v949_v9  ;;  %v943_v1 = vpop.f32.mrb[11].mxu1  ;;  %v952_v42 = vadd.f32 %v2842_v28, %v3835_v59  ;;  %v1041_v38 = vmul.f32 %v1025_v3, %v977_v33 }
 0x193   :  { %v3881_v16 = vadd.f32 %v673_v50, %v659_v30  ;;  %v3088_v40 = vpop.eup %3087  ;;  %v1039_v13 = vmul.f32 %v1023_v18, %v975_v29  ;;  %v944_v52 = vadd.f32 %v3835_v59, %v943_v1  ;;  %v478_v21 = vmul.f32 0.5, %v440_v22 }
 0x194   :  { %v995_v39 = vmul.f32 0.70710677, %v941_v32  ;;  %v1026_v41 = vadd.f32 1.0, %v3088_v40  ;;  %3095 = verf.f32 %v997_v51  ;;  %v998_v37 = vmul.f32 0.70710677, %v952_v42 }
 0x195   :  { %v1134_v44 = vadd.f32 %v3860_v48, %v1039_v13  ;;  %v1157_v47 = vmul.f32 %v1039_v13, %v1039_v13  ;;  %v996_v56 = vmul.f32 0.70710677, %v944_v52  ;;  %v1159_v4 = vmul.f32 %v1041_v38, %v1041_v38 }
 0x196   :  { %3097 = verf.f32 %v995_v39  ;;  %v1042_v14 = vmul.f32 %v1026_v41, %v978_v34  ;;  %v981_v58 = vmul.f32 0.5, %v949_v9  ;;  %v979_v7 = vmul.f32 0.5, %v941_v32 }
 0x197   :  { %3099 = verf.f32 %v497_v63  ;;  %v3090_v11 = vpop.eup %3089  ;;  %v1172_v53 = vadd.f32 %v3863_v31, %v1157_v47  ;;  %v481_v31 = vmul.f32 0.5, %v451_v23  ;;  %v982_v0 = vmul.f32 0.5, %v952_v42 }
 0x198   :  { %3101 = verf.f32 %v495_v46  ;;  %v2491_v43 = vpack.c.bf16 %v1042_v14, %v1041_v38  ;;  %v1024_v27 = vadd.f32 1.0, %v3090_v11  ;;  %v479_v55 = vmul.f32 0.5, %v3874_v24 }
 0x199   :  { %3103 = verf.f32 %v998_v37  ;;  %v1160_v15 = vmul.f32 %v1042_v14, %v1042_v14 }
 0x19a   :  { %v3092_v2 = vpop.eup %3091  ;;  %2682 = vst [vmem:[#allocation13 + $0x58] sm:$0xff] %v2491_v43   ;;  %v1040_v48 = vmul.f32 %v1024_v27, %v976_v35  ;;  %3105 = verf.f32 %v996_v56 }
 0x19b   :  { %v3094_v20 = vpop.eup %3093  ;;  %v528_v6 = vadd.f32 1.0, %v3092_v2 }
 0x19c   :  { %v526_v57 = vadd.f32 1.0, %v3094_v20  ;;  %v2486_v62 = vpack.c.bf16 %v1040_v48, %v1039_v13  ;;  %v1135_v45 = vadd.f32 %v1134_v44, %v1040_v48  ;;  %v1158_v36 = vmul.f32 %v1040_v48, %v1040_v48  ;;  %v2813_v26 = vpop.f32.mrb[12].mxu0 }
 0x19d   :  { %v455_v8 = vpop.f32.mrb[13].mxu0  ;;  %v3893_v23 = vadd.f32 %v2813_v26, %v3835_v59  ;;  %v544_v24 = vmul.f32 %v528_v6, %v480_v54  ;;  %v980_v13 = vmul.f32 0.5, %v944_v52 }
 0x19e   :  { %v542_v49 = vmul.f32 %v526_v57, %v478_v21  ;;  %v3096_v10 = vpop.eup %3095  ;;  %2681 = vst [vmem:[#allocation13 + $0x50] sm:$0xff] %v2486_v62   ;;  %v1136_v60 = vadd.f32 %v1135_v45, %v1041_v38  ;;  %v1173_v12 = vadd.f32 %v1172_v53, %v1158_v36  ;;  %v2814_v22 = vpop.f32.mrb[14].mxu0  ;;  %v3898_v29 = vadd.f32 %v3835_v59, %v455_v8 }
 0x19f   :  { %v3895_v5 = vpop.f32.mrb[15].mxu0  ;;  %v1029_v32 = vadd.f32 1.0, %v3096_v10  ;;  %v500_v41 = vmul.f32 0.70710677, %v3893_v23  ;;  %v662_v53 = vmul.f32 %v544_v24, %v544_v24  ;;  %v467_v36 = vadd.f32 %v2814_v22, %v3835_v59 }
 0x1a0   :  { %v3098_v61 = vpop.eup %3097  ;;  %v637_v30 = vadd.f32 %v3877_v17, %v542_v49  ;;  %v660_v19 = vmul.f32 %v542_v49, %v542_v49  ;;  %v1174_v9 = vadd.f32 %v1173_v12, %v1159_v4  ;;  %v1137_v3 = vadd.f32 %v1136_v60, %v1042_v14 }
 0x1a1   :  { %v3100_v50 = vpop.eup %3099  ;;  %v1027_v25 = vadd.f32 1.0, %v3098_v61  ;;  %v2845_v17 = vpop.f32.mrb[12].mxu1  ;;  %v1045_v43 = vmul.f32 %v1029_v32, %v981_v58  ;;  %3107 = verf.f32 %v500_v41  ;;  %v501_v12 = vmul.f32 0.70710677, %v467_v36 }
 0x1a2   :  { %v3102_v18 = vpop.eup %3101  ;;  %v675_v28 = vadd.f32 %v3881_v16, %v660_v19  ;;  %v529_v51 = vadd.f32 1.0, %v3100_v50  ;;  %v1175_v40 = vadd.f32 %v1174_v9, %v1160_v15  ;;  %v956_v39 = vpop.f32.mrb[13].mxu1  ;;  %v3903_v46 = vadd.f32 %v2845_v17, %v3835_v59 }
 0x1a3   :  { %v3104_v63 = vpop.eup %3103  ;;  %v1043_v1 = vmul.f32 %v1027_v25, %v979_v7  ;;  %v527_v33 = vadd.f32 1.0, %v3102_v18  ;;  %v2846_v38 = vpop.f32.mrb[14].mxu1  ;;  %v498_v16 = vmul.f32 0.70710677, %v3898_v29  ;;  %v957_v62 = vadd.f32 %v3835_v59, %v956_v39 }
 0x1a4   :  { %v545_v42 = vmul.f32 %v529_v51, %v481_v31  ;;  %v1030_v34 = vadd.f32 1.0, %v3104_v63  ;;  %v959_v37 = vpop.f32.mrb[15].mxu1  ;;  %v3106_v11 = vpop.eup %3105  ;;  %v1001_v4 = vmul.f32 0.70710677, %v3903_v46  ;;  %v968_v31 = vadd.f32 %v2846_v38, %v3835_v59 }
 0x1a5   :  { %v1138_v44 = vadd.f32 %v1137_v3, %v1043_v1  ;;  %v1161_v47 = vmul.f32 %v1043_v1, %v1043_v1  ;;  %v543_v14 = vmul.f32 %v527_v33, %v479_v55  ;;  %v1028_v54 = vadd.f32 1.0, %v3106_v11 }
 0x1a6   :  { %v2429_v35 = vpack.c.bf16 %v545_v42, %v544_v24  ;;  %v1046_v52 = vmul.f32 %v1030_v34, %v982_v0  ;;  %3109 = verf.f32 %v498_v16  ;;  %v663_v26 = vmul.f32 %v545_v42, %v545_v42 }
 0x1a7   :  { %v1176_v27 = vadd.f32 %v1175_v40, %v1161_v47  ;;  %v2424_v2 = vpack.c.bf16 %v543_v14, %v542_v49  ;;  %v638_v56 = vadd.f32 %v637_v30, %v543_v14  ;;  %v661_v20 = vmul.f32 %v543_v14, %v543_v14 }
 0x1a8   :  { %2668 = vst [vmem:[#allocation13 + $0x28] sm:$0xff] %v2429_v35   ;;  %v2501_v48 = vpack.c.bf16 %v1046_v52, %v1045_v43  ;;  %v1044_v45 = vmul.f32 %v1028_v54, %v980_v13  ;;  %3111 = verf.f32 %v1001_v4  ;;  %v999_v49 = vmul.f32 0.70710677, %v957_v62 }
 0x1a9   :  { %2667 = vst [vmem:[#allocation13 + $0x20] sm:$0xff] %v2424_v2   ;;  %v639_v21 = vadd.f32 %v638_v56, %v544_v24  ;;  %v676_v57 = vadd.f32 %v675_v28, %v661_v20  ;;  %v1163_v0 = vmul.f32 %v1045_v43, %v1045_v43  ;;  %v1002_v15 = vmul.f32 0.70710677, %v968_v31 }
 0x1aa   :  { %2684 = vst [vmem:[#allocation13 + $0x68] sm:$0xff] %v2501_v48   ;;  %v2496_v7 = vpack.c.bf16 %v1044_v45, %v1043_v1  ;;  %v1139_v8 = vadd.f32 %v1138_v44, %v1044_v45  ;;  %v1162_v10 = vmul.f32 %v1044_v45, %v1044_v45  ;;  %3113 = verf.f32 %v999_v49 }
 0x1ab   :  { %v677_v6 = vadd.f32 %v676_v57, %v662_v53  ;;  %v640_v58 = vadd.f32 %v639_v21, %v545_v42  ;;  %3115 = verf.f32 %v501_v12  ;;  %v459_v22 = vadd.f32 %v3835_v59, %v3895_v5  ;;  %v3108_v18 = vpop.eup %3107 }
 0x1ac   :  { %2683 = vst [vmem:[#allocation13 + $0x60] sm:$0xff] %v2496_v7   ;;  %v1140_v55 = vadd.f32 %v1139_v8, %v1045_v43  ;;  %v1177_v61 = vadd.f32 %v1176_v27, %v1162_v10  ;;  %v960_v30 = vadd.f32 %v3835_v59, %v959_v37  ;;  %v1164_v19 = vmul.f32 %v1046_v52, %v1046_v52 }
 0x1ad   :  { %v678_v60 = vadd.f32 %v677_v6, %v663_v26  ;;  %3117 = verf.f32 %v1002_v15  ;;  %v499_v25 = vmul.f32 0.70710677, %v459_v22  ;;  %v484_v51 = vmul.f32 0.5, %v3893_v23 }
 0x1ae   :  { %v1178_v50 = vadd.f32 %v1177_v61, %v1163_v0  ;;  %v1141_v9 = vadd.f32 %v1140_v55, %v1046_v52  ;;  %v1000_v3 = vmul.f32 0.70710677, %v960_v30  ;;  %v482_v17 = vmul.f32 0.5, %v3898_v29 }
 0x1af   :  { %3119 = verf.f32 %v499_v25  ;;  %v985_v40 = vmul.f32 0.5, %v3903_v46  ;;  %v532_v34 = vadd.f32 1.0, %v3108_v18  ;;  %v983_v41 = vmul.f32 0.5, %v957_v62 }
 0x1b0   :  { %v1179_v24 = vadd.f32 %v1178_v50, %v1164_v19  ;;  %v2865_v32 = vpop.f32.mrb[16].mxu0  ;;  %v3110_v28 = vpop.eup %3109  ;;  %3121 = verf.f32 %v1000_v3  ;;  %v485_v14 = vmul.f32 0.5, %v467_v36  ;;  %v986_v43 = vmul.f32 0.5, %v968_v31 }
 0x1b1   :  { %v1418_v63 = vadd.f32 %v2865_v32, %v3835_v59  ;;  %v1409_v5 = vpop.f32.mrb[17].mxu0  ;;  %v530_v33 = vadd.f32 1.0, %v3110_v28  ;;  %v548_v48 = vmul.f32 %v532_v34, %v484_v51  ;;  %v483_v54 = vmul.f32 0.5, %v459_v22 }
 0x1b2   :  { %v3112_v1 = vpop.eup %3111  ;;  %v1410_v39 = vadd.f32 %v3835_v59, %v1409_v5  ;;  %v2866_v42 = vpop.f32.mrb[18].mxu0  ;;  %v984_v26 = vmul.f32 0.5, %v960_v30 }
 0x1b3   :  { %v2897_v13 = vpop.f32.mrb[16].mxu1  ;;  %v1490_v38 = vmul.f32 0.70710677, %v1418_v63  ;;  %v1412_v29 = vpop.f32.mrb[19].mxu0  ;;  %v3919_v47 = vmul.f32 %v530_v33, %v482_v17  ;;  %v1033_v53 = vadd.f32 1.0, %v3112_v1  ;;  %v3928_v36 = vadd.f32 %v2866_v42, %v3835_v59 }
 0x1b4   :  { %v1919_v23 = vadd.f32 %v2897_v13, %v3835_v59  ;;  %v1910_v44 = vpop.f32.mrb[17].mxu1  ;;  %v1488_v16 = vmul.f32 0.70710677, %v1410_v39  ;;  %v3114_v11 = vpop.eup %3113  ;;  %v3936_v55 = vadd.f32 %v3835_v59, %v1412_v29  ;;  %v666_v15 = vmul.f32 %v548_v48, %v548_v48 }
 0x1b5   :  { %v1911_v37 = vadd.f32 %v3835_v59, %v1910_v44  ;;  %v2898_v46 = vpop.f32.mrb[18].mxu1  ;;  %3123 = verf.f32 %v1490_v38  ;;  %v641_v27 = vadd.f32 %v640_v58, %v3919_v47  ;;  %v664_v2 = vmul.f32 %v3919_v47, %v3919_v47  ;;  %v3116_v20 = vpop.eup %3115 }
 0x1b6   :  { %v1991_v35 = vmul.f32 0.70710677, %v1919_v23  ;;  %v3922_v52 = vpop.f32.mrb[19].mxu1  ;;  %v1031_v56 = vadd.f32 1.0, %v3114_v11  ;;  %3125 = verf.f32 %v1488_v16  ;;  %v533_v45 = vadd.f32 1.0, %v3116_v20 }
 0x1b7   :  { %v1989_v4 = vmul.f32 0.70710677, %v1911_v37  ;;  %v3118_v21 = vpop.eup %3117  ;;  %v679_v57 = vadd.f32 %v678_v60, %v664_v2  ;;  %v3931_v6 = vadd.f32 %v2898_v46, %v3835_v59  ;;  %v1049_v58 = vmul.f32 %v1033_v53, %v985_v40 }
 0x1b8   :  { %3127 = verf.f32 %v1991_v35  ;;  %v1047_v62 = vmul.f32 %v1031_v56, %v983_v41  ;;  %v1034_v31 = vadd.f32 1.0, %v3118_v21  ;;  %v549_v8 = vmul.f32 %v533_v45, %v485_v14 }
 0x1b9   :  { %3129 = verf.f32 %v1989_v4  ;;  %v3120_v10 = vpop.eup %3119  ;;  %v1491_v0 = vmul.f32 0.70710677, %v3928_v36  ;;  %v1992_v60 = vmul.f32 0.70710677, %v3931_v6  ;;  %v1474_v3 = vmul.f32 0.5, %v1418_v63 }
 0x1ba   :  { %v1142_v49 = vadd.f32 %v1141_v9, %v1047_v62  ;;  %v1165_v7 = vmul.f32 %v1047_v62, %v1047_v62  ;;  %v1050_v12 = vmul.f32 %v1034_v31, %v986_v43  ;;  %v3122_v61 = vpop.eup %3121  ;;  %v2439_v30 = vpack.c.bf16 %v549_v8, %v548_v48 }
 0x1bb   :  { %v531_v19 = vadd.f32 1.0, %v3120_v10  ;;  %v1032_v25 = vadd.f32 1.0, %v3122_v61  ;;  %3131 = verf.f32 %v1491_v0  ;;  %v1975_v18 = vmul.f32 0.5, %v1919_v23 }
 0x1bc   :  { %v1180_v22 = vadd.f32 %v1179_v24, %v1165_v7  ;;  %v2511_v50 = vpack.c.bf16 %v1050_v12, %v1049_v58  ;;  %2670 = vst [vmem:[#allocation13 + $0x38] sm:$0xff] %v2439_v30   ;;  %v1472_v32 = vmul.f32 0.5, %v1410_v39  ;;  %3133 = verf.f32 %v1992_v60 }
 0x1bd   :  { %v547_v9 = vmul.f32 %v531_v19, %v483_v54  ;;  %v1167_v51 = vmul.f32 %v1049_v58, %v1049_v58  ;;  %v1048_v17 = vmul.f32 %v1032_v25, %v984_v26  ;;  %v1973_v5 = vmul.f32 0.5, %v1911_v37 }
 0x1be   :  { %2686 = vst [vmem:[#allocation13 + $0x78] sm:$0xff] %v2511_v50   ;;  %v1489_v1 = vmul.f32 0.70710677, %v3936_v55  ;;  %v667_v44 = vmul.f32 %v549_v8, %v549_v8  ;;  %v1168_v35 = vmul.f32 %v1050_v12, %v1050_v12  ;;  %v1475_v31 = vmul.f32 0.5, %v3928_v36 }
 0x1bf   :  { %v3124_v28 = vpop.eup %3123  ;;  %v2434_v24 = vpack.c.bf16 %v547_v9, %v3919_v47  ;;  %v642_v33 = vadd.f32 %v641_v27, %v547_v9  ;;  %v665_v13 = vmul.f32 %v547_v9, %v547_v9  ;;  %v2506_v34 = vpack.c.bf16 %v1048_v17, %v1047_v62 }
 0x1c0   :  { %v3126_v40 = vpop.eup %3125  ;;  %v1522_v42 = vadd.f32 1.0, %v3124_v28  ;;  %v1143_v41 = vadd.f32 %v1142_v49, %v1048_v17  ;;  %v1166_v38 = vmul.f32 %v1048_v17, %v1048_v17  ;;  %3135 = verf.f32 %v1489_v1 }
 0x1c1   :  { %v1520_v23 = vadd.f32 1.0, %v3126_v40  ;;  %2669 = vst [vmem:[#allocation13 + $0x30] sm:$0xff] %v2434_v24   ;;  %v643_v29 = vadd.f32 %v642_v33, %v548_v48  ;;  %v680_v14 = vadd.f32 %v679_v57, %v665_v13  ;;  %2685 = vst [vmem:[#allocation13 + $0x70] sm:$0xff] %v2506_v34   ;;  %v1914_v47 = vadd.f32 %v3835_v59, %v3922_v52 }
 0x1c2   :  { %v3128_v63 = vpop.eup %3127  ;;  %v2869_v39 = vpop.f32.mrb[20].mxu0  ;;  %v1144_v11 = vadd.f32 %v1143_v41, %v1049_v58  ;;  %v1181_v53 = vadd.f32 %v1180_v22, %v1166_v38  ;;  %v3942_v56 = vmul.f32 %v1522_v42, %v1474_v3  ;;  %v1976_v49 = vmul.f32 0.5, %v3931_v6 }
 0x1c3   :  { %v2023_v16 = vadd.f32 1.0, %v3128_v63  ;;  %v1425_v37 = vpop.f32.mrb[21].mxu0  ;;  %v3130_v46 = vpop.eup %3129  ;;  %v644_v27 = vadd.f32 %v643_v29, %v549_v8  ;;  %v681_v2 = vadd.f32 %v680_v14, %v666_v15  ;;  %v3944_v4 = vmul.f32 %v1520_v23, %v1472_v32 }
 0x1c4   :  { %v2870_v43 = vpop.f32.mrb[22].mxu0  ;;  %v1145_v54 = vadd.f32 %v1144_v11, %v1050_v12  ;;  %v1182_v48 = vadd.f32 %v1181_v53, %v1167_v51  ;;  %v2021_v21 = vadd.f32 1.0, %v3130_v46  ;;  %v1990_v7 = vmul.f32 0.70710677, %v1914_v47 }
 0x1c5   :  { %v1428_v20 = vpop.f32.mrb[23].mxu0  ;;  %v645_v57 = vrot.slane %v644_v27, 4  ;;  %v682_v62 = vadd.f32 %v681_v2, %v667_v44  ;;  %v3946_v45 = vmul.f32 %v2023_v16, %v1975_v18  ;;  %v3132_v26 = vpop.eup %3131  ;;  %v1473_v60 = vmul.f32 0.5, %v3936_v55 }
 0x1c6   :  { %v1146_v52 = vrot.slane %v1145_v54, 4  ;;  %v1183_v58 = vadd.f32 %v1182_v48, %v1168_v35  ;;  %v3134_v10 = vpop.eup %3133  ;;  %v3950_v0 = vmul.f32 %v2021_v21, %v1973_v5  ;;  %v1523_v12 = vadd.f32 1.0, %v3132_v26 }
 0x1c7   :  { %v1434_v61 = vadd.f32 %v2869_v39, %v3835_v59  ;;  %v3954_v22 = vadd.f32 %v645_v57, %v644_v27  ;;  %v1656_v36 = vmul.f32 %v3942_v56, %v3942_v56  ;;  %v1654_v30 = vmul.f32 %v3944_v4, %v3944_v4 }
 0x1c8   :  { %v2901_v8 = vpop.f32.mrb[20].mxu1  ;;  %v2024_v6 = vadd.f32 1.0, %v3134_v10  ;;  %v683_v50 = vrot.slane %v682_v62, 4  ;;  %v3962_v25 = vmul.f32 %v3946_v45, %v3946_v45  ;;  %v1539_v3 = vmul.f32 %v1523_v12, %v1475_v31 }
 0x1c9   :  { %v1926_v15 = vpop.f32.mrb[21].mxu1  ;;  %3137 = verf.f32 %v1990_v7  ;;  %v3964_v9 = vadd.f32 %v1146_v52, %v1145_v54  ;;  %v1184_v18 = vrot.slane %v1183_v58, 4  ;;  %v1974_v28 = vmul.f32 0.5, %v1914_v47 }
 0x1ca   :  { %v2902_v19 = vpop.f32.mrb[22].mxu1  ;;  %v3966_v32 = vmul.f32 %v2024_v6, %v1976_v49  ;;  %v3970_v51 = vmul.f32 %v3950_v0, %v3950_v0  ;;  %v2553_v17 = vpack.c.bf16 %v1539_v3, %v3942_v56  ;;  %v1494_v5 = vmul.f32 0.70710677, %v1434_v61  ;;  %v3136_v40 = vpop.eup %3135 }
 0x1cb   :  { %v1929_v55 = vpop.f32.mrb[23].mxu1  ;;  %v1935_v1 = vadd.f32 %v2901_v8, %v3835_v59  ;;  %v647_v24 = vrot.slane %v3954_v22, 2  ;;  %v1426_v13 = vadd.f32 %v3835_v59, %v1425_v37  ;;  %v1927_v42 = vadd.f32 %v3835_v59, %v1926_v15 }
 0x1cc   :  { %v2625_v33 = vpack.c.bf16 %v3966_v32, %v3946_v45  ;;  %v3979_v63 = vadd.f32 %v683_v50, %v682_v62  ;;  %2696 = vst [vmem:[#allocation13 + $0x88] sm:$0xff] %v2553_v17   ;;  %v1521_v34 = vadd.f32 1.0, %v3136_v40  ;;  %3139 = verf.f32 %v1494_v5 }
 0x1cd   :  { %v1995_v41 = vmul.f32 0.70710677, %v1935_v1  ;;  %v1148_v38 = vrot.slane %v3964_v9, 2  ;;  %v3982_v23 = vadd.f32 %v1184_v18, %v1183_v58  ;;  %v1492_v39 = vmul.f32 0.70710677, %v1426_v13 }
 0x1ce   :  { %2712 = vst [vmem:[#allocation13 + $0xc8] sm:$0xff] %v2625_v33   ;;  %v1993_v44 = vmul.f32 0.70710677, %v1927_v42  ;;  %v1537_v29 = vmul.f32 %v1521_v34, %v1473_v60  ;;  %v1437_v14 = vadd.f32 %v2870_v43, %v3835_v59  ;;  %v1938_v16 = vadd.f32 %v2902_v19, %v3835_v59 }
 0x1cf   :  { %3141 = verf.f32 %v1995_v41  ;;  %v3986_v37 = vmul.f32 0.5, %v1434_v61  ;;  %v1429_v46 = vadd.f32 %v3835_v59, %v1428_v20  ;;  %v1930_v11 = vadd.f32 %v3835_v59, %v1929_v55  ;;  %v3998_v61 = vld [vmem:[#allocation11] ss:$0 sm:$0xff] }
 0x1d0   :  { %3143 = verf.f32 %v1492_v39  ;;  %v2548_v53 = vpack.c.bf16 %v1537_v29, %v3944_v4  ;;  %v1632_v47 = vadd.f32 %v1537_v29, %v3944_v4  ;;  %v1655_v35 = vmul.f32 %v1537_v29, %v1537_v29 }
 0x1d1   :  { %3145 = verf.f32 %v1993_v44  ;;  %v1657_v27 = vmul.f32 %v1539_v3, %v1539_v3  ;;  %v3994_v2 = vmul.f32 %v3966_v32, %v3966_v32  ;;  %v1495_v43 = vmul.f32 0.70710677, %v1437_v14 }
 0x1d2   :  { %v1996_v54 = vmul.f32 0.70710677, %v1938_v16  ;;  %2695 = vst [vmem:[#allocation13 + $0x80] sm:$0xff] %v2548_v53   ;;  %v1633_v21 = vadd.f32 %v1632_v47, %v3942_v56  ;;  %v1670_v20 = vadd.f32 %v1655_v35, %v1654_v30  ;;  %v1979_v57 = vmul.f32 0.5, %v1935_v1 }
 0x1d3   :  { %v3138_v48 = vpop.eup %3137  ;;  %v1493_v62 = vmul.f32 0.70710677, %v1429_v46  ;;  %v1476_v52 = vmul.f32 0.5, %v1426_v13  ;;  %3147 = verf.f32 %v1495_v43  ;;  %v1994_v4 = vmul.f32 0.70710677, %v1930_v11 }
 0x1d4   :  { %v2873_v31 = vpop.f32.mrb[24].mxu0  ;;  %v2022_v26 = vadd.f32 1.0, %v3138_v48  ;;  %v1671_v49 = vadd.f32 %v1670_v20, %v1656_v36  ;;  %v1634_v7 = vadd.f32 %v1633_v21, %v1539_v3  ;;  %3149 = verf.f32 %v1996_v54 }
 0x1d5   :  { %v1441_v58 = vpop.f32.mrb[25].mxu0  ;;  %v1450_v8 = vadd.f32 %v2873_v31, %v3835_v59  ;;  %v1977_v60 = vmul.f32 0.5, %v1927_v42  ;;  %3151 = verf.f32 %v1493_v62  ;;  %v1479_v19 = vmul.f32 0.5, %v1437_v14 }
 0x1d6   :  { %v2874_v10 = vpop.f32.mrb[26].mxu0  ;;  %v2038_v12 = vmul.f32 %v2022_v26, %v1974_v28  ;;  %v4001_v56 = vadd.f32 %v3998_v61, %v1441_v58  ;;  %v3140_v30 = vpop.eup %3139  ;;  %v1672_v6 = vadd.f32 %v1671_v49, %v1657_v27  ;;  %v1980_v50 = vmul.f32 0.5, %v1938_v16 }
 0x1d7   :  { %v4003_v15 = vpop.f32.mrb[27].mxu0  ;;  %3153 = verf.f32 %v1994_v4  ;;  %v1477_v55 = vmul.f32 0.5, %v1429_v46  ;;  %v1978_v28 = vmul.f32 0.5, %v1930_v11  ;;  %v1498_v17 = vmul.f32 0.70710677, %v1450_v8 }
 0x1d8   :  { %v2620_v36 = vpack.c.bf16 %v2038_v12, %v3950_v0  ;;  %v2133_v59 = vadd.f32 %v2038_v12, %v3950_v0  ;;  %v2156_v3 = vmul.f32 %v2038_v12, %v2038_v12  ;;  %v1496_v1 = vmul.f32 0.70710677, %v4001_v56 }
 0x1d9   :  { %v3142_v18 = vpop.eup %3141  ;;  %v4011_v40 = vadd.f32 %v647_v24, %v3954_v22  ;;  %v1526_v0 = vadd.f32 1.0, %v3140_v30  ;;  %v4017_v14 = vadd.f32 %v3998_v61, %v2874_v10  ;;  %v4020_v46 = vmul.f32 0.5, %v1450_v8 }
 0x1da   :  { %v3144_v33 = vpop.eup %3143  ;;  %2711 = vst [vmem:[#allocation13 + $0xc0] sm:$0xff] %v2620_v36   ;;  %v2134_v13 = vadd.f32 %v2133_v59, %v3946_v45  ;;  %v2171_v42 = vadd.f32 %v2156_v3, %v3970_v51  ;;  %v2027_v34 = vadd.f32 1.0, %v3142_v18  ;;  %3155 = verf.f32 %v1496_v1 }
 0x1db   :  { %v2905_v5 = vpop.f32.mrb[24].mxu1  ;;  %v3146_v39 = vpop.eup %3145  ;;  %v1524_v44 = vadd.f32 1.0, %v3144_v33  ;;  %3157 = verf.f32 %v1498_v17  ;;  %v1542_v27 = vmul.f32 %v1526_v0, %v3986_v37  ;;  %v1499_v37 = vmul.f32 0.70710677, %v4017_v14 }
 0x1dc   :  { %v1942_v41 = vpop.f32.mrb[25].mxu1  ;;  %v1951_v29 = vadd.f32 %v3998_v61, %v2905_v5  ;;  %v2172_v22 = vadd.f32 %v2171_v42, %v3962_v25  ;;  %v2025_v24 = vadd.f32 1.0, %v3146_v39  ;;  %v2135_v53 = vadd.f32 %v2134_v13, %v3966_v32 }
 0x1dd   :  { %v2906_v16 = vpop.f32.mrb[26].mxu1  ;;  %v4023_v45 = vadd.f32 %v3998_v61, %v1942_v41  ;;  %v1540_v11 = vmul.f32 %v1524_v44, %v1476_v52  ;;  %v3148_v35 = vpop.eup %3147  ;;  %v2043_v43 = vmul.f32 %v2027_v34, %v1979_v57  ;;  %v1480_v30 = vmul.f32 0.5, %v4001_v56 }
 0x1de   :  { %v4025_v51 = vpop.f32.mrb[27].mxu1  ;;  %v1999_v47 = vmul.f32 0.70710677, %v1951_v29  ;;  %v2041_v54 = vmul.f32 %v2025_v24, %v1977_v60  ;;  %v2173_v25 = vadd.f32 %v2172_v22, %v3994_v2  ;;  %v3150_v48 = vpop.eup %3149  ;;  %v1527_v62 = vadd.f32 1.0, %v3148_v35 }
 0x1df   :  { %v1635_v21 = vadd.f32 %v1634_v7, %v1540_v11  ;;  %v1658_v20 = vmul.f32 %v1540_v11, %v1540_v11  ;;  %v3152_v31 = vpop.eup %3151  ;;  %v2028_v52 = vadd.f32 1.0, %v3150_v48  ;;  %v1997_v32 = vmul.f32 0.70710677, %v4023_v45 }
 0x1e0   :  { %3159 = verf.f32 %v1999_v47  ;;  %v2136_v26 = vadd.f32 %v2135_v53, %v2041_v54  ;;  %v2159_v4 = vmul.f32 %v2041_v54, %v2041_v54  ;;  %v1543_v8 = vmul.f32 %v1527_v62, %v1479_v19 }
 0x1e1   :  { %v3154_v58 = vpop.eup %3153  ;;  %v1673_v49 = vadd.f32 %v1672_v6, %v1658_v20  ;;  %v1525_v10 = vadd.f32 1.0, %v3152_v31  ;;  %v2044_v12 = vmul.f32 %v2028_v52, %v1980_v50  ;;  %3161 = verf.f32 %v1997_v32 }
 0x1e2   :  { %v2174_v57 = vadd.f32 %v2173_v25, %v2159_v4  ;;  %v2026_v2 = vadd.f32 1.0, %v3154_v58  ;;  %v2563_v7 = vpack.c.bf16 %v1543_v8, %v1542_v27  ;;  %3163 = verf.f32 %v1499_v37 }
 0x1e3   :  { %v1541_v60 = vmul.f32 %v1525_v10, %v1477_v55  ;;  %v1660_v36 = vmul.f32 %v1542_v27, %v1542_v27  ;;  %v2635_v59 = vpack.c.bf16 %v2044_v12, %v2043_v43  ;;  %v1983_v18 = vmul.f32 0.5, %v1951_v29 }
 0x1e4   :  { %v2042_v3 = vmul.f32 %v2026_v2, %v1978_v28  ;;  %v3156_v17 = vpop.eup %3155  ;;  %2698 = vst [vmem:[#allocation13 + $0x98] sm:$0xff] %v2563_v7   ;;  %v1954_v1 = vadd.f32 %v3998_v61, %v2906_v16  ;;  %v2161_v33 = vmul.f32 %v2043_v43, %v2043_v43  ;;  %v1661_v0 = vmul.f32 %v1543_v8, %v1543_v8 }
 0x1e5   :  { %v2558_v6 = vpack.c.bf16 %v1541_v60, %v1540_v11  ;;  %v1636_v19 = vadd.f32 %v1635_v21, %v1541_v60  ;;  %v1659_v5 = vmul.f32 %v1541_v60, %v1541_v60  ;;  %2714 = vst [vmem:[#allocation13 + $0xd8] sm:$0xff] %v2635_v59   ;;  %v3158_v55 = vpop.eup %3157  ;;  %v1528_v41 = vadd.f32 1.0, %v3156_v17 }
 0x1e6   :  { %v2630_v50 = vpack.c.bf16 %v2042_v3, %v2041_v54  ;;  %v2137_v13 = vadd.f32 %v2136_v26, %v2042_v3  ;;  %v2160_v42 = vmul.f32 %v2042_v3, %v2042_v3  ;;  %v2162_v28 = vmul.f32 %v2044_v12, %v2044_v12 }
 0x1e7   :  { %2697 = vst [vmem:[#allocation13 + $0x90] sm:$0xff] %v2558_v6   ;;  %v1637_v56 = vadd.f32 %v1636_v19, %v1542_v27  ;;  %v1674_v34 = vadd.f32 %v1673_v49, %v1659_v5  ;;  %v2000_v29 = vmul.f32 0.70710677, %v1954_v1  ;;  %v4034_v16 = vmul.f32 %v1528_v41, %v1480_v30 }
 0x1e8   :  { %2713 = vst [vmem:[#allocation13 + $0xd0] sm:$0xff] %v2630_v50   ;;  %v2138_v39 = vadd.f32 %v2137_v13, %v2043_v43  ;;  %v2175_v44 = vadd.f32 %v2174_v57, %v2160_v42  ;;  %v1445_v47 = vadd.f32 %v3998_v61, %v4003_v15  ;;  %v1530_v25 = vadd.f32 1.0, %v3158_v55 }
 0x1e9   :  { %v1675_v11 = vadd.f32 %v1674_v34, %v1660_v36  ;;  %v1638_v53 = vadd.f32 %v1637_v56, %v1543_v8  ;;  %3165 = verf.f32 %v2000_v29  ;;  %v1662_v20 = vmul.f32 %v4034_v16, %v4034_v16 }
 0x1ea   :  { %v2877_v22 = vpop.f32.mrb[28].mxu0  ;;  %v3160_v24 = vpop.eup %3159  ;;  %v2176_v54 = vadd.f32 %v2175_v44, %v2161_v33  ;;  %v2139_v27 = vadd.f32 %v2138_v39, %v2044_v12  ;;  %v1981_v4 = vmul.f32 0.5, %v4023_v45  ;;  %v1497_v15 = vmul.f32 0.70710677, %v1445_v47 }
 0x1eb   :  { %v1457_v35 = vpop.f32.mrb[29].mxu0  ;;  %v2031_v21 = vadd.f32 1.0, %v3160_v24  ;;  %v4039_v43 = vadd.f32 %v1638_v53, %v4034_v16  ;;  %v1676_v62 = vadd.f32 %v1675_v11, %v1661_v0  ;;  %v3162_v26 = vpop.eup %3161  ;;  %v1946_v32 = vadd.f32 %v3998_v61, %v4025_v51 }
 0x1ec   :  { %v2878_v48 = vpop.f32.mrb[30].mxu0  ;;  %v2177_v52 = vadd.f32 %v2176_v54, %v2162_v28  ;;  %v3164_v49 = vpop.eup %3163  ;;  %v2029_v10 = vadd.f32 1.0, %v3162_v26  ;;  %v1466_v37 = vadd.f32 %v3998_v61, %v2877_v22  ;;  %v4051_v2 = vmul.f32 %v1530_v25, %v4020_v46 }
 0x1ed   :  { %v1460_v31 = vpop.f32.mrb[31].mxu0  ;;  %v2909_v58 = vpop.f32.mrb[28].mxu1  ;;  %v4046_v8 = vadd.f32 %v1676_v62, %v1662_v20  ;;  %v1483_v45 = vmul.f32 0.5, %v4017_v14  ;;  %v1531_v7 = vadd.f32 1.0, %v3164_v49  ;;  %3167 = verf.f32 %v1497_v15 }
 0x1ee   :  { %v1967_v57 = vadd.f32 %v3998_v61, %v2909_v58  ;;  %v1958_v12 = vpop.f32.mrb[29].mxu1  ;;  %v4054_v30 = vmul.f32 %v2031_v21, %v1983_v18  ;;  %v4056_v51 = vmul.f32 %v2029_v10, %v1981_v4  ;;  %v1998_v36 = vmul.f32 0.70710677, %v1946_v32 }
 0x1ef   :  { %v2910_v60 = vpop.f32.mrb[30].mxu1  ;;  %v1502_v59 = vmul.f32 0.70710677, %v1466_v37  ;;  %v4058_v17 = vmul.f32 %v1531_v7, %v1483_v45  ;;  %v1984_v6 = vmul.f32 0.5, %v1954_v1  ;;  %v1458_v5 = vadd.f32 %v3998_v61, %v1457_v35 }
 0x1f0   :  { %v1961_v3 = vpop.f32.mrb[31].mxu1  ;;  %v2003_v19 = vmul.f32 0.70710677, %v1967_v57  ;;  %v4062_v46 = vadd.f32 %v2139_v27, %v4056_v51  ;;  %v2163_v14 = vmul.f32 %v4056_v51, %v4056_v51  ;;  %3169 = verf.f32 %v1998_v36 }
 0x1f1   :  { %v1959_v18 = vadd.f32 %v3998_v61, %v1958_v12  ;;  %v4069_v33 = vmul.f32 %v4051_v2, %v4051_v2  ;;  %v2573_v50 = vpack.c.bf16 %v4058_v17, %v4051_v2  ;;  %v1481_v1 = vmul.f32 0.5, %v1445_v47 }
 0x1f2   :  { %3171 = verf.f32 %v1502_v59  ;;  %v4075_v13 = vmul.f32 %v4054_v30, %v4054_v30  ;;  %v4077_v42 = vadd.f32 %v2177_v52, %v2163_v14  ;;  %v1500_v55 = vmul.f32 0.70710677, %v1458_v5 }
 0x1f3   :  { %3173 = verf.f32 %v2003_v19  ;;  %v3166_v0 = vpop.eup %3165  ;;  %2700 = vst [vmem:[#allocation13 + $0xa8] sm:$0xff] %v2573_v50   ;;  %v2001_v56 = vmul.f32 0.70710677, %v1959_v18  ;;  %v1469_v34 = vadd.f32 %v3998_v61, %v2878_v48  ;;  %v1970_v41 = vadd.f32 %v3998_v61, %v2910_v60 }
 0x1f4   :  { %v1461_v28 = vadd.f32 %v3998_v61, %v1460_v31  ;;  %v2032_v39 = vadd.f32 1.0, %v3166_v0  ;;  %v1982_v44 = vmul.f32 0.5, %v1946_v32  ;;  %3175 = verf.f32 %v1500_v55 }
 0x1f5   :  { %v4083_v29 = vadd.f32 %v3998_v61, %v1961_v3  ;;  %v1486_v22 = vmul.f32 0.5, %v1466_v37  ;;  %v1987_v24 = vmul.f32 0.5, %v1967_v57  ;;  %3177 = verf.f32 %v2001_v56 }
 0x1f6   :  { %v1503_v11 = vmul.f32 0.70710677, %v1469_v34  ;;  %v1665_v53 = vmul.f32 %v4058_v17, %v4058_v17  ;;  %v4087_v47 = vmul.f32 %v2032_v39, %v1984_v6  ;;  %v2004_v35 = vmul.f32 0.70710677, %v1970_v41 }
 0x1f7   :  { %v1501_v54 = vmul.f32 0.70710677, %v1461_v28  ;;  %v3168_v25 = vpop.eup %3167  ;;  %v1484_v27 = vmul.f32 0.5, %v1458_v5  ;;  %v1985_v48 = vmul.f32 0.5, %v1959_v18  ;;  %v2002_v21 = vmul.f32 0.70710677, %v4083_v29 }
 0x1f8   :  { %3179 = verf.f32 %v1503_v11  ;;  %v2645_v61 = vpack.c.bf16 %v4087_v47, %v4054_v30  ;;  %v1529_v20 = vadd.f32 1.0, %v3168_v25  ;;  %v649_v62 = vrot.slane %v4011_v40, 1 }
 0x1f9   :  { %3181 = verf.f32 %v2004_v35  ;;  %v685_v31 = vrot.slane %v3979_v63, 2  ;;  %v1149_v26 = vadd.f32 %v1148_v38, %v3964_v9  ;;  %v1186_v4 = vrot.slane %v3982_v23, 2 }
 0x1fa   :  { %3183 = verf.f32 %v1501_v54  ;;  %v3170_v52 = vpop.eup %3169  ;;  %2716 = vst [vmem:[#allocation13 + $0xe8] sm:$0xff] %v2645_v61   ;;  %v1545_v15 = vmul.f32 %v1529_v20, %v1481_v1  ;;  %v1487_v32 = vmul.f32 0.5, %v1469_v34  ;;  %v1988_v58 = vmul.f32 0.5, %v1970_v41 }
 0x1fb   :  { %3185 = verf.f32 %v2002_v21  ;;  %v2030_v10 = vadd.f32 1.0, %v3170_v52  ;;  %v1485_v37 = vmul.f32 0.5, %v1461_v28  ;;  %v686_v57 = vadd.f32 %v685_v31, %v3979_v63 }
 0x1fc   :  { %v3172_v49 = vpop.eup %3171  ;;  %v1150_v12 = vrot.slane %v1149_v26, 1  ;;  %v2568_v7 = vpack.c.bf16 %v1545_v15, %v4034_v16  ;;  %v1640_v60 = vadd.f32 %v4039_v43, %v1545_v15  ;;  %v1663_v9 = vmul.f32 %v1545_v15, %v1545_v15 }
 0x1fd   :  { %v3174_v45 = vpop.eup %3173  ;;  %v1534_v38 = vadd.f32 1.0, %v3172_v49  ;;  %v2166_v36 = vmul.f32 %v4087_v47, %v4087_v47  ;;  %v2046_v59 = vmul.f32 %v2030_v10, %v1982_v44  ;;  %v650_v3 = vadd.f32 %v649_v62, %v4011_v40 }
 0x1fe   :  { %v1187_v6 = vadd.f32 %v1186_v4, %v3982_v23  ;;  %v3176_v19 = vpop.eup %3175  ;;  %2699 = vst [vmem:[#allocation13 + $0xa0] sm:$0xff] %v2568_v7   ;;  %v1641_v63 = vadd.f32 %v1640_v60, %v4051_v2  ;;  %v1678_v5 = vadd.f32 %v4046_v8, %v1663_v9  ;;  %v2035_v14 = vadd.f32 1.0, %v3174_v45 }
 0x1ff   :  { %v687_v16 = vrot.slane %v686_v57, 1  ;;  %v3178_v18 = vpop.eup %3177  ;;  %v2640_v43 = vpack.c.bf16 %v2046_v59, %v4056_v51  ;;  %v2141_v50 = vadd.f32 %v4062_v46, %v2046_v59  ;;  %v2164_v1 = vmul.f32 %v2046_v59, %v2046_v59 }
 0x200   :  { %v1151_v55 = vadd.f32 %v1150_v12, %v1149_v26  ;;  %v1679_v0 = vadd.f32 %v1678_v5, %v4069_v33  ;;  %v1550_v40 = vmul.f32 %v1534_v38, %v1486_v22  ;;  %v1532_v56 = vadd.f32 1.0, %v3176_v19 }
 0x201   :  { %v1642_v23 = vadd.f32 %v1641_v63, %v4058_v17  ;;  %2715 = vst [vmem:[#allocation13 + $0xe0] sm:$0xff] %v2640_v43   ;;  %v2142_v2 = vadd.f32 %v2141_v50, %v4054_v30  ;;  %v2179_v8 = vadd.f32 %v4077_v42, %v2164_v1  ;;  %v2033_v41 = vadd.f32 1.0, %v3178_v18 }
 0x202   :  { %v3180_v34 = vpop.eup %3179  ;;  %v1188_v28 = vrot.slane %v1187_v6, 1  ;;  %v2051_v51 = vmul.f32 %v2035_v14, %v1987_v24  ;;  %v1548_v44 = vmul.f32 %v1532_v56, %v1484_v27  ;;  %v1680_v46 = vadd.f32 %v1679_v0, %v1665_v53 }
 0x203   :  { %v3182_v39 = vpop.eup %3181  ;;  %v1535_v11 = vadd.f32 1.0, %v3180_v34  ;;  %v2180_v33 = vadd.f32 %v2179_v8, %v4075_v13  ;;  %v2049_v22 = vmul.f32 %v2033_v41, %v1985_v48  ;;  %v2143_v54 = vadd.f32 %v2142_v2, %v4087_v47 }
 0x204   :  { %v3184_v35 = vpop.eup %3183  ;;  %v2036_v17 = vadd.f32 1.0, %v3182_v39  ;;  %v1643_v21 = vadd.f32 %v1642_v23, %v1548_v44  ;;  %v1666_v61 = vmul.f32 %v1548_v44, %v1548_v44  ;;  %v1986_v4 = vmul.f32 0.5, %v4083_v29 }
 0x205   :  { %v3186_v25 = vpop.eup %3185  ;;  %v1551_v30 = vmul.f32 %v1535_v11, %v1487_v32  ;;  %v1533_v20 = vadd.f32 1.0, %v3184_v35  ;;  %v2144_v42 = vadd.f32 %v2143_v54, %v2049_v22  ;;  %v2167_v62 = vmul.f32 %v2049_v22, %v2049_v22 }
 0x206   :  { %v2181_v31 = vadd.f32 %v2180_v33, %v2166_v36  ;;  %v2052_v26 = vmul.f32 %v2036_v17, %v1988_v58  ;;  %v1681_v24 = vadd.f32 %v1680_v46, %v1666_v61  ;;  %v2034_v48 = vadd.f32 1.0, %v3186_v25 }
 0x207   :  { %v2583_v27 = vpack.c.bf16 %v1551_v30, %v1550_v40  ;;  %v1549_v53 = vmul.f32 %v1533_v20, %v1485_v37  ;;  %v688_v15 = vadd.f32 %v687_v16, %v686_v57  ;;  %v1152_v32 = vadd.f32 %v1151_v55, %v650_v3 }
 0x208   :  { %v2182_v52 = vadd.f32 %v2181_v31, %v2167_v62  ;;  %v2655_v13 = vpack.c.bf16 %v2052_v26, %v2051_v51  ;;  %v2050_v12 = vmul.f32 %v2034_v48, %v1986_v4  ;;  %v1189_v45 = vadd.f32 %v1188_v28, %v1187_v6 }
 0x209   :  { %2702 = vst [vmem:[#allocation13 + $0xb8] sm:$0xff] %v2583_v27   ;;  %v2578_v47 = vpack.c.bf16 %v1549_v53, %v1548_v44  ;;  %v1644_v49 = vadd.f32 %v1643_v21, %v1549_v53  ;;  %v1667_v10 = vmul.f32 %v1549_v53, %v1549_v53  ;;  %v1668_v58 = vmul.f32 %v1550_v40, %v1550_v40 }
 0x20a   :  { %2718 = vst [vmem:[#allocation13 + $0xf8] sm:$0xff] %v2655_v13   ;;  %v2650_v60 = vpack.c.bf16 %v2050_v12, %v2049_v22  ;;  %v2145_v29 = vadd.f32 %v2144_v42, %v2050_v12  ;;  %v2168_v9 = vmul.f32 %v2050_v12, %v2050_v12  ;;  %v1190_v38 = vadd.f32 %v1189_v45, %v688_v15 }
 0x20b   :  { %2701 = vst [vmem:[#allocation13 + $0xb0] sm:$0xff] %v2578_v47   ;;  %v1645_v7 = vadd.f32 %v1644_v49, %v1550_v40  ;;  %v1682_v37 = vadd.f32 %v1681_v24, %v1667_v10  ;;  %v1669_v57 = vmul.f32 %v1551_v30, %v1551_v30  ;;  %v2169_v19 = vmul.f32 %v2051_v51, %v2051_v51 }
 0x20c   :  { %2717 = vst [vmem:[#allocation13 + $0xf0] sm:$0xff] %v2650_v60   ;;  %v2146_v63 = vadd.f32 %v2145_v29, %v2051_v51  ;;  %v2183_v5 = vadd.f32 %v2182_v52, %v2168_v9 }
 0x20d   :  { %v1646_v36 = vadd.f32 %v1645_v7, %v1551_v30  ;;  %v1683_v59 = vadd.f32 %v1682_v37, %v1668_v58 }
 0x20f   :  { %v1647_v3 = vrot.slane %v1646_v36, 4  ;;  %v1684_v14 = vadd.f32 %v1683_v59, %v1669_v57 }
 0x210   :  { %3333 = shalt.err (!%p3330_p10)
}
 0x211   :  { %s3334_s8 = scalar_lea.hbm %s4149_s6, 4096 }
 0x212   :  { %p3335_p11 = scmp.ne.s32.totalorder %s4149_s6, %s3334_s8  ;;  %p3338_p12 = scmp.lt.u32.totalorder %s3334_s8, %s4149_s6 }
 0x214   :  { %p3340_p13 = pnand %p3338_p12, %p3335_p11 }
 0x216   :  { %3343 = shalt.err (!%p3340_p13)
}
 0x217   :  { %2207 = dma.vmem_to_hbm [thread:$0]  %s2202_s18, 4096, %s4149_s6, [#allocation4], %s3383_s3, %s3383_s3, %s3384_s14   ;;  %v2170_v6 = vmul.f32 %v2052_v26, %v2052_v26  ;;  %v2147_v16 = vadd.f32 %v2146_v63, %v2052_v26  ;;  %v2184_v18 = vadd.f32 %v2183_v5, %v2169_v19  ;;  %v1648_v43 = vadd.f32 %v1647_v3, %v1646_v36 }
 0x218   :  { %v1685_v50 = vrot.slane %v1684_v14, 4  ;;  %s3389_s6 = smov [#allocation14]   ;;  %vm2193_vm0 = vcmask 1040384  }
 0x219   :  { %v2148_v1 = vrot.slane %v2147_v16, 4  ;;  %v2185_v55 = vadd.f32 %v2184_v18, %v2170_v6  ;;  %v1649_v0 = vrot.slane %v1648_v43, 2  ;;  %s2214_s3 = sshll.u32 %s3389_s6, 4  ;;  %s2215_s3 = int_to_ptr.vmem [resolvable:$true] %s2214_s3 }
 0x21a   :  { %v1686_v40 = vadd.f32 %v1685_v50, %v1684_v14  ;;  %s3344_s14 = scalar_lea.vmem %s2215_s3, 32  ;;  %p3349_p1 = scmp.lt.s32.totalorder %s2215_s3, %s2215_s3 }
 0x21b   :  { %v2149_v56 = vadd.f32 %v2148_v1, %v2147_v16  ;;  %v2186_v23 = vrot.slane %v2185_v55, 4  ;;  %v1650_v34 = vadd.f32 %v1649_v0, %v1648_v43  ;;  %p3345_p0 = scmp.ne.s32.totalorder %s2215_s3, %s3344_s14  ;;  %p3350_p2 = scmp.lt.s32.totalorder %s3344_s14, %s3344_s14 }
 0x21c   :  { %v1687_v2 = vrot.slane %v1686_v40, 2 }
 0x21d   :  { %v2150_v8 = vrot.slane %v2149_v56, 2  ;;  %v2187_v41 = vadd.f32 %v2186_v23, %v2185_v55  ;;  %v1651_v28 = vrot.slane %v1650_v34, 1  ;;  %p3351_p3 = por %p3350_p2, %p3349_p1 }
 0x21e   :  { %v1688_v39 = vadd.f32 %v1687_v2, %v1686_v40 }
 0x21f   :  { %v2151_v51 = vadd.f32 %v2150_v8, %v2149_v56  ;;  %v2188_v44 = vrot.slane %v2187_v41, 2  ;;  %v1652_v46 = vadd.f32 %v1651_v28, %v1650_v34  ;;  %p3352_p4 = pnand %p3351_p3, %p3345_p0 }
 0x220   :  { %v1689_v11 = vrot.slane %v1688_v39, 1 }
 0x221   :  { %v2152_v35 = vrot.slane %v2151_v51, 1  ;;  %v2189_v33 = vadd.f32 %v2188_v44, %v2187_v41  ;;  %v1653_v22 = vadd.f32 %v1652_v46, %v1152_v32 }
 0x222   :  { %v1690_v54 = vadd.f32 %v1689_v11, %v1688_v39 }
 0x223   :  { %v2153_v17 = vadd.f32 %v2152_v35, %v2151_v51  ;;  %v2190_v25 = vrot.slane %v2189_v33, 1 }
 0x224   :  { %v1691_v21 = vadd.f32 %v1690_v54, %v1190_v38 }
 0x225   :  { %v2154_v61 = vadd.f32 %v2153_v17, %v1653_v22  ;;  %v2191_v30 = vadd.f32 %v2190_v25, %v2189_v33 }
 0x227   :  { %v2192_v20 = vadd.f32 %v2191_v30, %v1691_v21 }
 0x229   :  { %v2194_v42 = vsel %vm2193_vm0, %v2154_v61, %v2192_v20 }
 0x22a   :  { %2195 = vst [vmem:[#allocation14] sm:$0x3] %v2194_v42 }
 0x22b   :  { %3355 = shalt.err (!%p3352_p4)
}
 0x22c   :  { %s3356_s17 = scalar_lea.hbm %s4150_s7, 32 }
 0x22d   :  { %p3357_p5 = scmp.ne.s32.totalorder %s4150_s7, %s3356_s17  ;;  %p3360_p6 = scmp.lt.u32.totalorder %s3356_s17, %s4150_s7 }
 0x22f   :  { %p3362_p7 = pnand %p3360_p6, %p3357_p5 }
 0x231   :  { %3365 = shalt.err (!%p3362_p7)
}
 0x232   :  { %2217 = dma.vmem_to_hbm [thread:$0]  %s2215_s3, 32, %s4150_s7, [#allocation15]  }
 0x233   :  { %3374 = dma.done.wait [#allocation4], 4096  }
 0x234   :  { %3375 = vsyncadd [#allocation4], 4294963200 }
 0x235   :  { %3376 = dma.done.wait [#allocation15], 32  }
 0x236   :  { %3377 = vsyncadd [#allocation15], 4294967264 }
 0x237   :  { %2224 = vsyncpa [#allocation3], 1 }
 0x238   :  { %2225 = vsyncpa [#allocation6], 1 }
 0x239   :  { %2226 = vsyncpa [#allocation9], 1 }
 0x23a   :  { %2227 = vsyncpa [#allocation12], 1 }
 0x23b   :  { %2228 = vsyncpa [#allocation4], 1 }
 0x23c   :  { %2229 = vsyncpa [#allocation15], 1 }

</bundles_post_ra>
